<compile_context>
chip_gen: v7x
topology: tpu7x:2x2x1
jax: 0.10.0
libtpu: 0.0.40
codegen_flags: <defaults>
</compile_context>

<pallas_src>
import functools

import jax
import jax.numpy as jnp
from jax import lax
from jax.experimental import pallas as pl
from jax.experimental.pallas import tpu as pltpu

KH = 7
KW = 7
PAD_H = KH // 2
PAD_W = KW // 2


def _rot_lanes(x, d):
    """Circular left-rotate along the lane (last) axis: out[:, j] = x[:, (j+d) % n].

    Wrapped / out-of-range columns are killed by the per-tap validity masks, so
    the circular wrap is harmless.  Static d -> two static lane slices + concat.
    """
    n = x.shape[-1]
    d = d % n
    if d == 0:
        return x
    return jnp.concatenate([x[:, d:], x[:, :d]], axis=-1)


def gc_kernel(x_ref, wl1k_ref, wl2t_ref, wr1k_ref, wr2t_ref,
              mh_ref, mw_ref, bmap_ref, o_ref, *, H, W):
    # x_ref block: (1, Cin, H*W)  -- channel-major, spatial flattened on lanes.
    x = x_ref[0]                     # (Cin, H*W)
    mh = mh_ref[...]                 # (KH, H*W) validity mask for vertical taps
    mw = mw_ref[...]                 # (KW, H*W) validity mask for horizontal taps

    # Start from the exact precomputed bias map (conv1 biases folded through
    # conv2 with edge masking + conv2 biases).
    y = bmap_ref[...].astype(jnp.float32)                  # (planes, H*W)

    # ---------------- left branch: (kh,1) conv then (1,kw) conv ----------------
    # First conv, all KH taps fused into one matmul (contraction = KH*Cin).
    rhs_l = jnp.concatenate(
        [_rot_lanes(x, (dh - PAD_H) * W) * mh[dh:dh + 1, :] for dh in range(KH)],
        axis=0)                                            # (KH*Cin, H*W)
    t_l = jnp.dot(wl1k_ref[...], rhs_l,
                  preferred_element_type=jnp.float32)      # (256, H*W), no bias
    # Second conv, per-tap (K = 256 per tap is already MXU-friendly).
    for dw in range(KW):
        slab = _rot_lanes(t_l, dw - PAD_W) * mw[dw:dw + 1, :]
        y = y + jnp.dot(wl2t_ref[dw], slab,
                        preferred_element_type=jnp.float32)  # (planes, H*W)

    # ---------------- right branch: (1,kw) conv then (kh,1) conv ---------------
    rhs_r = jnp.concatenate(
        [_rot_lanes(x, dw - PAD_W) * mw[dw:dw + 1, :] for dw in range(KW)],
        axis=0)                                            # (KW*Cin, H*W)
    t_r = jnp.dot(wr1k_ref[...], rhs_r,
                  preferred_element_type=jnp.float32)      # (256, H*W), no bias
    for dh in range(KH):
        slab = _rot_lanes(t_r, (dh - PAD_H) * W) * mh[dh:dh + 1, :]
        y = y + jnp.dot(wr2t_ref[dh], slab,
                        preferred_element_type=jnp.float32)

    o_ref[0] = y.astype(o_ref.dtype)                       # (planes, H*W), lane-dense


def gc_forward(x_nchw, params):
    wl1, bl1, wl2, bl2, wr1, br1, wr2, br2 = params
    N, Cin, H, W = x_nchw.shape
    mid = wl1.shape[-1]
    planes = wl2.shape[-1]
    HW = H * W
    f32 = jnp.float32

    # Channel-major / spatial-on-lanes: NCHW flattened -> (N, Cin, H*W). Free
    # reshape, no transpose, no jnp.pad.
    x2 = x_nchw.reshape(N, Cin, HW)

    # Tap-fused first-conv weights: LHS (mid, K*Cin), rows ordered (tap, ci).
    wl1_k = jnp.transpose(wl1, (2, 0, 1)).reshape(mid, KH * Cin)
    wr1_k = jnp.transpose(wr1, (2, 0, 1)).reshape(mid, KW * Cin)
    # Per-tap second-conv weights: (tap, planes, mid).
    wl2_t = jnp.transpose(wl2, (0, 2, 1))                  # (KW, planes, mid)
    wr2_t = jnp.transpose(wr2, (0, 2, 1))                  # (KH, planes, mid)

    # Per-tap validity masks == the zero padding of the torch convs.
    hh = jnp.arange(H)
    ww = jnp.arange(W)
    valid_h = ((hh[None, :] + jnp.arange(KH)[:, None] - PAD_H >= 0) &
               (hh[None, :] + jnp.arange(KH)[:, None] - PAD_H <= H - 1))   # (KH, H)
    valid_w = ((ww[None, :] + jnp.arange(KW)[:, None] - PAD_W >= 0) &
               (ww[None, :] + jnp.arange(KW)[:, None] - PAD_W <= W - 1))   # (KW, W)
    mask_h = jnp.broadcast_to(valid_h[:, :, None], (KH, H, W)).reshape(KH, HW).astype(f32)
    mask_w = jnp.broadcast_to(valid_w[:, None, :], (KW, H, W)).reshape(KW, HW).astype(f32)

    # Exact bias map: conv1 biases folded through conv2 (edge-masked) + conv2 biases.
    b1l = jnp.einsum('kcp,c->kp', wl2, bl1[0])             # (KW, planes)
    b1r = jnp.einsum('kcp,c->kp', wr2, br1[0])             # (KH, planes)
    b_left = bl2[0][None, :] + valid_w.astype(f32).T @ b1l    # (W, planes)
    b_right = br2[0][None, :] + valid_h.astype(f32).T @ b1r   # (H, planes)
    bias_map = (b_right[:, None, :] + b_left[None, :, :])      # (H, W, planes)
    bias_map = jnp.transpose(bias_map, (2, 0, 1)).reshape(planes, HW)

    def full(a):
        nd = a.ndim
        return pl.BlockSpec(a.shape, lambda n, _nd=nd: (0,) * _nd)

    kernel = functools.partial(gc_kernel, H=H, W=W)

    out = pl.pallas_call(
        kernel,
        out_shape=jax.ShapeDtypeStruct((N, planes, HW), x_nchw.dtype),
        grid_spec=pltpu.PrefetchScalarGridSpec(
            num_scalar_prefetch=0,
            grid=(N,),
            in_specs=[pl.BlockSpec((1, Cin, HW), lambda n: (n, 0, 0)),
                      full(wl1_k), full(wl2_t), full(wr1_k), full(wr2_t),
                      full(mask_h), full(mask_w), full(bias_map)],
            out_specs=pl.BlockSpec((1, planes, HW), lambda n: (n, 0, 0)),
        ),
        compiler_params=pltpu.CompilerParams(
            dimension_semantics=("parallel",)),
    )(x2, wl1_k, wl2_t, wr1_k, wr2_t, mask_h, mask_w, bias_map)

    return out.reshape(N, planes, H, W)                    # already NCHW


def gc_reference(x_nchw, params):
    """Pure-JAX reference of the PyTorch GC forward (for validation)."""
    wl1, bl1, wl2, bl2, wr1, br1, wr2, br2 = params
    x = jnp.transpose(x_nchw, (0, 2, 3, 1))
    dn = ('NHWC', 'HWIO', 'NHWC')

    def conv(inp, w_hwio, b):
        return lax.conv_general_dilated(inp, w_hwio, (1, 1), 'SAME',
                                        dimension_numbers=dn,
                                        precision=lax.Precision.HIGHEST) + b

    t_l = conv(x, wl1[:, None], bl1)      # (kh,1,Cin,256)
    y_l = conv(t_l, wl2[None], bl2)       # (1,kw,256,planes)
    t_r = conv(x, wr1[None], br1)         # (1,kw,Cin,256)
    y_r = conv(t_r, wr2[:, None], br2)    # (kh,1,256,planes)
    return jnp.transpose(y_l + y_r, (0, 3, 1, 2))


if __name__ == "__main__":
    N, Cin, H, W = 2, 4, 16, 16
    planes, mid = 8, 256

    keys = jax.random.split(jax.random.PRNGKey(0), 9)
    x = jax.random.normal(keys[0], (N, Cin, H, W), jnp.float32)
    wl1 = jax.random.normal(keys[1], (KH, Cin, mid), jnp.float32) * 0.05
    bl1 = jax.random.normal(keys[2], (1, mid), jnp.float32) * 0.05
    wl2 = jax.random.normal(keys[3], (KW, mid, planes), jnp.float32) * 0.05
    bl2 = jax.random.normal(keys[4], (1, planes), jnp.float32) * 0.05
    wr1 = jax.random.normal(keys[5], (KW, Cin, mid), jnp.float32) * 0.05
    br1 = jax.random.normal(keys[6], (1, mid), jnp.float32) * 0.05
    wr2 = jax.random.normal(keys[7], (KH, mid, planes), jnp.float32) * 0.05
    br2 = jax.random.normal(keys[8], (1, planes), jnp.float32) * 0.05
    params = (wl1, bl1, wl2, bl2, wr1, br1, wr2, br2)

    y = jax.block_until_ready(gc_forward(x, params))
    y_ref = jax.block_until_ready(gc_reference(x, params))

    assert y.shape == (N, planes, H, W), y.shape
    err = float(jnp.max(jnp.abs(y - y_ref)))
    # Tolerance covers MXU f32 multi-pass rounding differences vs. the XLA conv
    # path; a semantic bug (e.g. the previous bias-in-padding leak) is ~0.2+.
    assert jnp.allclose(y, y_ref, atol=2e-2, rtol=2e-2), f"max abs err {err}"
    print("KERNEL_OK")
</pallas_src>

<mosaic_0001>
module attributes {stable_mosaic.version = 11 : i64} {
  func.func @gc_kernel(%arg0: i32, %arg1: memref<1x4x256xf32, #tpu.memory_space<vmem>>, %arg2: memref<256x28xf32, #tpu.memory_space<vmem>>, %arg3: memref<7x8x256xf32, #tpu.memory_space<vmem>>, %arg4: memref<256x28xf32, #tpu.memory_space<vmem>>, %arg5: memref<7x8x256xf32, #tpu.memory_space<vmem>>, %arg6: memref<7x256xf32, #tpu.memory_space<vmem>>, %arg7: memref<7x256xf32, #tpu.memory_space<vmem>>, %arg8: memref<8x256xf32, #tpu.memory_space<vmem>>, %arg9: memref<1x8x256xf32, #tpu.memory_space<vmem>>) attributes {dimension_semantics = [#tpu.dimension_semantics<parallel>], iteration_bounds = array<i64: 2>, scalar_prefetch = 0 : i64, scratch_operands = 0 : i64, tpu.core_type = #tpu.core_type<tc>, window_params = [{transform_indices = @transform_0, window_bounds = array<i64: 1, 4, 256>}, {pipeline_mode = #tpu.pipeline_mode<synchronous>, transform_indices = @transform_1, window_bounds = array<i64: 256, 28>}, {pipeline_mode = #tpu.pipeline_mode<synchronous>, transform_indices = @transform_2, window_bounds = array<i64: 7, 8, 256>}, {pipeline_mode = #tpu.pipeline_mode<synchronous>, transform_indices = @transform_3, window_bounds = array<i64: 256, 28>}, {pipeline_mode = #tpu.pipeline_mode<synchronous>, transform_indices = @transform_4, window_bounds = array<i64: 7, 8, 256>}, {pipeline_mode = #tpu.pipeline_mode<synchronous>, transform_indices = @transform_5, window_bounds = array<i64: 7, 256>}, {pipeline_mode = #tpu.pipeline_mode<synchronous>, transform_indices = @transform_6, window_bounds = array<i64: 7, 256>}, {pipeline_mode = #tpu.pipeline_mode<synchronous>, transform_indices = @transform_7, window_bounds = array<i64: 8, 256>}, {transform_indices = @transform_8, window_bounds = array<i64: 1, 8, 256>}]} {
    %c0 = arith.constant 0 : index
    %c0_0 = arith.constant 0 : index
    %c0_1 = arith.constant 0 : index
    %0 = vector.load %arg1[%c0, %c0_0, %c0_1] : memref<1x4x256xf32, #tpu.memory_space<vmem>>, vector<1x4x256xf32>
    %1 = vector.shape_cast %0 : vector<1x4x256xf32> to vector<4x256xf32>
    %c0_2 = arith.constant 0 : index
    %c0_3 = arith.constant 0 : index
    %2 = vector.load %arg6[%c0_2, %c0_3] : memref<7x256xf32, #tpu.memory_space<vmem>>, vector<7x256xf32>
    %c0_4 = arith.constant 0 : index
    %c0_5 = arith.constant 0 : index
    %3 = vector.load %arg7[%c0_4, %c0_5] : memref<7x256xf32, #tpu.memory_space<vmem>>, vector<7x256xf32>
    %c0_6 = arith.constant 0 : index
    %c0_7 = arith.constant 0 : index
    %4 = vector.load %arg8[%c0_6, %c0_7] : memref<8x256xf32, #tpu.memory_space<vmem>>, vector<8x256xf32>
    %5 = vector.extract_strided_slice %1 {offsets = [0, 208], sizes = [4, 48], strides = [1, 1]} : vector<4x256xf32> to vector<4x48xf32>
    %6 = vector.extract_strided_slice %1 {offsets = [0, 0], sizes = [4, 208], strides = [1, 1]} : vector<4x256xf32> to vector<4x208xf32>
    %7 = tpu.concatenate %5, %6 in 1 : vector<4x48xf32>, vector<4x208xf32> -> vector<4x256xf32>
    %8 = vector.extract_strided_slice %2 {offsets = [0, 0], sizes = [1, 256], strides = [1, 1]} : vector<7x256xf32> to vector<1x256xf32>
    %9 = vector.broadcast %8 : vector<1x256xf32> to vector<4x256xf32>
    %10 = arith.mulf %7, %9 : vector<4x256xf32>
    %11 = vector.extract_strided_slice %1 {offsets = [0, 224], sizes = [4, 32], strides = [1, 1]} : vector<4x256xf32> to vector<4x32xf32>
    %12 = vector.extract_strided_slice %1 {offsets = [0, 0], sizes = [4, 224], strides = [1, 1]} : vector<4x256xf32> to vector<4x224xf32>
    %13 = tpu.concatenate %11, %12 in 1 : vector<4x32xf32>, vector<4x224xf32> -> vector<4x256xf32>
    %14 = vector.extract_strided_slice %2 {offsets = [1, 0], sizes = [1, 256], strides = [1, 1]} : vector<7x256xf32> to vector<1x256xf32>
    %15 = vector.broadcast %14 : vector<1x256xf32> to vector<4x256xf32>
    %16 = arith.mulf %13, %15 : vector<4x256xf32>
    %17 = vector.extract_strided_slice %1 {offsets = [0, 240], sizes = [4, 16], strides = [1, 1]} : vector<4x256xf32> to vector<4x16xf32>
    %18 = vector.extract_strided_slice %1 {offsets = [0, 0], sizes = [4, 240], strides = [1, 1]} : vector<4x256xf32> to vector<4x240xf32>
    %19 = tpu.concatenate %17, %18 in 1 : vector<4x16xf32>, vector<4x240xf32> -> vector<4x256xf32>
    %20 = vector.extract_strided_slice %2 {offsets = [2, 0], sizes = [1, 256], strides = [1, 1]} : vector<7x256xf32> to vector<1x256xf32>
    %21 = vector.broadcast %20 : vector<1x256xf32> to vector<4x256xf32>
    %22 = arith.mulf %19, %21 : vector<4x256xf32>
    %23 = vector.extract_strided_slice %2 {offsets = [3, 0], sizes = [1, 256], strides = [1, 1]} : vector<7x256xf32> to vector<1x256xf32>
    %24 = vector.broadcast %23 : vector<1x256xf32> to vector<4x256xf32>
    %25 = arith.mulf %1, %24 : vector<4x256xf32>
    %26 = vector.extract_strided_slice %1 {offsets = [0, 16], sizes = [4, 240], strides = [1, 1]} : vector<4x256xf32> to vector<4x240xf32>
    %27 = vector.extract_strided_slice %1 {offsets = [0, 0], sizes = [4, 16], strides = [1, 1]} : vector<4x256xf32> to vector<4x16xf32>
    %28 = tpu.concatenate %26, %27 in 1 : vector<4x240xf32>, vector<4x16xf32> -> vector<4x256xf32>
    %29 = vector.extract_strided_slice %2 {offsets = [4, 0], sizes = [1, 256], strides = [1, 1]} : vector<7x256xf32> to vector<1x256xf32>
    %30 = vector.broadcast %29 : vector<1x256xf32> to vector<4x256xf32>
    %31 = arith.mulf %28, %30 : vector<4x256xf32>
    %32 = vector.extract_strided_slice %1 {offsets = [0, 32], sizes = [4, 224], strides = [1, 1]} : vector<4x256xf32> to vector<4x224xf32>
    %33 = vector.extract_strided_slice %1 {offsets = [0, 0], sizes = [4, 32], strides = [1, 1]} : vector<4x256xf32> to vector<4x32xf32>
    %34 = tpu.concatenate %32, %33 in 1 : vector<4x224xf32>, vector<4x32xf32> -> vector<4x256xf32>
    %35 = vector.extract_strided_slice %2 {offsets = [5, 0], sizes = [1, 256], strides = [1, 1]} : vector<7x256xf32> to vector<1x256xf32>
    %36 = vector.broadcast %35 : vector<1x256xf32> to vector<4x256xf32>
    %37 = arith.mulf %34, %36 : vector<4x256xf32>
    %38 = vector.extract_strided_slice %1 {offsets = [0, 48], sizes = [4, 208], strides = [1, 1]} : vector<4x256xf32> to vector<4x208xf32>
    %39 = vector.extract_strided_slice %1 {offsets = [0, 0], sizes = [4, 48], strides = [1, 1]} : vector<4x256xf32> to vector<4x48xf32>
    %40 = tpu.concatenate %38, %39 in 1 : vector<4x208xf32>, vector<4x48xf32> -> vector<4x256xf32>
    %41 = vector.extract_strided_slice %2 {offsets = [6, 0], sizes = [1, 256], strides = [1, 1]} : vector<7x256xf32> to vector<1x256xf32>
    %42 = vector.broadcast %41 : vector<1x256xf32> to vector<4x256xf32>
    %43 = arith.mulf %40, %42 : vector<4x256xf32>
    %44 = tpu.concatenate %10, %16, %22, %25, %31, %37, %43 in 0 : vector<4x256xf32>, vector<4x256xf32>, vector<4x256xf32>, vector<4x256xf32>, vector<4x256xf32>, vector<4x256xf32>, vector<4x256xf32> -> vector<28x256xf32>
    %c0_8 = arith.constant 0 : index
    %c0_9 = arith.constant 0 : index
    %45 = vector.load %arg2[%c0_8, %c0_9] : memref<256x28xf32, #tpu.memory_space<vmem>>, vector<256x28xf32>
    %cst = arith.constant dense<0.000000e+00> : vector<256x256xf32>
    %46 = tpu.matmul %45, %44, %cst {dimension_numbers = #tpu.dot_dimension_numbers<[1], [0], [0], [1], [0, 0, 1, 1], [], []>} : vector<256x28xf32>, vector<28x256xf32>, vector<256x256xf32> -> vector<256x256xf32>
    %47 = vector.extract_strided_slice %46 {offsets = [0, 253], sizes = [256, 3], strides = [1, 1]} : vector<256x256xf32> to vector<256x3xf32>
    %48 = vector.extract_strided_slice %46 {offsets = [0, 0], sizes = [256, 253], strides = [1, 1]} : vector<256x256xf32> to vector<256x253xf32>
    %49 = tpu.concatenate %47, %48 in 1 : vector<256x3xf32>, vector<256x253xf32> -> vector<256x256xf32>
    %50 = vector.extract_strided_slice %3 {offsets = [0, 0], sizes = [1, 256], strides = [1, 1]} : vector<7x256xf32> to vector<1x256xf32>
    %51 = vector.broadcast %50 : vector<1x256xf32> to vector<256x256xf32>
    %52 = arith.mulf %49, %51 : vector<256x256xf32>
    %c0_10 = arith.constant 0 : index
    %c0_11 = arith.constant 0 : index
    %c0_12 = arith.constant 0 : index
    %53 = vector.load %arg3[%c0_10, %c0_11, %c0_12] : memref<7x8x256xf32, #tpu.memory_space<vmem>>, vector<1x8x256xf32>
    %54 = vector.shape_cast %53 : vector<1x8x256xf32> to vector<8x256xf32>
    %cst_13 = arith.constant dense<0.000000e+00> : vector<8x256xf32>
    %55 = tpu.matmul %54, %52, %cst_13 {dimension_numbers = #tpu.dot_dimension_numbers<[1], [0], [0], [1], [0, 0, 1, 1], [], []>} : vector<8x256xf32>, vector<256x256xf32>, vector<8x256xf32> -> vector<8x256xf32>
    %56 = arith.addf %4, %55 : vector<8x256xf32>
    %57 = vector.extract_strided_slice %46 {offsets = [0, 254], sizes = [256, 2], strides = [1, 1]} : vector<256x256xf32> to vector<256x2xf32>
    %58 = vector.extract_strided_slice %46 {offsets = [0, 0], sizes = [256, 254], strides = [1, 1]} : vector<256x256xf32> to vector<256x254xf32>
    %59 = tpu.concatenate %57, %58 in 1 : vector<256x2xf32>, vector<256x254xf32> -> vector<256x256xf32>
    %60 = vector.extract_strided_slice %3 {offsets = [1, 0], sizes = [1, 256], strides = [1, 1]} : vector<7x256xf32> to vector<1x256xf32>
    %61 = vector.broadcast %60 : vector<1x256xf32> to vector<256x256xf32>
    %62 = arith.mulf %59, %61 : vector<256x256xf32>
    %c1 = arith.constant 1 : index
    %c0_14 = arith.constant 0 : index
    %c0_15 = arith.constant 0 : index
    %63 = vector.load %arg3[%c1, %c0_14, %c0_15] : memref<7x8x256xf32, #tpu.memory_space<vmem>>, vector<1x8x256xf32>
    %64 = vector.shape_cast %63 : vector<1x8x256xf32> to vector<8x256xf32>
    %cst_16 = arith.constant dense<0.000000e+00> : vector<8x256xf32>
    %65 = tpu.matmul %64, %62, %cst_16 {dimension_numbers = #tpu.dot_dimension_numbers<[1], [0], [0], [1], [0, 0, 1, 1], [], []>} : vector<8x256xf32>, vector<256x256xf32>, vector<8x256xf32> -> vector<8x256xf32>
    %66 = arith.addf %56, %65 : vector<8x256xf32>
    %67 = vector.extract_strided_slice %46 {offsets = [0, 255], sizes = [256, 1], strides = [1, 1]} : vector<256x256xf32> to vector<256x1xf32>
    %68 = vector.extract_strided_slice %46 {offsets = [0, 0], sizes = [256, 255], strides = [1, 1]} : vector<256x256xf32> to vector<256x255xf32>
    %69 = tpu.concatenate %67, %68 in 1 : vector<256x1xf32>, vector<256x255xf32> -> vector<256x256xf32>
    %70 = vector.extract_strided_slice %3 {offsets = [2, 0], sizes = [1, 256], strides = [1, 1]} : vector<7x256xf32> to vector<1x256xf32>
    %71 = vector.broadcast %70 : vector<1x256xf32> to vector<256x256xf32>
    %72 = arith.mulf %69, %71 : vector<256x256xf32>
    %c2 = arith.constant 2 : index
    %c0_17 = arith.constant 0 : index
    %c0_18 = arith.constant 0 : index
    %73 = vector.load %arg3[%c2, %c0_17, %c0_18] : memref<7x8x256xf32, #tpu.memory_space<vmem>>, vector<1x8x256xf32>
    %74 = vector.shape_cast %73 : vector<1x8x256xf32> to vector<8x256xf32>
    %cst_19 = arith.constant dense<0.000000e+00> : vector<8x256xf32>
    %75 = tpu.matmul %74, %72, %cst_19 {dimension_numbers = #tpu.dot_dimension_numbers<[1], [0], [0], [1], [0, 0, 1, 1], [], []>} : vector<8x256xf32>, vector<256x256xf32>, vector<8x256xf32> -> vector<8x256xf32>
    %76 = arith.addf %66, %75 : vector<8x256xf32>
    %77 = vector.extract_strided_slice %3 {offsets = [3, 0], sizes = [1, 256], strides = [1, 1]} : vector<7x256xf32> to vector<1x256xf32>
    %78 = vector.broadcast %77 : vector<1x256xf32> to vector<256x256xf32>
    %79 = arith.mulf %46, %78 : vector<256x256xf32>
    %c3 = arith.constant 3 : index
    %c0_20 = arith.constant 0 : index
    %c0_21 = arith.constant 0 : index
    %80 = vector.load %arg3[%c3, %c0_20, %c0_21] : memref<7x8x256xf32, #tpu.memory_space<vmem>>, vector<1x8x256xf32>
    %81 = vector.shape_cast %80 : vector<1x8x256xf32> to vector<8x256xf32>
    %cst_22 = arith.constant dense<0.000000e+00> : vector<8x256xf32>
    %82 = tpu.matmul %81, %79, %cst_22 {dimension_numbers = #tpu.dot_dimension_numbers<[1], [0], [0], [1], [0, 0, 1, 1], [], []>} : vector<8x256xf32>, vector<256x256xf32>, vector<8x256xf32> -> vector<8x256xf32>
    %83 = arith.addf %76, %82 : vector<8x256xf32>
    %84 = vector.extract_strided_slice %46 {offsets = [0, 1], sizes = [256, 255], strides = [1, 1]} : vector<256x256xf32> to vector<256x255xf32>
    %85 = vector.extract_strided_slice %46 {offsets = [0, 0], sizes = [256, 1], strides = [1, 1]} : vector<256x256xf32> to vector<256x1xf32>
    %86 = tpu.concatenate %84, %85 in 1 : vector<256x255xf32>, vector<256x1xf32> -> vector<256x256xf32>
    %87 = vector.extract_strided_slice %3 {offsets = [4, 0], sizes = [1, 256], strides = [1, 1]} : vector<7x256xf32> to vector<1x256xf32>
    %88 = vector.broadcast %87 : vector<1x256xf32> to vector<256x256xf32>
    %89 = arith.mulf %86, %88 : vector<256x256xf32>
    %c4 = arith.constant 4 : index
    %c0_23 = arith.constant 0 : index
    %c0_24 = arith.constant 0 : index
    %90 = vector.load %arg3[%c4, %c0_23, %c0_24] : memref<7x8x256xf32, #tpu.memory_space<vmem>>, vector<1x8x256xf32>
    %91 = vector.shape_cast %90 : vector<1x8x256xf32> to vector<8x256xf32>
    %cst_25 = arith.constant dense<0.000000e+00> : vector<8x256xf32>
    %92 = tpu.matmul %91, %89, %cst_25 {dimension_numbers = #tpu.dot_dimension_numbers<[1], [0], [0], [1], [0, 0, 1, 1], [], []>} : vector<8x256xf32>, vector<256x256xf32>, vector<8x256xf32> -> vector<8x256xf32>
    %93 = arith.addf %83, %92 : vector<8x256xf32>
    %94 = vector.extract_strided_slice %46 {offsets = [0, 2], sizes = [256, 254], strides = [1, 1]} : vector<256x256xf32> to vector<256x254xf32>
    %95 = vector.extract_strided_slice %46 {offsets = [0, 0], sizes = [256, 2], strides = [1, 1]} : vector<256x256xf32> to vector<256x2xf32>
    %96 = tpu.concatenate %94, %95 in 1 : vector<256x254xf32>, vector<256x2xf32> -> vector<256x256xf32>
    %97 = vector.extract_strided_slice %3 {offsets = [5, 0], sizes = [1, 256], strides = [1, 1]} : vector<7x256xf32> to vector<1x256xf32>
    %98 = vector.broadcast %97 : vector<1x256xf32> to vector<256x256xf32>
    %99 = arith.mulf %96, %98 : vector<256x256xf32>
    %c5 = arith.constant 5 : index
    %c0_26 = arith.constant 0 : index
    %c0_27 = arith.constant 0 : index
    %100 = vector.load %arg3[%c5, %c0_26, %c0_27] : memref<7x8x256xf32, #tpu.memory_space<vmem>>, vector<1x8x256xf32>
    %101 = vector.shape_cast %100 : vector<1x8x256xf32> to vector<8x256xf32>
    %cst_28 = arith.constant dense<0.000000e+00> : vector<8x256xf32>
    %102 = tpu.matmul %101, %99, %cst_28 {dimension_numbers = #tpu.dot_dimension_numbers<[1], [0], [0], [1], [0, 0, 1, 1], [], []>} : vector<8x256xf32>, vector<256x256xf32>, vector<8x256xf32> -> vector<8x256xf32>
    %103 = arith.addf %93, %102 : vector<8x256xf32>
    %104 = vector.extract_strided_slice %46 {offsets = [0, 3], sizes = [256, 253], strides = [1, 1]} : vector<256x256xf32> to vector<256x253xf32>
    %105 = vector.extract_strided_slice %46 {offsets = [0, 0], sizes = [256, 3], strides = [1, 1]} : vector<256x256xf32> to vector<256x3xf32>
    %106 = tpu.concatenate %104, %105 in 1 : vector<256x253xf32>, vector<256x3xf32> -> vector<256x256xf32>
    %107 = vector.extract_strided_slice %3 {offsets = [6, 0], sizes = [1, 256], strides = [1, 1]} : vector<7x256xf32> to vector<1x256xf32>
    %108 = vector.broadcast %107 : vector<1x256xf32> to vector<256x256xf32>
    %109 = arith.mulf %106, %108 : vector<256x256xf32>
    %c6 = arith.constant 6 : index
    %c0_29 = arith.constant 0 : index
    %c0_30 = arith.constant 0 : index
    %110 = vector.load %arg3[%c6, %c0_29, %c0_30] : memref<7x8x256xf32, #tpu.memory_space<vmem>>, vector<1x8x256xf32>
    %111 = vector.shape_cast %110 : vector<1x8x256xf32> to vector<8x256xf32>
    %cst_31 = arith.constant dense<0.000000e+00> : vector<8x256xf32>
    %112 = tpu.matmul %111, %109, %cst_31 {dimension_numbers = #tpu.dot_dimension_numbers<[1], [0], [0], [1], [0, 0, 1, 1], [], []>} : vector<8x256xf32>, vector<256x256xf32>, vector<8x256xf32> -> vector<8x256xf32>
    %113 = arith.addf %103, %112 : vector<8x256xf32>
    %114 = vector.extract_strided_slice %1 {offsets = [0, 253], sizes = [4, 3], strides = [1, 1]} : vector<4x256xf32> to vector<4x3xf32>
    %115 = vector.extract_strided_slice %1 {offsets = [0, 0], sizes = [4, 253], strides = [1, 1]} : vector<4x256xf32> to vector<4x253xf32>
    %116 = tpu.concatenate %114, %115 in 1 : vector<4x3xf32>, vector<4x253xf32> -> vector<4x256xf32>
    %117 = vector.extract_strided_slice %3 {offsets = [0, 0], sizes = [1, 256], strides = [1, 1]} : vector<7x256xf32> to vector<1x256xf32>
    %118 = vector.broadcast %117 : vector<1x256xf32> to vector<4x256xf32>
    %119 = arith.mulf %116, %118 : vector<4x256xf32>
    %120 = vector.extract_strided_slice %1 {offsets = [0, 254], sizes = [4, 2], strides = [1, 1]} : vector<4x256xf32> to vector<4x2xf32>
    %121 = vector.extract_strided_slice %1 {offsets = [0, 0], sizes = [4, 254], strides = [1, 1]} : vector<4x256xf32> to vector<4x254xf32>
    %122 = tpu.concatenate %120, %121 in 1 : vector<4x2xf32>, vector<4x254xf32> -> vector<4x256xf32>
    %123 = vector.extract_strided_slice %3 {offsets = [1, 0], sizes = [1, 256], strides = [1, 1]} : vector<7x256xf32> to vector<1x256xf32>
    %124 = vector.broadcast %123 : vector<1x256xf32> to vector<4x256xf32>
    %125 = arith.mulf %122, %124 : vector<4x256xf32>
    %126 = vector.extract_strided_slice %1 {offsets = [0, 255], sizes = [4, 1], strides = [1, 1]} : vector<4x256xf32> to vector<4x1xf32>
    %127 = vector.extract_strided_slice %1 {offsets = [0, 0], sizes = [4, 255], strides = [1, 1]} : vector<4x256xf32> to vector<4x255xf32>
    %128 = tpu.concatenate %126, %127 in 1 : vector<4x1xf32>, vector<4x255xf32> -> vector<4x256xf32>
    %129 = vector.extract_strided_slice %3 {offsets = [2, 0], sizes = [1, 256], strides = [1, 1]} : vector<7x256xf32> to vector<1x256xf32>
    %130 = vector.broadcast %129 : vector<1x256xf32> to vector<4x256xf32>
    %131 = arith.mulf %128, %130 : vector<4x256xf32>
    %132 = vector.extract_strided_slice %3 {offsets = [3, 0], sizes = [1, 256], strides = [1, 1]} : vector<7x256xf32> to vector<1x256xf32>
    %133 = vector.broadcast %132 : vector<1x256xf32> to vector<4x256xf32>
    %134 = arith.mulf %1, %133 : vector<4x256xf32>
    %135 = vector.extract_strided_slice %1 {offsets = [0, 1], sizes = [4, 255], strides = [1, 1]} : vector<4x256xf32> to vector<4x255xf32>
    %136 = vector.extract_strided_slice %1 {offsets = [0, 0], sizes = [4, 1], strides = [1, 1]} : vector<4x256xf32> to vector<4x1xf32>
    %137 = tpu.concatenate %135, %136 in 1 : vector<4x255xf32>, vector<4x1xf32> -> vector<4x256xf32>
    %138 = vector.extract_strided_slice %3 {offsets = [4, 0], sizes = [1, 256], strides = [1, 1]} : vector<7x256xf32> to vector<1x256xf32>
    %139 = vector.broadcast %138 : vector<1x256xf32> to vector<4x256xf32>
    %140 = arith.mulf %137, %139 : vector<4x256xf32>
    %141 = vector.extract_strided_slice %1 {offsets = [0, 2], sizes = [4, 254], strides = [1, 1]} : vector<4x256xf32> to vector<4x254xf32>
    %142 = vector.extract_strided_slice %1 {offsets = [0, 0], sizes = [4, 2], strides = [1, 1]} : vector<4x256xf32> to vector<4x2xf32>
    %143 = tpu.concatenate %141, %142 in 1 : vector<4x254xf32>, vector<4x2xf32> -> vector<4x256xf32>
    %144 = vector.extract_strided_slice %3 {offsets = [5, 0], sizes = [1, 256], strides = [1, 1]} : vector<7x256xf32> to vector<1x256xf32>
    %145 = vector.broadcast %144 : vector<1x256xf32> to vector<4x256xf32>
    %146 = arith.mulf %143, %145 : vector<4x256xf32>
    %147 = vector.extract_strided_slice %1 {offsets = [0, 3], sizes = [4, 253], strides = [1, 1]} : vector<4x256xf32> to vector<4x253xf32>
    %148 = vector.extract_strided_slice %1 {offsets = [0, 0], sizes = [4, 3], strides = [1, 1]} : vector<4x256xf32> to vector<4x3xf32>
    %149 = tpu.concatenate %147, %148 in 1 : vector<4x253xf32>, vector<4x3xf32> -> vector<4x256xf32>
    %150 = vector.extract_strided_slice %3 {offsets = [6, 0], sizes = [1, 256], strides = [1, 1]} : vector<7x256xf32> to vector<1x256xf32>
    %151 = vector.broadcast %150 : vector<1x256xf32> to vector<4x256xf32>
    %152 = arith.mulf %149, %151 : vector<4x256xf32>
    %153 = tpu.concatenate %119, %125, %131, %134, %140, %146, %152 in 0 : vector<4x256xf32>, vector<4x256xf32>, vector<4x256xf32>, vector<4x256xf32>, vector<4x256xf32>, vector<4x256xf32>, vector<4x256xf32> -> vector<28x256xf32>
    %c0_32 = arith.constant 0 : index
    %c0_33 = arith.constant 0 : index
    %154 = vector.load %arg4[%c0_32, %c0_33] : memref<256x28xf32, #tpu.memory_space<vmem>>, vector<256x28xf32>
    %cst_34 = arith.constant dense<0.000000e+00> : vector<256x256xf32>
    %155 = tpu.matmul %154, %153, %cst_34 {dimension_numbers = #tpu.dot_dimension_numbers<[1], [0], [0], [1], [0, 0, 1, 1], [], []>} : vector<256x28xf32>, vector<28x256xf32>, vector<256x256xf32> -> vector<256x256xf32>
    %156 = vector.extract_strided_slice %155 {offsets = [0, 208], sizes = [256, 48], strides = [1, 1]} : vector<256x256xf32> to vector<256x48xf32>
    %157 = vector.extract_strided_slice %155 {offsets = [0, 0], sizes = [256, 208], strides = [1, 1]} : vector<256x256xf32> to vector<256x208xf32>
    %158 = tpu.concatenate %156, %157 in 1 : vector<256x48xf32>, vector<256x208xf32> -> vector<256x256xf32>
    %159 = vector.extract_strided_slice %2 {offsets = [0, 0], sizes = [1, 256], strides = [1, 1]} : vector<7x256xf32> to vector<1x256xf32>
    %160 = vector.broadcast %159 : vector<1x256xf32> to vector<256x256xf32>
    %161 = arith.mulf %158, %160 : vector<256x256xf32>
    %c0_35 = arith.constant 0 : index
    %c0_36 = arith.constant 0 : index
    %c0_37 = arith.constant 0 : index
    %162 = vector.load %arg5[%c0_35, %c0_36, %c0_37] : memref<7x8x256xf32, #tpu.memory_space<vmem>>, vector<1x8x256xf32>
    %163 = vector.shape_cast %162 : vector<1x8x256xf32> to vector<8x256xf32>
    %cst_38 = arith.constant dense<0.000000e+00> : vector<8x256xf32>
    %164 = tpu.matmul %163, %161, %cst_38 {dimension_numbers = #tpu.dot_dimension_numbers<[1], [0], [0], [1], [0, 0, 1, 1], [], []>} : vector<8x256xf32>, vector<256x256xf32>, vector<8x256xf32> -> vector<8x256xf32>
    %165 = arith.addf %113, %164 : vector<8x256xf32>
    %166 = vector.extract_strided_slice %155 {offsets = [0, 224], sizes = [256, 32], strides = [1, 1]} : vector<256x256xf32> to vector<256x32xf32>
    %167 = vector.extract_strided_slice %155 {offsets = [0, 0], sizes = [256, 224], strides = [1, 1]} : vector<256x256xf32> to vector<256x224xf32>
    %168 = tpu.concatenate %166, %167 in 1 : vector<256x32xf32>, vector<256x224xf32> -> vector<256x256xf32>
    %169 = vector.extract_strided_slice %2 {offsets = [1, 0], sizes = [1, 256], strides = [1, 1]} : vector<7x256xf32> to vector<1x256xf32>
    %170 = vector.broadcast %169 : vector<1x256xf32> to vector<256x256xf32>
    %171 = arith.mulf %168, %170 : vector<256x256xf32>
    %c1_39 = arith.constant 1 : index
    %c0_40 = arith.constant 0 : index
    %c0_41 = arith.constant 0 : index
    %172 = vector.load %arg5[%c1_39, %c0_40, %c0_41] : memref<7x8x256xf32, #tpu.memory_space<vmem>>, vector<1x8x256xf32>
    %173 = vector.shape_cast %172 : vector<1x8x256xf32> to vector<8x256xf32>
    %cst_42 = arith.constant dense<0.000000e+00> : vector<8x256xf32>
    %174 = tpu.matmul %173, %171, %cst_42 {dimension_numbers = #tpu.dot_dimension_numbers<[1], [0], [0], [1], [0, 0, 1, 1], [], []>} : vector<8x256xf32>, vector<256x256xf32>, vector<8x256xf32> -> vector<8x256xf32>
    %175 = arith.addf %165, %174 : vector<8x256xf32>
    %176 = vector.extract_strided_slice %155 {offsets = [0, 240], sizes = [256, 16], strides = [1, 1]} : vector<256x256xf32> to vector<256x16xf32>
    %177 = vector.extract_strided_slice %155 {offsets = [0, 0], sizes = [256, 240], strides = [1, 1]} : vector<256x256xf32> to vector<256x240xf32>
    %178 = tpu.concatenate %176, %177 in 1 : vector<256x16xf32>, vector<256x240xf32> -> vector<256x256xf32>
    %179 = vector.extract_strided_slice %2 {offsets = [2, 0], sizes = [1, 256], strides = [1, 1]} : vector<7x256xf32> to vector<1x256xf32>
    %180 = vector.broadcast %179 : vector<1x256xf32> to vector<256x256xf32>
    %181 = arith.mulf %178, %180 : vector<256x256xf32>
    %c2_43 = arith.constant 2 : index
    %c0_44 = arith.constant 0 : index
    %c0_45 = arith.constant 0 : index
    %182 = vector.load %arg5[%c2_43, %c0_44, %c0_45] : memref<7x8x256xf32, #tpu.memory_space<vmem>>, vector<1x8x256xf32>
    %183 = vector.shape_cast %182 : vector<1x8x256xf32> to vector<8x256xf32>
    %cst_46 = arith.constant dense<0.000000e+00> : vector<8x256xf32>
    %184 = tpu.matmul %183, %181, %cst_46 {dimension_numbers = #tpu.dot_dimension_numbers<[1], [0], [0], [1], [0, 0, 1, 1], [], []>} : vector<8x256xf32>, vector<256x256xf32>, vector<8x256xf32> -> vector<8x256xf32>
    %185 = arith.addf %175, %184 : vector<8x256xf32>
    %186 = vector.extract_strided_slice %2 {offsets = [3, 0], sizes = [1, 256], strides = [1, 1]} : vector<7x256xf32> to vector<1x256xf32>
    %187 = vector.broadcast %186 : vector<1x256xf32> to vector<256x256xf32>
    %188 = arith.mulf %155, %187 : vector<256x256xf32>
    %c3_47 = arith.constant 3 : index
    %c0_48 = arith.constant 0 : index
    %c0_49 = arith.constant 0 : index
    %189 = vector.load %arg5[%c3_47, %c0_48, %c0_49] : memref<7x8x256xf32, #tpu.memory_space<vmem>>, vector<1x8x256xf32>
    %190 = vector.shape_cast %189 : vector<1x8x256xf32> to vector<8x256xf32>
    %cst_50 = arith.constant dense<0.000000e+00> : vector<8x256xf32>
    %191 = tpu.matmul %190, %188, %cst_50 {dimension_numbers = #tpu.dot_dimension_numbers<[1], [0], [0], [1], [0, 0, 1, 1], [], []>} : vector<8x256xf32>, vector<256x256xf32>, vector<8x256xf32> -> vector<8x256xf32>
    %192 = arith.addf %185, %191 : vector<8x256xf32>
    %193 = vector.extract_strided_slice %155 {offsets = [0, 16], sizes = [256, 240], strides = [1, 1]} : vector<256x256xf32> to vector<256x240xf32>
    %194 = vector.extract_strided_slice %155 {offsets = [0, 0], sizes = [256, 16], strides = [1, 1]} : vector<256x256xf32> to vector<256x16xf32>
    %195 = tpu.concatenate %193, %194 in 1 : vector<256x240xf32>, vector<256x16xf32> -> vector<256x256xf32>
    %196 = vector.extract_strided_slice %2 {offsets = [4, 0], sizes = [1, 256], strides = [1, 1]} : vector<7x256xf32> to vector<1x256xf32>
    %197 = vector.broadcast %196 : vector<1x256xf32> to vector<256x256xf32>
    %198 = arith.mulf %195, %197 : vector<256x256xf32>
    %c4_51 = arith.constant 4 : index
    %c0_52 = arith.constant 0 : index
    %c0_53 = arith.constant 0 : index
    %199 = vector.load %arg5[%c4_51, %c0_52, %c0_53] : memref<7x8x256xf32, #tpu.memory_space<vmem>>, vector<1x8x256xf32>
    %200 = vector.shape_cast %199 : vector<1x8x256xf32> to vector<8x256xf32>
    %cst_54 = arith.constant dense<0.000000e+00> : vector<8x256xf32>
    %201 = tpu.matmul %200, %198, %cst_54 {dimension_numbers = #tpu.dot_dimension_numbers<[1], [0], [0], [1], [0, 0, 1, 1], [], []>} : vector<8x256xf32>, vector<256x256xf32>, vector<8x256xf32> -> vector<8x256xf32>
    %202 = arith.addf %192, %201 : vector<8x256xf32>
    %203 = vector.extract_strided_slice %155 {offsets = [0, 32], sizes = [256, 224], strides = [1, 1]} : vector<256x256xf32> to vector<256x224xf32>
    %204 = vector.extract_strided_slice %155 {offsets = [0, 0], sizes = [256, 32], strides = [1, 1]} : vector<256x256xf32> to vector<256x32xf32>
    %205 = tpu.concatenate %203, %204 in 1 : vector<256x224xf32>, vector<256x32xf32> -> vector<256x256xf32>
    %206 = vector.extract_strided_slice %2 {offsets = [5, 0], sizes = [1, 256], strides = [1, 1]} : vector<7x256xf32> to vector<1x256xf32>
    %207 = vector.broadcast %206 : vector<1x256xf32> to vector<256x256xf32>
    %208 = arith.mulf %205, %207 : vector<256x256xf32>
    %c5_55 = arith.constant 5 : index
    %c0_56 = arith.constant 0 : index
    %c0_57 = arith.constant 0 : index
    %209 = vector.load %arg5[%c5_55, %c0_56, %c0_57] : memref<7x8x256xf32, #tpu.memory_space<vmem>>, vector<1x8x256xf32>
    %210 = vector.shape_cast %209 : vector<1x8x256xf32> to vector<8x256xf32>
    %cst_58 = arith.constant dense<0.000000e+00> : vector<8x256xf32>
    %211 = tpu.matmul %210, %208, %cst_58 {dimension_numbers = #tpu.dot_dimension_numbers<[1], [0], [0], [1], [0, 0, 1, 1], [], []>} : vector<8x256xf32>, vector<256x256xf32>, vector<8x256xf32> -> vector<8x256xf32>
    %212 = arith.addf %202, %211 : vector<8x256xf32>
    %213 = vector.extract_strided_slice %155 {offsets = [0, 48], sizes = [256, 208], strides = [1, 1]} : vector<256x256xf32> to vector<256x208xf32>
    %214 = vector.extract_strided_slice %155 {offsets = [0, 0], sizes = [256, 48], strides = [1, 1]} : vector<256x256xf32> to vector<256x48xf32>
    %215 = tpu.concatenate %213, %214 in 1 : vector<256x208xf32>, vector<256x48xf32> -> vector<256x256xf32>
    %216 = vector.extract_strided_slice %2 {offsets = [6, 0], sizes = [1, 256], strides = [1, 1]} : vector<7x256xf32> to vector<1x256xf32>
    %217 = vector.broadcast %216 : vector<1x256xf32> to vector<256x256xf32>
    %218 = arith.mulf %215, %217 : vector<256x256xf32>
    %c6_59 = arith.constant 6 : index
    %c0_60 = arith.constant 0 : index
    %c0_61 = arith.constant 0 : index
    %219 = vector.load %arg5[%c6_59, %c0_60, %c0_61] : memref<7x8x256xf32, #tpu.memory_space<vmem>>, vector<1x8x256xf32>
    %220 = vector.shape_cast %219 : vector<1x8x256xf32> to vector<8x256xf32>
    %cst_62 = arith.constant dense<0.000000e+00> : vector<8x256xf32>
    %221 = tpu.matmul %220, %218, %cst_62 {dimension_numbers = #tpu.dot_dimension_numbers<[1], [0], [0], [1], [0, 0, 1, 1], [], []>} : vector<8x256xf32>, vector<256x256xf32>, vector<8x256xf32> -> vector<8x256xf32>
    %222 = arith.addf %212, %221 : vector<8x256xf32>
    %c0_63 = arith.constant 0 : index
    %c0_64 = arith.constant 0 : index
    %c0_65 = arith.constant 0 : index
    %223 = vector.load %arg9[%c0_63, %c0_64, %c0_65] : memref<1x8x256xf32, #tpu.memory_space<vmem>>, vector<1x8x256xf32>
    %224 = vector.shape_cast %223 : vector<1x8x256xf32> to vector<8x256xf32>
    %225 = vector.shape_cast %222 : vector<8x256xf32> to vector<1x8x256xf32>
    tpu.vector_store %arg9[%c0_63, %c0_64, %c0_65], %225 {strides = array<i32>} : memref<1x8x256xf32, #tpu.memory_space<vmem>>, vector<1x8x256xf32>,
    return
  }
  func.func @transform_0(%arg0: i32) -> (i32, i32, i32) {
    %c0_i32 = arith.constant 0 : i32
    %c0_i32_0 = arith.constant 0 : i32
    %c0_i32_1 = arith.constant 0 : i32
    return %arg0, %c0_i32, %c0_i32_0 : i32, i32, i32
  }
  func.func @transform_1(%arg0: i32) -> (i32, i32) {
    %c0_i32 = arith.constant 0 : i32
    %c0_i32_0 = arith.constant 0 : i32
    %c0_i32_1 = arith.constant 0 : i32
    return %c0_i32, %c0_i32_0 : i32, i32
  }
  func.func @transform_2(%arg0: i32) -> (i32, i32, i32) {
    %c0_i32 = arith.constant 0 : i32
    %c0_i32_0 = arith.constant 0 : i32
    %c0_i32_1 = arith.constant 0 : i32
    %c0_i32_2 = arith.constant 0 : i32
    return %c0_i32, %c0_i32_0, %c0_i32_1 : i32, i32, i32
  }
  func.func @transform_3(%arg0: i32) -> (i32, i32) {
    %c0_i32 = arith.constant 0 : i32
    %c0_i32_0 = arith.constant 0 : i32
    %c0_i32_1 = arith.constant 0 : i32
    return %c0_i32, %c0_i32_0 : i32, i32
  }
  func.func @transform_4(%arg0: i32) -> (i32, i32, i32) {
    %c0_i32 = arith.constant 0 : i32
    %c0_i32_0 = arith.constant 0 : i32
    %c0_i32_1 = arith.constant 0 : i32
    %c0_i32_2 = arith.constant 0 : i32
    return %c0_i32, %c0_i32_0, %c0_i32_1 : i32, i32, i32
  }
  func.func @transform_5(%arg0: i32) -> (i32, i32) {
    %c0_i32 = arith.constant 0 : i32
    %c0_i32_0 = arith.constant 0 : i32
    %c0_i32_1 = arith.constant 0 : i32
    return %c0_i32, %c0_i32_0 : i32, i32
  }
  func.func @transform_6(%arg0: i32) -> (i32, i32) {
    %c0_i32 = arith.constant 0 : i32
    %c0_i32_0 = arith.constant 0 : i32
    %c0_i32_1 = arith.constant 0 : i32
    return %c0_i32, %c0_i32_0 : i32, i32
  }
  func.func @transform_7(%arg0: i32) -> (i32, i32) {
    %c0_i32 = arith.constant 0 : i32
    %c0_i32_0 = arith.constant 0 : i32
    %c0_i32_1 = arith.constant 0 : i32
    return %c0_i32, %c0_i32_0 : i32, i32
  }
  func.func @transform_8(%arg0: i32) -> (i32, i32, i32) {
    %c0_i32 = arith.constant 0 : i32
    %c0_i32_0 = arith.constant 0 : i32
    %c0_i32_1 = arith.constant 0 : i32
    return %arg0, %c0_i32, %c0_i32_0 : i32, i32, i32
  }
}

</mosaic_0001>

<bundles_post_ra>
// kernel: tpu_custom_call.1
= control target key start
LH: loop header
LB: loop body
LE: loop exit
PB: predicated region body
PF: predicated region fallthrough
CT: control target
= control target key end

     0   :  { %13 = vsyncpa [#allocation3], 0  ;;  %s15170_s0 = inlined_call_operand.vmem [shape: f32[2,4,256], index: 0, kind: input, shape index: {}]   ;;  %s15171_s1 = inlined_call_operand.vmem [shape: f32[256,28], index: 1, kind: input, shape index: {}]   ;;  %s15172_s2 = inlined_call_operand.vmem [shape: f32[7,8,256], index: 2, kind: input, shape index: {}]   ;;  %s15173_s3 = inlined_call_operand.vmem [shape: f32[256,28], index: 3, kind: input, shape index: {}]   ;;  %s15174_s4 = inlined_call_operand.vmem [shape: f32[7,8,256], index: 4, kind: input, shape index: {}]   ;;  %s15175_s5 = inlined_call_operand.vmem [shape: f32[7,256], index: 5, kind: input, shape index: {}]   ;;  %s15176_s6 = inlined_call_operand.vmem [shape: f32[7,256], index: 6, kind: input, shape index: {}]   ;;  %s15177_s7 = inlined_call_operand.vmem [shape: f32[8,256], index: 7, kind: input, shape index: {}]   ;;  %s15178_s8 = inlined_call_operand.hbm [shape: f32[2,8,256], index: 8, kind: output, shape index: {}]  }
   0x1   :  { %15 = vsyncpa [#allocation3 + $0x1], 0  ;;  %s8261_s27 = smov 0   ;;  %s8263_s28 = smov 0  }
   0x2   :  { %s8265_s29 = smov 0   ;;  %s8267_s30 = smov 0  }
   0x3 LB: > { %s8282_s9 = sadd.s32 4294967295, %s8199_s30   ;;  %s7023_s10 = sadd.s32 4294967294, %s8199_s30   ;;  %s8199_s30 = sphi %s8267_s30, %s17134_s30   ;;  %s8195_s29 = sphi %s8265_s29, %s17133_s29   ;;  %s8191_s28 = sphi %s8263_s28, %s17132_s28   ;;  %s8187_s27 = sphi %s8261_s27, %s17131_s27  }
   0x4   : > { %s8286_s11 = sadd.s32 1, %s8199_s30   ;;  %s201_s12 = sadd.s32 1, %s8195_s29 }
   0x5   : > { %s198_s13 = ssub.s32 %s8199_s30, %s8286_s11  ;;  %p211_p0 = scmp.ne.s32.totalorder %s8195_s29, %s8191_s28 }
   0x6   : > { %p199_p1 = scmp.eq.s32.totalorder %s198_s13, 0  ;;  %p212_p2 = scmp.eq.s32.totalorder %s8282_s9, 1 }
   0x7   : > { %p217_p3 = scmp.ne.s32.totalorder %s8191_s28, %s8187_s27  ;;  %p218_p4 = scmp.eq.s32.totalorder %s7023_s10, 1 }
   0x8   : > { %s8297_s14 = scalar_select %p199_p1, %s8195_s29, %s201_s12  }
   0x9   : > { %p8299_p5 = por %p212_p2, %p211_p0  ;;  %p8303_p6 = por %p218_p4, %p217_p3 }
   0xa   : > { %p7026_p7 = scmp.ge.s32.totalorder %s8199_s30, 1  ;;  %p265_p8 = scmp.lt.s32.totalorder %s8199_s30, 3 }
   0xc   : > { %p266_p9 = pnand %p7026_p7, %p265_p8 }
   0xe   : > { %269 = sbr.rel (%p266_p9) target bundleno = 2507 (0x9cb), region = 52 }
  0x15   : > { %p299_p10 = scmp.lt.s32.totalorder %s8282_s9, 1  ;;  %s8201_s22 = smov 48   ;;  %v15183_v2 = vmov 0.0   ;;  %v323_v3 = vlaneseq  ;;  %v8344_v6 = vld [vmem:[%s15175_s5] sm:$0x7f]  ;;  %vm338_vm0 = vcmask 261120  }
  0x16   : > { %s8202_s23 = smov 32   ;;  %s8203_s24 = smov 16   ;;  %667 = vmatprep.mubr.f32.mxu0 %v15183_v2  ;;  %763 = vmatprep.mubr.f32.mxu1 %v15183_v2  ;;  %v8349_v7 = vld [vmem:[%s15175_s5 + $0x8] sm:$0x7f]  ;;  %vm318_vm1 = vcmask 392192   ;;  %vm358_vm2 = vcmask 130048  }
  0x17   : > { %s300_s17 = scalar_select %p299_p10, %s8282_s9, 1  ;;  %v324_v4 = vshrl.u32 %v323_v3, 7  ;;  %vm461_vm3 = vcmask 1043456   ;;  %vm410_vm4 = vcmask 785408   ;;  %vm390_vm5 = vcmask 916480  }
  0x18   : > { %s15181_s25 = smov 96   ;;  %s15531_s26 = smov 112   ;;  %vm430_vm6 = vcmask 654336   ;;  %vm8208_vm7 = vmmov 1   ;;  %vm500_vm9 = vcmask 228352   ;;  %vm1084_vm10 = vcmask 23552  }
  0x19   : > { %s7127_s18 = sshll.u32 %s300_s17, 3  ;;  %s15179_s10 = smov 80   ;;  %v8339_v5 = vsub.s32 3, %v324_v4  ;;  %v8359_v10 = vsub.s32 1, %v324_v4  ;;  %v8363_v14 = vsub.s32 0, %v324_v4  ;;  %v8373_v17 = vsub.s32 2, %v324_v4  ;;  %vm8452_vm8 = vmpackc.low %vm461_vm3, %vm8208_vm7 }
  0x1a   : > { %s8314_s21 = scalar_lea.vmem %s15170_s0, %s7127_s18  ;;  %v8395_v29 = vsub.s32 5, %v324_v4  ;;  %v8405_v43 = vsub.s32 4, %v324_v4  ;;  %v8421_v56 = vsub.s32 6, %v324_v4  ;;  %s8209_s12 = smov 3   ;;  %vm1520_vm11 = vcmask 15360  }
  0x1b   : > { %v304_v0 = vld [vmem:[%s8314_s21] sm:$0xff]  ;;  %v8353_v8 = vrot.slane %v8344_v6, %v8339_v5  ;;  %v8357_v9 = vrot.slane %v8349_v7, %v8339_v5  ;;  %15860 = vst [vmem:[#allocation8_spill] sm:$0xff] %v8359_v10  ;;  %v8367_v15 = vrot.slane %v8344_v6, %v8359_v10  ;;  %v8371_v16 = vrot.slane %v8349_v7, %v8359_v10  ;;  %s8210_s13 = smov 127   ;;  %s8211_s18 = smov 2  }
  0x1c   : > { %316 = vrot.lane.b32.xlu1 %v304_v0, %s8201_s22  ;;  %336 = vrot.lane.b32.xlu0 %v304_v0, %s8202_s23  ;;  %v8319_v1 = vcombine.high %v304_v0, %v304_v0  ;;  %15863 = vst [vmem:[#allocation11_spill] sm:$0xff] %v8373_v17  ;;  %v8379_v23 = vrot.slane %v8344_v6, %v8363_v14  ;;  %15868 = vst [vmem:[#allocation16_spill] sm:$0xff] %v8395_v29  ;;  %s8212_s19 = smov 1   ;;  %vm1957_vm12 = vcmask 7168   ;;  %vm2947_vm13 = vcmask 1031168  }
  0x1d   : > { %15858 = vst [vmem:[#allocation6_spill] sm:$0xff] %v8353_v8  ;;  %15859 = vst [vmem:[#allocation7_spill] sm:$0xff] %v8357_v9  ;;  %v383_v13 = vcombine.low %v8353_v8, %v8357_v9  ;;  %v8383_v24 = vrot.slane %v8349_v7, %v8363_v14  ;;  %v8389_v27 = vrot.slane %v8344_v6, %v8373_v17  ;;  %vm2510_vm14 = vcmask 1039360  }
  0x1e   : > { %15857 = vst [vmem:[#allocation5_spill] sm:$0xff] %v8319_v1  ;;  %15861 = vst [vmem:[#allocation9_spill] sm:$0xff] %v8367_v15  ;;  %v8393_v28 = vrot.slane %v8349_v7, %v8373_v17  ;;  %v8413_v50 = vrot.slane %v8344_v6, %v8395_v29  ;;  %v8417_v51 = vrot.slane %v8349_v7, %v8395_v29  ;;  %vm3384_vm15 = vcmask 1022976  }
  0x1f   : > { %15862 = vst [vmem:[#allocation10_spill] sm:$0xff] %v8371_v16  ;;  %v385_v20 = vmul.f32 %v383_v13, %v304_v0  ;;  %15864 = vst [vmem:[#allocation12_spill] sm:$0xff] %v8379_v23  ;;  %v8425_v57 = vrot.slane %v8344_v6, %v8405_v43  ;;  %v8429_v58 = vrot.slane %v8349_v7, %v8405_v43 }
  0x20   : > { %356 = vrot.lane.b32.xlu1 %v304_v0, %s8203_s24  ;;  %333 = vrot.lane.b32.xlu0 %v8319_v1, %s8202_s23  ;;  %15865 = vst [vmem:[#allocation13_spill] sm:$0xff] %v8383_v24  ;;  %15866 = vst [vmem:[#allocation14_spill] sm:$0xff] %v8389_v27  ;;  %v8437_v3 = vrot.slane %v8344_v6, %v8421_v56  ;;  %v8441_v4 = vrot.slane %v8349_v7, %v8421_v56 }
  0x21   : > { %15867 = vst [vmem:[#allocation15_spill] sm:$0xff] %v8393_v28  ;;  %v453_v34 = vcombine.low %v385_v20, %v385_v20  ;;  %15869 = vst [vmem:[#allocation17_spill] sm:$0xff] %v8405_v43 }
  0x22   : > { %15870 = vst [vmem:[#allocation18_spill] sm:$0xff] %v8413_v50  ;;  %15871 = vst [vmem:[#allocation19_spill] sm:$0xff] %v8417_v51 }
  0x23   : > { %15872 = vst [vmem:[#allocation20_spill] sm:$0xff] %v8421_v56  ;;  %15873 = vst [vmem:[#allocation21_spill] sm:$0xff] %v8425_v57 }
  0x24   : > { %313 = vrot.lane.b32.xlu1 %v8319_v1, %s8201_s22  ;;  %353 = vrot.lane.b32.xlu0 %v8319_v1, %s8203_s24  ;;  %15874 = vst [vmem:[#allocation22_spill] sm:$0xff] %v8429_v58  ;;  %15875 = vst [vmem:[#allocation23_spill] sm:$0xff] %v8437_v3 }
  0x25   : > { %15876 = vst [vmem:[#allocation24_spill] sm:$0xff] %v8441_v4 }
  0x28   : > { %408 = vrot.lane.b32.xlu1 %v8319_v1, %s15181_s25  ;;  %406 = vrot.lane.b32.xlu0 %v304_v0, %s15181_s25  ;;  %s8213_s25 = smov 126  }
  0x2c   : > { %388 = vrot.lane.b32.xlu1 %v8319_v1, %s15531_s26  ;;  %386 = vrot.lane.b32.xlu0 %v304_v0, %s15531_s26  ;;  %s8214_s26 = smov 125  }
  0x30   : > { %428 = vrot.lane.b32.xlu1 %v8319_v1, %s15179_s10  ;;  %426 = vrot.lane.b32.xlu0 %v304_v0, %s15179_s10 }
  0x8e   : > { %v317_v11 = vpop.permute.xlu1 %316  ;;  %v337_v12 = vpop.permute.xlu0 %336 }
  0x92   : > { %v357_v18 = vpop.permute.xlu1 %356  ;;  %v334_v19 = vpop.permute.xlu0 %333 }
  0x93   : > { %v339_v21 = vsel %vm338_vm0, %v337_v12, %v334_v19  ;;  %v342_v22 = vsel %vm338_vm0, %v334_v19, %v337_v12 }
  0x94   : > { %v351_v25 = vmul.f32 %v8367_v15, %v342_v22  ;;  %v352_v26 = vmul.f32 %v8371_v16, %v339_v21 }
  0x96   : > { %v448_v30 = vrot.slane %v351_v25, 4  ;;  %v449_v31 = vrot.slane %v352_v26, 4  ;;  %v314_v32 = vpop.permute.xlu1 %313  ;;  %v354_v33 = vpop.permute.xlu0 %353 }
  0x97   : > { %v319_v35 = vsel %vm318_vm1, %v317_v11, %v314_v32  ;;  %v322_v36 = vsel %vm318_vm1, %v314_v32, %v317_v11  ;;  %v359_v37 = vsel %vm358_vm2, %v357_v18, %v354_v33  ;;  %v362_v38 = vsel %vm358_vm2, %v354_v33, %v357_v18  ;;  %v468_v33 = vld [vmem:[%s15171_s1] sm:$0xff] }
  0x98   : > { %v331_v39 = vmul.f32 %v8379_v23, %v322_v36  ;;  %v332_v40 = vmul.f32 %v8383_v24, %v319_v35  ;;  %v371_v41 = vmul.f32 %v8389_v27, %v362_v38  ;;  %v372_v42 = vmul.f32 %v8393_v28, %v359_v37  ;;  %v469_v35 = vld [vmem:[%s15171_s1 + $0x8] sm:$0xff]  ;;  %v470_v37 = vld [vmem:[%s15171_s1 + $0x10] sm:$0xff] }
  0x99   : > { %v485_v36 = vld [vmem:[%s15171_s1 + $0x88] sm:$0xff]  ;;  %v486_v38 = vld [vmem:[%s15171_s1 + $0x90] sm:$0xff] }
  0x9a   : > { %v409_v44 = vpop.permute.xlu1 %408  ;;  %v407_v45 = vpop.permute.xlu0 %406  ;;  %v463_v46 = vsel %vm461_vm3, %v332_v40, %v449_v31  ;;  %v465_v47 = vsel %vm461_vm3, %v372_v42, %v385_v20  ;;  %v462_v48 = vsel %vm461_vm3, %v331_v39, %v448_v30  ;;  %v464_v49 = vsel %vm461_vm3, %v371_v41, %v453_v34  ;;  %v484_v34 = vld [vmem:[%s15171_s1 + $0x80] sm:$0xff]  ;;  %v471_v39 = vld [vmem:[%s15171_s1 + $0x18] sm:$0xff] }
  0x9b   : > { %v7129_v52 = vpack.c.bf16 %v465_v47, %v463_v46  ;;  %v7131_v53 = vpack.c.bf16 %v464_v49, %v462_v48  ;;  %v411_v54 = vsel %vm410_vm4, %v407_v45, %v409_v44  ;;  %v415_v55 = vsel %vm410_vm4, %v409_v44, %v407_v45  ;;  %v487_v40 = vld [vmem:[%s15171_s1 + $0x98] sm:$0xff]  ;;  %v472_v41 = vld [vmem:[%s15171_s1 + $0x20] sm:$0xff]  ;;  %v473_v44 = vld [vmem:[%s15171_s1 + $0x28] sm:$0xff] }
  0x9c   : > { %v424_v61 = vmul.f32 %v8413_v50, %v411_v54  ;;  %v425_v62 = vmul.f32 %v8417_v51, %v415_v55  ;;  %v15877_v30 = vmov 0  ;;  %v488_v42 = vld [vmem:[%s15171_s1 + $0xa0] sm:$0xff]  ;;  %v489_v45 = vld [vmem:[%s15171_s1 + $0xa8] sm:$0xff]  ;;  %v474_v46 = vld [vmem:[%s15171_s1 + $0x30] sm:$0xff] }
  0x9d   : > { %7130 = vmatprep.subr.bf16.mxu0 %v7129_v52  ;;  %8045 = vmatprep.subr.bf16.mxu1 %v7129_v52  ;;  %v15878_v30 = vsel %vm8452_vm8, 4294967295, %v15877_v30  ;;  %v490_v47 = vld [vmem:[%s15171_s1 + $0xb0] sm:$0xff]  ;;  %v475_v48 = vld [vmem:[%s15171_s1 + $0x38] sm:$0xff]  ;;  %v476_v52 = vld [vmem:[%s15171_s1 + $0x40] sm:$0xff] }
  0x9e   : > { %v389_v59 = vpop.permute.xlu1 %388  ;;  %7132 = vmatpush1.bf16.msra.mxu0 %v7131_v53  ;;  %8047 = vmatpush1.bf16.msra.mxu1 %v7131_v53  ;;  %v387_v60 = vpop.permute.xlu0 %386  ;;  %v457_v19 = vrot.slane %v424_v61, 4  ;;  %v458_v20 = vrot.slane %v425_v62, 4  ;;  %15879 = vst [vmem:[#allocation25_spill] sm:$0xff] %v15878_v30  ;;  %v491_v49 = vld [vmem:[%s15171_s1 + $0xb8] sm:$0xff]  ;;  %v492_v53 = vld [vmem:[%s15171_s1 + $0xc0] sm:$0xff]  ;;  %v477_v54 = vld [vmem:[%s15171_s1 + $0x48] sm:$0xff] }
  0x9f   : > { %v391_v63 = vsel %vm390_vm5, %v387_v60, %v389_v59  ;;  %v395_v0 = vsel %vm390_vm5, %v389_v59, %v387_v60  ;;  %v493_v55 = vld [vmem:[%s15171_s1 + $0xc8] sm:$0xff]  ;;  %v478_v59 = vld [vmem:[%s15171_s1 + $0x50] sm:$0xff]  ;;  %v479_v60 = vld [vmem:[%s15171_s1 + $0x58] sm:$0xff] }
  0xa0   : > { %v404_v11 = vmul.f32 %v8425_v57, %v391_v63  ;;  %v405_v12 = vmul.f32 %v8429_v58, %v395_v0  ;;  %v494_v61 = vld [vmem:[%s15171_s1 + $0xd0] sm:$0xff]  ;;  %v495_v62 = vld [vmem:[%s15171_s1 + $0xd8] sm:$0xff]  ;;  %v480_v63 = vld [vmem:[%s15171_s1 + $0x60] sm:$0xff] }
  0xa1   : > { %v481_v0 = vld [vmem:[%s15171_s1 + $0x68] sm:$0xff] }
  0xa2   : > { %v429_v13 = vpop.permute.xlu1 %428  ;;  %v427_v18 = vpop.permute.xlu0 %426  ;;  %v466_v26 = vsel %vm461_vm3, %v404_v11, %v457_v19  ;;  %v467_v7 = vsel %vm461_vm3, %v405_v12, %v458_v20  ;;  %v496_v11 = vld [vmem:[%s15171_s1 + $0xe0] sm:$0xff]  ;;  %v497_v12 = vld [vmem:[%s15171_s1 + $0xe8] sm:$0xff] }
  0xa3   : > { %v431_v21 = vsel %vm430_vm6, %v427_v18, %v429_v13  ;;  %v435_v22 = vsel %vm430_vm6, %v429_v13, %v427_v18  ;;  %v482_v13 = vld [vmem:[%s15171_s1 + $0x70] sm:$0xff]  ;;  %v8612_v18 = vld [vmem:[%s15176_s6] sm:$0x7f]  ;;  %v8617_v19 = vld [vmem:[%s15176_s6 + $0x8] sm:$0x7f] }
  0xa4   : > { %v444_v25 = vmul.f32 %v8437_v3, %v431_v21  ;;  %v445_v6 = vmul.f32 %v8441_v4, %v435_v22  ;;  %v483_v22 = vld [vmem:[%s15171_s1 + $0x78] sm:$0xff] }
  0xa6   : > { %v7133_v31 = vpack.c.bf16 %v445_v6, %v467_v7  ;;  %v7136_v32 = vpack.c.bf16 %v444_v25, %v466_v26  ;;  %v498_v25 = vld [vmem:[%s15171_s1 + $0xf0] sm:$0xff]  ;;  %v8638_v7 = vrot.slane %v8612_v18, %v8339_v5 }
  0xa8   : > { %7135 = vmatprep.subr.msk.bf16.mxu0 %vm8452_vm8, %v7133_v31  ;;  %8046 = vmatprep.subr.msk.bf16.mxu1 %vm8452_vm8, %v7133_v31  ;;  %15884 = vst [vmem:[#allocation30_spill] sm:$0xff] %v8638_v7  ;;  %v8645_v31 = vrot.slane %v8617_v19, %v8339_v5 }
  0xa9   : > { %7138 = vmatpush1.bf16.msk.msra.mxu0 %vm8452_vm8, %v7136_v32  ;;  %8048 = vmatpush1.bf16.msk.msra.mxu1 %vm8452_vm8, %v7136_v32 }
  0xaa   : > { %15885 = vst [vmem:[#allocation31_spill] sm:$0xff] %v8645_v31 }
  0xac   : > { %7032 = vmatmul.mubr.msk.f32.vlgmr.msra.gmra.mrb[0].mxu0 %vm500_vm9, %v468_v33  ;;  %7048 = vmatmul.mubr.msk.f32.vlgmr.msra.gmra.mrb[0].mxu1 %vm500_vm9, %v484_v34 }
  0xad   : > { %673 = vmatprep.mubr.f32.mxu0 %v15183_v2  ;;  %769 = vmatprep.mubr.f32.mxu1 %v15183_v2 }
  0xb0   : > { %7033 = vmatmul.mubr.msk.f32.gmra.mrb[2].mxu0 %vm500_vm9, %v469_v35  ;;  %7049 = vmatmul.mubr.msk.f32.gmra.mrb[2].mxu1 %vm500_vm9, %v485_v36  ;;  %v499_v35 = vld [vmem:[%s15171_s1 + $0xf8] sm:$0xff] }
  0xb1   : > { %679 = vmatprep.mubr.f32.mxu0 %v15183_v2  ;;  %775 = vmatprep.mubr.f32.mxu1 %v15183_v2 }
  0xb4   : > { %7034 = vmatmul.mubr.msk.f32.gmra.mrb[4].mxu0 %vm500_vm9, %v470_v37  ;;  %7050 = vmatmul.mubr.msk.f32.gmra.mrb[4].mxu1 %vm500_vm9, %v486_v38 }
  0xb5   : > { %685 = vmatprep.mubr.f32.mxu0 %v15183_v2  ;;  %781 = vmatprep.mubr.f32.mxu1 %v15183_v2 }
  0xb8   : > { %7035 = vmatmul.mubr.msk.f32.gmra.mrb[6].mxu0 %vm500_vm9, %v471_v39  ;;  %7051 = vmatmul.mubr.msk.f32.gmra.mrb[6].mxu1 %vm500_vm9, %v487_v40 }
  0xb9   : > { %691 = vmatprep.mubr.f32.mxu0 %v15183_v2  ;;  %787 = vmatprep.mubr.f32.mxu1 %v15183_v2 }
  0xbc   : > { %7036 = vmatmul.mubr.msk.f32.gmra.mrb[8].mxu0 %vm500_vm9, %v472_v41  ;;  %7052 = vmatmul.mubr.msk.f32.gmra.mrb[8].mxu1 %vm500_vm9, %v488_v42 }
  0xbd   : > { %697 = vmatprep.mubr.f32.mxu0 %v15183_v2  ;;  %793 = vmatprep.mubr.f32.mxu1 %v15183_v2 }
  0xc0   : > { %7037 = vmatmul.mubr.msk.f32.gmra.mrb[10].mxu0 %vm500_vm9, %v473_v44  ;;  %7053 = vmatmul.mubr.msk.f32.gmra.mrb[10].mxu1 %vm500_vm9, %v489_v45 }
  0xc1   : > { %703 = vmatprep.mubr.f32.mxu0 %v15183_v2  ;;  %799 = vmatprep.mubr.f32.mxu1 %v15183_v2 }
  0xc4   : > { %7038 = vmatmul.mubr.msk.f32.gmra.mrb[12].mxu0 %vm500_vm9, %v474_v46  ;;  %7054 = vmatmul.mubr.msk.f32.gmra.mrb[12].mxu1 %vm500_vm9, %v490_v47 }
  0xc5   : > { %709 = vmatprep.mubr.f32.mxu0 %v15183_v2  ;;  %805 = vmatprep.mubr.f32.mxu1 %v15183_v2 }
  0xc8   : > { %7039 = vmatmul.mubr.msk.f32.gmra.mrb[14].mxu0 %vm500_vm9, %v475_v48  ;;  %7055 = vmatmul.mubr.msk.f32.gmra.mrb[14].mxu1 %vm500_vm9, %v491_v49 }
  0xc9   : > { %715 = vmatprep.mubr.f32.mxu0 %v15183_v2  ;;  %811 = vmatprep.mubr.f32.mxu1 %v15183_v2 }
  0xcc   : > { %7040 = vmatmul.mubr.msk.f32.gmra.mrb[16].mxu0 %vm500_vm9, %v476_v52  ;;  %7056 = vmatmul.mubr.msk.f32.gmra.mrb[16].mxu1 %vm500_vm9, %v492_v53 }
  0xcd   : > { %721 = vmatprep.mubr.f32.mxu0 %v15183_v2  ;;  %817 = vmatprep.mubr.f32.mxu1 %v15183_v2 }
  0xd0   : > { %7041 = vmatmul.mubr.msk.f32.gmra.mrb[18].mxu0 %vm500_vm9, %v477_v54  ;;  %7057 = vmatmul.mubr.msk.f32.gmra.mrb[18].mxu1 %vm500_vm9, %v493_v55 }
  0xd1   : > { %727 = vmatprep.mubr.f32.mxu0 %v15183_v2  ;;  %823 = vmatprep.mubr.f32.mxu1 %v15183_v2 }
  0xd4   : > { %7042 = vmatmul.mubr.msk.f32.gmra.mrb[20].mxu0 %vm500_vm9, %v478_v59  ;;  %7058 = vmatmul.mubr.msk.f32.gmra.mrb[20].mxu1 %vm500_vm9, %v494_v61 }
  0xd5   : > { %733 = vmatprep.mubr.f32.mxu0 %v15183_v2  ;;  %829 = vmatprep.mubr.f32.mxu1 %v15183_v2 }
  0xd8   : > { %7043 = vmatmul.mubr.msk.f32.gmra.mrb[22].mxu0 %vm500_vm9, %v479_v60  ;;  %7059 = vmatmul.mubr.msk.f32.gmra.mrb[22].mxu1 %vm500_vm9, %v495_v62 }
  0xd9   : > { %739 = vmatprep.mubr.f32.mxu0 %v15183_v2  ;;  %835 = vmatprep.mubr.f32.mxu1 %v15183_v2 }
  0xdc   : > { %7044 = vmatmul.mubr.msk.f32.gmra.mrb[24].mxu0 %vm500_vm9, %v480_v63  ;;  %7060 = vmatmul.mubr.msk.f32.gmra.mrb[24].mxu1 %vm500_vm9, %v496_v11 }
  0xdd   : > { %745 = vmatprep.mubr.f32.mxu0 %v15183_v2  ;;  %841 = vmatprep.mubr.f32.mxu1 %v15183_v2 }
  0xe0   : > { %7045 = vmatmul.mubr.msk.f32.gmra.mrb[26].mxu0 %vm500_vm9, %v481_v0  ;;  %7061 = vmatmul.mubr.msk.f32.gmra.mrb[26].mxu1 %vm500_vm9, %v497_v12 }
  0xe1   : > { %751 = vmatprep.mubr.f32.mxu0 %v15183_v2  ;;  %847 = vmatprep.mubr.f32.mxu1 %v15183_v2 }
  0xe4   : > { %7046 = vmatmul.mubr.msk.f32.gmra.mrb[28].mxu0 %vm500_vm9, %v482_v13  ;;  %7062 = vmatmul.mubr.msk.f32.gmra.mrb[28].mxu1 %vm500_vm9, %v498_v25 }
  0xe5   : > { %757 = vmatprep.mubr.f32.mxu0 %v15183_v2  ;;  %853 = vmatprep.mubr.f32.mxu1 %v15183_v2 }
  0xe8   : > { %7047 = vmatmul.mubr.msk.f32.gmra.mrb[30].mxu0 %vm500_vm9, %v483_v22  ;;  %7063 = vmatmul.mubr.msk.f32.gmra.mrb[30].mxu1 %vm500_vm9, %v499_v35 }
 0x17f   : > { %v8619_v20 = vpop.f32.mrb[0].mxu0  ;;  %v8621_v21 = vpop.f32.mrb[0].mxu1 }
 0x180   : > { %15880 = vst [vmem:[#allocation26_spill] sm:$0xff] %v8619_v20  ;;  %15881 = vst [vmem:[#allocation27_spill] sm:$0xff] %v8621_v21  ;;  %1020 = vrot.lane.b32.xlu0 %v8619_v20, %s8209_s12  ;;  %v8631_v6 = vpop.f32.mrb[1].mxu0  ;;  %v8633_v26 = vpop.f32.mrb[1].mxu1  ;;  %v8650_v32 = vmul.f32 %v8638_v7, %v8621_v21  ;;  %v8671_v38 = vmul.f32 %v8638_v7, %v8619_v20 }
 0x181   : > { %15882 = vst [vmem:[#allocation28_spill] sm:$0xff] %v8631_v6  ;;  %15883 = vst [vmem:[#allocation29_spill] sm:$0xff] %v8633_v26  ;;  %2384 = vrot.lane.b32.xlu1 %v8631_v6, %s8210_s13  ;;  %v8661_v36 = vmul.f32 %v8645_v31, %v8633_v26  ;;  %v8686_v41 = vmul.f32 %v8645_v31, %v8631_v6 }
 0x182   : > { %15886 = vst [vmem:[#allocation32_spill] sm:$0xff] %v8650_v32  ;;  %15892 = vst [vmem:[#allocation38_spill] sm:$0xff] %v8671_v38 }
 0x183   : > { %v8652_v33 = vpop.f32.mrb[2].mxu0  ;;  %v8654_v34 = vpop.f32.mrb[2].mxu1  ;;  %15889 = vst [vmem:[#allocation35_spill] sm:$0xff] %v8661_v36  ;;  %15895 = vst [vmem:[#allocation41_spill] sm:$0xff] %v8686_v41 }
 0x184   : > { %15887 = vst [vmem:[#allocation33_spill] sm:$0xff] %v8652_v33  ;;  %15888 = vst [vmem:[#allocation34_spill] sm:$0xff] %v8654_v34  ;;  %v8663_v5 = vpop.f32.mrb[3].mxu1  ;;  %1052 = vrot.lane.b32.xlu0 %v8621_v21, %s8209_s12  ;;  %v8667_v37 = vpop.f32.mrb[3].mxu0  ;;  %v8675_v39 = vmul.f32 %v8638_v7, %v8652_v33  ;;  %v8679_v40 = vmul.f32 %v8638_v7, %v8654_v34 }
 0x185   : > { %15890 = vst [vmem:[#allocation36_spill] sm:$0xff] %v8663_v5  ;;  %15891 = vst [vmem:[#allocation37_spill] sm:$0xff] %v8667_v37  ;;  %1022 = vrot.lane.b32.xlu1 %v8652_v33, %s8209_s12  ;;  %v8690_v42 = vmul.f32 %v8645_v31, %v8667_v37  ;;  %v8694_v44 = vmul.f32 %v8645_v31, %v8663_v5 }
 0x186   : > { %15893 = vst [vmem:[#allocation39_spill] sm:$0xff] %v8675_v39  ;;  %15894 = vst [vmem:[#allocation40_spill] sm:$0xff] %v8679_v40 }
 0x187   : > { %15896 = vst [vmem:[#allocation42_spill] sm:$0xff] %v8690_v42  ;;  %15897 = vst [vmem:[#allocation43_spill] sm:$0xff] %v8694_v44  ;;  %v8700_v47 = vpop.f32.mrb[4].mxu0  ;;  %v8702_v48 = vpop.f32.mrb[4].mxu1 }
 0x188   : > { %15898 = vst [vmem:[#allocation44_spill] sm:$0xff] %v8702_v48  ;;  %1456 = vrot.lane.b32.xlu0 %v8619_v20, %s8211_s18  ;;  %v8710_v53 = vpop.f32.mrb[5].mxu0  ;;  %v8712_v54 = vpop.f32.mrb[5].mxu1  ;;  %v8718_v55 = vmul.f32 %v8638_v7, %v8700_v47  ;;  %v8722_v59 = vmul.f32 %v8638_v7, %v8702_v48 }
 0x189   : > { %15899 = vst [vmem:[#allocation45_spill] sm:$0xff] %v8712_v54  ;;  %1054 = vrot.lane.b32.xlu1 %v8654_v34, %s8209_s12  ;;  %v8730_v62 = vmul.f32 %v8645_v31, %v8710_v53  ;;  %v8744_v12 = vmul.f32 %v8645_v31, %v8712_v54 }
 0x18a   : > { %15900 = vst [vmem:[#allocation46_spill] sm:$0xff] %v8718_v55  ;;  %15901 = vst [vmem:[#allocation47_spill] sm:$0xff] %v8722_v59 }
 0x18b   : > { %v8724_v60 = vpop.f32.mrb[6].mxu0  ;;  %v8726_v61 = vpop.f32.mrb[6].mxu1  ;;  %15903 = vst [vmem:[#allocation49_spill] sm:$0xff] %v8730_v62  ;;  %15906 = vst [vmem:[#allocation52_spill] sm:$0xff] %v8744_v12 }
 0x18c   : > { %15902 = vst [vmem:[#allocation48_spill] sm:$0xff] %v8726_v61  ;;  %1488 = vrot.lane.b32.xlu0 %v8621_v21, %s8211_s18  ;;  %v8734_v63 = vpop.f32.mrb[7].mxu0  ;;  %v8736_v0 = vpop.f32.mrb[7].mxu1  ;;  %v8740_v11 = vmul.f32 %v8638_v7, %v8724_v60  ;;  %v8748_v13 = vmul.f32 %v8638_v7, %v8726_v61 }
 0x18d   : > { %15904 = vst [vmem:[#allocation50_spill] sm:$0xff] %v8736_v0  ;;  %1458 = vrot.lane.b32.xlu1 %v8652_v33, %s8211_s18  ;;  %v8754_v22 = vmul.f32 %v8645_v31, %v8734_v63  ;;  %v8760_v35 = vmul.f32 %v8645_v31, %v8736_v0 }
 0x18e   : > { %15905 = vst [vmem:[#allocation51_spill] sm:$0xff] %v8740_v11  ;;  %15907 = vst [vmem:[#allocation53_spill] sm:$0xff] %v8748_v13 }
 0x18f   : > { %15908 = vst [vmem:[#allocation54_spill] sm:$0xff] %v8754_v22  ;;  %15909 = vst [vmem:[#allocation55_spill] sm:$0xff] %v8760_v35  ;;  %v8764_v46 = vpop.f32.mrb[8].mxu0  ;;  %v8766_v52 = vpop.f32.mrb[8].mxu1 }
 0x190   : > { %15910 = vst [vmem:[#allocation56_spill] sm:$0xff] %v8766_v52  ;;  %1893 = vrot.lane.b32.xlu0 %v8619_v20, %s8212_s19  ;;  %v8772_v49 = vpop.f32.mrb[9].mxu0  ;;  %v8774_v25 = vpop.f32.mrb[9].mxu1  ;;  %v8782_v2 = vmul.f32 %v8638_v7, %v8764_v46  ;;  %v8798_v4 = vmul.f32 %v8638_v7, %v8766_v52 }
 0x191   : > { %15911 = vst [vmem:[#allocation57_spill] sm:$0xff] %v8774_v25  ;;  %1490 = vrot.lane.b32.xlu1 %v8654_v34, %s8211_s18  ;;  %v8790_v50 = vmul.f32 %v8645_v31, %v8772_v49  ;;  %v8794_v51 = vmul.f32 %v8645_v31, %v8774_v25 }
 0x192   : > { %15912 = vst [vmem:[#allocation58_spill] sm:$0xff] %v8782_v2  ;;  %15916 = vst [vmem:[#allocation62_spill] sm:$0xff] %v8798_v4 }
 0x193   : > { %v8784_v3 = vpop.f32.mrb[10].mxu0  ;;  %v8786_v45 = vpop.f32.mrb[10].mxu1  ;;  %15914 = vst [vmem:[#allocation60_spill] sm:$0xff] %v8790_v50  ;;  %15915 = vst [vmem:[#allocation61_spill] sm:$0xff] %v8794_v51 }
 0x194   : > { %15913 = vst [vmem:[#allocation59_spill] sm:$0xff] %v8786_v45  ;;  %1925 = vrot.lane.b32.xlu0 %v8621_v21, %s8212_s19  ;;  %v8802_v57 = vpop.f32.mrb[11].mxu0  ;;  %v8804_v58 = vpop.f32.mrb[11].mxu1  ;;  %v8808_v27 = vmul.f32 %v8638_v7, %v8784_v3  ;;  %v8812_v28 = vmul.f32 %v8638_v7, %v8786_v45 }
 0x195   : > { %15917 = vst [vmem:[#allocation63_spill] sm:$0xff] %v8804_v58  ;;  %1895 = vrot.lane.b32.xlu1 %v8652_v33, %s8212_s19  ;;  %v8818_v24 = vmul.f32 %v8645_v31, %v8802_v57  ;;  %v8822_v23 = vmul.f32 %v8645_v31, %v8804_v58 }
 0x196   : > { %15918 = vst [vmem:[#allocation64_spill] sm:$0xff] %v8808_v27  ;;  %15919 = vst [vmem:[#allocation65_spill] sm:$0xff] %v8812_v28 }
 0x197   : > { %15920 = vst [vmem:[#allocation66_spill] sm:$0xff] %v8818_v24  ;;  %15921 = vst [vmem:[#allocation67_spill] sm:$0xff] %v8822_v23  ;;  %v8826_v15 = vpop.f32.mrb[12].mxu0  ;;  %v8828_v9 = vpop.f32.mrb[12].mxu1 }
 0x198   : > { %15922 = vst [vmem:[#allocation68_spill] sm:$0xff] %v8828_v9  ;;  %2382 = vrot.lane.b32.xlu0 %v8619_v20, %s8210_s13  ;;  %v8838_v43 = vpop.f32.mrb[13].mxu0  ;;  %v8840_v59 = vpop.f32.mrb[13].mxu1  ;;  %v8846_v16 = vmul.f32 %v8638_v7, %v8826_v15  ;;  %v8862_v28 = vmul.f32 %v8638_v7, %v8828_v9 }
 0x199   : > { %15923 = vst [vmem:[#allocation69_spill] sm:$0xff] %v8840_v59  ;;  %1927 = vrot.lane.b32.xlu1 %v8654_v34, %s8212_s19  ;;  %v8854_v56 = vmul.f32 %v8645_v31, %v8838_v43  ;;  %v8858_v4 = vmul.f32 %v8645_v31, %v8840_v59 }
 0x19a   : > { %15924 = vst [vmem:[#allocation70_spill] sm:$0xff] %v8846_v16  ;;  %15929 = vst [vmem:[#allocation75_spill] sm:$0xff] %v8862_v28 }
 0x19b   : > { %v8848_v8 = vpop.f32.mrb[14].mxu0  ;;  %v8850_v30 = vpop.f32.mrb[14].mxu1  ;;  %15927 = vst [vmem:[#allocation73_spill] sm:$0xff] %v8854_v56  ;;  %15928 = vst [vmem:[#allocation74_spill] sm:$0xff] %v8858_v4 }
 0x19c   : > { %15925 = vst [vmem:[#allocation71_spill] sm:$0xff] %v8848_v8  ;;  %15926 = vst [vmem:[#allocation72_spill] sm:$0xff] %v8850_v30  ;;  %892 = vrot.lane.b32.xlu0 %v8631_v6, %s8209_s12  ;;  %v8866_v51 = vpop.f32.mrb[15].mxu0  ;;  %v8868_v23 = vpop.f32.mrb[15].mxu1  ;;  %v8872_v13 = vmul.f32 %v8638_v7, %v8848_v8  ;;  %v8876_v12 = vmul.f32 %v8638_v7, %v8850_v30 }
 0x19d   : > { %15930 = vst [vmem:[#allocation76_spill] sm:$0xff] %v8866_v51  ;;  %15931 = vst [vmem:[#allocation77_spill] sm:$0xff] %v8868_v23  ;;  %894 = vrot.lane.b32.xlu1 %v8667_v37, %s8209_s12  ;;  %v8882_v35 = vmul.f32 %v8645_v31, %v8866_v51  ;;  %v8886_v32 = vmul.f32 %v8645_v31, %v8868_v23 }
 0x19e   : > { %15932 = vst [vmem:[#allocation78_spill] sm:$0xff] %v8872_v13  ;;  %15933 = vst [vmem:[#allocation79_spill] sm:$0xff] %v8876_v12 }
 0x19f   : > { %15934 = vst [vmem:[#allocation80_spill] sm:$0xff] %v8882_v35  ;;  %15935 = vst [vmem:[#allocation81_spill] sm:$0xff] %v8886_v32  ;;  %v8928_v2 = vpop.f32.mrb[16].mxu0  ;;  %v8940_v28 = vpop.f32.mrb[16].mxu1 }
 0x1a0   : > { %924 = vrot.lane.b32.xlu0 %v8633_v26, %s8209_s12  ;;  %15936 = vst [vmem:[#allocation82_spill] sm:$0xff] %v8928_v2  ;;  %v8930_v44 = vpop.f32.mrb[17].mxu0  ;;  %15940 = vst [vmem:[#allocation86_spill] sm:$0xff] %v8940_v28  ;;  %v8942_v12 = vpop.f32.mrb[17].mxu1  ;;  %v8954_v16 = vmul.f32 %v8638_v7, %v8928_v2  ;;  %v8982_v11 = vmul.f32 %v8638_v7, %v8940_v28 }
 0x1a1   : > { %926 = vrot.lane.b32.xlu1 %v8663_v5, %s8209_s12  ;;  %15937 = vst [vmem:[#allocation83_spill] sm:$0xff] %v8930_v44  ;;  %15941 = vst [vmem:[#allocation87_spill] sm:$0xff] %v8942_v12  ;;  %v8946_v4 = vmul.f32 %v8645_v31, %v8930_v44  ;;  %v8974_v24 = vmul.f32 %v8645_v31, %v8942_v12 }
 0x1a2   : > { %15944 = vst [vmem:[#allocation90_spill] sm:$0xff] %v8954_v16  ;;  %15949 = vst [vmem:[#allocation95_spill] sm:$0xff] %v8982_v11 }
 0x1a3   : > { %v8932_v40 = vpop.f32.mrb[18].mxu0  ;;  %15942 = vst [vmem:[#allocation88_spill] sm:$0xff] %v8946_v4  ;;  %v8960_v56 = vpop.f32.mrb[18].mxu1  ;;  %15947 = vst [vmem:[#allocation93_spill] sm:$0xff] %v8974_v24 }
 0x1a4   : > { %1360 = vrot.lane.b32.xlu0 %v8631_v6, %s8211_s18  ;;  %15938 = vst [vmem:[#allocation84_spill] sm:$0xff] %v8932_v40  ;;  %v8936_v36 = vpop.f32.mrb[19].mxu0  ;;  %v8958_v13 = vmul.f32 %v8638_v7, %v8932_v40  ;;  %15946 = vst [vmem:[#allocation92_spill] sm:$0xff] %v8960_v56  ;;  %v8964_v35 = vpop.f32.mrb[19].mxu1  ;;  %v8986_v27 = vmul.f32 %v8638_v7, %v8960_v56 }
 0x1a5   : > { %1362 = vrot.lane.b32.xlu1 %v8667_v37, %s8211_s18  ;;  %15939 = vst [vmem:[#allocation85_spill] sm:$0xff] %v8936_v36  ;;  %v8950_v32 = vmul.f32 %v8645_v31, %v8936_v36  ;;  %v8978_v55 = vmul.f32 %v8645_v31, %v8964_v35 }
 0x1a6   : > { %15945 = vst [vmem:[#allocation91_spill] sm:$0xff] %v8958_v13  ;;  %15950 = vst [vmem:[#allocation96_spill] sm:$0xff] %v8986_v27 }
 0x1a7   : > { %15943 = vst [vmem:[#allocation89_spill] sm:$0xff] %v8950_v32  ;;  %15948 = vst [vmem:[#allocation94_spill] sm:$0xff] %v8978_v55  ;;  %v9032_v16 = vpop.f32.mrb[20].mxu0  ;;  %v9044_v24 = vpop.f32.mrb[20].mxu1 }
 0x1a8   : > { %1392 = vrot.lane.b32.xlu0 %v8633_v26, %s8211_s18  ;;  %15951 = vst [vmem:[#allocation97_spill] sm:$0xff] %v9032_v16  ;;  %v9034_v50 = vpop.f32.mrb[21].mxu0  ;;  %v9046_v13 = vpop.f32.mrb[21].mxu1  ;;  %v9058_v62 = vmul.f32 %v8638_v7, %v9032_v16 }
 0x1a9   : > { %1394 = vrot.lane.b32.xlu1 %v8663_v5, %s8211_s18  ;;  %15952 = vst [vmem:[#allocation98_spill] sm:$0xff] %v9034_v50  ;;  %v9050_v4 = vmul.f32 %v8645_v31, %v9034_v50 }
 0x1aa   : > { %15957 = vst [vmem:[#allocation103_spill] sm:$0xff] %v9058_v62 }
 0x1ab   : > { %v9036_v11 = vpop.f32.mrb[22].mxu0  ;;  %15955 = vst [vmem:[#allocation101_spill] sm:$0xff] %v9050_v4  ;;  %v9066_v39 = vpop.f32.mrb[22].mxu1 }
 0x1ac   : > { %1797 = vrot.lane.b32.xlu0 %v8631_v6, %s8212_s19  ;;  %15953 = vst [vmem:[#allocation99_spill] sm:$0xff] %v9036_v11  ;;  %v9040_v27 = vpop.f32.mrb[23].mxu0  ;;  %v9062_v22 = vmul.f32 %v8638_v7, %v9036_v11  ;;  %15960 = vst [vmem:[#allocation106_spill] sm:$0xff] %v9066_v39  ;;  %v9070_v41 = vpop.f32.mrb[23].mxu1  ;;  %v9090_v6 = vmul.f32 %v8638_v7, %v9044_v24  ;;  %v9094_v29 = vmul.f32 %v8638_v7, %v9066_v39 }
 0x1ad   : > { %1799 = vrot.lane.b32.xlu1 %v8667_v37, %s8212_s19  ;;  %15954 = vst [vmem:[#allocation100_spill] sm:$0xff] %v9040_v27  ;;  %v9054_v32 = vmul.f32 %v8645_v31, %v9040_v27  ;;  %v9086_v1 = vmul.f32 %v8645_v31, %v9070_v41 }
 0x1ae   : > { %15958 = vst [vmem:[#allocation104_spill] sm:$0xff] %v9062_v22  ;;  %15964 = vst [vmem:[#allocation110_spill] sm:$0xff] %v9090_v6 }
 0x1af   : > { %15956 = vst [vmem:[#allocation102_spill] sm:$0xff] %v9054_v32  ;;  %15963 = vst [vmem:[#allocation109_spill] sm:$0xff] %v9086_v1 }
 0x1b0   : > { %1829 = vrot.lane.b32.xlu0 %v8633_v26, %s8212_s19  ;;  %15965 = vst [vmem:[#allocation111_spill] sm:$0xff] %v9094_v29 }
 0x1b1   : > { %1831 = vrot.lane.b32.xlu1 %v8663_v5, %s8212_s19 }
 0x1b4   : > { %1024 = vrot.lane.b32.xlu0 %v8700_v47, %s8209_s12 }
 0x1b5   : > { %1026 = vrot.lane.b32.xlu1 %v8724_v60, %s8209_s12 }
 0x1b8   : > { %1056 = vrot.lane.b32.xlu0 %v8702_v48, %s8209_s12 }
 0x1b9   : > { %1058 = vrot.lane.b32.xlu1 %v8726_v61, %s8209_s12 }
 0x1bc   : > { %1460 = vrot.lane.b32.xlu0 %v8700_v47, %s8211_s18 }
 0x1bd   : > { %1462 = vrot.lane.b32.xlu1 %v8724_v60, %s8211_s18 }
 0x1c0   : > { %1492 = vrot.lane.b32.xlu0 %v8702_v48, %s8211_s18 }
 0x1c1   : > { %1494 = vrot.lane.b32.xlu1 %v8726_v61, %s8211_s18 }
 0x1c4   : > { %1897 = vrot.lane.b32.xlu0 %v8700_v47, %s8212_s19 }
 0x1c5   : > { %1899 = vrot.lane.b32.xlu1 %v8724_v60, %s8212_s19 }
 0x1c8   : > { %1929 = vrot.lane.b32.xlu0 %v8702_v48, %s8212_s19 }
 0x1c9   : > { %1931 = vrot.lane.b32.xlu1 %v8726_v61, %s8212_s19 }
 0x1cc   : > { %896 = vrot.lane.b32.xlu0 %v8710_v53, %s8209_s12 }
 0x1cd   : > { %898 = vrot.lane.b32.xlu1 %v8734_v63, %s8209_s12 }
 0x1d0   : > { %928 = vrot.lane.b32.xlu0 %v8712_v54, %s8209_s12 }
 0x1d1   : > { %930 = vrot.lane.b32.xlu1 %v8736_v0, %s8209_s12 }
 0x1d4   : > { %1364 = vrot.lane.b32.xlu0 %v8710_v53, %s8211_s18 }
 0x1d5   : > { %1366 = vrot.lane.b32.xlu1 %v8734_v63, %s8211_s18 }
 0x1d8   : > { %1396 = vrot.lane.b32.xlu0 %v8712_v54, %s8211_s18 }
 0x1d9   : > { %1398 = vrot.lane.b32.xlu1 %v8736_v0, %s8211_s18 }
 0x1dc   : > { %1801 = vrot.lane.b32.xlu0 %v8710_v53, %s8212_s19 }
 0x1dd   : > { %1803 = vrot.lane.b32.xlu1 %v8734_v63, %s8212_s19 }
 0x1e0   : > { %1833 = vrot.lane.b32.xlu0 %v8712_v54, %s8212_s19 }
 0x1e1   : > { %1835 = vrot.lane.b32.xlu1 %v8736_v0, %s8212_s19 }
 0x1e4   : > { %1028 = vrot.lane.b32.xlu0 %v8764_v46, %s8209_s12 }
 0x1e5   : > { %1030 = vrot.lane.b32.xlu1 %v8784_v3, %s8209_s12 }
 0x1e8   : > { %1060 = vrot.lane.b32.xlu0 %v8766_v52, %s8209_s12 }
 0x1e9   : > { %1062 = vrot.lane.b32.xlu1 %v8786_v45, %s8209_s12 }
 0x1ec   : > { %1464 = vrot.lane.b32.xlu0 %v8764_v46, %s8211_s18 }
 0x1ed   : > { %1466 = vrot.lane.b32.xlu1 %v8784_v3, %s8211_s18 }
 0x1f0   : > { %1496 = vrot.lane.b32.xlu0 %v8766_v52, %s8211_s18 }
 0x1f1   : > { %1498 = vrot.lane.b32.xlu1 %v8786_v45, %s8211_s18 }
 0x1f2   : > { %v1021_v55 = vpop.permute.xlu0 %1020 }
 0x1f3   : > { %v9064_v38 = vpop.permute.xlu1 %2384 }
 0x1f4   : > { %15959 = vst [vmem:[#allocation105_spill] sm:$0xff] %v9064_v38  ;;  %1901 = vrot.lane.b32.xlu0 %v8764_v46, %s8212_s19  ;;  %v9082_v38 = vmul.f32 %v8645_v31, %v9046_v13 }
 0x1f5   : > { %1903 = vrot.lane.b32.xlu1 %v8784_v3, %s8212_s19 }
 0x1f6   : > { %v9078_v17 = vpop.permute.xlu0 %1052  ;;  %15962 = vst [vmem:[#allocation108_spill] sm:$0xff] %v9082_v38 }
 0x1f7   : > { %15961 = vst [vmem:[#allocation107_spill] sm:$0xff] %v9078_v17  ;;  %v1023_v42 = vpop.permute.xlu1 %1022 }
 0x1f8   : > { %1933 = vrot.lane.b32.xlu0 %v8766_v52, %s8212_s19 }
 0x1f9   : > { %1935 = vrot.lane.b32.xlu1 %v8786_v45, %s8212_s19 }
 0x1fa   : > { %v9104_v4 = vpop.permute.xlu0 %1456 }
 0x1fb   : > { %15966 = vst [vmem:[#allocation112_spill] sm:$0xff] %v9104_v4  ;;  %v9106_v32 = vpop.permute.xlu1 %1054 }
 0x1fc   : > { %15967 = vst [vmem:[#allocation113_spill] sm:$0xff] %v9106_v32  ;;  %900 = vrot.lane.b32.xlu0 %v8772_v49, %s8209_s12 }
 0x1fd   : > { %902 = vrot.lane.b32.xlu1 %v8802_v57, %s8209_s12 }
 0x1fe   : > { %v9112_v20 = vpop.permute.xlu0 %1488 }
 0x1ff   : > { %15968 = vst [vmem:[#allocation114_spill] sm:$0xff] %v9112_v20  ;;  %v9114_v10 = vpop.permute.xlu1 %1458 }
 0x200   : > { %15969 = vst [vmem:[#allocation115_spill] sm:$0xff] %v9114_v10  ;;  %932 = vrot.lane.b32.xlu0 %v8774_v25, %s8209_s12 }
 0x201   : > { %934 = vrot.lane.b32.xlu1 %v8804_v58, %s8209_s12 }
 0x202   : > { %v9120_v22 = vpop.permute.xlu0 %1893 }
 0x203   : > { %15970 = vst [vmem:[#allocation116_spill] sm:$0xff] %v9120_v22  ;;  %v9122_v62 = vpop.permute.xlu1 %1490  ;;  %v9144_v22 = vrot.slane %v8612_v18, %v8363_v14 }
 0x204   : > { %15971 = vst [vmem:[#allocation117_spill] sm:$0xff] %v9122_v62  ;;  %1368 = vrot.lane.b32.xlu0 %v8772_v49, %s8211_s18 }
 0x205   : > { %1370 = vrot.lane.b32.xlu1 %v8802_v57, %s8211_s18  ;;  %15976 = vst [vmem:[#allocation122_spill] sm:$0xff] %v9144_v22 }
 0x206   : > { %v9128_v6 = vpop.permute.xlu0 %1925 }
 0x207   : > { %15972 = vst [vmem:[#allocation118_spill] sm:$0xff] %v9128_v6  ;;  %v9130_v29 = vpop.permute.xlu1 %1895  ;;  %v9148_v6 = vrot.slane %v8617_v19, %v8363_v14 }
 0x208   : > { %15973 = vst [vmem:[#allocation119_spill] sm:$0xff] %v9130_v29  ;;  %1400 = vrot.lane.b32.xlu0 %v8774_v25, %s8211_s18 }
 0x209   : > { %1402 = vrot.lane.b32.xlu1 %v8804_v58, %s8211_s18  ;;  %15977 = vst [vmem:[#allocation123_spill] sm:$0xff] %v9148_v6 }
 0x20a   : > { %v9136_v38 = vpop.permute.xlu0 %2382 }
 0x20b   : > { %15974 = vst [vmem:[#allocation120_spill] sm:$0xff] %v9136_v38  ;;  %v9138_v1 = vpop.permute.xlu1 %1927 }
 0x20c   : > { %15975 = vst [vmem:[#allocation121_spill] sm:$0xff] %v9138_v1  ;;  %1805 = vrot.lane.b32.xlu0 %v8772_v49, %s8212_s19 }
 0x20d   : > { %1807 = vrot.lane.b32.xlu1 %v8802_v57, %s8212_s19 }
 0x20e   : > { %v893_v29 = vpop.permute.xlu0 %892 }
 0x20f   : > { %v1085_v38 = vsel %vm1084_vm10, %v1021_v55, %v893_v29  ;;  %v1181_v1 = vsel %vm1084_vm10, %v893_v29, %v1021_v55  ;;  %v895_v62 = vpop.permute.xlu1 %894 }
 0x210   : > { %v1221_v20 = vmul.f32 %v9144_v22, %v1181_v1  ;;  %v1222_v10 = vmul.f32 %v9148_v6, %v1085_v38  ;;  %v1086_v18 = vsel %vm1084_vm10, %v1023_v42, %v895_v62  ;;  %v1182_v4 = vsel %vm1084_vm10, %v895_v62, %v1023_v42  ;;  %1837 = vrot.lane.b32.xlu0 %v8774_v25, %s8212_s19  ;;  %v9188_v62 = vpop.f32.mrb[24].mxu0 }
 0x211   : > { %v1223_v14 = vmul.f32 %v9144_v22, %v1182_v4  ;;  %v1224_v19 = vmul.f32 %v9148_v6, %v1086_v18  ;;  %1839 = vrot.lane.b32.xlu1 %v8804_v58, %s8212_s19  ;;  %15984 = vst [vmem:[#allocation130_spill] sm:$0xff] %v9188_v62 }
 0x212   : > { %v9164_v29 = vpop.permute.xlu0 %924 }
 0x213   : > { %15978 = vst [vmem:[#allocation124_spill] sm:$0xff] %v9164_v29  ;;  %v7141_v55 = vpack.c.bf16 %v1223_v14, %v1221_v20  ;;  %v9166_v1 = vpop.permute.xlu1 %926  ;;  %v7139_v38 = vpack.c.bf16 %v1224_v19, %v1222_v10  ;;  %v9192_v14 = vpop.f32.mrb[25].mxu0 }
 0x214   : > { %15979 = vst [vmem:[#allocation125_spill] sm:$0xff] %v9166_v1  ;;  %1032 = vrot.lane.b32.xlu0 %v8826_v15, %s8209_s12  ;;  %15986 = vst [vmem:[#allocation132_spill] sm:$0xff] %v9192_v14 }
 0x215   : > { %7140 = vmatprep.subr.bf16.mxu0 %v7139_v38  ;;  %1034 = vrot.lane.b32.xlu1 %v8848_v8, %s8209_s12 }
 0x216   : > { %v9172_v42 = vpop.permute.xlu0 %1360  ;;  %7142 = vmatpush1.bf16.msra.mxu0 %v7141_v55  ;;  %v9196_v55 = vpop.f32.mrb[26].mxu0 }
 0x217   : > { %15980 = vst [vmem:[#allocation126_spill] sm:$0xff] %v9172_v42  ;;  %v9174_v4 = vpop.permute.xlu1 %1362  ;;  %15988 = vst [vmem:[#allocation134_spill] sm:$0xff] %v9196_v55  ;;  %v9200_v38 = vpop.f32.mrb[27].mxu0  ;;  %v9220_v42 = vmul.f32 %v8638_v7, %v9188_v62  ;;  %v9224_v32 = vmul.f32 %v8638_v7, %v9196_v55 }
 0x218   : > { %15981 = vst [vmem:[#allocation127_spill] sm:$0xff] %v9174_v4  ;;  %1064 = vrot.lane.b32.xlu0 %v8828_v9, %s8209_s12  ;;  %15989 = vst [vmem:[#allocation135_spill] sm:$0xff] %v9200_v38 }
 0x219   : > { %1066 = vrot.lane.b32.xlu1 %v8850_v30, %s8209_s12  ;;  %15995 = vst [vmem:[#allocation141_spill] sm:$0xff] %v9220_v42  ;;  %15996 = vst [vmem:[#allocation142_spill] sm:$0xff] %v9224_v32 }
 0x21a   : > { %v9180_v20 = vpop.permute.xlu0 %1392 }
 0x21b   : > { %15982 = vst [vmem:[#allocation128_spill] sm:$0xff] %v9180_v20  ;;  %v9182_v10 = vpop.permute.xlu1 %1394 }
 0x21c   : > { %15983 = vst [vmem:[#allocation129_spill] sm:$0xff] %v9182_v10  ;;  %1468 = vrot.lane.b32.xlu0 %v8826_v15, %s8211_s18  ;;  %v9204_v10 = vpop.f32.mrb[24].mxu1 }
 0x21d   : > { %1470 = vrot.lane.b32.xlu1 %v8848_v8, %s8211_s18  ;;  %15990 = vst [vmem:[#allocation136_spill] sm:$0xff] %v9204_v10  ;;  %v9208_v4 = vpop.f32.mrb[25].mxu1  ;;  %v9250_v52 = vmul.f32 %v8638_v7, %v9204_v10 }
 0x21e   : > { %v9190_v18 = vpop.permute.xlu0 %1797  ;;  %15992 = vst [vmem:[#allocation138_spill] sm:$0xff] %v9208_v4 }
 0x21f   : > { %15985 = vst [vmem:[#allocation131_spill] sm:$0xff] %v9190_v18  ;;  %v9194_v19 = vpop.permute.xlu1 %1799  ;;  %v9212_v18 = vmul.f32 %v8645_v31, %v9192_v14  ;;  %16002 = vst [vmem:[#allocation148_spill] sm:$0xff] %v9250_v52 }
 0x220   : > { %15987 = vst [vmem:[#allocation133_spill] sm:$0xff] %v9194_v19  ;;  %1500 = vrot.lane.b32.xlu0 %v8828_v9, %s8211_s18  ;;  %v9216_v19 = vmul.f32 %v8645_v31, %v9200_v38 }
 0x221   : > { %1502 = vrot.lane.b32.xlu1 %v8850_v30, %s8211_s18  ;;  %15993 = vst [vmem:[#allocation139_spill] sm:$0xff] %v9212_v18 }
 0x222   : > { %v9206_v20 = vpop.permute.xlu0 %1829  ;;  %15994 = vst [vmem:[#allocation140_spill] sm:$0xff] %v9216_v19 }
 0x223   : > { %15991 = vst [vmem:[#allocation137_spill] sm:$0xff] %v9206_v20  ;;  %v9226_v1 = vpop.permute.xlu1 %1831  ;;  %v9228_v20 = vpop.f32.mrb[26].mxu1 }
 0x224   : > { %15997 = vst [vmem:[#allocation143_spill] sm:$0xff] %v9226_v1  ;;  %15998 = vst [vmem:[#allocation144_spill] sm:$0xff] %v9228_v20  ;;  %1905 = vrot.lane.b32.xlu0 %v8826_v15, %s8212_s19  ;;  %v9232_v17 = vpop.f32.mrb[27].mxu1  ;;  %v9242_v1 = vmul.f32 %v8645_v31, %v9208_v4  ;;  %v9254_v0 = vmul.f32 %v8638_v7, %v9228_v20 }
 0x225   : > { %15999 = vst [vmem:[#allocation145_spill] sm:$0xff] %v9232_v17  ;;  %1907 = vrot.lane.b32.xlu1 %v8848_v8, %s8212_s19  ;;  %v9246_v25 = vmul.f32 %v8645_v31, %v9232_v17 }
 0x226   : > { %v1025_v45 = vpop.permute.xlu0 %1024  ;;  %16000 = vst [vmem:[#allocation146_spill] sm:$0xff] %v9242_v1  ;;  %16003 = vst [vmem:[#allocation149_spill] sm:$0xff] %v9254_v0 }
 0x227   : > { %16001 = vst [vmem:[#allocation147_spill] sm:$0xff] %v9246_v25  ;;  %v1027_v29 = vpop.permute.xlu1 %1026 }
 0x228   : > { %1937 = vrot.lane.b32.xlu0 %v8828_v9, %s8212_s19 }
 0x229   : > { %1939 = vrot.lane.b32.xlu1 %v8850_v30, %s8212_s19 }
 0x22a   : > { %v9264_v32 = vpop.permute.xlu0 %1056 }
 0x22b   : > { %16004 = vst [vmem:[#allocation150_spill] sm:$0xff] %v9264_v32  ;;  %v9266_v18 = vpop.permute.xlu1 %1058 }
 0x22c   : > { %16005 = vst [vmem:[#allocation151_spill] sm:$0xff] %v9266_v18  ;;  %904 = vrot.lane.b32.xlu0 %v8838_v43, %s8209_s12 }
 0x22d   : > { %906 = vrot.lane.b32.xlu1 %v8866_v51, %s8209_s12 }
 0x22e   : > { %v9272_v19 = vpop.permute.xlu0 %1460 }
 0x22f   : > { %16006 = vst [vmem:[#allocation152_spill] sm:$0xff] %v9272_v19  ;;  %v9274_v9 = vpop.permute.xlu1 %1462 }
 0x230   : > { %16007 = vst [vmem:[#allocation153_spill] sm:$0xff] %v9274_v9  ;;  %936 = vrot.lane.b32.xlu0 %v8840_v59, %s8209_s12 }
 0x231   : > { %938 = vrot.lane.b32.xlu1 %v8868_v23, %s8209_s12 }
 0x232   : > { %v9280_v42 = vpop.permute.xlu0 %1492 }
 0x233   : > { %16008 = vst [vmem:[#allocation154_spill] sm:$0xff] %v9280_v42  ;;  %v9282_v58 = vpop.permute.xlu1 %1494 }
 0x234   : > { %16009 = vst [vmem:[#allocation155_spill] sm:$0xff] %v9282_v58  ;;  %1372 = vrot.lane.b32.xlu0 %v8838_v43, %s8211_s18 }
 0x235   : > { %1374 = vrot.lane.b32.xlu1 %v8866_v51, %s8211_s18 }
 0x236   : > { %v9288_v52 = vpop.permute.xlu0 %1897 }
 0x237   : > { %16010 = vst [vmem:[#allocation156_spill] sm:$0xff] %v9288_v52  ;;  %v9290_v0 = vpop.permute.xlu1 %1899 }
 0x238   : > { %16011 = vst [vmem:[#allocation157_spill] sm:$0xff] %v9290_v0  ;;  %1404 = vrot.lane.b32.xlu0 %v8840_v59, %s8211_s18 }
 0x239   : > { %1406 = vrot.lane.b32.xlu1 %v8868_v23, %s8211_s18 }
 0x23a   : > { %v9296_v1 = vpop.permute.xlu0 %1929 }
 0x23b   : > { %16012 = vst [vmem:[#allocation158_spill] sm:$0xff] %v9296_v1  ;;  %v9298_v25 = vpop.permute.xlu1 %1931 }
 0x23c   : > { %16013 = vst [vmem:[#allocation159_spill] sm:$0xff] %v9298_v25  ;;  %1809 = vrot.lane.b32.xlu0 %v8838_v43, %s8212_s19 }
 0x23d   : > { %1811 = vrot.lane.b32.xlu1 %v8866_v51, %s8212_s19 }
 0x23e   : > { %v897_v58 = vpop.permute.xlu0 %896 }
 0x23f   : > { %v1087_v52 = vsel %vm1084_vm10, %v1025_v45, %v897_v58  ;;  %v1183_v0 = vsel %vm1084_vm10, %v897_v58, %v1025_v45  ;;  %v899_v42 = vpop.permute.xlu1 %898 }
 0x240   : > { %v1225_v9 = vmul.f32 %v9144_v22, %v1183_v0  ;;  %v1226_v19 = vmul.f32 %v9148_v6, %v1087_v52  ;;  %v1088_v1 = vsel %vm1084_vm10, %v1027_v29, %v899_v42  ;;  %v1184_v25 = vsel %vm1084_vm10, %v899_v42, %v1027_v29  ;;  %1841 = vrot.lane.b32.xlu0 %v8840_v59, %s8212_s19 }
 0x241   : > { %v1227_v18 = vmul.f32 %v9144_v22, %v1184_v25  ;;  %v1228_v32 = vmul.f32 %v9148_v6, %v1088_v1  ;;  %1843 = vrot.lane.b32.xlu1 %v8868_v23, %s8212_s19 }
 0x242   : > { %v9316_v58 = vpop.permute.xlu0 %928 }
 0x243   : > { %16014 = vst [vmem:[#allocation160_spill] sm:$0xff] %v9316_v58  ;;  %v7145_v45 = vpack.c.bf16 %v1227_v18, %v1225_v9  ;;  %v9318_v0 = vpop.permute.xlu1 %930  ;;  %v7143_v52 = vpack.c.bf16 %v1228_v32, %v1226_v19  ;;  %v9348_v18 = vpop.f32.mrb[28].mxu0 }
 0x244   : > { %16015 = vst [vmem:[#allocation161_spill] sm:$0xff] %v9318_v0  ;;  %1036 = vrot.lane.b32.xlu0 %v8928_v2, %s8209_s12  ;;  %16022 = vst [vmem:[#allocation168_spill] sm:$0xff] %v9348_v18 }
 0x245   : > { %7144 = vmatprep.subr.bf16.mxu0 %v7143_v52  ;;  %1038 = vrot.lane.b32.xlu1 %v8932_v40, %s8209_s12 }
 0x246   : > { %v9324_v29 = vpop.permute.xlu0 %1364  ;;  %7146 = vmatpush1.bf16.msra.mxu0 %v7145_v45  ;;  %v9352_v45 = vpop.f32.mrb[29].mxu0 }
 0x247   : > { %16016 = vst [vmem:[#allocation162_spill] sm:$0xff] %v9324_v29  ;;  %v9326_v25 = vpop.permute.xlu1 %1366  ;;  %16024 = vst [vmem:[#allocation170_spill] sm:$0xff] %v9352_v45  ;;  %v9378_v29 = vmul.f32 %v8638_v7, %v9348_v18 }
 0x248   : > { %16017 = vst [vmem:[#allocation163_spill] sm:$0xff] %v9326_v25  ;;  %1068 = vrot.lane.b32.xlu0 %v8940_v28, %s8209_s12 }
 0x249   : > { %1070 = vrot.lane.b32.xlu1 %v8960_v56, %s8209_s12  ;;  %16032 = vst [vmem:[#allocation178_spill] sm:$0xff] %v9378_v29 }
 0x24a   : > { %v9332_v9 = vpop.permute.xlu0 %1396 }
 0x24b   : > { %16018 = vst [vmem:[#allocation164_spill] sm:$0xff] %v9332_v9  ;;  %v9334_v32 = vpop.permute.xlu1 %1398 }
 0x24c   : > { %16019 = vst [vmem:[#allocation165_spill] sm:$0xff] %v9334_v32  ;;  %1472 = vrot.lane.b32.xlu0 %v8928_v2, %s8211_s18  ;;  %v9356_v32 = vpop.f32.mrb[30].mxu0 }
 0x24d   : > { %1474 = vrot.lane.b32.xlu1 %v8932_v40, %s8211_s18  ;;  %16026 = vst [vmem:[#allocation172_spill] sm:$0xff] %v9356_v32  ;;  %v9382_v0 = vmul.f32 %v8638_v7, %v9356_v32 }
 0x24e   : > { %v9340_v1 = vpop.permute.xlu0 %1801 }
 0x24f   : > { %16020 = vst [vmem:[#allocation166_spill] sm:$0xff] %v9340_v1  ;;  %v9342_v42 = vpop.permute.xlu1 %1803  ;;  %v9364_v1 = vpop.f32.mrb[28].mxu1  ;;  %16033 = vst [vmem:[#allocation179_spill] sm:$0xff] %v9382_v0 }
 0x250   : > { %16021 = vst [vmem:[#allocation167_spill] sm:$0xff] %v9342_v42  ;;  %1504 = vrot.lane.b32.xlu0 %v8940_v28, %s8211_s18  ;;  %v9360_v42 = vpop.f32.mrb[31].mxu0  ;;  %16028 = vst [vmem:[#allocation174_spill] sm:$0xff] %v9364_v1  ;;  %v9366_v25 = vpop.f32.mrb[29].mxu1  ;;  %v9408_v30 = vmul.f32 %v8638_v7, %v9364_v1 }
 0x251   : > { %1506 = vrot.lane.b32.xlu1 %v8960_v56, %s8211_s18  ;;  %16027 = vst [vmem:[#allocation173_spill] sm:$0xff] %v9360_v42  ;;  %16029 = vst [vmem:[#allocation175_spill] sm:$0xff] %v9366_v25  ;;  %v9386_v23 = vpop.f32.mrb[30].mxu1  ;;  %v9400_v48 = vmul.f32 %v8645_v31, %v9366_v25 }
 0x252   : > { %v9350_v19 = vpop.permute.xlu0 %1833  ;;  %16034 = vst [vmem:[#allocation180_spill] sm:$0xff] %v9386_v23  ;;  %v9394_v61 = vpop.f32.mrb[31].mxu1  ;;  %16038 = vst [vmem:[#allocation184_spill] sm:$0xff] %v9408_v30  ;;  %v9412_v59 = vmul.f32 %v8638_v7, %v9386_v23 }
 0x253   : > { %16023 = vst [vmem:[#allocation169_spill] sm:$0xff] %v9350_v19  ;;  %v9354_v52 = vpop.permute.xlu1 %1835  ;;  %v9370_v19 = vmul.f32 %v8645_v31, %v9352_v45  ;;  %16035 = vst [vmem:[#allocation181_spill] sm:$0xff] %v9394_v61 }
 0x254   : > { %16025 = vst [vmem:[#allocation171_spill] sm:$0xff] %v9354_v52  ;;  %1909 = vrot.lane.b32.xlu0 %v8928_v2, %s8212_s19  ;;  %v9374_v52 = vmul.f32 %v8645_v31, %v9360_v42  ;;  %16036 = vst [vmem:[#allocation182_spill] sm:$0xff] %v9400_v48 }
 0x255   : > { %1911 = vrot.lane.b32.xlu1 %v8932_v40, %s8212_s19  ;;  %16030 = vst [vmem:[#allocation176_spill] sm:$0xff] %v9370_v19  ;;  %16039 = vst [vmem:[#allocation185_spill] sm:$0xff] %v9412_v59 }
 0x256   : > { %v1029_v9 = vpop.permute.xlu0 %1028  ;;  %16031 = vst [vmem:[#allocation177_spill] sm:$0xff] %v9374_v52 }
 0x257   : > { %v1031_v58 = vpop.permute.xlu1 %1030 }
 0x258   : > { %1941 = vrot.lane.b32.xlu0 %v8940_v28, %s8212_s19  ;;  %v9404_v28 = vmul.f32 %v8645_v31, %v9394_v61 }
 0x259   : > { %1943 = vrot.lane.b32.xlu1 %v8960_v56, %s8212_s19 }
 0x25a   : > { %v9396_v54 = vpop.permute.xlu0 %1060  ;;  %16037 = vst [vmem:[#allocation183_spill] sm:$0xff] %v9404_v28 }
 0x25b   : > { %v9414_v29 = vpop.permute.xlu1 %1062 }
 0x25c   : > { %16040 = vst [vmem:[#allocation186_spill] sm:$0xff] %v9414_v29  ;;  %908 = vrot.lane.b32.xlu0 %v8930_v44, %s8209_s12 }
 0x25d   : > { %910 = vrot.lane.b32.xlu1 %v8936_v36, %s8209_s12 }
 0x25e   : > { %v9424_v19 = vpop.permute.xlu0 %1464 }
 0x25f   : > { %16041 = vst [vmem:[#allocation187_spill] sm:$0xff] %v9424_v19  ;;  %v9426_v52 = vpop.permute.xlu1 %1466 }
 0x260   : > { %16042 = vst [vmem:[#allocation188_spill] sm:$0xff] %v9426_v52  ;;  %940 = vrot.lane.b32.xlu0 %v8942_v12, %s8209_s12 }
 0x261   : > { %942 = vrot.lane.b32.xlu1 %v8964_v35, %s8209_s12 }
 0x262   : > { %v9432_v7 = vpop.permute.xlu0 %1496 }
 0x263   : > { %16043 = vst [vmem:[#allocation189_spill] sm:$0xff] %v9432_v7  ;;  %v9434_v29 = vpop.permute.xlu1 %1498 }
 0x264   : > { %16044 = vst [vmem:[#allocation190_spill] sm:$0xff] %v9434_v29  ;;  %1376 = vrot.lane.b32.xlu0 %v8930_v44, %s8211_s18 }
 0x265   : > { %1378 = vrot.lane.b32.xlu1 %v8936_v36, %s8211_s18 }
 0x266   : > { %v9440_v31 = vpop.permute.xlu0 %1901 }
 0x267   : > { %16045 = vst [vmem:[#allocation191_spill] sm:$0xff] %v9440_v31  ;;  %v9442_v0 = vpop.permute.xlu1 %1903 }
 0x268   : > { %16046 = vst [vmem:[#allocation192_spill] sm:$0xff] %v9442_v0  ;;  %1408 = vrot.lane.b32.xlu0 %v8942_v12, %s8211_s18 }
 0x269   : > { %1410 = vrot.lane.b32.xlu1 %v8964_v35, %s8211_s18 }
 0x26a   : > { %v9448_v30 = vpop.permute.xlu0 %1933 }
 0x26b   : > { %16047 = vst [vmem:[#allocation193_spill] sm:$0xff] %v9448_v30  ;;  %v9450_v59 = vpop.permute.xlu1 %1935 }
 0x26c   : > { %16048 = vst [vmem:[#allocation194_spill] sm:$0xff] %v9450_v59  ;;  %1813 = vrot.lane.b32.xlu0 %v8930_v44, %s8212_s19 }
 0x26d   : > { %1815 = vrot.lane.b32.xlu1 %v8936_v36, %s8212_s19 }
 0x26e   : > { %v901_v48 = vpop.permute.xlu0 %900 }
 0x26f   : > { %v1089_v28 = vsel %vm1084_vm10, %v1029_v9, %v901_v48  ;;  %v1185_v0 = vsel %vm1084_vm10, %v901_v48, %v1029_v9  ;;  %v903_v31 = vpop.permute.xlu1 %902 }
 0x270   : > { %v1229_v29 = vmul.f32 %v9144_v22, %v1185_v0  ;;  %v1230_v7 = vmul.f32 %v9148_v6, %v1089_v28  ;;  %v1090_v30 = vsel %vm1084_vm10, %v1031_v58, %v903_v31  ;;  %v1186_v59 = vsel %vm1084_vm10, %v903_v31, %v1031_v58  ;;  %1845 = vrot.lane.b32.xlu0 %v8942_v12, %s8212_s19 }
 0x271   : > { %v1231_v52 = vmul.f32 %v9144_v22, %v1186_v59  ;;  %v1232_v19 = vmul.f32 %v9148_v6, %v1090_v30  ;;  %1847 = vrot.lane.b32.xlu1 %v8964_v35, %s8212_s19 }
 0x272   : > { %v9468_v48 = vpop.permute.xlu0 %932 }
 0x273   : > { %v7149_v9 = vpack.c.bf16 %v1231_v52, %v1229_v29  ;;  %v9470_v0 = vpop.permute.xlu1 %934  ;;  %v7147_v28 = vpack.c.bf16 %v1232_v19, %v1230_v7 }
 0x274   : > { %16049 = vst [vmem:[#allocation195_spill] sm:$0xff] %v9470_v0  ;;  %1040 = vrot.lane.b32.xlu0 %v9032_v16, %s8209_s12 }
 0x275   : > { %7148 = vmatprep.subr.bf16.mxu0 %v7147_v28  ;;  %1042 = vrot.lane.b32.xlu1 %v9036_v11, %s8209_s12 }
 0x276   : > { %v9476_v31 = vpop.permute.xlu0 %1368  ;;  %7150 = vmatpush1.bf16.msra.mxu0 %v7149_v9 }
 0x277   : > { %16050 = vst [vmem:[#allocation196_spill] sm:$0xff] %v9476_v31  ;;  %v9478_v30 = vpop.permute.xlu1 %1370 }
 0x278   : > { %16051 = vst [vmem:[#allocation197_spill] sm:$0xff] %v9478_v30  ;;  %1072 = vrot.lane.b32.xlu0 %v9044_v24, %s8209_s12 }
 0x279   : > { %1074 = vrot.lane.b32.xlu1 %v9066_v39, %s8209_s12 }
 0x27a   : > { %v9484_v59 = vpop.permute.xlu0 %1400 }
 0x27b   : > { %16052 = vst [vmem:[#allocation198_spill] sm:$0xff] %v9484_v59  ;;  %v9486_v7 = vpop.permute.xlu1 %1402 }
 0x27c   : > { %16053 = vst [vmem:[#allocation199_spill] sm:$0xff] %v9486_v7  ;;  %1476 = vrot.lane.b32.xlu0 %v9032_v16, %s8211_s18 }
 0x27d   : > { %1478 = vrot.lane.b32.xlu1 %v9036_v11, %s8211_s18 }
 0x27e   : > { %v9492_v58 = vpop.permute.xlu0 %1805 }
 0x27f   : > { %16054 = vst [vmem:[#allocation200_spill] sm:$0xff] %v9492_v58  ;;  %v9494_v29 = vpop.permute.xlu1 %1807 }
 0x280   : > { %16055 = vst [vmem:[#allocation201_spill] sm:$0xff] %v9494_v29  ;;  %1508 = vrot.lane.b32.xlu0 %v9044_v24, %s8211_s18 }
 0x281   : > { %1510 = vrot.lane.b32.xlu1 %v9066_v39, %s8211_s18 }
 0x282   : > { %v9500_v19 = vpop.permute.xlu0 %1837 }
 0x283   : > { %16056 = vst [vmem:[#allocation202_spill] sm:$0xff] %v9500_v19  ;;  %v9502_v52 = vpop.permute.xlu1 %1839 }
 0x284   : > { %16057 = vst [vmem:[#allocation203_spill] sm:$0xff] %v9502_v52  ;;  %1913 = vrot.lane.b32.xlu0 %v9032_v16, %s8212_s19 }
 0x285   : > { %1915 = vrot.lane.b32.xlu1 %v9036_v11, %s8212_s19 }
 0x286   : > { %v1033_v9 = vpop.permute.xlu0 %1032 }
 0x287   : > { %v1035_v28 = vpop.permute.xlu1 %1034 }
 0x288   : > { %1945 = vrot.lane.b32.xlu0 %v9044_v24, %s8212_s19 }
 0x289   : > { %1947 = vrot.lane.b32.xlu1 %v9066_v39, %s8212_s19 }
 0x28a   : > { %v9512_v29 = vpop.permute.xlu0 %1064 }
 0x28b   : > { %16058 = vst [vmem:[#allocation204_spill] sm:$0xff] %v9512_v29  ;;  %v9514_v58 = vpop.permute.xlu1 %1066 }
 0x28c   : > { %16059 = vst [vmem:[#allocation205_spill] sm:$0xff] %v9514_v58  ;;  %912 = vrot.lane.b32.xlu0 %v9034_v50, %s8209_s12 }
 0x28d   : > { %914 = vrot.lane.b32.xlu1 %v9040_v27, %s8209_s12 }
 0x28e   : > { %v9520_v52 = vpop.permute.xlu0 %1468 }
 0x28f   : > { %16060 = vst [vmem:[#allocation206_spill] sm:$0xff] %v9520_v52  ;;  %v9522_v19 = vpop.permute.xlu1 %1470 }
 0x290   : > { %16061 = vst [vmem:[#allocation207_spill] sm:$0xff] %v9522_v19  ;;  %944 = vrot.lane.b32.xlu0 %v9046_v13, %s8209_s12 }
 0x291   : > { %946 = vrot.lane.b32.xlu1 %v9070_v41, %s8209_s12 }
 0x292   : > { %v9528_v7 = vpop.permute.xlu0 %1500 }
 0x293   : > { %16062 = vst [vmem:[#allocation208_spill] sm:$0xff] %v9528_v7  ;;  %v9530_v59 = vpop.permute.xlu1 %1502 }
 0x294   : > { %16063 = vst [vmem:[#allocation209_spill] sm:$0xff] %v9530_v59  ;;  %1380 = vrot.lane.b32.xlu0 %v9034_v50, %s8211_s18 }
 0x295   : > { %1382 = vrot.lane.b32.xlu1 %v9040_v27, %s8211_s18 }
 0x296   : > { %v9536_v30 = vpop.permute.xlu0 %1905 }
 0x297   : > { %16064 = vst [vmem:[#allocation210_spill] sm:$0xff] %v9536_v30  ;;  %v9538_v52 = vpop.permute.xlu1 %1907 }
 0x298   : > { %16065 = vst [vmem:[#allocation211_spill] sm:$0xff] %v9538_v52  ;;  %1412 = vrot.lane.b32.xlu0 %v9046_v13, %s8211_s18 }
 0x299   : > { %1414 = vrot.lane.b32.xlu1 %v9070_v41, %s8211_s18 }
 0x29a   : > { %v9544_v19 = vpop.permute.xlu0 %1937 }
 0x29b   : > { %16066 = vst [vmem:[#allocation212_spill] sm:$0xff] %v9544_v19  ;;  %v9546_v7 = vpop.permute.xlu1 %1939 }
 0x29c   : > { %16067 = vst [vmem:[#allocation213_spill] sm:$0xff] %v9546_v7  ;;  %1817 = vrot.lane.b32.xlu0 %v9034_v50, %s8212_s19 }
 0x29d   : > { %1819 = vrot.lane.b32.xlu1 %v9040_v27, %s8212_s19 }
 0x29e   : > { %v905_v59 = vpop.permute.xlu0 %904 }
 0x29f   : > { %v1091_v30 = vsel %vm1084_vm10, %v1033_v9, %v905_v59  ;;  %v1187_v52 = vsel %vm1084_vm10, %v905_v59, %v1033_v9  ;;  %v907_v31 = vpop.permute.xlu1 %906 }
 0x2a0   : > { %v1233_v58 = vmul.f32 %v9144_v22, %v1187_v52  ;;  %v1234_v29 = vmul.f32 %v9148_v6, %v1091_v30  ;;  %v1092_v19 = vsel %vm1084_vm10, %v1035_v28, %v907_v31  ;;  %v1188_v7 = vsel %vm1084_vm10, %v907_v31, %v1035_v28  ;;  %1849 = vrot.lane.b32.xlu0 %v9046_v13, %s8212_s19 }
 0x2a1   : > { %v1235_v39 = vmul.f32 %v9144_v22, %v1188_v7  ;;  %v1236_v0 = vmul.f32 %v9148_v6, %v1092_v19  ;;  %1851 = vrot.lane.b32.xlu1 %v9070_v41, %s8212_s19 }
 0x2a2   : > { %v9564_v59 = vpop.permute.xlu0 %936 }
 0x2a3   : > { %v7153_v9 = vpack.c.bf16 %v1235_v39, %v1233_v58  ;;  %v9566_v52 = vpop.permute.xlu1 %938  ;;  %v7151_v30 = vpack.c.bf16 %v1236_v0, %v1234_v29 }
 0x2a4   : > { %1044 = vrot.lane.b32.xlu0 %v9188_v62, %s8209_s12 }
 0x2a5   : > { %7152 = vmatprep.subr.bf16.mxu0 %v7151_v30  ;;  %1046 = vrot.lane.b32.xlu1 %v9196_v55, %s8209_s12 }
 0x2a6   : > { %v9572_v31 = vpop.permute.xlu0 %1372  ;;  %7154 = vmatpush1.bf16.msra.mxu0 %v7153_v9 }
 0x2a7   : > { %16068 = vst [vmem:[#allocation214_spill] sm:$0xff] %v9572_v31  ;;  %v9574_v7 = vpop.permute.xlu1 %1374 }
 0x2a8   : > { %16069 = vst [vmem:[#allocation215_spill] sm:$0xff] %v9574_v7  ;;  %1076 = vrot.lane.b32.xlu0 %v9204_v10, %s8209_s12 }
 0x2a9   : > { %1078 = vrot.lane.b32.xlu1 %v9228_v20, %s8209_s12 }
 0x2aa   : > { %v9580_v39 = vpop.permute.xlu0 %1404 }
 0x2ab   : > { %16070 = vst [vmem:[#allocation216_spill] sm:$0xff] %v9580_v39  ;;  %v9582_v0 = vpop.permute.xlu1 %1406 }
 0x2ac   : > { %16071 = vst [vmem:[#allocation217_spill] sm:$0xff] %v9582_v0  ;;  %1480 = vrot.lane.b32.xlu0 %v9188_v62, %s8211_s18 }
 0x2ad   : > { %1482 = vrot.lane.b32.xlu1 %v9196_v55, %s8211_s18 }
 0x2ae   : > { %v9588_v58 = vpop.permute.xlu0 %1809 }
 0x2af   : > { %16072 = vst [vmem:[#allocation218_spill] sm:$0xff] %v9588_v58  ;;  %v9590_v29 = vpop.permute.xlu1 %1811 }
 0x2b0   : > { %16073 = vst [vmem:[#allocation219_spill] sm:$0xff] %v9590_v29  ;;  %1512 = vrot.lane.b32.xlu0 %v9204_v10, %s8211_s18 }
 0x2b1   : > { %1514 = vrot.lane.b32.xlu1 %v9228_v20, %s8211_s18 }
 0x2b2   : > { %v9596_v19 = vpop.permute.xlu0 %1841 }
 0x2b3   : > { %16074 = vst [vmem:[#allocation220_spill] sm:$0xff] %v9596_v19  ;;  %v9598_v28 = vpop.permute.xlu1 %1843 }
 0x2b4   : > { %16075 = vst [vmem:[#allocation221_spill] sm:$0xff] %v9598_v28  ;;  %1917 = vrot.lane.b32.xlu0 %v9188_v62, %s8212_s19 }
 0x2b5   : > { %1919 = vrot.lane.b32.xlu1 %v9196_v55, %s8212_s19 }
 0x2b6   : > { %v1037_v9 = vpop.permute.xlu0 %1036 }
 0x2b7   : > { %v1039_v30 = vpop.permute.xlu1 %1038 }
 0x2b8   : > { %1949 = vrot.lane.b32.xlu0 %v9204_v10, %s8212_s19 }
 0x2b9   : > { %1951 = vrot.lane.b32.xlu1 %v9228_v20, %s8212_s19 }
 0x2ba   : > { %v9608_v29 = vpop.permute.xlu0 %1068 }
 0x2bb   : > { %16076 = vst [vmem:[#allocation222_spill] sm:$0xff] %v9608_v29  ;;  %v9610_v58 = vpop.permute.xlu1 %1070 }
 0x2bc   : > { %16077 = vst [vmem:[#allocation223_spill] sm:$0xff] %v9610_v58  ;;  %916 = vrot.lane.b32.xlu0 %v9192_v14, %s8209_s12 }
 0x2bd   : > { %918 = vrot.lane.b32.xlu1 %v9200_v38, %s8209_s12 }
 0x2be   : > { %v9616_v28 = vpop.permute.xlu0 %1472 }
 0x2bf   : > { %16078 = vst [vmem:[#allocation224_spill] sm:$0xff] %v9616_v28  ;;  %v9618_v19 = vpop.permute.xlu1 %1474 }
 0x2c0   : > { %16079 = vst [vmem:[#allocation225_spill] sm:$0xff] %v9618_v19  ;;  %948 = vrot.lane.b32.xlu0 %v9208_v4, %s8209_s12 }
 0x2c1   : > { %950 = vrot.lane.b32.xlu1 %v9232_v17, %s8209_s12 }
 0x2c2   : > { %v9624_v0 = vpop.permute.xlu0 %1504 }
 0x2c3   : > { %16080 = vst [vmem:[#allocation226_spill] sm:$0xff] %v9624_v0  ;;  %v9626_v39 = vpop.permute.xlu1 %1506 }
 0x2c4   : > { %16081 = vst [vmem:[#allocation227_spill] sm:$0xff] %v9626_v39  ;;  %1384 = vrot.lane.b32.xlu0 %v9192_v14, %s8211_s18 }
 0x2c5   : > { %1386 = vrot.lane.b32.xlu1 %v9200_v38, %s8211_s18 }
 0x2c6   : > { %v9632_v7 = vpop.permute.xlu0 %1909 }
 0x2c7   : > { %16082 = vst [vmem:[#allocation228_spill] sm:$0xff] %v9632_v7  ;;  %v9634_v28 = vpop.permute.xlu1 %1911 }
 0x2c8   : > { %16083 = vst [vmem:[#allocation229_spill] sm:$0xff] %v9634_v28  ;;  %1416 = vrot.lane.b32.xlu0 %v9208_v4, %s8211_s18 }
 0x2c9   : > { %1418 = vrot.lane.b32.xlu1 %v9232_v17, %s8211_s18 }
 0x2ca   : > { %v9640_v19 = vpop.permute.xlu0 %1941 }
 0x2cb   : > { %16084 = vst [vmem:[#allocation230_spill] sm:$0xff] %v9640_v19  ;;  %v9642_v0 = vpop.permute.xlu1 %1943 }
 0x2cc   : > { %16085 = vst [vmem:[#allocation231_spill] sm:$0xff] %v9642_v0  ;;  %1821 = vrot.lane.b32.xlu0 %v9192_v14, %s8212_s19 }
 0x2cd   : > { %1823 = vrot.lane.b32.xlu1 %v9200_v38, %s8212_s19 }
 0x2ce   : > { %v909_v39 = vpop.permute.xlu0 %908 }
 0x2cf   : > { %v1093_v7 = vsel %vm1084_vm10, %v1037_v9, %v909_v39  ;;  %v1189_v28 = vsel %vm1084_vm10, %v909_v39, %v1037_v9  ;;  %v911_v31 = vpop.permute.xlu1 %910 }
 0x2d0   : > { %v1237_v20 = vmul.f32 %v9144_v22, %v1189_v28  ;;  %v1238_v58 = vmul.f32 %v9148_v6, %v1093_v7  ;;  %v1094_v19 = vsel %vm1084_vm10, %v1039_v30, %v911_v31  ;;  %v1190_v0 = vsel %vm1084_vm10, %v911_v31, %v1039_v30  ;;  %1853 = vrot.lane.b32.xlu0 %v9208_v4, %s8212_s19 }
 0x2d1   : > { %v1239_v29 = vmul.f32 %v9144_v22, %v1190_v0  ;;  %v1240_v10 = vmul.f32 %v9148_v6, %v1094_v19  ;;  %1855 = vrot.lane.b32.xlu1 %v9232_v17, %s8212_s19 }
 0x2d2   : > { %v9660_v39 = vpop.permute.xlu0 %940 }
 0x2d3   : > { %v7157_v9 = vpack.c.bf16 %v1239_v29, %v1237_v20  ;;  %v9662_v28 = vpop.permute.xlu1 %942  ;;  %v7155_v7 = vpack.c.bf16 %v1240_v10, %v1238_v58 }
 0x2d4   : > { %1048 = vrot.lane.b32.xlu0 %v9348_v18, %s8209_s12 }
 0x2d5   : > { %7156 = vmatprep.subr.bf16.mxu0 %v7155_v7  ;;  %2388 = vrot.lane.b32.xlu1 %v8667_v37, %s8210_s13 }
 0x2d6   : > { %v9668_v31 = vpop.permute.xlu0 %1376  ;;  %7158 = vmatpush1.bf16.msra.mxu0 %v7157_v9 }
 0x2d7   : > { %16086 = vst [vmem:[#allocation232_spill] sm:$0xff] %v9668_v31  ;;  %v9670_v0 = vpop.permute.xlu1 %1378 }
 0x2d8   : > { %16087 = vst [vmem:[#allocation233_spill] sm:$0xff] %v9670_v0  ;;  %1080 = vrot.lane.b32.xlu0 %v9364_v1, %s8209_s12 }
 0x2d9   : > { %1050 = vrot.lane.b32.xlu1 %v9356_v32, %s8209_s12 }
 0x2da   : > { %v9676_v20 = vpop.permute.xlu0 %1408 }
 0x2db   : > { %16088 = vst [vmem:[#allocation234_spill] sm:$0xff] %v9676_v20  ;;  %v9678_v10 = vpop.permute.xlu1 %1410 }
 0x2dc   : > { %16089 = vst [vmem:[#allocation235_spill] sm:$0xff] %v9678_v10  ;;  %1484 = vrot.lane.b32.xlu0 %v9348_v18, %s8211_s18 }
 0x2dd   : > { %1082 = vrot.lane.b32.xlu1 %v9386_v23, %s8209_s12 }
 0x2de   : > { %v9684_v58 = vpop.permute.xlu0 %1813 }
 0x2df   : > { %16090 = vst [vmem:[#allocation236_spill] sm:$0xff] %v9684_v58  ;;  %v9686_v29 = vpop.permute.xlu1 %1815 }
 0x2e0   : > { %16091 = vst [vmem:[#allocation237_spill] sm:$0xff] %v9686_v29  ;;  %1516 = vrot.lane.b32.xlu0 %v9364_v1, %s8211_s18 }
 0x2e1   : > { %1486 = vrot.lane.b32.xlu1 %v9356_v32, %s8211_s18 }
 0x2e2   : > { %v9692_v19 = vpop.permute.xlu0 %1845 }
 0x2e3   : > { %16092 = vst [vmem:[#allocation238_spill] sm:$0xff] %v9692_v19  ;;  %v9694_v30 = vpop.permute.xlu1 %1847 }
 0x2e4   : > { %16093 = vst [vmem:[#allocation239_spill] sm:$0xff] %v9694_v30  ;;  %1921 = vrot.lane.b32.xlu0 %v9348_v18, %s8212_s19 }
 0x2e5   : > { %1518 = vrot.lane.b32.xlu1 %v9386_v23, %s8211_s18 }
 0x2e6   : > { %v1041_v9 = vpop.permute.xlu0 %1040 }
 0x2e7   : > { %v1043_v7 = vpop.permute.xlu1 %1042 }
 0x2e8   : > { %1953 = vrot.lane.b32.xlu0 %v9364_v1, %s8212_s19 }
 0x2e9   : > { %1923 = vrot.lane.b32.xlu1 %v9356_v32, %s8212_s19 }
 0x2ea   : > { %v9704_v29 = vpop.permute.xlu0 %1072 }
 0x2eb   : > { %v9706_v58 = vpop.permute.xlu1 %1074 }
 0x2ec   : > { %920 = vrot.lane.b32.xlu0 %v9352_v45, %s8209_s12 }
 0x2ed   : > { %1955 = vrot.lane.b32.xlu1 %v9386_v23, %s8212_s19 }
 0x2ee   : > { %v9712_v30 = vpop.permute.xlu0 %1476 }
 0x2ef   : > { %16094 = vst [vmem:[#allocation240_spill] sm:$0xff] %v9712_v30  ;;  %v9714_v19 = vpop.permute.xlu1 %1478 }
 0x2f0   : > { %16095 = vst [vmem:[#allocation241_spill] sm:$0xff] %v9714_v19  ;;  %952 = vrot.lane.b32.xlu0 %v9366_v25, %s8209_s12 }
 0x2f1   : > { %922 = vrot.lane.b32.xlu1 %v9360_v42, %s8209_s12 }
 0x2f2   : > { %v9720_v10 = vpop.permute.xlu0 %1508 }
 0x2f3   : > { %16096 = vst [vmem:[#allocation242_spill] sm:$0xff] %v9720_v10  ;;  %v9722_v20 = vpop.permute.xlu1 %1510 }
 0x2f4   : > { %16097 = vst [vmem:[#allocation243_spill] sm:$0xff] %v9722_v20  ;;  %1388 = vrot.lane.b32.xlu0 %v9352_v45, %s8211_s18 }
 0x2f5   : > { %954 = vrot.lane.b32.xlu1 %v9394_v61, %s8209_s12 }
 0x2f6   : > { %v9728_v0 = vpop.permute.xlu0 %1913 }
 0x2f7   : > { %16098 = vst [vmem:[#allocation244_spill] sm:$0xff] %v9728_v0  ;;  %v9730_v30 = vpop.permute.xlu1 %1915 }
 0x2f8   : > { %16099 = vst [vmem:[#allocation245_spill] sm:$0xff] %v9730_v30  ;;  %1420 = vrot.lane.b32.xlu0 %v9366_v25, %s8211_s18 }
 0x2f9   : > { %1390 = vrot.lane.b32.xlu1 %v9360_v42, %s8211_s18 }
 0x2fa   : > { %v9736_v19 = vpop.permute.xlu0 %1945 }
 0x2fb   : > { %16100 = vst [vmem:[#allocation246_spill] sm:$0xff] %v9736_v19  ;;  %v9738_v10 = vpop.permute.xlu1 %1947 }
 0x2fc   : > { %16101 = vst [vmem:[#allocation247_spill] sm:$0xff] %v9738_v10  ;;  %1825 = vrot.lane.b32.xlu0 %v9352_v45, %s8212_s19 }
 0x2fd   : > { %1422 = vrot.lane.b32.xlu1 %v9394_v61, %s8211_s18 }
 0x2fe   : > { %v913_v20 = vpop.permute.xlu0 %912 }
 0x2ff   : > { %v1095_v0 = vsel %vm1084_vm10, %v1041_v9, %v913_v20  ;;  %v1191_v30 = vsel %vm1084_vm10, %v913_v20, %v1041_v9  ;;  %v915_v31 = vpop.permute.xlu1 %914 }
 0x300   : > { %v1241_v37 = vmul.f32 %v9144_v22, %v1191_v30  ;;  %v1242_v23 = vmul.f32 %v9148_v6, %v1095_v0  ;;  %v1096_v19 = vsel %vm1084_vm10, %v1043_v7, %v915_v31  ;;  %v1192_v10 = vsel %vm1084_vm10, %v915_v31, %v1043_v7  ;;  %1857 = vrot.lane.b32.xlu0 %v9366_v25, %s8212_s19 }
 0x301   : > { %v1243_v1 = vmul.f32 %v9144_v22, %v1192_v10  ;;  %v1244_v17 = vmul.f32 %v9148_v6, %v1096_v19  ;;  %1827 = vrot.lane.b32.xlu1 %v9360_v42, %s8212_s19 }
 0x302   : > { %v9756_v20 = vpop.permute.xlu0 %944 }
 0x303   : > { %v7161_v9 = vpack.c.bf16 %v1243_v1, %v1241_v37  ;;  %v9758_v30 = vpop.permute.xlu1 %946  ;;  %v7159_v0 = vpack.c.bf16 %v1244_v17, %v1242_v23  ;;  %v1286_v23 = vld [vmem:[%s15172_s2 + $0x8] sm:$0xff] }
 0x304   : > { %2386 = vrot.lane.b32.xlu0 %v8652_v33, %s8210_s13  ;;  %1351 = vmatprep.mubr.f32.mxu0 %v1286_v23 }
 0x305   : > { %7160 = vmatprep.subr.bf16.mxu0 %v7159_v0  ;;  %1859 = vrot.lane.b32.xlu1 %v9394_v61, %s8212_s19 }
 0x306   : > { %v9764_v31 = vpop.permute.xlu0 %1380  ;;  %7162 = vmatpush1.bf16.msra.mxu0 %v7161_v9 }
 0x307   : > { %v9766_v10 = vpop.permute.xlu1 %1382 }
 0x308   : > { %2390 = vrot.lane.b32.xlu0 %v8700_v47, %s8210_s13 }
 0x309   : > { %2392 = vrot.lane.b32.xlu1 %v8710_v53, %s8210_s13 }
 0x30a   : > { %v9772_v37 = vpop.permute.xlu0 %1412 }
 0x30b   : > { %16102 = vst [vmem:[#allocation248_spill] sm:$0xff] %v9772_v37  ;;  %v9774_v17 = vpop.permute.xlu1 %1414 }
 0x30c   : > { %16103 = vst [vmem:[#allocation249_spill] sm:$0xff] %v9774_v17  ;;  %2394 = vrot.lane.b32.xlu0 %v8724_v60, %s8210_s13 }
 0x30d   : > { %2396 = vrot.lane.b32.xlu1 %v8734_v63, %s8210_s13 }
 0x30e   : > { %v9783_v1 = vpop.permute.xlu0 %1817 }
 0x30f   : > { %16104 = vst [vmem:[#allocation250_spill] sm:$0xff] %v9783_v1  ;;  %v9785_v19 = vpop.permute.xlu1 %1819 }
 0x310   : > { %16105 = vst [vmem:[#allocation251_spill] sm:$0xff] %v9785_v19  ;;  %2398 = vrot.lane.b32.xlu0 %v8764_v46, %s8210_s13 }
 0x311   : > { %2400 = vrot.lane.b32.xlu1 %v8772_v49, %s8210_s13 }
 0x312   : > { %v9791_v7 = vpop.permute.xlu0 %1849 }
 0x313   : > { %16106 = vst [vmem:[#allocation252_spill] sm:$0xff] %v9791_v7  ;;  %v9793_v9 = vpop.permute.xlu1 %1851 }
 0x314   : > { %16107 = vst [vmem:[#allocation253_spill] sm:$0xff] %v9793_v9  ;;  %2402 = vrot.lane.b32.xlu0 %v8784_v3, %s8210_s13 }
 0x315   : > { %2404 = vrot.lane.b32.xlu1 %v8802_v57, %s8210_s13 }
 0x316   : > { %v1045_v0 = vpop.permute.xlu0 %1044 }
 0x317   : > { %v1047_v23 = vpop.permute.xlu1 %1046 }
 0x318   : > { %2406 = vrot.lane.b32.xlu0 %v8826_v15, %s8210_s13 }
 0x319   : > { %2408 = vrot.lane.b32.xlu1 %v8838_v43, %s8210_s13 }
 0x31a   : > { %v9803_v19 = vpop.permute.xlu0 %1076 }
 0x31b   : > { %v9805_v1 = vpop.permute.xlu1 %1078 }
 0x31c   : > { %2410 = vrot.lane.b32.xlu0 %v8848_v8, %s8210_s13 }
 0x31d   : > { %2412 = vrot.lane.b32.xlu1 %v8866_v51, %s8210_s13 }
 0x31e   : > { %v9811_v9 = vpop.permute.xlu0 %1480 }
 0x31f   : > { %16108 = vst [vmem:[#allocation254_spill] sm:$0xff] %v9811_v9  ;;  %v9813_v7 = vpop.permute.xlu1 %1482 }
 0x320   : > { %16109 = vst [vmem:[#allocation255_spill] sm:$0xff] %v9813_v7  ;;  %2414 = vrot.lane.b32.xlu0 %v8928_v2, %s8210_s13  ;;  %v16150_v2 = vld [vmem:[#allocation150_spill] sm:$0xff] }
 0x321   : > { %2416 = vrot.lane.b32.xlu1 %v8930_v44, %s8210_s13 }
 0x322   : > { %v9819_v17 = vpop.permute.xlu0 %1512 }
 0x323   : > { %16110 = vst [vmem:[#allocation256_spill] sm:$0xff] %v9819_v17  ;;  %v9821_v37 = vpop.permute.xlu1 %1514 }
 0x324   : > { %16111 = vst [vmem:[#allocation257_spill] sm:$0xff] %v9821_v37  ;;  %2418 = vrot.lane.b32.xlu0 %v8932_v40, %s8210_s13 }
 0x325   : > { %2420 = vrot.lane.b32.xlu1 %v8936_v36, %s8210_s13 }
 0x326   : > { %v9827_v51 = vpop.permute.xlu0 %1917 }
 0x327   : > { %16112 = vst [vmem:[#allocation258_spill] sm:$0xff] %v9827_v51  ;;  %v9829_v8 = vpop.permute.xlu1 %1919 }
 0x328   : > { %16113 = vst [vmem:[#allocation259_spill] sm:$0xff] %v9829_v8  ;;  %2422 = vrot.lane.b32.xlu0 %v9032_v16, %s8210_s13 }
 0x329   : > { %2424 = vrot.lane.b32.xlu1 %v9034_v50, %s8210_s13 }
 0x32a   : > { %v9835_v44 = vpop.permute.xlu0 %1949 }
 0x32b   : > { %16114 = vst [vmem:[#allocation260_spill] sm:$0xff] %v9835_v44  ;;  %v9837_v17 = vpop.permute.xlu1 %1951 }
 0x32c   : > { %16115 = vst [vmem:[#allocation261_spill] sm:$0xff] %v9837_v17  ;;  %2426 = vrot.lane.b32.xlu0 %v9036_v11, %s8210_s13 }
 0x32d   : > { %2428 = vrot.lane.b32.xlu1 %v9040_v27, %s8210_s13 }
 0x32e   : > { %v917_v36 = vpop.permute.xlu0 %916 }
 0x32f   : > { %v1097_v51 = vsel %vm1084_vm10, %v1045_v0, %v917_v36  ;;  %v1193_v8 = vsel %vm1084_vm10, %v917_v36, %v1045_v0  ;;  %v919_v40 = vpop.permute.xlu1 %918 }
 0x330   : > { %v1245_v16 = vmul.f32 %v9144_v22, %v1193_v8  ;;  %v1246_v50 = vmul.f32 %v9148_v6, %v1097_v51  ;;  %v1098_v44 = vsel %vm1084_vm10, %v1047_v23, %v919_v40  ;;  %v1194_v17 = vsel %vm1084_vm10, %v919_v40, %v1047_v23  ;;  %2430 = vrot.lane.b32.xlu0 %v9188_v62, %s8210_s13  ;;  %v16145_v62 = vld [vmem:[#allocation107_spill] sm:$0xff] }
 0x331   : > { %v1247_v11 = vmul.f32 %v9144_v22, %v1194_v17  ;;  %v1248_v27 = vmul.f32 %v9148_v6, %v1098_v44  ;;  %2432 = vrot.lane.b32.xlu1 %v9192_v14, %s8210_s13  ;;  %v16144_v14 = vld [vmem:[#allocation124_spill] sm:$0xff] }
 0x332   : > { %v9855_v36 = vpop.permute.xlu0 %948 }
 0x333   : > { %v7165_v0 = vpack.c.bf16 %v1247_v11, %v1245_v16  ;;  %v9857_v8 = vpop.permute.xlu1 %950  ;;  %v7163_v51 = vpack.c.bf16 %v1248_v27, %v1246_v50 }
 0x334   : > { %2434 = vrot.lane.b32.xlu0 %v9196_v55, %s8210_s13  ;;  %v16141_v55 = vld [vmem:[#allocation72_spill] sm:$0xff] }
 0x335   : > { %7164 = vmatprep.subr.bf16.mxu0 %v7163_v51  ;;  %2436 = vrot.lane.b32.xlu1 %v9200_v38, %s8210_s13 }
 0x336   : > { %v9863_v40 = vpop.permute.xlu0 %1384  ;;  %7166 = vmatpush1.bf16.msra.mxu0 %v7165_v0 }
 0x337   : > { %v9865_v44 = vpop.permute.xlu1 %1386 }
 0x338   : > { %16116 = vst [vmem:[#allocation262_spill] sm:$0xff] %v9865_v44  ;;  %2438 = vrot.lane.b32.xlu0 %v9348_v18, %s8210_s13  ;;  %v16137_v18 = vld [vmem:[#allocation68_spill] sm:$0xff] }
 0x339   : > { %2440 = vrot.lane.b32.xlu1 %v9352_v45, %s8210_s13 }
 0x33a   : > { %v9871_v16 = vpop.permute.xlu0 %1416 }
 0x33b   : > { %16117 = vst [vmem:[#allocation263_spill] sm:$0xff] %v9871_v16  ;;  %v9873_v27 = vpop.permute.xlu1 %1418 }
 0x33c   : > { %16118 = vst [vmem:[#allocation264_spill] sm:$0xff] %v9873_v27  ;;  %2442 = vrot.lane.b32.xlu0 %v9356_v32, %s8210_s13  ;;  %v16133_v32 = vld [vmem:[#allocation59_spill] sm:$0xff] }
 0x33d   : > { %2444 = vrot.lane.b32.xlu1 %v9360_v42, %s8210_s13 }
 0x33e   : > { %v9879_v50 = vpop.permute.xlu0 %1821 }
 0x33f   : > { %16119 = vst [vmem:[#allocation265_spill] sm:$0xff] %v9879_v50  ;;  %v9881_v11 = vpop.permute.xlu1 %1823  ;;  %v16125_v50 = vld [vmem:[#allocation45_spill] sm:$0xff] }
 0x340   : > { %16120 = vst [vmem:[#allocation266_spill] sm:$0xff] %v9881_v11  ;;  %2446 = vrot.lane.b32.xlu0 %v8621_v21, %s8210_s13  ;;  %v16124_v11 = vld [vmem:[#allocation44_spill] sm:$0xff] }
 0x341   : > { %2448 = vrot.lane.b32.xlu1 %v8633_v26, %s8210_s13 }
 0x342   : > { %v9887_v17 = vpop.permute.xlu0 %1853 }
 0x343   : > { %16121 = vst [vmem:[#allocation267_spill] sm:$0xff] %v9887_v17  ;;  %v9889_v23 = vpop.permute.xlu1 %1855 }
 0x344   : > { %16122 = vst [vmem:[#allocation268_spill] sm:$0xff] %v9889_v23  ;;  %2450 = vrot.lane.b32.xlu0 %v8654_v34, %s8210_s13  ;;  %v16126_v23 = vld [vmem:[#allocation48_spill] sm:$0xff]  ;;  %v16127_v34 = vld [vmem:[#allocation50_spill] sm:$0xff] }
 0x345   : > { %2452 = vrot.lane.b32.xlu1 %v8663_v5, %s8210_s13 }
 0x346   : > { %v1049_v0 = vpop.permute.xlu0 %1048 }
 0x347   : > { %v9895_v51 = vpop.permute.xlu1 %2388 }
 0x348   : > { %16123 = vst [vmem:[#allocation269_spill] sm:$0xff] %v9895_v51  ;;  %2454 = vrot.lane.b32.xlu0 %v16124_v11, %s8210_s13  ;;  %v16129_v51 = vld [vmem:[#allocation56_spill] sm:$0xff]  ;;  %v16130_v11 = vld [vmem:[#allocation57_spill] sm:$0xff] }
 0x349   : > { %2456 = vrot.lane.b32.xlu1 %v16125_v50, %s8210_s13 }
 0x34a   : > { %v9901_v26 = vpop.permute.xlu0 %1080 }
 0x34b   : > { %v1051_v17 = vpop.permute.xlu1 %1050 }
 0x34c   : > { %2458 = vrot.lane.b32.xlu0 %v16126_v23, %s8210_s13  ;;  %v16134_v23 = vld [vmem:[#allocation63_spill] sm:$0xff] }
 0x34d   : > { %2460 = vrot.lane.b32.xlu1 %v16127_v34, %s8210_s13 }
 0x34e   : > { %v9907_v21 = vpop.permute.xlu0 %1484 }
 0x34f   : > { %16128 = vst [vmem:[#allocation270_spill] sm:$0xff] %v9907_v21  ;;  %v9909_v5 = vpop.permute.xlu1 %1082 }
 0x350   : > { %2462 = vrot.lane.b32.xlu0 %v16129_v51, %s8210_s13  ;;  %v16138_v51 = vld [vmem:[#allocation69_spill] sm:$0xff] }
 0x351   : > { %2464 = vrot.lane.b32.xlu1 %v16130_v11, %s8210_s13 }
 0x352   : > { %v9915_v50 = vpop.permute.xlu0 %1516 }
 0x353   : > { %16131 = vst [vmem:[#allocation271_spill] sm:$0xff] %v9915_v50  ;;  %v9917_v42 = vpop.permute.xlu1 %1486  ;;  %v16146_v50 = vld [vmem:[#allocation125_spill] sm:$0xff] }
 0x354   : > { %16132 = vst [vmem:[#allocation272_spill] sm:$0xff] %v9917_v42  ;;  %2466 = vrot.lane.b32.xlu0 %v16133_v32, %s8210_s13  ;;  %v16142_v32 = vld [vmem:[#allocation77_spill] sm:$0xff] }
 0x355   : > { %2468 = vrot.lane.b32.xlu1 %v16134_v23, %s8210_s13 }
 0x356   : > { %v9923_v34 = vpop.permute.xlu0 %1921 }
 0x357   : > { %16135 = vst [vmem:[#allocation273_spill] sm:$0xff] %v9923_v34  ;;  %v9925_v45 = vpop.permute.xlu1 %1518 }
 0x358   : > { %16136 = vst [vmem:[#allocation274_spill] sm:$0xff] %v9925_v45  ;;  %2470 = vrot.lane.b32.xlu0 %v16137_v18, %s8210_s13  ;;  %v1101_v18 = vsel %vm1084_vm10, %v16145_v62, %v16144_v14  ;;  %v16147_v45 = vld [vmem:[#allocation113_spill] sm:$0xff] }
 0x359   : > { %2472 = vrot.lane.b32.xlu1 %v16138_v51, %s8210_s13  ;;  %v1102_v51 = vsel %vm1084_vm10, %v16147_v45, %v16146_v50  ;;  %v1254_v37 = vmul.f32 %v9148_v6, %v1101_v18  ;;  %v1198_v27 = vsel %vm1084_vm10, %v16146_v50, %v16147_v45 }
 0x35a   : > { %v9931_v11 = vpop.permute.xlu0 %1953 }
 0x35b   : > { %16139 = vst [vmem:[#allocation275_spill] sm:$0xff] %v9931_v11  ;;  %v9933_v38 = vpop.permute.xlu1 %1923  ;;  %v16148_v11 = vld [vmem:[#allocation86_spill] sm:$0xff] }
 0x35c   : > { %16140 = vst [vmem:[#allocation276_spill] sm:$0xff] %v9933_v38  ;;  %2474 = vrot.lane.b32.xlu0 %v16141_v55, %s8210_s13 }
 0x35d   : > { %2476 = vrot.lane.b32.xlu1 %v16142_v32, %s8210_s13 }
 0x35e   : > { %v921_v23 = vpop.permute.xlu0 %920 }
 0x35f   : > { %v9939_v34 = vpop.permute.xlu1 %1955  ;;  %v1099_v55 = vsel %vm1084_vm10, %v1049_v0, %v921_v23  ;;  %v1195_v32 = vsel %vm1084_vm10, %v921_v23, %v1049_v0  ;;  %v16151_v23 = vld [vmem:[#allocation161_spill] sm:$0xff]  ;;  %v16152_v0 = vld [vmem:[#allocation151_spill] sm:$0xff] }
 0x360   : > { %16143 = vst [vmem:[#allocation277_spill] sm:$0xff] %v9939_v34  ;;  %2478 = vrot.lane.b32.xlu0 %v16148_v11, %s8210_s13  ;;  %v1197_v34 = vsel %vm1084_vm10, %v16144_v14, %v16145_v62  ;;  %v1256_v11 = vmul.f32 %v9148_v6, %v1102_v51  ;;  %v1104_v42 = vsel %vm1084_vm10, %v16152_v0, %v16151_v23 }
 0x361   : > { %2480 = vrot.lane.b32.xlu1 %v8942_v12, %s8210_s13  ;;  %v16149_v12 = vld [vmem:[#allocation160_spill] sm:$0xff]  ;;  %v1249_v14 = vmul.f32 %v9144_v22, %v1195_v32  ;;  %v1250_v18 = vmul.f32 %v9148_v6, %v1099_v55  ;;  %v1253_v44 = vmul.f32 %v9144_v22, %v1197_v34 }
 0x362   : > { %v9953_v38 = vpop.permute.xlu0 %952  ;;  %v1103_v21 = vsel %vm1084_vm10, %v16150_v2, %v16149_v12  ;;  %v1199_v55 = vsel %vm1084_vm10, %v16149_v12, %v16150_v2  ;;  %v7171_v34 = vpack.c.bf16 %v1256_v11, %v1254_v37  ;;  %v1105_v2 = vsel %vm1084_vm10, %v9396_v54, %v9468_v48  ;;  %v16153_v12 = vld [vmem:[#allocation195_spill] sm:$0xff] }
 0x363   : > { %v923_v16 = vpop.permute.xlu1 %922  ;;  %v1258_v32 = vmul.f32 %v9148_v6, %v1103_v21  ;;  %v16154_v21 = vld [vmem:[#allocation186_spill] sm:$0xff]  ;;  %v1201_v37 = vsel %vm1084_vm10, %v9468_v48, %v9396_v54 }
 0x364   : > { %v1100_v7 = vsel %vm1084_vm10, %v1051_v17, %v923_v16  ;;  %v1196_v62 = vsel %vm1084_vm10, %v923_v16, %v1051_v17  ;;  %2482 = vrot.lane.b32.xlu0 %v8960_v56, %s8210_s13  ;;  %v1255_v16 = vmul.f32 %v9144_v22, %v1198_v27  ;;  %v1106_v27 = vsel %vm1084_vm10, %v16154_v21, %v16153_v12 }
 0x365   : > { %v1251_v45 = vmul.f32 %v9144_v22, %v1196_v62  ;;  %v1252_v50 = vmul.f32 %v9148_v6, %v1100_v7  ;;  %2484 = vrot.lane.b32.xlu1 %v8964_v35, %s8210_s13  ;;  %v1200_v7 = vsel %vm1084_vm10, %v16151_v23, %v16152_v0  ;;  %v1260_v62 = vmul.f32 %v9148_v6, %v1104_v42 }
 0x366   : > { %v9979_v51 = vpop.permute.xlu0 %1388  ;;  %v1257_v42 = vmul.f32 %v9144_v22, %v1199_v55  ;;  %v1259_v23 = vmul.f32 %v9144_v22, %v1200_v7  ;;  %v1202_v11 = vsel %vm1084_vm10, %v16153_v12, %v16154_v21  ;;  %v16156_v55 = vld [vmem:[#allocation204_spill] sm:$0xff] }
 0x367   : > { %v7169_v17 = vpack.c.bf16 %v1251_v45, %v1249_v14  ;;  %v9983_v9 = vpop.permute.xlu1 %954  ;;  %v7167_v56 = vpack.c.bf16 %v1252_v50, %v1250_v18  ;;  %v16155_v18 = vld [vmem:[#allocation106_spill] sm:$0xff]  ;;  %v7175_v45 = vpack.c.bf16 %v1260_v62, %v1258_v32  ;;  %v1262_v50 = vmul.f32 %v9148_v6, %v1105_v2 }
 0x368   : > { %2486 = vrot.lane.b32.xlu0 %v9044_v24, %s8210_s13  ;;  %v7177_v7 = vpack.c.bf16 %v1259_v23, %v1257_v42  ;;  %v1261_v32 = vmul.f32 %v9144_v22, %v1201_v37  ;;  %v1263_v62 = vmul.f32 %v9144_v22, %v1202_v11  ;;  %v1203_v2 = vsel %vm1084_vm10, %v9564_v59, %v16156_v55  ;;  %v16158_v42 = vld [vmem:[#allocation136_spill] sm:$0xff]  ;;  %v16159_v23 = vld [vmem:[#allocation222_spill] sm:$0xff] }
 0x369   : > { %2488 = vrot.lane.b32.xlu1 %v9046_v13, %s8210_s13  ;;  %7168 = vmatprep.subr.bf16.mxu0 %v7167_v56  ;;  %v7173_v56 = vpack.c.bf16 %v1255_v16, %v1253_v44  ;;  %v1107_v44 = vsel %vm1084_vm10, %v16156_v55, %v9564_v59  ;;  %v16157_v16 = vld [vmem:[#allocation205_spill] sm:$0xff]  ;;  %v16160_v59 = vld [vmem:[#allocation223_spill] sm:$0xff] }
 0x36a   : > { %v10003_v14 = vpop.permute.xlu0 %1420  ;;  %7170 = vmatpush1.bf16.msra.mxu0 %v7169_v17  ;;  %v1264_v17 = vmul.f32 %v9148_v6, %v1106_v27  ;;  %v1108_v54 = vsel %vm1084_vm10, %v16157_v16, %v9566_v52  ;;  %v1266_v12 = vmul.f32 %v9148_v6, %v1107_v44  ;;  %v1204_v21 = vsel %vm1084_vm10, %v9566_v52, %v16157_v16 }
 0x36b   : > { %7172 = vmatprep.subr.bf16.mxu0 %v7171_v34  ;;  %v10007_v0 = vpop.permute.xlu1 %1390  ;;  %v1268_v27 = vmul.f32 %v9148_v6, %v1108_v54  ;;  %v1110_v11 = vsel %vm1084_vm10, %v16160_v59, %v9662_v28  ;;  %v1265_v52 = vmul.f32 %v9144_v22, %v1203_v2  ;;  %v1267_v55 = vmul.f32 %v9144_v22, %v1204_v21 }
 0x36c   : > { %2490 = vrot.lane.b32.xlu0 %v16155_v18, %s8210_s13  ;;  %v7179_v37 = vpack.c.bf16 %v1264_v17, %v1262_v50  ;;  %v7181_v16 = vpack.c.bf16 %v1263_v62, %v1261_v32  ;;  %v1205_v54 = vsel %vm1084_vm10, %v9660_v39, %v16159_v23  ;;  %v16161_v17 = vld [vmem:[#allocation144_spill] sm:$0xff]  ;;  %v1272_v2 = vmul.f32 %v9148_v6, %v1110_v11  ;;  %v16162_v62 = vld [vmem:[#allocation145_spill] sm:$0xff] }
 0x36d   : > { %2492 = vrot.lane.b32.xlu1 %v9070_v41, %s8210_s13  ;;  %v1111_v32 = vsel %vm1084_vm10, %v9704_v29, %v9756_v20  ;;  %v1207_v11 = vsel %vm1084_vm10, %v9756_v20, %v9704_v29 }
 0x36e   : > { %v10027_v48 = vpop.permute.xlu0 %1825  ;;  %7174 = vmatpush1.bf16.msra.mxu0 %v7173_v56  ;;  %v1109_v56 = vsel %vm1084_vm10, %v16159_v23, %v9660_v39  ;;  %v1112_v39 = vsel %vm1084_vm10, %v9706_v58, %v9758_v30 }
 0x36f   : > { %7176 = vmatprep.subr.bf16.mxu0 %v7175_v45  ;;  %v10031_v34 = vpop.permute.xlu1 %1422  ;;  %v1270_v50 = vmul.f32 %v9148_v6, %v1109_v56  ;;  %v1274_v56 = vmul.f32 %v9148_v6, %v1111_v32 }
 0x370   : > { %2494 = vrot.lane.b32.xlu0 %v16158_v42, %s8210_s13 }
 0x371   : > { %2496 = vrot.lane.b32.xlu1 %v9208_v4, %s8210_s13  ;;  %v7183_v4 = vpack.c.bf16 %v1268_v27, %v1266_v12  ;;  %v7185_v12 = vpack.c.bf16 %v1267_v55, %v1265_v52  ;;  %v7187_v52 = vpack.c.bf16 %v1272_v2, %v1270_v50  ;;  %v1113_v55 = vsel %vm1084_vm10, %v9803_v19, %v9855_v36  ;;  %v16167_v50 = vld [vmem:[#allocation180_spill] sm:$0xff] }
 0x372   : > { %v10051_v45 = vpop.permute.xlu0 %1857  ;;  %7178 = vmatpush1.bf16.msra.mxu0 %v7177_v7  ;;  %v1206_v7 = vsel %vm1084_vm10, %v9662_v28, %v16160_v59  ;;  %v1269_v28 = vmul.f32 %v9144_v22, %v1205_v54  ;;  %v16164_v59 = vld [vmem:[#allocation174_spill] sm:$0xff]  ;;  %v1209_v2 = vsel %vm1084_vm10, %v9855_v36, %v9803_v19  ;;  %v1278_v32 = vmul.f32 %v9148_v6, %v1113_v55  ;;  %v16169_v36 = vld [vmem:[#allocation8_spill] sm:$0xff] }
 0x373   : > { %7180 = vmatprep.subr.bf16.mxu0 %v7179_v37  ;;  %v10055_v44 = vpop.permute.xlu1 %1827  ;;  %v1271_v23 = vmul.f32 %v9144_v22, %v1206_v7  ;;  %v1276_v37 = vmul.f32 %v9148_v6, %v1112_v39  ;;  %v1210_v39 = vsel %vm1084_vm10, %v9857_v8, %v9805_v1  ;;  %v10125_v19 = vld [vmem:[%s15176_s6 + $0x8] sm:$0x7f] }
 0x374   : > { %2498 = vrot.lane.b32.xlu0 %v16161_v17, %s8210_s13  ;;  %v16173_v55 = vld [vmem:[#allocation126_spill] sm:$0xff] }
 0x375   : > { %2500 = vrot.lane.b32.xlu1 %v16162_v62, %s8210_s13  ;;  %v7189_v20 = vpack.c.bf16 %v1271_v23, %v1269_v28  ;;  %v7191_v7 = vpack.c.bf16 %v1276_v37, %v1274_v56  ;;  %v1116_v28 = vsel %vm1084_vm10, %v9909_v5, %v9983_v9  ;;  %v1277_v37 = vmul.f32 %v9144_v22, %v1209_v2 }
 0x376   : > { %v10075_v21 = vpop.permute.xlu0 %2386  ;;  %7182 = vmatpush1.bf16.msra.mxu0 %v7181_v16  ;;  %v1114_v16 = vsel %vm1084_vm10, %v9805_v1, %v9857_v8  ;;  %v10129_v1 = vrot.slane %v10125_v19, %v16169_v36 }
 0x377   : > { %16163 = vst [vmem:[#allocation124_spill] sm:$0xff] %v10075_v21  ;;  %7184 = vmatprep.subr.bf16.mxu0 %v7183_v4  ;;  %v10077_v27 = vpop.permute.xlu1 %1859  ;;  %v1208_v4 = vsel %vm1084_vm10, %v9758_v30, %v9706_v58  ;;  %v1273_v58 = vmul.f32 %v9144_v22, %v1207_v11  ;;  %v1279_v11 = vmul.f32 %v9144_v22, %v1210_v39  ;;  %v16176_v39 = vld [vmem:[#allocation127_spill] sm:$0xff] }
 0x378   : > { %2502 = vrot.lane.b32.xlu0 %v16164_v59, %s8210_s13  ;;  %v1275_v30 = vmul.f32 %v9144_v22, %v1208_v4  ;;  %16170 = vst [vmem:[#allocation160_spill] sm:$0xff] %v10129_v1  ;;  %v1115_v4 = vsel %vm1084_vm10, %v9901_v26, %v9953_v38 }
 0x379   : > { %2504 = vrot.lane.b32.xlu1 %v9366_v25, %s8210_s13 }
 0x37a   : > { %v10099_v54 = vpop.permute.xlu0 %2390  ;;  %7186 = vmatpush1.bf16.msra.mxu0 %v7185_v12  ;;  %v1280_v12 = vmul.f32 %v9148_v6, %v1114_v16  ;;  %v7193_v56 = vpack.c.bf16 %v1275_v30, %v1273_v58  ;;  %v16174_v16 = vld [vmem:[#allocation112_spill] sm:$0xff]  ;;  %v1212_v58 = vsel %vm1084_vm10, %v9983_v9, %v9909_v5  ;;  %v1284_v30 = vmul.f32 %v9148_v6, %v1116_v28 }
 0x37b   : > { %16165 = vst [vmem:[#allocation107_spill] sm:$0xff] %v10099_v54  ;;  %7188 = vmatprep.subr.bf16.mxu0 %v7187_v52  ;;  %v10101_v29 = vpop.permute.xlu1 %2392  ;;  %v16172_v52 = vld [vmem:[#allocation26_spill] sm:$0xff]  ;;  %v1617_v9 = vsel %vm1520_vm11, %v16173_v55, %v16174_v16  ;;  %v1283_v21 = vmul.f32 %v9144_v22, %v1212_v58 }
 0x37c   : > { %16166 = vst [vmem:[#allocation125_spill] sm:$0xff] %v10101_v29  ;;  %2506 = vrot.lane.b32.xlu0 %v16167_v50, %s8210_s13  ;;  %v7195_v2 = vpack.c.bf16 %v1280_v12, %v1278_v32  ;;  %v10157_v29 = vld [vmem:[%s15176_s6] sm:$0x7f]  ;;  %v1211_v32 = vsel %vm1084_vm10, %v9953_v38, %v9901_v26  ;;  %v1282_v12 = vmul.f32 %v9148_v6, %v1115_v4  ;;  %v16181_v26 = vld [vmem:[#allocation162_spill] sm:$0xff]  ;;  %v16182_v38 = vld [vmem:[#allocation152_spill] sm:$0xff] }
 0x37d   : > { %2508 = vrot.lane.b32.xlu1 %v9394_v61, %s8210_s13  ;;  %v10161_v5 = vrot.slane %v10157_v29, %v16169_v36  ;;  %v1523_v4 = vsel %vm1520_vm11, %v16182_v38, %v16181_v26  ;;  %v16185_v6 = vld [vmem:[#allocation37_spill] sm:$0xff] }
 0x37e   : > { %v10120_v23 = vpop.permute.xlu0 %2394  ;;  %7190 = vmatpush1.bf16.msra.mxu0 %v7189_v20  ;;  %v1521_v20 = vsel %vm1520_vm11, %v16174_v16, %v16173_v55  ;;  %v16183_v16 = vld [vmem:[#allocation163_spill] sm:$0xff] }
 0x37f   : > { %16168 = vst [vmem:[#allocation113_spill] sm:$0xff] %v10120_v23  ;;  %7192 = vmatprep.subr.bf16.mxu0 %v7191_v7  ;;  %v10131_v8 = vpop.permute.xlu1 %2396  ;;  %v16175_v7 = vld [vmem:[#allocation28_spill] sm:$0xff]  ;;  %v16177_v23 = vld [vmem:[#allocation115_spill] sm:$0xff]  ;;  %16179 = vst [vmem:[#allocation151_spill] sm:$0xff] %v10161_v5  ;;  %v1657_v58 = vmul.f32 %v10161_v5, %v1617_v9 }
 0x380   : > { %16171 = vst [vmem:[#allocation150_spill] sm:$0xff] %v10131_v8  ;;  %2819 = vrot.lane.b32.xlu0 %v16172_v52, %s8213_s25  ;;  %v1522_v8 = vsel %vm1520_vm11, %v16177_v23, %v16176_v39  ;;  %v1618_v36 = vsel %vm1520_vm11, %v16176_v39, %v16177_v23  ;;  %v7199_v23 = vpack.c.bf16 %v1284_v30, %v1282_v12  ;;  %v16188_v9 = vld [vmem:[#allocation196_spill] sm:$0xff]  ;;  %v16189_v12 = vld [vmem:[#allocation187_spill] sm:$0xff] }
 0x381   : > { %2821 = vrot.lane.b32.xlu1 %v16175_v7, %s8213_s25  ;;  %v1660_v55 = vmul.f32 %v10129_v1, %v1522_v8  ;;  %v1659_v8 = vmul.f32 %v10161_v5, %v1618_v36  ;;  %v1619_v39 = vsel %vm1520_vm11, %v16181_v26, %v16182_v38  ;;  %v1525_v36 = vsel %vm1520_vm11, %v16189_v12, %v16188_v9  ;;  %v16190_v38 = vld [vmem:[#allocation197_spill] sm:$0xff] }
 0x382   : > { %v10152_v54 = vpop.permute.xlu0 %2398  ;;  %7194 = vmatpush1.bf16.msra.mxu0 %v7193_v56  ;;  %v1658_v56 = vmul.f32 %v10129_v1, %v1521_v20 }
 0x383   : > { %16178 = vst [vmem:[#allocation161_spill] sm:$0xff] %v10152_v54  ;;  %7196 = vmatprep.subr.bf16.mxu0 %v7195_v2  ;;  %v10170_v28 = vpop.permute.xlu1 %2400  ;;  %v7197_v54 = vpack.c.bf16 %v1279_v11, %v1277_v37  ;;  %v16184_v2 = vld [vmem:[#allocation153_spill] sm:$0xff]  ;;  %v1281_v37 = vmul.f32 %v9144_v22, %v1211_v32 }
 0x384   : > { %16180 = vst [vmem:[#allocation195_spill] sm:$0xff] %v10170_v28  ;;  %2823 = vrot.lane.b32.xlu0 %v8652_v33, %s8213_s25  ;;  %v1524_v20 = vsel %vm1520_vm11, %v16184_v2, %v16183_v16  ;;  %v1662_v33 = vmul.f32 %v10129_v1, %v1523_v4  ;;  %v1620_v30 = vsel %vm1520_vm11, %v16183_v16, %v16184_v2  ;;  %v16191_v4 = vld [vmem:[#allocation188_spill] sm:$0xff] }
 0x385   : > { %2825 = vrot.lane.b32.xlu1 %v16185_v6, %s8213_s25  ;;  %v1664_v32 = vmul.f32 %v10129_v1, %v1524_v20  ;;  %v7203_v26 = vpack.c.bf16 %v1660_v55, %v1658_v56  ;;  %v7205_v16 = vpack.c.bf16 %v1659_v8, %v1657_v58  ;;  %v1661_v2 = vmul.f32 %v10161_v5, %v1619_v39  ;;  %v7065_v56 = vld [vmem:[%s15172_s2 + $0x18] sm:$0xff] }
 0x386   : > { %v10189_v11 = vpop.permute.xlu0 %2402  ;;  %7198 = vmatpush1.bf16.msra.mxu0 %v7197_v54  ;;  %v7201_v54 = vpack.c.bf16 %v1283_v21, %v1281_v37  ;;  %v1285_v21 = vld [vmem:[%s15172_s2] sm:$0xff]  ;;  %v1663_v20 = vmul.f32 %v10161_v5, %v1620_v30  ;;  %v1621_v55 = vsel %vm1520_vm11, %v16188_v9, %v16189_v12  ;;  %v1622_v58 = vsel %vm1520_vm11, %v16190_v38, %v16191_v4  ;;  %v16194_v30 = vld [vmem:[#allocation214_spill] sm:$0xff] }
 0x387   : > { %16186 = vst [vmem:[#allocation186_spill] sm:$0xff] %v10189_v11  ;;  %7200 = vmatprep.subr.bf16.mxu0 %v7199_v23  ;;  %v10196_v28 = vpop.permute.xlu1 %2404  ;;  %v1526_v23 = vsel %vm1520_vm11, %v16191_v4, %v16190_v38  ;;  %v7207_v8 = vpack.c.bf16 %v1664_v32, %v1662_v33  ;;  %v16197_v11 = vld [vmem:[#allocation207_spill] sm:$0xff]  ;;  %v1665_v33 = vmul.f32 %v10161_v5, %v1621_v55 }
 0x388   : > { %16187 = vst [vmem:[#allocation106_spill] sm:$0xff] %v10196_v28  ;;  %2827 = vrot.lane.b32.xlu0 %v8700_v47, %s8213_s25  ;;  %v1668_v39 = vmul.f32 %v10129_v1, %v1526_v23  ;;  %v1667_v32 = vmul.f32 %v10161_v5, %v1622_v58  ;;  %v16202_v58 = vld [vmem:[#allocation233_spill] sm:$0xff] }
 0x389   : > { %2829 = vrot.lane.b32.xlu1 %v8710_v53, %s8213_s25 }
 0x38a   : > { %v10213_v22 = vpop.permute.xlu0 %2406  ;;  %7202 = vmatpush1.bf16.msra.mxu0 %v7201_v54  ;;  %v1666_v54 = vmul.f32 %v10129_v1, %v1525_v36  ;;  %v7209_v36 = vpack.c.bf16 %v1663_v20, %v1661_v2  ;;  %v16200_v2 = vld [vmem:[#allocation232_spill] sm:$0xff] }
 0x38b   : > { %16192 = vst [vmem:[#allocation204_spill] sm:$0xff] %v10213_v22  ;;  %7204 = vmatprep.subr.bf16.mxu0 %v7203_v26  ;;  %v10220_v37 = vpop.permute.xlu1 %2408  ;;  %v16195_v26 = vld [vmem:[#allocation206_spill] sm:$0xff]  ;;  %v16201_v20 = vld [vmem:[#allocation224_spill] sm:$0xff] }
 0x38c   : > { %16193 = vst [vmem:[#allocation205_spill] sm:$0xff] %v10220_v37  ;;  %2831 = vrot.lane.b32.xlu0 %v8724_v60, %s8213_s25  ;;  %v1527_v22 = vsel %vm1520_vm11, %v16195_v26, %v16194_v30  ;;  %v16196_v37 = vld [vmem:[#allocation215_spill] sm:$0xff]  ;;  %v1623_v4 = vsel %vm1520_vm11, %v16194_v30, %v16195_v26  ;;  %v7211_v55 = vpack.c.bf16 %v1668_v39, %v1666_v54 }
 0x38d   : > { %v1528_v9 = vsel %vm1520_vm11, %v16197_v11, %v16196_v37  ;;  %2833 = vrot.lane.b32.xlu1 %v8734_v63, %s8213_s25  ;;  %1352 = vmatmul.mubr.f32.vlgmr.msra.gmra.mrb[32].mxu0 %v1285_v21  ;;  %v1670_v23 = vmul.f32 %v10129_v1, %v1527_v22  ;;  %v1624_v21 = vsel %vm1520_vm11, %v16196_v37, %v16197_v11 }
 0x38e   : > { %v10243_v12 = vpop.permute.xlu0 %2410  ;;  %7206 = vmatpush1.bf16.msra.mxu0 %v7205_v16  ;;  %1788 = vmatprep.mubr.f32.mxu0 %v7065_v56  ;;  %v1672_v16 = vmul.f32 %v10129_v1, %v1528_v9  ;;  %v1529_v56 = vsel %vm1520_vm11, %v16201_v20, %v16200_v2  ;;  %v1669_v11 = vmul.f32 %v10161_v5, %v1623_v4 }
 0x38f   : > { %16198 = vst [vmem:[#allocation222_spill] sm:$0xff] %v10243_v12  ;;  %7208 = vmatprep.subr.bf16.mxu0 %v7207_v8  ;;  %v10247_v38 = vpop.permute.xlu1 %2412  ;;  %v16203_v8 = vld [vmem:[#allocation225_spill] sm:$0xff]  ;;  %v1671_v37 = vmul.f32 %v10161_v5, %v1624_v21  ;;  %v7213_v9 = vpack.c.bf16 %v1667_v32, %v1665_v33  ;;  %v1625_v12 = vsel %vm1520_vm11, %v16200_v2, %v16201_v20  ;;  %v16206_v21 = vld [vmem:[#allocation240_spill] sm:$0xff] }
 0x390   : > { %16199 = vst [vmem:[#allocation223_spill] sm:$0xff] %v10247_v38  ;;  %2835 = vrot.lane.b32.xlu0 %v8764_v46, %s8213_s25  ;;  %v1530_v22 = vsel %vm1520_vm11, %v16203_v8, %v16202_v58  ;;  %v1674_v54 = vmul.f32 %v10129_v1, %v1529_v56  ;;  %v7215_v39 = vpack.c.bf16 %v1672_v16, %v1670_v23  ;;  %v16207_v32 = vld [vmem:[#allocation241_spill] sm:$0xff] }
 0x391   : > { %2837 = vrot.lane.b32.xlu1 %v8772_v49, %s8213_s25  ;;  %v1676_v4 = vmul.f32 %v10129_v1, %v1530_v22  ;;  %v1531_v33 = vsel %vm1520_vm11, %v16206_v21, %v9764_v31  ;;  %v1532_v2 = vsel %vm1520_vm11, %v16207_v32, %v9766_v10  ;;  %v7217_v23 = vpack.c.bf16 %v1671_v37, %v1669_v11  ;;  %v16210_v37 = vld [vmem:[#allocation254_spill] sm:$0xff] }
 0x392   : > { %v10267_v30 = vpop.permute.xlu0 %2414  ;;  %7210 = vmatpush1.bf16.msra.mxu0 %v7209_v36  ;;  %v1626_v36 = vsel %vm1520_vm11, %v16202_v58, %v16203_v8  ;;  %v1673_v56 = vmul.f32 %v10161_v5, %v1625_v12  ;;  %v1678_v58 = vmul.f32 %v10129_v1, %v1531_v33  ;;  %v1680_v8 = vmul.f32 %v10129_v1, %v1532_v2 }
 0x393   : > { %16204 = vst [vmem:[#allocation8_spill] sm:$0xff] %v10267_v30  ;;  %7212 = vmatprep.subr.bf16.mxu0 %v7211_v55  ;;  %v10271_v26 = vpop.permute.xlu1 %2416  ;;  %v1675_v55 = vmul.f32 %v10161_v5, %v1626_v36  ;;  %v1627_v22 = vsel %vm1520_vm11, %v9764_v31, %v16206_v21  ;;  %v1628_v11 = vsel %vm1520_vm11, %v9766_v10, %v16207_v32  ;;  %v16212_v36 = vld [vmem:[#allocation255_spill] sm:$0xff] }
 0x394   : > { %16205 = vst [vmem:[#allocation26_spill] sm:$0xff] %v10271_v26  ;;  %2839 = vrot.lane.b32.xlu0 %v8784_v3, %s8213_s25  ;;  %v7219_v12 = vpack.c.bf16 %v1676_v4, %v1674_v54  ;;  %v1677_v10 = vmul.f32 %v10161_v5, %v1627_v22  ;;  %v1679_v32 = vmul.f32 %v10161_v5, %v1628_v11  ;;  %v16215_v54 = vld [vmem:[#allocation71_spill] sm:$0xff]  ;;  %v16217_v22 = vld [vmem:[#allocation272_spill] sm:$0xff]  ;;  %v10376_v26 = vld [vmem:[%s8314_s21] sm:$0xff] }
 0x395   : > { %2841 = vrot.lane.b32.xlu1 %v8802_v57, %s8213_s25  ;;  %v7221_v21 = vpack.c.bf16 %v1675_v55, %v1673_v56  ;;  %v7223_v4 = vpack.c.bf16 %v1680_v8, %v1678_v58  ;;  %v16216_v55 = vld [vmem:[#allocation76_spill] sm:$0xff]  ;;  %v1536_v11 = vsel %vm1520_vm11, %v16217_v22, %v10007_v0 }
 0x396   : > { %v10291_v20 = vpop.permute.xlu0 %2418  ;;  %7214 = vmatpush1.bf16.msra.mxu0 %v7213_v9  ;;  %v1533_v9 = vsel %vm1520_vm11, %v16210_v37, %v9863_v40  ;;  %v7225_v8 = vpack.c.bf16 %v1679_v32, %v1677_v10  ;;  %v16224_v10 = vld [vmem:[#allocation5_spill] sm:$0xff] }
 0x397   : > { %16208 = vst [vmem:[#allocation126_spill] sm:$0xff] %v10291_v20  ;;  %7216 = vmatprep.subr.bf16.mxu0 %v7215_v39  ;;  %v10293_v16 = vpop.permute.xlu1 %2420  ;;  %v16211_v39 = vld [vmem:[#allocation262_spill] sm:$0xff]  ;;  %v1629_v20 = vsel %vm1520_vm11, %v9863_v40, %v16210_v37 }
 0x398   : > { %16209 = vst [vmem:[#allocation112_spill] sm:$0xff] %v10293_v16  ;;  %2843 = vrot.lane.b32.xlu0 %v8826_v15, %s8213_s25  ;;  %v1534_v33 = vsel %vm1520_vm11, %v16212_v36, %v16211_v39  ;;  %v1682_v16 = vmul.f32 %v10129_v1, %v1533_v9  ;;  %v16220_v9 = vld [vmem:[#allocation270_spill] sm:$0xff] }
 0x399   : > { %2845 = vrot.lane.b32.xlu1 %v8838_v43, %s8213_s25  ;;  %v1684_v56 = vmul.f32 %v10129_v1, %v1534_v33  ;;  %v16222_v33 = vld [vmem:[#allocation128_spill] sm:$0xff] }
 0x39a   : > { %v10315_v2 = vpop.permute.xlu0 %2422  ;;  %7218 = vmatpush1.bf16.msra.mxu0 %v7217_v23  ;;  %v1630_v23 = vsel %vm1520_vm11, %v16211_v39, %v16212_v36  ;;  %v1535_v39 = vsel %vm1520_vm11, %v16220_v9, %v9979_v51  ;;  %v16221_v36 = vld [vmem:[#allocation82_spill] sm:$0xff] }
 0x39b   : > { %16213 = vst [vmem:[#allocation28_spill] sm:$0xff] %v10315_v2  ;;  %7220 = vmatprep.subr.bf16.mxu0 %v7219_v12  ;;  %v10317_v31 = vpop.permute.xlu1 %2424  ;;  %v1681_v12 = vmul.f32 %v10161_v5, %v1629_v20  ;;  %v1683_v37 = vmul.f32 %v10161_v5, %v1630_v23  ;;  %v16223_v2 = vld [vmem:[#allocation114_spill] sm:$0xff]  ;;  %v1688_v20 = vmul.f32 %v10129_v1, %v1536_v11  ;;  %v16226_v23 = vld [vmem:[#allocation117_spill] sm:$0xff] }
 0x39c   : > { %16214 = vst [vmem:[#allocation127_spill] sm:$0xff] %v10317_v31  ;;  %2847 = vrot.lane.b32.xlu0 %v16215_v54, %s8213_s25  ;;  %v7227_v32 = vpack.c.bf16 %v1684_v56, %v1682_v16  ;;  %v1633_v30 = vsel %vm1520_vm11, %v16222_v33, %v16223_v2 }
 0x39d   : > { %2849 = vrot.lane.b32.xlu1 %v16216_v55, %s8213_s25 }
 0x39e   : > { %v10336_v58 = vpop.permute.xlu0 %2426  ;;  %7222 = vmatpush1.bf16.msra.mxu0 %v7221_v21  ;;  %v1632_v21 = vsel %vm1520_vm11, %v10007_v0, %v16217_v22  ;;  %v1631_v0 = vsel %vm1520_vm11, %v9979_v51, %v16220_v9  ;;  %v1686_v22 = vmul.f32 %v10129_v1, %v1535_v39  ;;  %v16230_v9 = vld [vmem:[#allocation154_spill] sm:$0xff] }
 0x39f   : > { %16218 = vst [vmem:[#allocation115_spill] sm:$0xff] %v10336_v58  ;;  %7224 = vmatprep.subr.bf16.mxu0 %v7223_v4  ;;  %v10338_v40 = vpop.permute.xlu1 %2428  ;;  %v1537_v58 = vsel %vm1520_vm11, %v16223_v2, %v16222_v33  ;;  %v16225_v4 = vld [vmem:[#allocation129_spill] sm:$0xff]  ;;  %v16229_v2 = vld [vmem:[#allocation164_spill] sm:$0xff] }
 0x3a0   : > { %16219 = vst [vmem:[#allocation162_spill] sm:$0xff] %v10338_v40  ;;  %2851 = vrot.lane.b32.xlu0 %v16221_v36, %s8213_s25  ;;  %v1538_v40 = vsel %vm1520_vm11, %v16226_v23, %v16225_v4  ;;  %v1690_v16 = vmul.f32 %v10129_v1, %v1537_v58  ;;  %v1634_v56 = vsel %vm1520_vm11, %v16225_v4, %v16226_v23  ;;  %v16231_v33 = vld [vmem:[#allocation165_spill] sm:$0xff]  ;;  %v16232_v58 = vld [vmem:[#allocation155_spill] sm:$0xff] }
 0x3a1   : > { %3704 = vrot.lane.b32.xlu1 %v16224_v10, %s8211_s18  ;;  %v1692_v51 = vmul.f32 %v10129_v1, %v1538_v40  ;;  %v1539_v39 = vsel %vm1520_vm11, %v16230_v9, %v16229_v2  ;;  %v1689_v4 = vmul.f32 %v10161_v5, %v1633_v30  ;;  %v1691_v40 = vmul.f32 %v10161_v5, %v1634_v56  ;;  %v16235_v56 = vld [vmem:[#allocation198_spill] sm:$0xff] }
 0x3a2   : > { %v10359_v31 = vpop.permute.xlu0 %2430  ;;  %7226 = vmatpush1.bf16.msra.mxu0 %v7225_v8  ;;  %v7229_v8 = vpack.c.bf16 %v1683_v37, %v1681_v12  ;;  %v7231_v12 = vpack.c.bf16 %v1688_v20, %v1686_v22  ;;  %v1685_v37 = vmul.f32 %v10161_v5, %v1631_v0  ;;  %v1635_v23 = vsel %vm1520_vm11, %v16229_v2, %v16230_v9  ;;  %v16237_v9 = vld [vmem:[#allocation199_spill] sm:$0xff] }
 0x3a3   : > { %16227 = vst [vmem:[#allocation152_spill] sm:$0xff] %v10359_v31  ;;  %7228 = vmatprep.subr.bf16.mxu0 %v7227_v32  ;;  %v10368_v11 = vpop.permute.xlu1 %2432  ;;  %v1687_v31 = vmul.f32 %v10161_v5, %v1632_v21  ;;  %v1540_v32 = vsel %vm1520_vm11, %v16232_v58, %v16231_v33  ;;  %v1694_v38 = vmul.f32 %v10129_v1, %v1539_v39  ;;  %v16238_v39 = vld [vmem:[#allocation190_spill] sm:$0xff] }
 0x3a4   : > { %16228 = vst [vmem:[#allocation163_spill] sm:$0xff] %v10368_v11  ;;  %3707 = vrot.lane.b32.xlu0 %v10376_v26, %s8211_s18  ;;  %v1636_v20 = vsel %vm1520_vm11, %v16231_v33, %v16232_v58  ;;  %v1696_v0 = vmul.f32 %v10129_v1, %v1540_v32  ;;  %v7235_v30 = vpack.c.bf16 %v1692_v51, %v1690_v16  ;;  %s17040_s18 = smov 80  }
 0x3a5   : > { %3693 = vrot.lane.b32.xlu1 %v16224_v10, %s8209_s12  ;;  %v7233_v22 = vpack.c.bf16 %v1687_v31, %v1685_v37  ;;  %v1693_v31 = vmul.f32 %v10161_v5, %v1635_v23  ;;  %v1695_v33 = vmul.f32 %v10161_v5, %v1636_v20  ;;  %v7237_v32 = vpack.c.bf16 %v1691_v40, %v1689_v4  ;;  %v16243_v40 = vld [vmem:[#allocation217_spill] sm:$0xff] }
 0x3a6   : > { %v10390_v21 = vpop.permute.xlu0 %2434  ;;  %7230 = vmatpush1.bf16.msra.mxu0 %v7229_v8  ;;  %v16236_v8 = vld [vmem:[#allocation189_spill] sm:$0xff]  ;;  %v1638_v51 = vsel %vm1520_vm11, %v16237_v9, %v16238_v39  ;;  %v7239_v37 = vpack.c.bf16 %v1696_v0, %v1694_v38 }
 0x3a7   : > { %16233 = vst [vmem:[#allocation153_spill] sm:$0xff] %v10390_v21  ;;  %7232 = vmatprep.subr.bf16.mxu0 %v7231_v12  ;;  %v10397_v11 = vpop.permute.xlu1 %2436  ;;  %v1541_v2 = vsel %vm1520_vm11, %v16236_v8, %v16235_v56  ;;  %v1542_v12 = vsel %vm1520_vm11, %v16238_v39, %v16237_v9  ;;  %v1637_v16 = vsel %vm1520_vm11, %v16235_v56, %v16236_v8 }
 0x3a8   : > { %16234 = vst [vmem:[#allocation37_spill] sm:$0xff] %v10397_v11  ;;  %3696 = vrot.lane.b32.xlu0 %v10376_v26, %s8209_s12  ;;  %v1698_v23 = vmul.f32 %v10129_v1, %v1541_v2  ;;  %v1700_v20 = vmul.f32 %v10129_v1, %v1542_v12  ;;  %v7241_v9 = vpack.c.bf16 %v1695_v33, %v1693_v31  ;;  %v16247_v31 = vld [vmem:[#allocation234_spill] sm:$0xff] }
 0x3a9   : > { %3715 = vrot.lane.b32.xlu1 %v16224_v10, %s8212_s19  ;;  %v1697_v38 = vmul.f32 %v10161_v5, %v1637_v16  ;;  %v1699_v0 = vmul.f32 %v10161_v5, %v1638_v51  ;;  %v16248_v33 = vld [vmem:[#allocation226_spill] sm:$0xff] }
 0x3aa   : > { %v10414_v21 = vpop.permute.xlu0 %2438  ;;  %7234 = vmatpush1.bf16.msra.mxu0 %v7233_v22  ;;  %v16241_v22 = vld [vmem:[#allocation216_spill] sm:$0xff]  ;;  %v1545_v16 = vsel %vm1520_vm11, %v16248_v33, %v16247_v31  ;;  %v7243_v51 = vpack.c.bf16 %v1700_v20, %v1698_v23 }
 0x3ab   : > { %16239 = vst [vmem:[#allocation196_spill] sm:$0xff] %v10414_v21  ;;  %7236 = vmatprep.subr.bf16.mxu0 %v7235_v30  ;;  %v10418_v58 = vpop.permute.xlu1 %2440  ;;  %v16242_v30 = vld [vmem:[#allocation208_spill] sm:$0xff]  ;;  %v16244_v21 = vld [vmem:[#allocation209_spill] sm:$0xff]  ;;  %v1706_v23 = vmul.f32 %v10129_v1, %v1545_v16 }
 0x3ac   : > { %16240 = vst [vmem:[#allocation187_spill] sm:$0xff] %v10418_v58  ;;  %3718 = vrot.lane.b32.xlu0 %v10376_v26, %s8212_s19  ;;  %v1543_v4 = vsel %vm1520_vm11, %v16242_v30, %v16241_v22  ;;  %v1544_v56 = vsel %vm1520_vm11, %v16244_v21, %v16243_v40  ;;  %v1639_v39 = vsel %vm1520_vm11, %v16241_v22, %v16242_v30  ;;  %v16250_v22 = vld [vmem:[#allocation227_spill] sm:$0xff]  ;;  %s7128_s19 = sshll.u32 %s8282_s9, 8 }
 0x3ad   : > { %3742 = vrot.lane.b32.xlu1 %v10376_v26, %s8213_s25  ;;  %v1702_v12 = vmul.f32 %v10129_v1, %v1543_v4  ;;  %v1640_v58 = vsel %vm1520_vm11, %v16243_v40, %v16244_v21  ;;  %v1701_v21 = vmul.f32 %v10161_v5, %v1639_v39  ;;  %v16253_v39 = vld [vmem:[#allocation248_spill] sm:$0xff] }
 0x3ae   : > { %v10438_v8 = vpop.permute.xlu0 %2442  ;;  %7238 = vmatpush1.bf16.msra.mxu0 %v7237_v32  ;;  %v1704_v32 = vmul.f32 %v10129_v1, %v1544_v56  ;;  %v1703_v40 = vmul.f32 %v10161_v5, %v1640_v58 }
 0x3af   : > { %16245 = vst [vmem:[#allocation197_spill] sm:$0xff] %v10438_v8  ;;  %7240 = vmatprep.subr.bf16.mxu0 %v7239_v37  ;;  %v10442_v2 = vpop.permute.xlu1 %2444  ;;  %v16249_v37 = vld [vmem:[#allocation235_spill] sm:$0xff]  ;;  %v7245_v8 = vpack.c.bf16 %v1699_v0, %v1697_v38  ;;  %v16255_v0 = vld [vmem:[#allocation249_spill] sm:$0xff] }
 0x3b0   : > { %16246 = vst [vmem:[#allocation188_spill] sm:$0xff] %v10442_v2  ;;  %3744 = vrot.lane.b32.xlu0 %v16224_v10, %s8213_s25  ;;  %v1546_v30 = vsel %vm1520_vm11, %v16250_v22, %v16249_v37  ;;  %v1641_v2 = vsel %vm1520_vm11, %v16247_v31, %v16248_v33  ;;  %v7247_v20 = vpack.c.bf16 %v1704_v32, %v1702_v12 }
 0x3b1   : > { %3731 = vrot.lane.b32.xlu1 %v10376_v26, %s8210_s13  ;;  %v1708_v58 = vmul.f32 %v10129_v1, %v1546_v30  ;;  %v7249_v12 = vpack.c.bf16 %v1703_v40, %v1701_v21  ;;  %v1705_v16 = vmul.f32 %v10161_v5, %v1641_v2  ;;  %v16259_v21 = vld [vmem:[#allocation83_spill] sm:$0xff] }
 0x3b2   : > { %v10462_v4 = vpop.permute.xlu0 %2446  ;;  %7242 = vmatpush1.bf16.msra.mxu0 %v7241_v9  ;;  %v1642_v9 = vsel %vm1520_vm11, %v16249_v37, %v16250_v22  ;;  %v16260_v40 = vld [vmem:[#allocation263_spill] sm:$0xff] }
 0x3b3   : > { %16251 = vst [vmem:[#allocation214_spill] sm:$0xff] %v10462_v4  ;;  %7244 = vmatprep.subr.bf16.mxu0 %v7243_v51  ;;  %v10466_v56 = vpop.permute.xlu1 %2448  ;;  %v16254_v51 = vld [vmem:[#allocation242_spill] sm:$0xff]  ;;  %v16256_v4 = vld [vmem:[#allocation243_spill] sm:$0xff]  ;;  %v1707_v37 = vmul.f32 %v10161_v5, %v1642_v9  ;;  %v7251_v2 = vpack.c.bf16 %v1708_v58, %v1706_v23  ;;  %v16266_v23 = vld [vmem:[#allocation84_spill] sm:$0xff] }
 0x3b4   : > { %16252 = vst [vmem:[#allocation206_spill] sm:$0xff] %v10466_v56  ;;  %3733 = vrot.lane.b32.xlu0 %v16224_v10, %s8210_s13  ;;  %v1547_v38 = vsel %vm1520_vm11, %v16254_v51, %v16253_v39  ;;  %v1548_v31 = vsel %vm1520_vm11, %v16256_v4, %v16255_v0  ;;  %s15128_s13 = scalar_lea.hbm %s15178_s8, %s7128_s19 }
 0x3b5   : > { %3753 = vrot.lane.b32.xlu1 %v10376_v26, %s8214_s26  ;;  %v1710_v22 = vmul.f32 %v10129_v1, %v1547_v38  ;;  %v1712_v30 = vmul.f32 %v10129_v1, %v1548_v31  ;;  %v1643_v26 = vsel %vm1520_vm11, %v16253_v39, %v16254_v51  ;;  %v16262_v38 = vld [vmem:[#allocation264_spill] sm:$0xff]  ;;  %v16263_v31 = vld [vmem:[#allocation257_spill] sm:$0xff]  ;;  %v7253_v51 = vpack.c.bf16 %v1707_v37, %v1705_v16 }
 0x3b6   : > { %v10486_v33 = vpop.permute.xlu0 %2450  ;;  %7246 = vmatpush1.bf16.msra.mxu0 %v7245_v8  ;;  %v1644_v8 = vsel %vm1520_vm11, %v16255_v0, %v16256_v4  ;;  %v1709_v4 = vmul.f32 %v10161_v5, %v1643_v26  ;;  %v16267_v37 = vld [vmem:[#allocation85_spill] sm:$0xff]  ;;  %v16268_v26 = vld [vmem:[#allocation274_spill] sm:$0xff] }
 0x3b7   : > { %16257 = vst [vmem:[#allocation215_spill] sm:$0xff] %v10486_v33  ;;  %7248 = vmatprep.subr.bf16.mxu0 %v7247_v20  ;;  %v10488_v32 = vpop.permute.xlu1 %2452  ;;  %v16261_v20 = vld [vmem:[#allocation256_spill] sm:$0xff]  ;;  %v1711_v0 = vmul.f32 %v10161_v5, %v1644_v8  ;;  %v7255_v58 = vpack.c.bf16 %v1712_v30, %v1710_v22  ;;  %v1552_v22 = vsel %vm1520_vm11, %v16268_v26, %v10031_v34  ;;  %v16270_v8 = vld [vmem:[#allocation11_spill] sm:$0xff] }
 0x3b8   : > { %16258 = vst [vmem:[#allocation207_spill] sm:$0xff] %v10488_v32  ;;  %3755 = vrot.lane.b32.xlu0 %v16224_v10, %s8214_s26  ;;  %v1549_v9 = vsel %vm1520_vm11, %v16261_v20, %v16260_v40  ;;  %v1550_v10 = vsel %vm1520_vm11, %v16263_v31, %v16262_v38  ;;  %v1645_v32 = vsel %vm1520_vm11, %v16260_v40, %v16261_v20 }
 0x3b9   : > { %2853 = vrot.lane.b32.xlu1 %v16259_v21, %s8213_s25  ;;  %v1714_v56 = vmul.f32 %v10129_v1, %v1549_v9  ;;  %v1716_v16 = vmul.f32 %v10129_v1, %v1550_v10  ;;  %v7257_v20 = vpack.c.bf16 %v1711_v0, %v1709_v4  ;;  %v1713_v9 = vmul.f32 %v10161_v5, %v1645_v32  ;;  %v16276_v32 = vld [vmem:[#allocation98_spill] sm:$0xff] }
 0x3ba   : > { %v10510_v33 = vpop.permute.xlu0 %2454  ;;  %7250 = vmatpush1.bf16.msra.mxu0 %v7249_v12  ;;  %v1646_v12 = vsel %vm1520_vm11, %v16262_v38, %v16263_v31  ;;  %v16272_v31 = vld [vmem:[#allocation271_spill] sm:$0xff]  ;;  %v1720_v4 = vmul.f32 %v10129_v1, %v1552_v22 }
 0x3bb   : > { %16264 = vst [vmem:[#allocation232_spill] sm:$0xff] %v10510_v33  ;;  %7252 = vmatprep.subr.bf16.mxu0 %v7251_v2  ;;  %v10512_v39 = vpop.permute.xlu1 %2456  ;;  %v10535_v2 = vrot.slane %v10125_v19, %v16270_v8  ;;  %v1715_v38 = vmul.f32 %v10161_v5, %v1646_v12  ;;  %v1551_v10 = vsel %vm1520_vm11, %v16272_v31, %v10003_v14  ;;  %v16273_v33 = vld [vmem:[#allocation97_spill] sm:$0xff] }
 0x3bc   : > { %16265 = vst [vmem:[#allocation224_spill] sm:$0xff] %v10512_v39  ;;  %2855 = vrot.lane.b32.xlu0 %v16266_v23, %s8213_s25  ;;  %v16275_v39 = vld [vmem:[#allocation116_spill] sm:$0xff]  ;;  %v7259_v0 = vpack.c.bf16 %v1716_v16, %v1714_v56  ;;  %v16277_v12 = vld [vmem:[#allocation133_spill] sm:$0xff]  ;;  %v1718_v56 = vmul.f32 %v10129_v1, %v1551_v10 }
 0x3bd   : > { %2857 = vrot.lane.b32.xlu1 %v16267_v37, %s8213_s25  ;;  %v16286_v1 = vld [vmem:[#allocation157_spill] sm:$0xff] }
 0x3be   : > { %v10531_v30 = vpop.permute.xlu0 %2458  ;;  %7254 = vmatpush1.bf16.msra.mxu0 %v7253_v51  ;;  %v16274_v51 = vld [vmem:[#allocation131_spill] sm:$0xff] }
 0x3bf   : > { %16269 = vst [vmem:[#allocation233_spill] sm:$0xff] %v10531_v30  ;;  %7256 = vmatprep.subr.bf16.mxu0 %v7255_v58  ;;  %v10537_v40 = vpop.permute.xlu1 %2460  ;;  %v1958_v30 = vsel %vm1957_vm12, %v16275_v39, %v16274_v51  ;;  %v1648_v58 = vsel %vm1520_vm11, %v10031_v34, %v16268_v26  ;;  %v2054_v34 = vsel %vm1957_vm12, %v16274_v51, %v16275_v39  ;;  %v16282_v39 = vld [vmem:[#allocation99_spill] sm:$0xff] }
 0x3c0   : > { %16271 = vst [vmem:[#allocation225_spill] sm:$0xff] %v10537_v40  ;;  %2859 = vrot.lane.b32.xlu0 %v16273_v33, %s8213_s25  ;;  %v16278_v40 = vld [vmem:[#allocation119_spill] sm:$0xff]  ;;  %v10562_v33 = vrot.slane %v10157_v29, %v16270_v8  ;;  %v1647_v26 = vsel %vm1520_vm11, %v10003_v14, %v16272_v31  ;;  %v2095_v22 = vmul.f32 %v10535_v2, %v1958_v30  ;;  %v16283_v14 = vld [vmem:[#allocation166_spill] sm:$0xff]  ;;  %v16284_v31 = vld [vmem:[#allocation156_spill] sm:$0xff] }
 0x3c1   : > { %2861 = vrot.lane.b32.xlu1 %v16276_v32, %s8213_s25  ;;  %v1959_v11 = vsel %vm1957_vm12, %v16278_v40, %v16277_v12  ;;  %v2055_v8 = vsel %vm1957_vm12, %v16277_v12, %v16278_v40  ;;  %v1960_v10 = vsel %vm1957_vm12, %v16284_v31, %v16283_v14  ;;  %v7263_v40 = vpack.c.bf16 %v1720_v4, %v1718_v56 }
 0x3c2   : > { %v10558_v37 = vpop.permute.xlu0 %2462  ;;  %7258 = vmatpush1.bf16.msra.mxu0 %v7257_v20  ;;  %16280 = vst [vmem:[#allocation241_spill] sm:$0xff] %v10562_v33  ;;  %v7261_v20 = vpack.c.bf16 %v1715_v38, %v1713_v9  ;;  %v2097_v51 = vmul.f32 %v10535_v2, %v1959_v11  ;;  %v1717_v9 = vmul.f32 %v10161_v5, %v1647_v26 }
 0x3c3   : > { %16279 = vst [vmem:[#allocation240_spill] sm:$0xff] %v10558_v37  ;;  %7260 = vmatprep.subr.bf16.mxu0 %v7259_v0  ;;  %v10571_v16 = vpop.permute.xlu1 %2464  ;;  %v1719_v37 = vmul.f32 %v10161_v5, %v1648_v58  ;;  %v16285_v0 = vld [vmem:[#allocation167_spill] sm:$0xff]  ;;  %v2094_v58 = vmul.f32 %v10562_v33, %v2054_v34  ;;  %v2096_v11 = vmul.f32 %v10562_v33, %v2055_v8  ;;  %v16290_v34 = vld [vmem:[#allocation130_spill] sm:$0xff]  ;;  %v16291_v8 = vld [vmem:[#allocation200_spill] sm:$0xff] }
 0x3c4   : > { %16281 = vst [vmem:[#allocation254_spill] sm:$0xff] %v10571_v16  ;;  %2863 = vrot.lane.b32.xlu0 %v16282_v39, %s8213_s25  ;;  %v1961_v30 = vsel %vm1957_vm12, %v16286_v1, %v16285_v0  ;;  %v16287_v16 = vld [vmem:[#allocation100_spill] sm:$0xff]  ;;  %v2056_v12 = vsel %vm1957_vm12, %v16283_v14, %v16284_v31  ;;  %v2099_v32 = vmul.f32 %v10535_v2, %v1960_v10 }
 0x3c5   : > { %2865 = vrot.lane.b32.xlu1 %v16287_v16, %s8213_s25  ;;  %v2057_v4 = vsel %vm1957_vm12, %v16285_v0, %v16286_v1  ;;  %v2101_v26 = vmul.f32 %v10535_v2, %v1961_v30  ;;  %v7265_v56 = vpack.c.bf16 %v1719_v37, %v1717_v9  ;;  %v16293_v14 = vld [vmem:[#allocation132_spill] sm:$0xff]  ;;  %v7267_v31 = vpack.c.bf16 %v2097_v51, %v2095_v22  ;;  %v7064_v1 = vld [vmem:[%s15172_s2 + $0x10] sm:$0xff]  ;;  %v7067_v22 = vld [vmem:[%s15172_s2 + $0x28] sm:$0xff] }
 0x3c6   : > { %v10590_v38 = vpop.permute.xlu0 %2466  ;;  %7262 = vmatpush1.bf16.msra.mxu0 %v7261_v20  ;;  %v16292_v20 = vld [vmem:[#allocation191_spill] sm:$0xff]  ;;  %v16295_v10 = vld [vmem:[#allocation192_spill] sm:$0xff]  ;;  %v7269_v37 = vpack.c.bf16 %v2096_v11, %v2094_v58  ;;  %v2098_v0 = vmul.f32 %v10562_v33, %v2056_v12  ;;  %v2100_v30 = vmul.f32 %v10562_v33, %v2057_v4  ;;  %v16298_v11 = vld [vmem:[#allocation134_spill] sm:$0xff] }
 0x3c7   : > { %16288 = vst [vmem:[#allocation262_spill] sm:$0xff] %v10590_v38  ;;  %7264 = vmatprep.subr.bf16.mxu0 %v7263_v40  ;;  %v10597_v39 = vpop.permute.xlu1 %2468  ;;  %v1962_v5 = vsel %vm1957_vm12, %v16292_v20, %v16291_v8  ;;  %v16294_v40 = vld [vmem:[#allocation201_spill] sm:$0xff]  ;;  %v2058_v51 = vsel %vm1957_vm12, %v16291_v8, %v16292_v20  ;;  %v7271_v12 = vpack.c.bf16 %v2101_v26, %v2099_v32 }
 0x3c8   : > { %16289 = vst [vmem:[#allocation255_spill] sm:$0xff] %v10597_v39  ;;  %2867 = vrot.lane.b32.xlu0 %v16290_v34, %s8213_s25  ;;  %v1963_v38 = vsel %vm1957_vm12, %v16295_v10, %v16294_v40  ;;  %v2059_v58 = vsel %vm1957_vm12, %v16294_v40, %v16295_v10  ;;  %v16302_v34 = vld [vmem:[#allocation211_spill] sm:$0xff]  ;;  %v7273_v40 = vpack.c.bf16 %v2100_v30, %v2098_v0  ;;  %v16306_v0 = vld [vmem:[#allocation168_spill] sm:$0xff] }
 0x3c9   : > { %2869 = vrot.lane.b32.xlu1 %v16293_v14, %s8213_s25  ;;  %v2105_v4 = vmul.f32 %v10535_v2, %v1963_v38  ;;  %v16301_v14 = vld [vmem:[#allocation219_spill] sm:$0xff]  ;;  %v2102_v32 = vmul.f32 %v10562_v33, %v2058_v51  ;;  %v2104_v38 = vmul.f32 %v10562_v33, %v2059_v58  ;;  %v16307_v30 = vld [vmem:[#allocation236_spill] sm:$0xff]  ;;  %v16309_v58 = vld [vmem:[#allocation170_spill] sm:$0xff] }
 0x3ca   : > { %v10614_v39 = vpop.permute.xlu0 %2470  ;;  %7266 = vmatpush1.bf16.msra.mxu0 %v7265_v56  ;;  %v2103_v56 = vmul.f32 %v10535_v2, %v1962_v5  ;;  %v1965_v8 = vsel %vm1957_vm12, %v16302_v34, %v16301_v14  ;;  %v16303_v5 = vld [vmem:[#allocation135_spill] sm:$0xff] }
 0x3cb   : > { %16296 = vst [vmem:[#allocation71_spill] sm:$0xff] %v10614_v39  ;;  %7268 = vmatprep.subr.bf16.mxu0 %v7267_v31  ;;  %v10621_v9 = vpop.permute.xlu1 %2472  ;;  %v16299_v31 = vld [vmem:[#allocation218_spill] sm:$0xff] }
 0x3cc   : > { %16297 = vst [vmem:[#allocation76_spill] sm:$0xff] %v10621_v9  ;;  %2871 = vrot.lane.b32.xlu0 %v16298_v11, %s8213_s25  ;;  %v16300_v39 = vld [vmem:[#allocation210_spill] sm:$0xff] }
 0x3cd   : > { %v1964_v9 = vsel %vm1957_vm12, %v16300_v39, %v16299_v31  ;;  %2873 = vrot.lane.b32.xlu1 %v16303_v5, %s8213_s25  ;;  %1789 = vmatmul.mubr.f32.vlgmr.msra.gmra.mrb[32].mxu0 %v7064_v1  ;;  %v2060_v10 = vsel %vm1957_vm12, %v16299_v31, %v16300_v39  ;;  %v2061_v1 = vsel %vm1957_vm12, %v16301_v14, %v16302_v34  ;;  %v16310_v39 = vld [vmem:[#allocation237_spill] sm:$0xff]  ;;  %v16379_v5 = vld [vmem:[#allocation16_spill] sm:$0xff] }
 0x3ce   : > { %v10644_v20 = vpop.permute.xlu0 %2474  ;;  %7270 = vmatpush1.bf16.msra.mxu0 %v7269_v37  ;;  %2225 = vmatprep.mubr.f32.mxu0 %v7067_v22  ;;  %v2107_v11 = vmul.f32 %v10535_v2, %v1964_v9  ;;  %v2109_v37 = vmul.f32 %v10535_v2, %v1965_v8  ;;  %v16308_v22 = vld [vmem:[#allocation228_spill] sm:$0xff]  ;;  %v16311_v31 = vld [vmem:[#allocation229_spill] sm:$0xff]  ;;  %v2106_v34 = vmul.f32 %v10562_v33, %v2060_v10 }
 0x3cf   : > { %16304 = vst [vmem:[#allocation272_spill] sm:$0xff] %v10644_v20  ;;  %7272 = vmatprep.subr.bf16.mxu0 %v7271_v12  ;;  %v10648_v26 = vpop.permute.xlu1 %2476  ;;  %v1966_v51 = vsel %vm1957_vm12, %v16308_v22, %v16307_v30  ;;  %v7275_v12 = vpack.c.bf16 %v2105_v4, %v2103_v56  ;;  %v1967_v9 = vsel %vm1957_vm12, %v16311_v31, %v16310_v39  ;;  %v16314_v4 = vld [vmem:[#allocation172_spill] sm:$0xff] }
 0x3d0   : > { %16305 = vst [vmem:[#allocation270_spill] sm:$0xff] %v10648_v26  ;;  %2875 = vrot.lane.b32.xlu0 %v16306_v0, %s8213_s25  ;;  %v2108_v14 = vmul.f32 %v10562_v33, %v2061_v1  ;;  %v7277_v26 = vpack.c.bf16 %v2104_v38, %v2102_v32  ;;  %v2111_v56 = vmul.f32 %v10535_v2, %v1966_v51  ;;  %v16315_v1 = vld [vmem:[#allocation250_spill] sm:$0xff]  ;;  %v16317_v38 = vld [vmem:[#allocation251_spill] sm:$0xff] }
 0x3d1   : > { %2877 = vrot.lane.b32.xlu1 %v16309_v58, %s8213_s25  ;;  %v2062_v58 = vsel %vm1957_vm12, %v16307_v30, %v16308_v22  ;;  %v7279_v0 = vpack.c.bf16 %v2109_v37, %v2107_v11  ;;  %v2113_v10 = vmul.f32 %v10535_v2, %v1967_v9  ;;  %v16319_v22 = vld [vmem:[#allocation173_spill] sm:$0xff] }
 0x3d2   : > { %v10668_v20 = vpop.permute.xlu0 %2478  ;;  %7274 = vmatpush1.bf16.msra.mxu0 %v7273_v40  ;;  %v2063_v40 = vsel %vm1957_vm12, %v16310_v39, %v16311_v31  ;;  %v7281_v11 = vpack.c.bf16 %v2108_v14, %v2106_v34  ;;  %v2110_v39 = vmul.f32 %v10562_v33, %v2062_v58  ;;  %v16324_v34 = vld [vmem:[#allocation265_spill] sm:$0xff]  ;;  %v16325_v14 = vld [vmem:[#allocation258_spill] sm:$0xff] }
 0x3d3   : > { %16312 = vst [vmem:[#allocation82_spill] sm:$0xff] %v10668_v20  ;;  %7276 = vmatprep.subr.bf16.mxu0 %v7275_v12  ;;  %v10672_v8 = vpop.permute.xlu1 %2480  ;;  %v16316_v12 = vld [vmem:[#allocation244_spill] sm:$0xff]  ;;  %v16318_v20 = vld [vmem:[#allocation245_spill] sm:$0xff]  ;;  %v2112_v31 = vmul.f32 %v10562_v33, %v2063_v40  ;;  %v7283_v58 = vpack.c.bf16 %v2113_v10, %v2111_v56  ;;  %v1970_v40 = vsel %vm1957_vm12, %v16325_v14, %v16324_v34  ;;  %v16330_v56 = vld [vmem:[#allocation34_spill] sm:$0xff] }
 0x3d4   : > { %16313 = vst [vmem:[#allocation128_spill] sm:$0xff] %v10672_v8  ;;  %2879 = vrot.lane.b32.xlu0 %v16314_v4, %s8213_s25  ;;  %v1968_v32 = vsel %vm1957_vm12, %v16316_v12, %v16315_v1  ;;  %v1969_v30 = vsel %vm1957_vm12, %v16318_v20, %v16317_v38  ;;  %v16322_v4 = vld [vmem:[#allocation27_spill] sm:$0xff] }
 0x3d5   : > { %2881 = vrot.lane.b32.xlu1 %v16319_v22, %s8213_s25  ;;  %v2115_v9 = vmul.f32 %v10535_v2, %v1968_v32  ;;  %v2117_v8 = vmul.f32 %v10535_v2, %v1969_v30  ;;  %v16326_v32 = vld [vmem:[#allocation266_spill] sm:$0xff]  ;;  %v16327_v30 = vld [vmem:[#allocation259_spill] sm:$0xff]  ;;  %v2119_v22 = vmul.f32 %v10535_v2, %v1970_v40 }
 0x3d6   : > { %v10692_v51 = vpop.permute.xlu0 %2482  ;;  %7278 = vmatpush1.bf16.msra.mxu0 %v7277_v26  ;;  %v2065_v26 = vsel %vm1957_vm12, %v16317_v38, %v16318_v20 }
 0x3d7   : > { %16320 = vst [vmem:[#allocation114_spill] sm:$0xff] %v10692_v51  ;;  %7280 = vmatprep.subr.bf16.mxu0 %v7279_v0  ;;  %v10694_v37 = vpop.permute.xlu1 %2484  ;;  %v2064_v51 = vsel %vm1957_vm12, %v16315_v1, %v16316_v12  ;;  %v16323_v0 = vld [vmem:[#allocation29_spill] sm:$0xff]  ;;  %v7285_v12 = vpack.c.bf16 %v2112_v31, %v2110_v39  ;;  %v2116_v38 = vmul.f32 %v10562_v33, %v2065_v26  ;;  %v16332_v31 = vld [vmem:[#allocation276_spill] sm:$0xff] }
 0x3d8   : > { %16321 = vst [vmem:[#allocation5_spill] sm:$0xff] %v10694_v37  ;;  %2883 = vrot.lane.b32.xlu0 %v16322_v4, %s8213_s25  ;;  %v1971_v37 = vsel %vm1957_vm12, %v16327_v30, %v16326_v32  ;;  %v2114_v20 = vmul.f32 %v10562_v33, %v2064_v51  ;;  %v7287_v10 = vpack.c.bf16 %v2117_v8, %v2115_v9  ;;  %v16331_v51 = vld [vmem:[#allocation36_spill] sm:$0xff] }
 0x3d9   : > { %2885 = vrot.lane.b32.xlu1 %v16323_v0, %s8213_s25  ;;  %v2066_v0 = vsel %vm1957_vm12, %v16324_v34, %v16325_v14  ;;  %v2121_v39 = vmul.f32 %v10535_v2, %v1971_v37  ;;  %v1973_v26 = vsel %vm1957_vm12, %v16332_v31, %v10055_v44  ;;  %v16335_v37 = vld [vmem:[#allocation273_spill] sm:$0xff] }
 0x3da   : > { %v10716_v4 = vpop.permute.xlu0 %2486  ;;  %7282 = vmatpush1.bf16.msra.mxu0 %v7281_v11  ;;  %v2067_v11 = vsel %vm1957_vm12, %v16326_v32, %v16327_v30  ;;  %v2118_v34 = vmul.f32 %v10562_v33, %v2066_v0  ;;  %v1972_v40 = vsel %vm1957_vm12, %v16335_v37, %v10027_v48  ;;  %v16336_v32 = vld [vmem:[#allocation44_spill] sm:$0xff]  ;;  %v16337_v30 = vld [vmem:[#allocation137_spill] sm:$0xff] }
 0x3db   : > { %16328 = vst [vmem:[#allocation129_spill] sm:$0xff] %v10716_v4  ;;  %7284 = vmatprep.subr.bf16.mxu0 %v7283_v58  ;;  %v10718_v1 = vpop.permute.xlu1 %2488  ;;  %v7289_v58 = vpack.c.bf16 %v2116_v38, %v2114_v20  ;;  %v2120_v14 = vmul.f32 %v10562_v33, %v2067_v11  ;;  %v16338_v4 = vld [vmem:[#allocation118_spill] sm:$0xff]  ;;  %v2125_v20 = vmul.f32 %v10535_v2, %v1973_v26  ;;  %v16339_v0 = vld [vmem:[#allocation45_spill] sm:$0xff] }
 0x3dc   : > { %16329 = vst [vmem:[#allocation117_spill] sm:$0xff] %v10718_v1  ;;  %2887 = vrot.lane.b32.xlu0 %v16330_v56, %s8213_s25  ;;  %v1974_v1 = vsel %vm1957_vm12, %v16338_v4, %v16337_v30  ;;  %v7291_v38 = vpack.c.bf16 %v2121_v39, %v2119_v22  ;;  %v16341_v11 = vld [vmem:[#allocation121_spill] sm:$0xff] }
 0x3dd   : > { %2889 = vrot.lane.b32.xlu1 %v16331_v51, %s8213_s25  ;;  %v2127_v22 = vmul.f32 %v10535_v2, %v1974_v1 }
 0x3de   : > { %v10737_v8 = vpop.permute.xlu0 %2490  ;;  %7286 = vmatpush1.bf16.msra.mxu0 %v7285_v12  ;;  %v2069_v12 = vsel %vm1957_vm12, %v10055_v44, %v16332_v31  ;;  %v2068_v44 = vsel %vm1957_vm12, %v10027_v48, %v16335_v37  ;;  %v2123_v31 = vmul.f32 %v10535_v2, %v1972_v40  ;;  %v16345_v48 = vld [vmem:[#allocation169_spill] sm:$0xff]  ;;  %v16346_v37 = vld [vmem:[#allocation158_spill] sm:$0xff] }
 0x3df   : > { %16333 = vst [vmem:[#allocation164_spill] sm:$0xff] %v10737_v8  ;;  %7288 = vmatprep.subr.bf16.mxu0 %v7287_v10  ;;  %v10739_v9 = vpop.permute.xlu1 %2492  ;;  %v16340_v10 = vld [vmem:[#allocation143_spill] sm:$0xff]  ;;  %v1976_v40 = vsel %vm1957_vm12, %v16346_v37, %v16345_v48 }
 0x3e0   : > { %16334 = vst [vmem:[#allocation154_spill] sm:$0xff] %v10739_v9  ;;  %2891 = vrot.lane.b32.xlu0 %v16336_v32, %s8213_s25  ;;  %v1975_v8 = vsel %vm1957_vm12, %v16341_v11, %v16340_v10  ;;  %v2070_v32 = vsel %vm1957_vm12, %v16337_v30, %v16338_v4  ;;  %v2071_v39 = vsel %vm1957_vm12, %v16340_v10, %v16341_v11  ;;  %v16344_v4 = vld [vmem:[#allocation48_spill] sm:$0xff] }
 0x3e1   : > { %2893 = vrot.lane.b32.xlu1 %v16339_v0, %s8213_s25  ;;  %v2129_v30 = vmul.f32 %v10535_v2, %v1975_v8  ;;  %v16349_v0 = vld [vmem:[#allocation50_spill] sm:$0xff]  ;;  %v7295_v10 = vpack.c.bf16 %v2125_v20, %v2123_v31  ;;  %v2128_v8 = vmul.f32 %v10562_v33, %v2071_v39  ;;  %v2072_v11 = vsel %vm1957_vm12, %v16345_v48, %v16346_v37  ;;  %v16355_v48 = vld [vmem:[#allocation57_spill] sm:$0xff] }
 0x3e2   : > { %v10760_v9 = vpop.permute.xlu0 %2494  ;;  %7290 = vmatpush1.bf16.msra.mxu0 %v7289_v58  ;;  %v7293_v58 = vpack.c.bf16 %v2120_v14, %v2118_v34  ;;  %v2122_v34 = vmul.f32 %v10562_v33, %v2068_v44  ;;  %v2131_v51 = vmul.f32 %v10535_v2, %v1976_v40  ;;  %v16353_v39 = vld [vmem:[#allocation202_spill] sm:$0xff] }
 0x3e3   : > { %16342 = vst [vmem:[#allocation165_spill] sm:$0xff] %v10760_v9  ;;  %7292 = vmatprep.subr.bf16.mxu0 %v7291_v38  ;;  %v10769_v26 = vpop.permute.xlu1 %2496  ;;  %v2124_v9 = vmul.f32 %v10562_v33, %v2069_v12  ;;  %v16347_v38 = vld [vmem:[#allocation171_spill] sm:$0xff]  ;;  %v2126_v12 = vmul.f32 %v10562_v33, %v2070_v32  ;;  %v16352_v32 = vld [vmem:[#allocation56_spill] sm:$0xff]  ;;  %v7299_v37 = vpack.c.bf16 %v2129_v30, %v2127_v22  ;;  %v16357_v40 = vld [vmem:[#allocation194_spill] sm:$0xff] }
 0x3e4   : > { %16343 = vst [vmem:[#allocation155_spill] sm:$0xff] %v10769_v26  ;;  %2895 = vrot.lane.b32.xlu0 %v16344_v4, %s8213_s25  ;;  %v16348_v26 = vld [vmem:[#allocation159_spill] sm:$0xff] }
 0x3e5   : > { %v1977_v1 = vsel %vm1957_vm12, %v16348_v26, %v16347_v38  ;;  %2897 = vrot.lane.b32.xlu1 %v16349_v0, %s8213_s25  ;;  %v2073_v20 = vsel %vm1957_vm12, %v16347_v38, %v16348_v26  ;;  %v7297_v31 = vpack.c.bf16 %v2124_v9, %v2122_v34  ;;  %v2130_v9 = vmul.f32 %v10562_v33, %v2072_v11  ;;  %v16360_v30 = vld [vmem:[#allocation59_spill] sm:$0xff] }
 0x3e6   : > { %v10788_v14 = vpop.permute.xlu0 %2498  ;;  %7294 = vmatpush1.bf16.msra.mxu0 %v7293_v58  ;;  %v2133_v44 = vmul.f32 %v10535_v2, %v1977_v1  ;;  %v16354_v58 = vld [vmem:[#allocation193_spill] sm:$0xff]  ;;  %v2132_v26 = vmul.f32 %v10562_v33, %v2073_v20  ;;  %v7301_v1 = vpack.c.bf16 %v2128_v8, %v2126_v12 }
 0x3e7   : > { %16350 = vst [vmem:[#allocation198_spill] sm:$0xff] %v10788_v14  ;;  %7296 = vmatprep.subr.bf16.mxu0 %v7295_v10  ;;  %v10795_v4 = vpop.permute.xlu1 %2500  ;;  %v1978_v14 = vsel %vm1957_vm12, %v16354_v58, %v16353_v39  ;;  %v16356_v10 = vld [vmem:[#allocation203_spill] sm:$0xff]  ;;  %v2074_v34 = vsel %vm1957_vm12, %v16353_v39, %v16354_v58  ;;  %v16363_v8 = vld [vmem:[#allocation213_spill] sm:$0xff] }
 0x3e8   : > { %16351 = vst [vmem:[#allocation189_spill] sm:$0xff] %v10795_v4  ;;  %2899 = vrot.lane.b32.xlu0 %v16352_v32, %s8213_s25  ;;  %v1979_v4 = vsel %vm1957_vm12, %v16357_v40, %v16356_v10  ;;  %v2135_v22 = vmul.f32 %v10535_v2, %v1978_v14  ;;  %v2075_v11 = vsel %vm1957_vm12, %v16356_v10, %v16357_v40  ;;  %v16365_v14 = vld [vmem:[#allocation63_spill] sm:$0xff]  ;;  %v16367_v10 = vld [vmem:[#allocation238_spill] sm:$0xff] }
 0x3e9   : > { %2901 = vrot.lane.b32.xlu1 %v16355_v48, %s8213_s25  ;;  %v7303_v48 = vpack.c.bf16 %v2133_v44, %v2131_v51  ;;  %v2137_v20 = vmul.f32 %v10535_v2, %v1979_v4  ;;  %v7305_v58 = vpack.c.bf16 %v2132_v26, %v2130_v9  ;;  %v16368_v40 = vld [vmem:[#allocation230_spill] sm:$0xff]  ;;  %v16370_v32 = vld [vmem:[#allocation231_spill] sm:$0xff]  ;;  %v16372_v9 = vld [vmem:[#allocation68_spill] sm:$0xff] }
 0x3ea   : > { %v10812_v0 = vpop.permute.xlu0 %2502  ;;  %7298 = vmatpush1.bf16.msra.mxu0 %v7297_v31  ;;  %v16361_v31 = vld [vmem:[#allocation212_spill] sm:$0xff] }
 0x3eb   : > { %16358 = vst [vmem:[#allocation199_spill] sm:$0xff] %v10812_v0  ;;  %7300 = vmatprep.subr.bf16.mxu0 %v7299_v37  ;;  %v10816_v38 = vpop.permute.xlu1 %2504  ;;  %v16362_v37 = vld [vmem:[#allocation220_spill] sm:$0xff]  ;;  %v16364_v0 = vld [vmem:[#allocation221_spill] sm:$0xff] }
 0x3ec   : > { %16359 = vst [vmem:[#allocation190_spill] sm:$0xff] %v10816_v38  ;;  %2903 = vrot.lane.b32.xlu0 %v16360_v30, %s8213_s25  ;;  %v2076_v12 = vsel %vm1957_vm12, %v16362_v37, %v16361_v31  ;;  %v2077_v39 = vsel %vm1957_vm12, %v16364_v0, %v16363_v8  ;;  %v1980_v51 = vsel %vm1957_vm12, %v16361_v31, %v16362_v37  ;;  %v16369_v30 = vld [vmem:[#allocation239_spill] sm:$0xff] }
 0x3ed   : > { %2905 = vrot.lane.b32.xlu1 %v16365_v14, %s8213_s25  ;;  %v1981_v44 = vsel %vm1957_vm12, %v16363_v8, %v16364_v0  ;;  %v1982_v38 = vsel %vm1957_vm12, %v16368_v40, %v16367_v10  ;;  %v1983_v14 = vsel %vm1957_vm12, %v16370_v32, %v16369_v30  ;;  %v2134_v31 = vmul.f32 %v10562_v33, %v2074_v34 }
 0x3ee   : > { %v10842_v4 = vpop.permute.xlu0 %2506  ;;  %7302 = vmatpush1.bf16.msra.mxu0 %v7301_v1  ;;  %v2136_v37 = vmul.f32 %v10562_v33, %v2075_v11  ;;  %v2138_v0 = vmul.f32 %v10562_v33, %v2076_v12  ;;  %v2140_v1 = vmul.f32 %v10562_v33, %v2077_v39  ;;  %v2139_v26 = vmul.f32 %v10535_v2, %v1980_v51 }
 0x3ef   : > { %16366 = vst [vmem:[#allocation216_spill] sm:$0xff] %v10842_v4  ;;  %7304 = vmatprep.subr.bf16.mxu0 %v7303_v48  ;;  %v10850_v56 = vpop.permute.xlu1 %2508  ;;  %v2141_v8 = vmul.f32 %v10535_v2, %v1981_v44  ;;  %v16373_v4 = vld [vmem:[#allocation69_spill] sm:$0xff]  ;;  %v7307_v48 = vpack.c.bf16 %v2137_v20, %v2135_v22  ;;  %v2078_v34 = vsel %vm1957_vm12, %v16367_v10, %v16368_v40  ;;  %v16374_v22 = vld [vmem:[#allocation252_spill] sm:$0xff]  ;;  %v16375_v20 = vld [vmem:[#allocation246_spill] sm:$0xff] }
 0x3f0   : > { %16371 = vst [vmem:[#allocation208_spill] sm:$0xff] %v10850_v56  ;;  %2907 = vrot.lane.b32.xlu0 %v16372_v9, %s8213_s25  ;;  %v2143_v11 = vmul.f32 %v10535_v2, %v1982_v38  ;;  %v2145_v12 = vmul.f32 %v10535_v2, %v1983_v14  ;;  %v2079_v51 = vsel %vm1957_vm12, %v16369_v30, %v16370_v32  ;;  %v16376_v10 = vld [vmem:[#allocation253_spill] sm:$0xff]  ;;  %v16377_v40 = vld [vmem:[#allocation247_spill] sm:$0xff]  ;;  %v16378_v14 = vld [vmem:[#allocation72_spill] sm:$0xff] }
 0x3f1   : > { %2909 = vrot.lane.b32.xlu1 %v16373_v4, %s8213_s25  ;;  %v7309_v56 = vpack.c.bf16 %v2136_v37, %v2134_v31  ;;  %v7313_v4 = vpack.c.bf16 %v2140_v1, %v2138_v0  ;;  %v1984_v9 = vsel %vm1957_vm12, %v16375_v20, %v16374_v22  ;;  %v1985_v38 = vsel %vm1957_vm12, %v16377_v40, %v16376_v10  ;;  %v16380_v31 = vld [vmem:[#allocation77_spill] sm:$0xff] }
 0x3f2   : > { %v2820_v39 = vpop.permute.xlu0 %2819  ;;  %7306 = vmatpush1.bf16.msra.mxu0 %v7305_v58  ;;  %v2142_v58 = vmul.f32 %v10562_v33, %v2078_v34  ;;  %v10881_v32 = vrot.slane %v10157_v29, %v16379_v5  ;;  %v10885_v30 = vrot.slane %v10125_v19, %v16379_v5  ;;  %v7311_v37 = vpack.c.bf16 %v2141_v8, %v2139_v26 }
 0x3f3   : > { %7308 = vmatprep.subr.bf16.mxu0 %v7307_v48  ;;  %v2822_v44 = vpop.permute.xlu1 %2821  ;;  %v2144_v0 = vmul.f32 %v10562_v33, %v2079_v51  ;;  %v7315_v34 = vpack.c.bf16 %v2145_v12, %v2143_v11  ;;  %v2080_v29 = vsel %vm1957_vm12, %v16374_v22, %v16375_v20  ;;  %v2147_v19 = vmul.f32 %v10535_v2, %v1984_v9  ;;  %v16381_v51 = vld [vmem:[#allocation267_spill] sm:$0xff]  ;;  %v16384_v11 = vld [vmem:[#allocation261_spill] sm:$0xff]  ;;  %v16385_v22 = vld [vmem:[#allocation86_spill] sm:$0xff] }
 0x3f4   : > { %2911 = vrot.lane.b32.xlu0 %v16378_v14, %s8213_s25  ;;  %v2948_v1 = vsel %vm2947_vm13, %v2820_v39, %v2822_v44  ;;  %v3076_v48 = vsel %vm2947_vm13, %v2822_v44, %v2820_v39  ;;  %v2081_v5 = vsel %vm1957_vm12, %v16376_v10, %v16377_v40  ;;  %v2149_v26 = vmul.f32 %v10535_v2, %v1985_v38 }
 0x3f5   : > { %2913 = vrot.lane.b32.xlu1 %v16380_v31, %s8213_s25  ;;  %v16382_v31 = vld [vmem:[#allocation260_spill] sm:$0xff]  ;;  %v3116_v20 = vmul.f32 %v10881_v32, %v2948_v1  ;;  %v3117_v10 = vmul.f32 %v10885_v30, %v3076_v48  ;;  %v2146_v16 = vmul.f32 %v10562_v33, %v2080_v29  ;;  %v2148_v23 = vmul.f32 %v10562_v33, %v2081_v5 }
 0x3f6   : > { %v2824_v14 = vpop.permute.xlu0 %2823  ;;  %7310 = vmatpush1.bf16.msra.mxu0 %v7309_v56  ;;  %v1986_v39 = vsel %vm1957_vm12, %v16382_v31, %v16381_v51  ;;  %v16383_v56 = vld [vmem:[#allocation268_spill] sm:$0xff] }
 0x3f7   : > { %7312 = vmatprep.subr.bf16.mxu0 %v7311_v37  ;;  %v2826_v8 = vpop.permute.xlu1 %2825  ;;  %v1987_v12 = vsel %vm1957_vm12, %v16384_v11, %v16383_v56  ;;  %v16386_v37 = vld [vmem:[#allocation87_spill] sm:$0xff]  ;;  %v2083_v29 = vsel %vm1957_vm12, %v16383_v56, %v16384_v11  ;;  %v16387_v5 = vld [vmem:[#allocation92_spill] sm:$0xff] }
 0x3f8   : > { %v2949_v44 = vsel %vm2947_vm13, %v2824_v14, %v2826_v8  ;;  %v3077_v9 = vsel %vm2947_vm13, %v2826_v8, %v2824_v14  ;;  %2915 = vrot.lane.b32.xlu0 %v16385_v22, %s8213_s25  ;;  %v2151_v14 = vmul.f32 %v10535_v2, %v1986_v39  ;;  %v2153_v8 = vmul.f32 %v10535_v2, %v1987_v12  ;;  %v16389_v12 = vld [vmem:[#allocation275_spill] sm:$0xff] }
 0x3f9   : > { %v3118_v40 = vmul.f32 %v10881_v32, %v2949_v44  ;;  %v3119_v38 = vmul.f32 %v10885_v30, %v3077_v9  ;;  %2917 = vrot.lane.b32.xlu1 %v16386_v37, %s8213_s25  ;;  %v7317_v44 = vpack.c.bf16 %v2144_v0, %v2142_v58  ;;  %v2082_v9 = vsel %vm1957_vm12, %v16381_v51, %v16382_v31 }
 0x3fa   : > { %v2828_v28 = vpop.permute.xlu0 %2827  ;;  %7314 = vmatpush1.bf16.msra.mxu0 %v7313_v4  ;;  %v16388_v4 = vld [vmem:[#allocation277_spill] sm:$0xff]  ;;  %v7319_v58 = vpack.c.bf16 %v2149_v26, %v2147_v19  ;;  %v7321_v0 = vpack.c.bf16 %v2148_v23, %v2146_v16  ;;  %v2150_v56 = vmul.f32 %v10562_v33, %v2082_v9  ;;  %v2152_v11 = vmul.f32 %v10562_v33, %v2083_v29 }
 0x3fb   : > { %v7461_v1 = vpack.c.bf16 %v3118_v40, %v3116_v20  ;;  %7316 = vmatprep.subr.bf16.mxu0 %v7315_v34  ;;  %v2830_v48 = vpop.permute.xlu1 %2829  ;;  %v7459_v22 = vpack.c.bf16 %v3119_v38, %v3117_v10  ;;  %v1989_v39 = vsel %vm1957_vm12, %v16388_v4, %v10077_v27  ;;  %v1988_v20 = vsel %vm1957_vm12, %v16389_v12, %v10051_v45 }
 0x3fc   : > { %2919 = vrot.lane.b32.xlu0 %v16387_v5, %s8213_s25  ;;  %v2950_v34 = vsel %vm2947_vm13, %v2828_v28, %v2830_v48  ;;  %v3078_v31 = vsel %vm2947_vm13, %v2830_v48, %v2828_v28  ;;  %v2085_v23 = vsel %vm1957_vm12, %v10077_v27, %v16388_v4  ;;  %v2157_v28 = vmul.f32 %v10535_v2, %v1989_v39 }
 0x3fd   : > { %2921 = vrot.lane.b32.xlu1 %v8964_v35, %s8213_s25  ;;  %7460 = vmatprep.subr.bf16.mxu1 %v7459_v22  ;;  %v7323_v22 = vpack.c.bf16 %v2153_v8, %v2151_v14  ;;  %v3120_v26 = vmul.f32 %v10881_v32, %v2950_v34  ;;  %v3121_v40 = vmul.f32 %v10885_v30, %v3078_v31 }
 0x3fe   : > { %v2832_v51 = vpop.permute.xlu0 %2831  ;;  %7318 = vmatpush1.bf16.msra.mxu0 %v7317_v44  ;;  %7462 = vmatpush1.bf16.msra.mxu1 %v7461_v1  ;;  %v2084_v8 = vsel %vm1957_vm12, %v10051_v45, %v16389_v12  ;;  %v2155_v1 = vmul.f32 %v10535_v2, %v1988_v20  ;;  %v7325_v29 = vpack.c.bf16 %v2152_v11, %v2150_v56 }
 0x3ff   : > { %7320 = vmatprep.subr.bf16.mxu0 %v7319_v58  ;;  %v2834_v10 = vpop.permute.xlu1 %2833  ;;  %v2156_v4 = vmul.f32 %v10562_v33, %v2085_v23  ;;  %v2154_v58 = vmul.f32 %v10562_v33, %v2084_v8  ;;  %v16390_v23 = vld [vmem:[#allocation138_spill] sm:$0xff]  ;;  %v7069_v8 = vld [vmem:[%s15172_s2 + $0x38] sm:$0xff] }
 0x400   : > { %v2951_v16 = vsel %vm2947_vm13, %v2832_v51, %v2834_v10  ;;  %v3079_v19 = vsel %vm2947_vm13, %v2834_v10, %v2832_v51  ;;  %2923 = vrot.lane.b32.xlu0 %v9044_v24, %s8213_s25  ;;  %v7327_v39 = vpack.c.bf16 %v2157_v28, %v2155_v1 }
 0x401   : > { %v3122_v38 = vmul.f32 %v10881_v32, %v2951_v16  ;;  %v3123_v14 = vmul.f32 %v10885_v30, %v3079_v19  ;;  %2925 = vrot.lane.b32.xlu1 %v9046_v13, %s8213_s25  ;;  %v7329_v51 = vpack.c.bf16 %v2156_v4, %v2154_v58  ;;  %v16391_v19 = vld [vmem:[#allocation42_spill] sm:$0xff] }
 0x402   : > { %v2836_v27 = vpop.permute.xlu0 %2835  ;;  %7322 = vmatpush1.bf16.msra.mxu0 %v7321_v0  ;;  %v16397_v58 = vld [vmem:[#allocation54_spill] sm:$0xff] }
 0x403   : > { %v7465_v48 = vpack.c.bf16 %v3122_v38, %v3120_v26  ;;  %7324 = vmatprep.subr.bf16.mxu0 %v7323_v22  ;;  %v2838_v44 = vpop.permute.xlu1 %2837  ;;  %v7463_v9 = vpack.c.bf16 %v3123_v14, %v3121_v40  ;;  %v16392_v26 = vld [vmem:[#allocation41_spill] sm:$0xff] }
 0x404   : > { %2927 = vrot.lane.b32.xlu0 %v16155_v18, %s8213_s25  ;;  %v2952_v45 = vsel %vm2947_vm13, %v2836_v27, %v2838_v44  ;;  %v3080_v0 = vsel %vm2947_vm13, %v2838_v44, %v2836_v27  ;;  %v16393_v40 = vpack.c.bf16 %v16391_v19, %v16392_v26  ;;  %v7066_v27 = vld [vmem:[%s15172_s2 + $0x20] sm:$0xff] }
 0x405   : > { %2929 = vrot.lane.b32.xlu1 %v9070_v41, %s8213_s25  ;;  %7464 = vmatprep.subr.bf16.mxu1 %v7463_v9  ;;  %v3124_v12 = vmul.f32 %v10881_v32, %v2952_v45  ;;  %v3125_v20 = vmul.f32 %v10885_v30, %v3080_v0  ;;  %v16394_v9 = vld [vmem:[#allocation39_spill] sm:$0xff]  ;;  %v16398_v45 = vld [vmem:[#allocation49_spill] sm:$0xff] }
 0x406   : > { %v2840_v34 = vpop.permute.xlu0 %2839  ;;  %7326 = vmatpush1.bf16.msra.mxu0 %v7325_v29  ;;  %7466 = vmatpush1.bf16.msra.mxu1 %v7465_v48  ;;  %v16395_v29 = vld [vmem:[#allocation38_spill] sm:$0xff]  ;;  %v16399_v0 = vpack.c.bf16 %v16397_v58, %v16398_v45 }
 0x407   : > { %7328 = vmatprep.subr.bf16.mxu0 %v7327_v39  ;;  %v2842_v31 = vpop.permute.xlu1 %2841  ;;  %v16396_v4 = vpack.c.bf16 %v16394_v9, %v16395_v29  ;;  %v16409_v29 = vld [vmem:[#allocation80_spill] sm:$0xff]  ;;  %v16412_v45 = vld [vmem:[#allocation78_spill] sm:$0xff] }
 0x408   : > { %v2953_v56 = vsel %vm2947_vm13, %v2840_v34, %v2842_v31  ;;  %v3081_v11 = vsel %vm2947_vm13, %v2842_v31, %v2840_v34  ;;  %2931 = vrot.lane.b32.xlu0 %v16158_v42, %s8213_s25 }
 0x409   : > { %v3126_v10 = vmul.f32 %v10881_v32, %v2953_v56  ;;  %v3127_v22 = vmul.f32 %v10885_v30, %v3081_v11  ;;  %2933 = vrot.lane.b32.xlu1 %v16390_v23, %s8213_s25  ;;  %v16512_v23 = vld [vmem:[#allocation182_spill] sm:$0xff] }
 0x40a   : > { %v2844_v28 = vpop.permute.xlu0 %2843  ;;  %7330 = vmatpush1.bf16.msra.mxu0 %v7329_v51 }
 0x40b   : > { %v7469_v16 = vpack.c.bf16 %v3126_v10, %v3124_v12  ;;  %7332 = vmatprep.subr.bf16.mxu0 %v16393_v40  ;;  %v2846_v38 = vpop.permute.xlu1 %2845  ;;  %v7467_v14 = vpack.c.bf16 %v3127_v22, %v3125_v20  ;;  %v16400_v22 = vld [vmem:[#allocation51_spill] sm:$0xff]  ;;  %v16403_v40 = vld [vmem:[#allocation66_spill] sm:$0xff] }
 0x40c   : > { %2935 = vrot.lane.b32.xlu0 %v16161_v17, %s8213_s25  ;;  %v2954_v1 = vsel %vm2947_vm13, %v2844_v28, %v2846_v38  ;;  %v3082_v48 = vsel %vm2947_vm13, %v2846_v38, %v2844_v28  ;;  %v16401_v28 = vld [vmem:[#allocation46_spill] sm:$0xff]  ;;  %v16404_v38 = vld [vmem:[#allocation60_spill] sm:$0xff] }
 0x40d   : > { %2937 = vrot.lane.b32.xlu1 %v16162_v62, %s8213_s25  ;;  %7468 = vmatprep.subr.bf16.mxu1 %v7467_v14  ;;  %v3128_v51 = vmul.f32 %v10881_v32, %v2954_v1  ;;  %v3129_v56 = vmul.f32 %v10885_v30, %v3082_v48  ;;  %v16405_v14 = vpack.c.bf16 %v16403_v40, %v16404_v38  ;;  %v16406_v1 = vld [vmem:[#allocation64_spill] sm:$0xff]  ;;  %v16407_v48 = vld [vmem:[#allocation58_spill] sm:$0xff]  ;;  %v16499_v62 = vld [vmem:[#allocation147_spill] sm:$0xff] }
 0x40e   : > { %v2848_v44 = vpop.permute.xlu0 %2847  ;;  %2226 = vmatmul.mubr.f32.vlgmr.msra.gmra.mrb[32].mxu0 %v7066_v27  ;;  %7470 = vmatpush1.bf16.msra.mxu1 %v7469_v16  ;;  %v16402_v16 = vpack.c.bf16 %v16400_v22, %v16401_v28  ;;  %v7073_v27 = vld [vmem:[%s15172_s2 + $0x58] sm:$0xff]  ;;  %v16500_v17 = vld [vmem:[#allocation146_spill] sm:$0xff] }
 0x40f   : > { %7334 = vmatpush1.bf16.msra.mxu0 %v16396_v4  ;;  %v2850_v39 = vpop.permute.xlu1 %2849  ;;  %2373 = vmatprep.mubr.f32.mxu0 %v7069_v8  ;;  %v16410_v4 = vld [vmem:[#allocation73_spill] sm:$0xff] }
 0x410   : > { %7336 = vmatprep.subr.bf16.mxu0 %v16399_v0  ;;  %v2955_v34 = vsel %vm2947_vm13, %v2848_v44, %v2850_v39  ;;  %v3083_v31 = vsel %vm2947_vm13, %v2850_v39, %v2848_v44  ;;  %2939 = vrot.lane.b32.xlu0 %v16164_v59, %s8213_s25  ;;  %v16408_v44 = vpack.c.bf16 %v16406_v1, %v16407_v48  ;;  %v16413_v0 = vld [vmem:[#allocation70_spill] sm:$0xff]  ;;  %v16428_v48 = vld [vmem:[#allocation140_spill] sm:$0xff] }
 0x411   : > { %v3130_v11 = vmul.f32 %v10881_v32, %v2955_v34  ;;  %v3131_v12 = vmul.f32 %v10885_v30, %v3083_v31  ;;  %2941 = vrot.lane.b32.xlu1 %v9366_v25, %s8213_s25  ;;  %3247 = vmatprep.mubr.f32.mxu1 %v7073_v27  ;;  %v16411_v39 = vpack.c.bf16 %v16409_v29, %v16410_v4  ;;  %v16432_v4 = vld [vmem:[#allocation141_spill] sm:$0xff] }
 0x412   : > { %v2852_v20 = vpop.permute.xlu0 %2851  ;;  %v16414_v34 = vpack.c.bf16 %v16412_v45, %v16413_v0  ;;  %v16435_v0 = vld [vmem:[#allocation177_spill] sm:$0xff] }
 0x413   : > { %v7473_v10 = vpack.c.bf16 %v3130_v11, %v3128_v51  ;;  %7338 = vmatpush1.bf16.msra.mxu0 %v16402_v16  ;;  %v11010_v19 = vpop.permute.xlu1 %3704  ;;  %v7471_v26 = vpack.c.bf16 %v3131_v12, %v3129_v56  ;;  %v16415_v51 = vld [vmem:[#allocation89_spill] sm:$0xff]  ;;  %v16416_v56 = vld [vmem:[#allocation88_spill] sm:$0xff]  ;;  %v16422_v16 = vld [vmem:[#allocation102_spill] sm:$0xff] }
 0x414   : > { %7340 = vmatprep.subr.bf16.mxu0 %v16405_v14  ;;  %2943 = vrot.lane.b32.xlu0 %v16167_v50, %s8213_s25  ;;  %v16417_v11 = vpack.c.bf16 %v16415_v51, %v16416_v56  ;;  %v16418_v12 = vld [vmem:[#allocation33_spill] sm:$0xff]  ;;  %v16426_v14 = vld [vmem:[#allocation103_spill] sm:$0xff]  ;;  %v16440_v56 = vld [vmem:[#allocation178_spill] sm:$0xff] }
 0x415   : > { %2945 = vrot.lane.b32.xlu1 %v9394_v61, %s8213_s25  ;;  %7472 = vmatprep.subr.bf16.mxu1 %v7471_v26  ;;  %v16423_v26 = vld [vmem:[#allocation101_spill] sm:$0xff]  ;;  %s16857_s25 = smov 96  }
 0x416   : > { %v11022_v8 = vpop.permute.xlu0 %3707  ;;  %7474 = vmatpush1.bf16.msra.mxu1 %v7473_v10  ;;  %v16420_v10 = vld [vmem:[#allocation90_spill] sm:$0xff]  ;;  %v16424_v40 = vpack.c.bf16 %v16422_v16, %v16423_v26  ;;  %v16445_v26 = vld [vmem:[#allocation40_spill] sm:$0xff] }
 0x417   : > { %7342 = vmatpush1.bf16.msra.mxu0 %v16408_v44  ;;  %v11027_v9 = vpop.permute.xlu1 %3693  ;;  %v16429_v44 = vld [vmem:[#allocation139_spill] sm:$0xff] }
 0x418   : > { %7344 = vmatprep.subr.bf16.mxu0 %v16411_v39  ;;  %3256 = vrot.lane.b32.xlu0 %v16172_v52, %s8214_s26  ;;  %v16430_v29 = vpack.c.bf16 %v16428_v48, %v16429_v44 }
 0x419   : > { %3258 = vrot.lane.b32.xlu1 %v16175_v7, %s8214_s26  ;;  %v16419_v7 = vld [vmem:[#allocation91_spill] sm:$0xff] }
 0x41a   : > { %v11036_v58 = vpop.permute.xlu0 %3696  ;;  %v16421_v22 = vpack.c.bf16 %v16419_v7, %v16420_v10  ;;  %v16442_v7 = vld [vmem:[#allocation43_spill] sm:$0xff] }
 0x41b   : > { %7346 = vmatpush1.bf16.msra.mxu0 %v16414_v34  ;;  %v11041_v31 = vpop.permute.xlu1 %3715  ;;  %v16436_v34 = vld [vmem:[#allocation176_spill] sm:$0xff]  ;;  %v16443_v10 = vld [vmem:[#allocation35_spill] sm:$0xff] }
 0x41c   : > { %7348 = vmatprep.subr.bf16.mxu0 %v16417_v11  ;;  %3260 = vrot.lane.b32.xlu0 %v16418_v12, %s8214_s26  ;;  %v16437_v51 = vpack.c.bf16 %v16435_v0, %v16436_v34  ;;  %v16451_v34 = vld [vmem:[#allocation53_spill] sm:$0xff] }
 0x41d   : > { %3262 = vrot.lane.b32.xlu1 %v16185_v6, %s8214_s26  ;;  %v16425_v6 = vld [vmem:[#allocation104_spill] sm:$0xff] }
 0x41e   : > { %v11050_v52 = vpop.permute.xlu0 %3718  ;;  %v16427_v27 = vpack.c.bf16 %v16425_v6, %v16426_v14 }
 0x41f   : > { %7350 = vmatpush1.bf16.msra.mxu0 %v16421_v22  ;;  %v11055_v28 = vpop.permute.xlu1 %3742  ;;  %v16444_v22 = vpack.c.bf16 %v16442_v7, %v16443_v10  ;;  %v16455_v7 = vld [vmem:[#allocation124_spill] sm:$0xff] }
 0x420   : > { %7352 = vmatprep.subr.bf16.mxu0 %v16424_v40  ;;  %3264 = vrot.lane.b32.xlu0 %v8700_v47, %s8214_s26  ;;  %v16446_v40 = vld [vmem:[#allocation32_spill] sm:$0xff] }
 0x421   : > { %3266 = vrot.lane.b32.xlu1 %v8710_v53, %s8214_s26  ;;  %v16431_v53 = vld [vmem:[#allocation142_spill] sm:$0xff]  ;;  %v16447_v6 = vpack.c.bf16 %v16445_v26, %v16446_v40 }
 0x422   : > { %v11064_v38 = vpop.permute.xlu0 %3744  ;;  %v16433_v39 = vpack.c.bf16 %v16431_v53, %v16432_v4  ;;  %v16449_v53 = vld [vmem:[#allocation52_spill] sm:$0xff] }
 0x423   : > { %7354 = vmatpush1.bf16.msra.mxu0 %v16427_v27  ;;  %v11069_v1 = vpop.permute.xlu1 %3731 }
 0x424   : > { %7356 = vmatprep.subr.bf16.mxu0 %v16430_v29  ;;  %3268 = vrot.lane.b32.xlu0 %v8724_v60, %s8214_s26  ;;  %v16448_v29 = vld [vmem:[#allocation55_spill] sm:$0xff] }
 0x425   : > { %3270 = vrot.lane.b32.xlu1 %v8734_v63, %s8214_s26  ;;  %v16439_v63 = vld [vmem:[#allocation179_spill] sm:$0xff] }
 0x426   : > { %v11078_v47 = vpop.permute.xlu0 %3733  ;;  %v16441_v11 = vpack.c.bf16 %v16439_v63, %v16440_v56 }
 0x427   : > { %7358 = vmatpush1.bf16.msra.mxu0 %v16433_v39  ;;  %v11083_v45 = vpop.permute.xlu1 %3753 }
 0x428   : > { %16434 = vst [vmem:[#allocation217_spill] sm:$0xff] %v11083_v45  ;;  %7360 = vmatprep.subr.bf16.mxu0 %v16437_v51  ;;  %3272 = vrot.lane.b32.xlu0 %v8764_v46, %s8214_s26  ;;  %v16452_v51 = vld [vmem:[#allocation47_spill] sm:$0xff] }
 0x429   : > { %3274 = vrot.lane.b32.xlu1 %v8772_v49, %s8214_s26  ;;  %v16453_v63 = vpack.c.bf16 %v16451_v34, %v16452_v51 }
 0x42a   : > { %v11092_v60 = vpop.permute.xlu0 %3755 }
 0x42b   : > { %16438 = vst [vmem:[#allocation209_spill] sm:$0xff] %v11092_v60  ;;  %7362 = vmatpush1.bf16.msra.mxu0 %v16441_v11  ;;  %v2854_v12 = vpop.permute.xlu1 %2853  ;;  %v16521_v60 = vld [vmem:[#allocation184_spill] sm:$0xff] }
 0x42c   : > { %7364 = vmatprep.subr.bf16.mxu0 %v16444_v22  ;;  %v2956_v16 = vsel %vm2947_vm13, %v2852_v20, %v2854_v12  ;;  %3276 = vrot.lane.b32.xlu0 %v8784_v3, %s8214_s26  ;;  %v3084_v46 = vsel %vm2947_vm13, %v2854_v12, %v2852_v20  ;;  %v16450_v3 = vpack.c.bf16 %v16448_v29, %v16449_v53  ;;  %v16454_v12 = vld [vmem:[#allocation269_spill] sm:$0xff]  ;;  %v16456_v22 = vld [vmem:[#allocation67_spill] sm:$0xff]  ;;  %v16461_v29 = vld [vmem:[#allocation120_spill] sm:$0xff] }
 0x42d   : > { %3278 = vrot.lane.b32.xlu1 %v8802_v57, %s8214_s26  ;;  %v3132_v27 = vmul.f32 %v10881_v32, %v2956_v16  ;;  %v3133_v57 = vmul.f32 %v10885_v30, %v3084_v46  ;;  %v2512_v10 = vsel %vm2510_vm14, %v16455_v7, %v16454_v12  ;;  %v16457_v16 = vld [vmem:[#allocation61_spill] sm:$0xff]  ;;  %v2640_v26 = vsel %vm2510_vm14, %v16454_v12, %v16455_v7 }
 0x42e   : > { %v2856_v49 = vpop.permute.xlu0 %2855  ;;  %v16458_v46 = vpack.c.bf16 %v16456_v22, %v16457_v16 }
 0x42f   : > { %7366 = vmatpush1.bf16.msra.mxu0 %v16447_v6  ;;  %v2858_v14 = vpop.permute.xlu1 %2857  ;;  %v11151_v6 = vld [vmem:[%s15176_s6 + $0x8] sm:$0x7f] }
 0x430   : > { %v2957_v48 = vsel %vm2947_vm13, %v2856_v49, %v2858_v14  ;;  %v3085_v44 = vsel %vm2947_vm13, %v2858_v14, %v2856_v49  ;;  %7368 = vmatprep.subr.bf16.mxu0 %v16450_v3  ;;  %3280 = vrot.lane.b32.xlu0 %v8826_v15, %s8214_s26  ;;  %v11134_v15 = vld [vmem:[%s15176_s6] sm:$0x7f] }
 0x431   : > { %v3134_v20 = vmul.f32 %v10881_v32, %v2957_v48  ;;  %v3135_v4 = vmul.f32 %v10885_v30, %v3085_v44  ;;  %3282 = vrot.lane.b32.xlu1 %v8838_v43, %s8214_s26  ;;  %v16459_v43 = vld [vmem:[#allocation17_spill] sm:$0xff] }
 0x432   : > { %v2860_v39 = vpop.permute.xlu0 %2859  ;;  %v11138_v49 = vrot.slane %v11134_v15, %v16459_v43  ;;  %v11155_v14 = vrot.slane %v11151_v6, %v16459_v43  ;;  %v16460_v44 = vld [vmem:[#allocation105_spill] sm:$0xff] }
 0x433   : > { %v7477_v0 = vpack.c.bf16 %v3134_v20, %v3132_v27  ;;  %7370 = vmatpush1.bf16.msra.mxu0 %v16453_v63  ;;  %v2862_v56 = vpop.permute.xlu1 %2861  ;;  %v7475_v11 = vpack.c.bf16 %v3135_v4, %v3133_v57  ;;  %v16462_v3 = vld [vmem:[#allocation65_spill] sm:$0xff]  ;;  %v16463_v57 = vld [vmem:[#allocation62_spill] sm:$0xff] }
 0x434   : > { %7372 = vmatprep.subr.bf16.mxu0 %v16458_v46  ;;  %v2958_v40 = vsel %vm2947_vm13, %v2860_v39, %v2862_v56  ;;  %3284 = vrot.lane.b32.xlu0 %v16215_v54, %s8214_s26  ;;  %v3086_v27 = vsel %vm2947_vm13, %v2862_v56, %v2860_v39  ;;  %v2511_v54 = vsel %vm2510_vm14, %v16461_v29, %v16460_v44  ;;  %v16465_v56 = vld [vmem:[#allocation81_spill] sm:$0xff] }
 0x435   : > { %3286 = vrot.lane.b32.xlu1 %v16216_v55, %s8214_s26  ;;  %7476 = vmatprep.subr.bf16.mxu1 %v7475_v11  ;;  %v2639_v55 = vsel %vm2510_vm14, %v16460_v44, %v16461_v29  ;;  %v11165_v53 = vmul.f32 %v11138_v49, %v2512_v10  ;;  %v16464_v20 = vpack.c.bf16 %v16462_v3, %v16463_v57  ;;  %v16466_v11 = vld [vmem:[#allocation74_spill] sm:$0xff]  ;;  %v16468_v43 = vld [vmem:[#allocation125_spill] sm:$0xff]  ;;  %v16473_v3 = vld [vmem:[#allocation75_spill] sm:$0xff] }
 0x436   : > { %v2864_v48 = vpop.permute.xlu0 %2863  ;;  %7478 = vmatpush1.bf16.msra.mxu1 %v7477_v0  ;;  %v11171_v39 = vmul.f32 %v11155_v14, %v2640_v26  ;;  %v3136_v34 = vmul.f32 %v10881_v32, %v2958_v40  ;;  %v16467_v12 = vpack.c.bf16 %v16465_v56, %v16466_v11  ;;  %v3137_v7 = vmul.f32 %v10885_v30, %v3086_v27  ;;  %v16469_v26 = vld [vmem:[#allocation107_spill] sm:$0xff]  ;;  %v16470_v27 = vld [vmem:[#allocation150_spill] sm:$0xff] }
 0x437   : > { %7374 = vmatpush1.bf16.msra.mxu0 %v16464_v20  ;;  %v2866_v4 = vpop.permute.xlu1 %2865  ;;  %v11187_v22 = vmul.f32 %v11138_v49, %v2511_v54  ;;  %v11190_v16 = vmul.f32 %v11155_v14, %v2639_v55  ;;  %v2513_v40 = vsel %vm2510_vm14, %v16469_v26, %v16468_v43  ;;  %v16478_v56 = vld [vmem:[#allocation106_spill] sm:$0xff]  ;;  %v16487_v55 = vld [vmem:[#allocation109_spill] sm:$0xff] }
 0x438   : > { %v2959_v51 = vsel %vm2947_vm13, %v2864_v48, %v2866_v4  ;;  %v3087_v63 = vsel %vm2947_vm13, %v2866_v4, %v2864_v48  ;;  %7376 = vmatprep.subr.bf16.mxu0 %v16467_v12  ;;  %3288 = vrot.lane.b32.xlu0 %v16221_v36, %s8214_s26  ;;  %v16471_v48 = vld [vmem:[#allocation113_spill] sm:$0xff]  ;;  %v16472_v36 = vld [vmem:[#allocation79_spill] sm:$0xff]  ;;  %v16475_v4 = vld [vmem:[#allocation94_spill] sm:$0xff] }
 0x439   : > { %v3138_v10 = vmul.f32 %v10881_v32, %v2959_v51  ;;  %v3139_v0 = vmul.f32 %v10885_v30, %v3087_v63  ;;  %3290 = vrot.lane.b32.xlu1 %v16259_v21, %s8214_s26  ;;  %v2514_v44 = vsel %vm2510_vm14, %v16471_v48, %v16470_v27  ;;  %v16474_v57 = vpack.c.bf16 %v16472_v36, %v16473_v3  ;;  %v16476_v51 = vld [vmem:[#allocation93_spill] sm:$0xff]  ;;  %v16479_v11 = vld [vmem:[#allocation186_spill] sm:$0xff] }
 0x43a   : > { %v2868_v46 = vpop.permute.xlu0 %2867  ;;  %v2642_v20 = vsel %vm2510_vm14, %v16470_v27, %v16471_v48  ;;  %v16477_v63 = vpack.c.bf16 %v16475_v4, %v16476_v51  ;;  %v2641_v27 = vsel %vm2510_vm14, %v16468_v43, %v16469_v26  ;;  %v11223_v48 = vmul.f32 %v11138_v49, %v2513_v40  ;;  %v16482_v51 = vld [vmem:[#allocation195_spill] sm:$0xff]  ;;  %v16484_v26 = vld [vmem:[#allocation96_spill] sm:$0xff] }
 0x43b   : > { %v7481_v29 = vpack.c.bf16 %v3138_v10, %v3136_v34  ;;  %7378 = vmatpush1.bf16.msra.mxu0 %v16474_v57  ;;  %v2870_v21 = vpop.permute.xlu1 %2869  ;;  %v7479_v54 = vpack.c.bf16 %v3139_v0, %v3137_v7  ;;  %v2516_v34 = vsel %vm2510_vm14, %v16479_v11, %v16478_v56  ;;  %v16480_v10 = vld [vmem:[#allocation84_spill] sm:$0xff]  ;;  %v16481_v7 = vld [vmem:[#allocation85_spill] sm:$0xff]  ;;  %v11226_v36 = vmul.f32 %v11138_v49, %v2514_v44  ;;  %v16485_v40 = vld [vmem:[#allocation95_spill] sm:$0xff] }
 0x43c   : > { %7380 = vmatprep.subr.bf16.mxu0 %v16477_v63  ;;  %v2960_v12 = vsel %vm2947_vm13, %v2868_v46, %v2870_v21  ;;  %3292 = vrot.lane.b32.xlu0 %v16480_v10, %s8214_s26  ;;  %v3088_v3 = vsel %vm2947_vm13, %v2870_v21, %v2868_v46  ;;  %v11230_v4 = vmul.f32 %v11155_v14, %v2642_v20  ;;  %v16483_v63 = vld [vmem:[#allocation161_spill] sm:$0xff]  ;;  %v16488_v0 = vld [vmem:[#allocation108_spill] sm:$0xff] }
 0x43d   : > { %3294 = vrot.lane.b32.xlu1 %v16481_v7, %s8214_s26  ;;  %7480 = vmatprep.subr.bf16.mxu1 %v7479_v54  ;;  %v2515_v10 = vsel %vm2510_vm14, %v16483_v63, %v16482_v51  ;;  %v2643_v43 = vsel %vm2510_vm14, %v16482_v51, %v16483_v63  ;;  %v16486_v7 = vpack.c.bf16 %v16484_v26, %v16485_v40  ;;  %v16490_v26 = vld [vmem:[#allocation97_spill] sm:$0xff] }
 0x43e   : > { %v2872_v57 = vpop.permute.xlu0 %2871  ;;  %7482 = vmatpush1.bf16.msra.mxu1 %v7481_v29  ;;  %v11242_v46 = vmul.f32 %v11138_v49, %v2516_v34  ;;  %v3140_v21 = vmul.f32 %v10881_v32, %v2960_v12  ;;  %v16489_v61 = vpack.c.bf16 %v16487_v55, %v16488_v0  ;;  %v3141_v51 = vmul.f32 %v10885_v30, %v3088_v3  ;;  %v16491_v34 = vld [vmem:[#allocation98_spill] sm:$0xff]  ;;  %v16492_v55 = vld [vmem:[#allocation205_spill] sm:$0xff]  ;;  %v16493_v0 = vld [vmem:[#allocation204_spill] sm:$0xff] }
 0x43f   : > { %7382 = vmatpush1.bf16.msra.mxu0 %v16486_v7  ;;  %v2874_v44 = vpop.permute.xlu1 %2873  ;;  %v11258_v12 = vmul.f32 %v11155_v14, %v2641_v27  ;;  %v2517_v3 = vsel %vm2510_vm14, %v16493_v0, %v16492_v55  ;;  %v16494_v7 = vld [vmem:[#allocation223_spill] sm:$0xff]  ;;  %v11281_v25 = vmul.f32 %v11155_v14, %v2643_v43  ;;  %v2645_v59 = vsel %vm2510_vm14, %v16492_v55, %v16493_v0  ;;  %v16503_v55 = vld [vmem:[#allocation100_spill] sm:$0xff] }
 0x440   : > { %v2961_v54 = vsel %vm2947_vm13, %v2872_v57, %v2874_v44  ;;  %v3089_v20 = vsel %vm2947_vm13, %v2874_v44, %v2872_v57  ;;  %7384 = vmatprep.subr.bf16.mxu0 %v16489_v61  ;;  %3296 = vrot.lane.b32.xlu0 %v16490_v26, %s8214_s26  ;;  %v11261_v57 = vmul.f32 %v11138_v49, %v2515_v10  ;;  %v16495_v44 = vld [vmem:[#allocation222_spill] sm:$0xff]  ;;  %v16496_v10 = vld [vmem:[#allocation111_spill] sm:$0xff] }
 0x441   : > { %v3142_v63 = vmul.f32 %v10881_v32, %v2961_v54  ;;  %v3143_v29 = vmul.f32 %v10885_v30, %v3089_v20  ;;  %3298 = vrot.lane.b32.xlu1 %v16491_v34, %s8214_s26  ;;  %v2644_v61 = vsel %vm2510_vm14, %v16478_v56, %v16479_v11  ;;  %v2518_v54 = vsel %vm2510_vm14, %v16495_v44, %v16494_v7  ;;  %v16497_v26 = vld [vmem:[#allocation110_spill] sm:$0xff] }
 0x442   : > { %v2876_v40 = vpop.permute.xlu0 %2875  ;;  %v2646_v27 = vsel %vm2510_vm14, %v16494_v7, %v16495_v44  ;;  %v16498_v34 = vpack.c.bf16 %v16496_v10, %v16497_v26  ;;  %v16501_v7 = vpack.c.bf16 %v16499_v62, %v16500_v17  ;;  %v11302_v17 = vmul.f32 %v11138_v49, %v2517_v3  ;;  %v16504_v26 = vld [vmem:[#allocation26_spill] sm:$0xff] }
 0x443   : > { %v7485_v20 = vpack.c.bf16 %v3142_v63, %v3140_v21  ;;  %v2878_v50 = vpop.permute.xlu1 %2877  ;;  %v7483_v56 = vpack.c.bf16 %v3143_v29, %v3141_v51  ;;  %v11292_v63 = vmul.f32 %v11155_v14, %v2644_v61  ;;  %v16502_v29 = vld [vmem:[#allocation99_spill] sm:$0xff]  ;;  %v11305_v62 = vmul.f32 %v11138_v49, %v2518_v54  ;;  %v16506_v54 = vld [vmem:[#allocation149_spill] sm:$0xff] }
 0x444   : > { %7386 = vmatpush1.bf16.msra.mxu0 %v16498_v34  ;;  %v2962_v43 = vsel %vm2947_vm13, %v2876_v40, %v2878_v50  ;;  %3300 = vrot.lane.b32.xlu0 %v16502_v29, %s8214_s26  ;;  %v11308_v61 = vmul.f32 %v11155_v14, %v2646_v27  ;;  %v3090_v0 = vsel %vm2947_vm13, %v2878_v50, %v2876_v40  ;;  %v16505_v34 = vld [vmem:[#allocation8_spill] sm:$0xff]  ;;  %v16510_v40 = vld [vmem:[#allocation126_spill] sm:$0xff]  ;;  %v16511_v21 = vld [vmem:[#allocation183_spill] sm:$0xff] }
 0x445   : > { %7388 = vmatprep.subr.bf16.mxu0 %v16501_v7  ;;  %3302 = vrot.lane.b32.xlu1 %v16503_v55, %s8214_s26  ;;  %v11312_v10 = vmul.f32 %v11155_v14, %v2645_v59  ;;  %v2519_v7 = vsel %vm2510_vm14, %v16505_v34, %v16504_v26  ;;  %v2647_v3 = vsel %vm2510_vm14, %v16504_v26, %v16505_v34  ;;  %v16507_v29 = vld [vmem:[#allocation148_spill] sm:$0xff] }
 0x446   : > { %7484 = vmatprep.subr.bf16.mxu1 %v7483_v56  ;;  %v2880_v44 = vpop.permute.xlu0 %2879  ;;  %v16508_v55 = vpack.c.bf16 %v16506_v54, %v16507_v29  ;;  %v16509_v50 = vld [vmem:[#allocation112_spill] sm:$0xff]  ;;  %v3144_v59 = vmul.f32 %v10881_v32, %v2962_v43  ;;  %v16513_v42 = vpack.c.bf16 %v16511_v21, %v16512_v23  ;;  %v3145_v26 = vmul.f32 %v10885_v30, %v3090_v0  ;;  %v16514_v54 = vld [vmem:[#allocation130_spill] sm:$0xff]  ;;  %v16520_v43 = vld [vmem:[#allocation185_spill] sm:$0xff] }
 0x447   : > { %7486 = vmatpush1.bf16.msra.mxu1 %v7485_v20  ;;  %v2882_v27 = vpop.permute.xlu1 %2881  ;;  %v2520_v56 = vsel %vm2510_vm14, %v16510_v40, %v16509_v50  ;;  %v16515_v29 = vld [vmem:[#allocation132_spill] sm:$0xff]  ;;  %v2648_v23 = vsel %vm2510_vm14, %v16509_v50, %v16510_v40  ;;  %v7403_v21 = vpack.c.bf16 %v11292_v63, %v11281_v25  ;;  %v16522_v45 = vpack.c.bf16 %v16520_v43, %v16521_v60  ;;  %v7068_v25 = vld [vmem:[%s15172_s2 + $0x30] sm:$0xff] }
 0x448   : > { %7390 = vmatpush1.bf16.msra.mxu0 %v16508_v55  ;;  %v2963_v51 = vsel %vm2947_vm13, %v2880_v44, %v2882_v27  ;;  %v3091_v11 = vsel %vm2947_vm13, %v2882_v27, %v2880_v44  ;;  %3304 = vrot.lane.b32.xlu0 %v16514_v54, %s8214_s26  ;;  %v16517_v0 = vld [vmem:[#allocation28_spill] sm:$0xff]  ;;  %v16518_v55 = vld [vmem:[#allocation162_spill] sm:$0xff]  ;;  %v16519_v27 = vld [vmem:[#allocation115_spill] sm:$0xff]  ;;  %v11361_v63 = vmul.f32 %v11138_v49, %v2519_v7 }
 0x449   : > { %7392 = vmatprep.subr.bf16.mxu0 %v16513_v42  ;;  %v3146_v34 = vmul.f32 %v10881_v32, %v2963_v51  ;;  %v3147_v20 = vmul.f32 %v10885_v30, %v3091_v11  ;;  %3306 = vrot.lane.b32.xlu1 %v16515_v29, %s8214_s26  ;;  %v16516_v51 = vld [vmem:[#allocation127_spill] sm:$0xff]  ;;  %v2522_v54 = vsel %vm2510_vm14, %v16519_v27, %v16518_v55 }
 0x44a   : > { %v2884_v42 = vpop.permute.xlu0 %2883  ;;  %v2521_v44 = vsel %vm2510_vm14, %v16517_v0, %v16516_v51  ;;  %v11364_v11 = vmul.f32 %v11155_v14, %v2647_v3  ;;  %v11367_v33 = vmul.f32 %v11138_v49, %v2520_v56  ;;  %v2650_v60 = vsel %vm2510_vm14, %v16518_v55, %v16519_v27  ;;  %v16524_v56 = vld [vmem:[#allocation134_spill] sm:$0xff] }
 0x44b   : > { %v7489_v29 = vpack.c.bf16 %v3146_v34, %v3144_v59  ;;  %v2886_v50 = vpop.permute.xlu1 %2885  ;;  %v7487_v40 = vpack.c.bf16 %v3147_v20, %v3145_v26  ;;  %v11376_v59 = vmul.f32 %v11155_v14, %v2648_v23  ;;  %v2649_v7 = vsel %vm2510_vm14, %v16516_v51, %v16517_v0  ;;  %v16525_v26 = vld [vmem:[#allocation135_spill] sm:$0xff]  ;;  %v16527_v0 = vld [vmem:[#allocation152_spill] sm:$0xff] }
 0x44c   : > { %7394 = vmatpush1.bf16.msra.mxu0 %v16522_v45  ;;  %v16523_v45 = vpack.c.bf16 %v11171_v39, %v11190_v16  ;;  %v2964_v3 = vsel %vm2947_vm13, %v2884_v42, %v2886_v50  ;;  %3308 = vrot.lane.b32.xlu0 %v16524_v56, %s8214_s26  ;;  %v7071_v39 = vld [vmem:[%s15172_s2 + $0x48] sm:$0xff]  ;;  %v11390_v16 = vmul.f32 %v11138_v49, %v2521_v44  ;;  %v16526_v51 = vld [vmem:[#allocation163_spill] sm:$0xff] }
 0x44d   : > { %3310 = vrot.lane.b32.xlu1 %v16525_v26, %s8214_s26  ;;  %v11393_v34 = vmul.f32 %v11138_v49, %v2522_v54  ;;  %v3092_v20 = vsel %vm2947_vm13, %v2886_v50, %v2884_v42  ;;  %7488 = vmatprep.subr.bf16.mxu1 %v7487_v40  ;;  %v11397_v23 = vmul.f32 %v11155_v14, %v2650_v60 }
 0x44e   : > { %7396 = vmatprep.subr.bf16.mxu0 %v16523_v45  ;;  %v2888_v43 = vpop.permute.xlu0 %2887  ;;  %v2523_v55 = vsel %vm2510_vm14, %v16527_v0, %v16526_v51  ;;  %v2651_v44 = vsel %vm2510_vm14, %v16526_v51, %v16527_v0  ;;  %v16528_v27 = vpack.c.bf16 %v11165_v53, %v11187_v22  ;;  %7490 = vmatpush1.bf16.msra.mxu1 %v7489_v29  ;;  %v16530_v22 = vld [vmem:[#allocation168_spill] sm:$0xff]  ;;  %v16531_v29 = vld [vmem:[#allocation170_spill] sm:$0xff] }
 0x44f   : > { %2374 = vmatmul.mubr.f32.vlgmr.msra.gmra.mrb[32].mxu0 %v7068_v25  ;;  %v2890_v42 = vpop.permute.xlu1 %2889  ;;  %v3148_v54 = vmul.f32 %v10881_v32, %v2964_v3  ;;  %v16529_v25 = vpack.c.bf16 %v11230_v4, %v11258_v12  ;;  %v3149_v60 = vmul.f32 %v10885_v30, %v3092_v20  ;;  %v7413_v3 = vpack.c.bf16 %v11367_v33, %v11361_v63  ;;  %v16532_v4 = vld [vmem:[#allocation37_spill] sm:$0xff] }
 0x450   : > { %7398 = vmatpush1.bf16.msra.mxu0 %v16528_v27  ;;  %v2965_v50 = vsel %vm2947_vm13, %v2888_v43, %v2890_v42  ;;  %v3093_v40 = vsel %vm2947_vm13, %v2890_v42, %v2888_v43  ;;  %2810 = vmatprep.mubr.f32.mxu0 %v7071_v39  ;;  %v11424_v56 = vmul.f32 %v11155_v14, %v2649_v7  ;;  %v16533_v12 = vld [vmem:[#allocation153_spill] sm:$0xff] }
 0x451   : > { %7400 = vmatprep.subr.bf16.mxu0 %v16529_v25  ;;  %v3150_v45 = vmul.f32 %v10881_v32, %v2965_v50  ;;  %v3151_v53 = vmul.f32 %v10885_v30, %v3093_v40  ;;  %3312 = vrot.lane.b32.xlu0 %v16530_v22, %s8214_s26  ;;  %v2524_v26 = vsel %vm2510_vm14, %v16533_v12, %v16532_v4 }
 0x452   : > { %3314 = vrot.lane.b32.xlu1 %v16531_v29, %s8214_s26  ;;  %v2892_v39 = vpop.permute.xlu0 %2891  ;;  %v7411_v20 = vpack.c.bf16 %v11376_v59, %v11364_v11  ;;  %v2652_v51 = vsel %vm2510_vm14, %v16532_v4, %v16533_v12  ;;  %v16534_v7 = vpack.c.bf16 %v11226_v36, %v11223_v48  ;;  %v11440_v50 = vmul.f32 %v11138_v49, %v2523_v55  ;;  %v16535_v11 = vld [vmem:[#allocation188_spill] sm:$0xff]  ;;  %v16536_v59 = vld [vmem:[#allocation197_spill] sm:$0xff]  ;;  %v16540_v12 = vld [vmem:[#allocation187_spill] sm:$0xff] }
 0x453   : > { %v7493_v0 = vpack.c.bf16 %v3150_v45, %v3148_v54  ;;  %v2894_v27 = vpop.permute.xlu1 %2893  ;;  %v7491_v42 = vpack.c.bf16 %v3151_v53, %v3149_v60  ;;  %v11443_v40 = vmul.f32 %v11155_v14, %v2651_v44  ;;  %v2526_v25 = vsel %vm2510_vm14, %v16536_v59, %v16535_v11  ;;  %v16537_v55 = vld [vmem:[#allocation172_spill] sm:$0xff]  ;;  %v16538_v44 = vld [vmem:[#allocation173_spill] sm:$0xff] }
 0x454   : > { %7402 = vmatpush1.bf16.msra.mxu0 %v16534_v7  ;;  %v7415_v54 = vpack.c.bf16 %v11397_v23, %v11424_v56  ;;  %v11451_v45 = vmul.f32 %v11138_v49, %v2524_v26  ;;  %v2654_v48 = vsel %vm2510_vm14, %v16535_v11, %v16536_v59  ;;  %v2966_v36 = vsel %vm2947_vm13, %v2892_v39, %v2894_v27  ;;  %v16539_v60 = vld [vmem:[#allocation20_spill] sm:$0xff] }
 0x455   : > { %7404 = vmatprep.subr.bf16.mxu0 %v7403_v21  ;;  %3316 = vrot.lane.b32.xlu0 %v16537_v55, %s8214_s26  ;;  %v11462_v21 = vmul.f32 %v11155_v14, %v2652_v51  ;;  %v11466_v53 = vrot.slane %v11134_v15, %v16539_v60  ;;  %v11470_v22 = vrot.slane %v11151_v6, %v16539_v60  ;;  %v16541_v26 = vld [vmem:[#allocation196_spill] sm:$0xff]  ;;  %v16547_v60 = vld [vmem:[#allocation214_spill] sm:$0xff] }
 0x456   : > { %3318 = vrot.lane.b32.xlu1 %v16538_v44, %s8214_s26  ;;  %v3094_v29 = vsel %vm2947_vm13, %v2894_v27, %v2892_v39  ;;  %7492 = vmatprep.subr.bf16.mxu1 %v7491_v42  ;;  %v2896_v4 = vpop.permute.xlu0 %2895  ;;  %v2525_v7 = vsel %vm2510_vm14, %v16541_v26, %v16540_v12  ;;  %v2653_v51 = vsel %vm2510_vm14, %v16540_v12, %v16541_v26  ;;  %v16548_v12 = vld [vmem:[#allocation207_spill] sm:$0xff] }
 0x457   : > { %v11480_v11 = vmul.f32 %v11138_v49, %v2526_v25  ;;  %v16542_v15 = vpack.c.bf16 %v11242_v46, %v11261_v57  ;;  %7494 = vmatpush1.bf16.msra.mxu1 %v7493_v0  ;;  %v2898_v6 = vpop.permute.xlu1 %2897  ;;  %v11486_v39 = vmul.f32 %v11155_v14, %v2654_v48  ;;  %v3152_v27 = vmul.f32 %v10881_v32, %v2966_v36  ;;  %v16544_v0 = vld [vmem:[#allocation27_spill] sm:$0xff]  ;;  %v16545_v48 = vld [vmem:[#allocation29_spill] sm:$0xff] }
 0x458   : > { %v2967_v42 = vsel %vm2947_vm13, %v2896_v4, %v2898_v6  ;;  %v3095_v59 = vsel %vm2947_vm13, %v2898_v6, %v2896_v4  ;;  %v16543_v55 = vpack.c.bf16 %v11308_v61, %v11312_v10  ;;  %v3153_v25 = vmul.f32 %v10885_v30, %v3094_v29  ;;  %v16546_v10 = vld [vmem:[#allocation206_spill] sm:$0xff]  ;;  %v16549_v26 = vld [vmem:[#allocation215_spill] sm:$0xff] }
 0x459   : > { %7406 = vmatpush1.bf16.msra.mxu0 %v16542_v15  ;;  %v3154_v46 = vmul.f32 %v10881_v32, %v2967_v42  ;;  %v3155_v57 = vmul.f32 %v10885_v30, %v3095_v59  ;;  %3320 = vrot.lane.b32.xlu0 %v16544_v0, %s8214_s26  ;;  %v11504_v44 = vmul.f32 %v11138_v49, %v2525_v7  ;;  %v16551_v0 = vld [vmem:[#allocation225_spill] sm:$0xff] }
 0x45a   : > { %7408 = vmatprep.subr.bf16.mxu0 %v16543_v55  ;;  %3322 = vrot.lane.b32.xlu1 %v16545_v48, %s8214_s26  ;;  %v11507_v61 = vmul.f32 %v11155_v14, %v2653_v51  ;;  %v2527_v29 = vsel %vm2510_vm14, %v16547_v60, %v16546_v10  ;;  %v2900_v4 = vpop.permute.xlu0 %2899  ;;  %v2528_v15 = vsel %vm2510_vm14, %v16549_v26, %v16548_v12  ;;  %v16552_v48 = vld [vmem:[#allocation233_spill] sm:$0xff] }
 0x45b   : > { %v2656_v6 = vsel %vm2510_vm14, %v16548_v12, %v16549_v26  ;;  %v7497_v42 = vpack.c.bf16 %v3154_v46, %v3152_v27  ;;  %v16550_v7 = vpack.c.bf16 %v11305_v62, %v11302_v17  ;;  %v2902_v51 = vpop.permute.xlu1 %2901  ;;  %v7495_v59 = vpack.c.bf16 %v3155_v57, %v3153_v25  ;;  %v16553_v46 = vld [vmem:[#allocation34_spill] sm:$0xff]  ;;  %v16555_v12 = vld [vmem:[#allocation224_spill] sm:$0xff] }
 0x45c   : > { %v7425_v55 = vpack.c.bf16 %v11480_v11, %v11504_v44  ;;  %v2530_v36 = vsel %vm2510_vm14, %v16552_v48, %v16551_v0  ;;  %v7419_v43 = vpack.c.bf16 %v11462_v21, %v11443_v40  ;;  %v7423_v27 = vpack.c.bf16 %v11486_v39, %v11507_v61  ;;  %v16556_v26 = vld [vmem:[#allocation232_spill] sm:$0xff]  ;;  %v16577_v11 = vld [vmem:[#allocation154_spill] sm:$0xff] }
 0x45d   : > { %7410 = vmatpush1.bf16.msra.mxu0 %v16550_v7  ;;  %v2655_v17 = vsel %vm2510_vm14, %v16546_v10, %v16547_v60  ;;  %v2658_v62 = vsel %vm2510_vm14, %v16551_v0, %v16552_v48  ;;  %v2968_v25 = vsel %vm2947_vm13, %v2900_v4, %v2902_v51  ;;  %3324 = vrot.lane.b32.xlu0 %v16553_v46, %s8214_s26  ;;  %v16560_v46 = vld [vmem:[#allocation262_spill] sm:$0xff]  ;;  %v16578_v44 = vld [vmem:[#allocation164_spill] sm:$0xff] }
 0x45e   : > { %7412 = vmatprep.subr.bf16.mxu0 %v7411_v20  ;;  %v16554_v20 = vld [vmem:[#allocation36_spill] sm:$0xff]  ;;  %v11542_v40 = vmul.f32 %v11138_v49, %v2527_v29  ;;  %v11545_v21 = vmul.f32 %v11138_v49, %v2528_v15  ;;  %v11548_v57 = vmul.f32 %v11155_v14, %v2656_v6  ;;  %v3096_v10 = vsel %vm2947_vm13, %v2902_v51, %v2900_v4  ;;  %v2904_v60 = vpop.permute.xlu0 %2903 }
 0x45f   : > { %3326 = vrot.lane.b32.xlu1 %v16554_v20, %s8214_s26  ;;  %7496 = vmatprep.subr.bf16.mxu1 %v7495_v59  ;;  %v2529_v7 = vsel %vm2510_vm14, %v16556_v26, %v16555_v12  ;;  %v2657_v0 = vsel %vm2510_vm14, %v16555_v12, %v16556_v26  ;;  %v11558_v29 = vmul.f32 %v11138_v49, %v2530_v36  ;;  %v2906_v15 = vpop.permute.xlu1 %2905 }
 0x460   : > { %7498 = vmatpush1.bf16.msra.mxu1 %v7497_v42  ;;  %v11564_v4 = vmul.f32 %v11155_v14, %v2658_v62  ;;  %v3156_v6 = vmul.f32 %v10881_v32, %v2968_v25  ;;  %v2969_v51 = vsel %vm2947_vm13, %v2904_v60, %v2906_v15  ;;  %v3097_v59 = vsel %vm2947_vm13, %v2906_v15, %v2904_v60  ;;  %v16558_v42 = vld [vmem:[#allocation45_spill] sm:$0xff]  ;;  %v16559_v25 = vld [vmem:[#allocation255_spill] sm:$0xff]  ;;  %v16563_v15 = vld [vmem:[#allocation272_spill] sm:$0xff] }
 0x461   : > { %7414 = vmatpush1.bf16.msra.mxu0 %v7413_v3  ;;  %v3157_v36 = vmul.f32 %v10885_v30, %v3096_v10  ;;  %v3158_v33 = vmul.f32 %v10881_v32, %v2969_v51  ;;  %v3159_v63 = vmul.f32 %v10885_v30, %v3097_v59  ;;  %v16557_v3 = vld [vmem:[#allocation44_spill] sm:$0xff]  ;;  %v2712_v48 = vmul.f32 %v11155_v14, %v2655_v17 }
 0x462   : > { %7416 = vmatprep.subr.bf16.mxu0 %v7415_v54  ;;  %3328 = vrot.lane.b32.xlu0 %v16557_v3, %s8214_s26  ;;  %v7429_v62 = vpack.c.bf16 %v11545_v21, %v11542_v40  ;;  %v11583_v23 = vmul.f32 %v11138_v49, %v2529_v7  ;;  %v11586_v56 = vmul.f32 %v11155_v14, %v2657_v0  ;;  %v2908_v54 = vpop.permute.xlu0 %2907  ;;  %v16562_v0 = vld [vmem:[#allocation270_spill] sm:$0xff] }
 0x463   : > { %3330 = vrot.lane.b32.xlu1 %v16558_v42, %s8214_s26  ;;  %v2532_v20 = vsel %vm2510_vm14, %v16560_v46, %v16559_v25  ;;  %v2660_v10 = vsel %vm2510_vm14, %v16559_v25, %v16560_v46  ;;  %v7501_v60 = vpack.c.bf16 %v3158_v33, %v3156_v6  ;;  %v16561_v17 = vpack.c.bf16 %v11393_v34, %v11390_v16  ;;  %v2910_v12 = vpop.permute.xlu1 %2909  ;;  %v16564_v6 = vld [vmem:[#allocation254_spill] sm:$0xff]  ;;  %v16565_v33 = vld [vmem:[#allocation240_spill] sm:$0xff] }
 0x464   : > { %v7499_v26 = vpack.c.bf16 %v3159_v63, %v3157_v36  ;;  %v7433_v7 = vpack.c.bf16 %v11558_v29, %v11583_v23  ;;  %v2534_v51 = vsel %vm2510_vm14, %v16563_v15, %v16562_v0  ;;  %v7427_v59 = vpack.c.bf16 %v11548_v57, %v2712_v48  ;;  %v16566_v63 = vld [vmem:[#allocation48_spill] sm:$0xff] }
 0x465   : > { %7418 = vmatpush1.bf16.msra.mxu0 %v16561_v17  ;;  %v7431_v3 = vpack.c.bf16 %v11564_v4, %v11586_v56  ;;  %v2531_v16 = vsel %vm2510_vm14, %v16565_v33, %v16564_v6  ;;  %v2662_v34 = vsel %vm2510_vm14, %v16562_v0, %v16563_v15  ;;  %v2970_v36 = vsel %vm2947_vm13, %v2908_v54, %v2910_v12  ;;  %v16568_v17 = vld [vmem:[#allocation76_spill] sm:$0xff]  ;;  %v16569_v0 = vld [vmem:[#allocation71_spill] sm:$0xff] }
 0x466   : > { %7420 = vmatprep.subr.bf16.mxu0 %v7419_v43  ;;  %3332 = vrot.lane.b32.xlu0 %v16566_v63, %s8214_s26  ;;  %v16567_v43 = vld [vmem:[#allocation50_spill] sm:$0xff]  ;;  %v2659_v57 = vsel %vm2510_vm14, %v16564_v6, %v16565_v33  ;;  %v11620_v42 = vmul.f32 %v11138_v49, %v2532_v20  ;;  %v11623_v48 = vmul.f32 %v11155_v14, %v2660_v10  ;;  %v2912_v46 = vpop.permute.xlu0 %2911 }
 0x467   : > { %3334 = vrot.lane.b32.xlu1 %v16567_v43, %s8214_s26  ;;  %v3098_v25 = vsel %vm2947_vm13, %v2910_v12, %v2908_v54  ;;  %7500 = vmatprep.subr.bf16.mxu1 %v7499_v26  ;;  %v2533_v15 = vsel %vm2510_vm14, %v16569_v0, %v16568_v17  ;;  %v2661_v63 = vsel %vm2510_vm14, %v16568_v17, %v16569_v0  ;;  %v2914_v10 = vpop.permute.xlu1 %2913 }
 0x468   : > { %v11633_v6 = vmul.f32 %v11138_v49, %v2534_v51  ;;  %v16570_v20 = vpack.c.bf16 %v11451_v45, %v11440_v50  ;;  %7502 = vmatpush1.bf16.msra.mxu1 %v7501_v60  ;;  %v11639_v54 = vmul.f32 %v11155_v14, %v2662_v34  ;;  %v3160_v12 = vmul.f32 %v10881_v32, %v2970_v36  ;;  %v16571_v60 = vld [vmem:[#allocation56_spill] sm:$0xff]  ;;  %v16572_v34 = vld [vmem:[#allocation57_spill] sm:$0xff] }
 0x469   : > { %v2971_v26 = vsel %vm2947_vm13, %v2912_v46, %v2914_v10  ;;  %v3099_v33 = vsel %vm2947_vm13, %v2914_v10, %v2912_v46  ;;  %v3161_v51 = vmul.f32 %v10885_v30, %v3098_v25  ;;  %v11655_v36 = vmul.f32 %v11138_v49, %v2531_v16  ;;  %v16573_v25 = vld [vmem:[#allocation5_spill] sm:$0xff]  ;;  %v16574_v46 = vld [vmem:[#allocation114_spill] sm:$0xff] }
 0x46a   : > { %7422 = vmatpush1.bf16.msra.mxu0 %v16570_v20  ;;  %v3162_v50 = vmul.f32 %v10881_v32, %v2971_v26  ;;  %v3163_v45 = vmul.f32 %v10885_v30, %v3099_v33  ;;  %3336 = vrot.lane.b32.xlu0 %v16571_v60, %s8214_s26  ;;  %v2720_v43 = vmul.f32 %v11155_v14, %v2659_v57  ;;  %v16575_v33 = vld [vmem:[#allocation128_spill] sm:$0xff] }
 0x46b   : > { %7424 = vmatprep.subr.bf16.mxu0 %v7423_v27  ;;  %3338 = vrot.lane.b32.xlu1 %v16572_v34, %s8214_s26  ;;  %v11659_v39 = vmul.f32 %v11138_v49, %v2533_v15  ;;  %v11662_v61 = vmul.f32 %v11155_v14, %v2661_v63  ;;  %v2916_v27 = vpop.permute.xlu0 %2915  ;;  %v2536_v17 = vsel %vm2510_vm14, %v16574_v46, %v16573_v25  ;;  %v2918_v16 = vpop.permute.xlu1 %2917  ;;  %v16582_v63 = vld [vmem:[#allocation129_spill] sm:$0xff] }
 0x46c   : > { %v2664_v0 = vsel %vm2510_vm14, %v16573_v25, %v16574_v46  ;;  %v7505_v20 = vpack.c.bf16 %v3162_v50, %v3160_v12  ;;  %v7503_v57 = vpack.c.bf16 %v3163_v45, %v3161_v51  ;;  %v7437_v15 = vpack.c.bf16 %v11620_v42, %v11655_v36  ;;  %v16576_v12 = vld [vmem:[#allocation82_spill] sm:$0xff]  ;;  %v16579_v45 = vld [vmem:[#allocation59_spill] sm:$0xff]  ;;  %v16581_v46 = vld [vmem:[#allocation117_spill] sm:$0xff] }
 0x46d   : > { %v7435_v10 = vpack.c.bf16 %v11623_v48, %v2720_v43  ;;  %v7439_v26 = vpack.c.bf16 %v11639_v54, %v11662_v61  ;;  %v2535_v50 = vsel %vm2510_vm14, %v16576_v12, %v16575_v33  ;;  %v2972_v51 = vsel %vm2947_vm13, %v2916_v27, %v2918_v16 }
 0x46e   : > { %7426 = vmatpush1.bf16.msra.mxu0 %v7425_v55  ;;  %v2538_v55 = vsel %vm2510_vm14, %v16578_v44, %v16577_v11  ;;  %3340 = vrot.lane.b32.xlu0 %v16579_v45, %s8214_s26  ;;  %v2663_v48 = vsel %vm2510_vm14, %v16575_v33, %v16576_v12  ;;  %v11695_v60 = vmul.f32 %v11138_v49, %v2536_v17 }
 0x46f   : > { %7428 = vmatprep.subr.bf16.mxu0 %v7427_v59  ;;  %v16580_v59 = vld [vmem:[#allocation63_spill] sm:$0xff]  ;;  %v11698_v34 = vmul.f32 %v11155_v14, %v2664_v0  ;;  %v3100_v43 = vsel %vm2947_vm13, %v2918_v16, %v2916_v27  ;;  %7504 = vmatprep.subr.bf16.mxu1 %v7503_v57  ;;  %v2920_v25 = vpop.permute.xlu0 %2919  ;;  %v2537_v45 = vsel %vm2510_vm14, %v16582_v63, %v16581_v46  ;;  %v2922_v27 = vpop.permute.xlu1 %2921 }
 0x470   : > { %3342 = vrot.lane.b32.xlu1 %v16580_v59, %s8214_s26  ;;  %v2665_v59 = vsel %vm2510_vm14, %v16581_v46, %v16582_v63  ;;  %v2666_v17 = vsel %vm2510_vm14, %v16577_v11, %v16578_v44  ;;  %7506 = vmatpush1.bf16.msra.mxu1 %v7505_v20  ;;  %v11714_v0 = vmul.f32 %v11138_v49, %v2538_v55  ;;  %v16584_v20 = vld [vmem:[#allocation69_spill] sm:$0xff]  ;;  %v16585_v44 = vld [vmem:[#allocation155_spill] sm:$0xff] }
 0x471   : > { %v3164_v16 = vmul.f32 %v10881_v32, %v2972_v51  ;;  %v2973_v57 = vsel %vm2947_vm13, %v2920_v25, %v2922_v27  ;;  %v3101_v33 = vsel %vm2947_vm13, %v2922_v27, %v2920_v25  ;;  %v3165_v63 = vmul.f32 %v10885_v30, %v3100_v43  ;;  %v16586_v55 = vld [vmem:[#allocation165_spill] sm:$0xff]  ;;  %v16588_v25 = vld [vmem:[#allocation198_spill] sm:$0xff] }
 0x472   : > { %7430 = vmatpush1.bf16.msra.mxu0 %v7429_v62  ;;  %v3166_v40 = vmul.f32 %v10881_v32, %v2973_v57  ;;  %v3167_v21 = vmul.f32 %v10885_v30, %v3101_v33  ;;  %v16583_v62 = vld [vmem:[#allocation68_spill] sm:$0xff]  ;;  %v11730_v12 = vmul.f32 %v11138_v49, %v2535_v50  ;;  %v2728_v11 = vmul.f32 %v11155_v14, %v2663_v48  ;;  %v16587_v43 = vld [vmem:[#allocation189_spill] sm:$0xff] }
 0x473   : > { %7432 = vmatprep.subr.bf16.mxu0 %v7431_v3  ;;  %3344 = vrot.lane.b32.xlu0 %v16583_v62, %s8214_s26  ;;  %v11734_v4 = vmul.f32 %v11138_v49, %v2537_v45  ;;  %v11737_v56 = vmul.f32 %v11155_v14, %v2666_v17  ;;  %v2924_v3 = vpop.permute.xlu0 %2923  ;;  %v2539_v51 = vsel %vm2510_vm14, %v16586_v55, %v16585_v44  ;;  %v2926_v50 = vpop.permute.xlu1 %2925 }
 0x474   : > { %3346 = vrot.lane.b32.xlu1 %v16584_v20, %s8214_s26  ;;  %v2540_v46 = vsel %vm2510_vm14, %v16588_v25, %v16587_v43  ;;  %v7509_v27 = vpack.c.bf16 %v3166_v40, %v3164_v16  ;;  %v7507_v48 = vpack.c.bf16 %v3167_v21, %v3165_v63  ;;  %v7445_v45 = vpack.c.bf16 %v11695_v60, %v11730_v12 }
 0x475   : > { %v11751_v17 = vmul.f32 %v11155_v14, %v2665_v59  ;;  %v2667_v57 = vsel %vm2510_vm14, %v16585_v44, %v16586_v55  ;;  %v2668_v16 = vsel %vm2510_vm14, %v16587_v43, %v16588_v25  ;;  %v7449_v29 = vpack.c.bf16 %v11714_v0, %v11734_v4  ;;  %v16590_v59 = vld [vmem:[#allocation77_spill] sm:$0xff]  ;;  %v16602_v0 = vld [vmem:[#allocation122_spill] sm:$0xff] }
 0x476   : > { %7434 = vmatpush1.bf16.msra.mxu0 %v7433_v7  ;;  %v2974_v23 = vsel %vm2947_vm13, %v2924_v3, %v2926_v50  ;;  %v16589_v7 = vld [vmem:[#allocation72_spill] sm:$0xff]  ;;  %v7443_v33 = vpack.c.bf16 %v11698_v34, %v2728_v11  ;;  %v11768_v63 = vmul.f32 %v11138_v49, %v2539_v51  ;;  %v11771_v40 = vmul.f32 %v11138_v49, %v2540_v46  ;;  %v16591_v34 = vld [vmem:[#allocation190_spill] sm:$0xff]  ;;  %v16592_v11 = vld [vmem:[#allocation199_spill] sm:$0xff] }
 0x477   : > { %7436 = vmatprep.subr.bf16.mxu0 %v7435_v10  ;;  %3348 = vrot.lane.b32.xlu0 %v16589_v7, %s8214_s26  ;;  %v3102_v10 = vsel %vm2947_vm13, %v2926_v50, %v2924_v3  ;;  %v2928_v21 = vpop.permute.xlu0 %2927  ;;  %v7447_v62 = vpack.c.bf16 %v11737_v56, %v11751_v17  ;;  %v11777_v20 = vmul.f32 %v11155_v14, %v2667_v57  ;;  %v2930_v3 = vpop.permute.xlu1 %2929  ;;  %v16594_v50 = vld [vmem:[#allocation208_spill] sm:$0xff]  ;;  %v16596_v17 = vld [vmem:[#allocation31_spill] sm:$0xff]  ;;  %v16597_v57 = vld [vmem:[#allocation30_spill] sm:$0xff] }
 0x478   : > { %3350 = vrot.lane.b32.xlu1 %v16590_v59, %s8214_s26  ;;  %7508 = vmatprep.subr.bf16.mxu1 %v7507_v48  ;;  %v11780_v44 = vmul.f32 %v11155_v14, %v2668_v16  ;;  %v2541_v55 = vsel %vm2510_vm14, %v16592_v11, %v16591_v34  ;;  %v2669_v56 = vsel %vm2510_vm14, %v16591_v34, %v16592_v11  ;;  %v16595_v48 = vld [vmem:[#allocation216_spill] sm:$0xff] }
 0x479   : > { %7510 = vmatpush1.bf16.msra.mxu1 %v7509_v27  ;;  %v3168_v51 = vmul.f32 %v10881_v32, %v2974_v23  ;;  %v2975_v43 = vsel %vm2947_vm13, %v2928_v21, %v2930_v3  ;;  %v3103_v25 = vsel %vm2947_vm13, %v2930_v3, %v2928_v21  ;;  %v3169_v46 = vmul.f32 %v10885_v30, %v3102_v10 }
 0x47a   : > { %7438 = vmatpush1.bf16.msra.mxu0 %v7437_v15  ;;  %v3170_v42 = vmul.f32 %v10881_v32, %v2975_v43  ;;  %v3171_v36 = vmul.f32 %v10885_v30, %v3103_v25  ;;  %v16593_v15 = vld [vmem:[#allocation86_spill] sm:$0xff]  ;;  %v7453_v27 = vpack.c.bf16 %v11771_v40, %v11768_v63  ;;  %v2542_v54 = vsel %vm2510_vm14, %v16595_v48, %v16594_v50  ;;  %v8136_v43 = vld [vmem:[%s8314_s21] sm:$0xff]  ;;  %v16606_v40 = vld [vmem:[#allocation136_spill] sm:$0xff] }
 0x47b   : > { %7440 = vmatprep.subr.bf16.mxu0 %v7439_v26  ;;  %3352 = vrot.lane.b32.xlu0 %v16593_v15, %s8214_s26  ;;  %v3709_v61 = vsel %vm1520_vm11, %v11022_v8, %v11010_v19  ;;  %v2932_v26 = vpop.permute.xlu0 %2931  ;;  %v3728_v16 = vcombine.low %v16597_v57, %v16596_v17  ;;  %v2670_v23 = vsel %vm2510_vm14, %v16594_v50, %v16595_v48  ;;  %v2934_v10 = vpop.permute.xlu1 %2933 }
 0x47c   : > { %3354 = vrot.lane.b32.xlu1 %v16386_v37, %s8214_s26  ;;  %v3712_v37 = vsel %vm1520_vm11, %v11010_v19, %v11022_v8  ;;  %v7513_v7 = vpack.c.bf16 %v3170_v42, %v3168_v51  ;;  %v16598_v59 = vpack.c.bf16 %v11633_v6, %v11659_v39  ;;  %v7511_v21 = vpack.c.bf16 %v3171_v36, %v3169_v46  ;;  %v16599_v6 = vld [vmem:[#allocation160_spill] sm:$0xff]  ;;  %v16601_v46 = vld [vmem:[#allocation123_spill] sm:$0xff] }
 0x47d   : > { %v11824_v34 = vmul.f32 %v11138_v49, %v2541_v55  ;;  %v11827_v11 = vmul.f32 %v11155_v14, %v2669_v56  ;;  %v3698_v3 = vsel %vm1084_vm10, %v11036_v58, %v11027_v9  ;;  %v7451_v19 = vpack.c.bf16 %v11780_v44, %v11777_v20 }
 0x47e   : > { %7442 = vmatpush1.bf16.msra.mxu0 %v16598_v59  ;;  %v11835_v8 = vmul.f32 %v11138_v49, %v2542_v54  ;;  %v3714_v39 = vmul.f32 %v3709_v61, %v16599_v6  ;;  %v2976_v51 = vsel %vm2947_vm13, %v2932_v26, %v2934_v10  ;;  %v11844_v55 = vmul.f32 %v11155_v14, %v2670_v23 }
 0x47f   : > { %7444 = vmatprep.subr.bf16.mxu0 %v7443_v33  ;;  %3356 = vrot.lane.b32.xlu0 %v16387_v5, %s8214_s26  ;;  %v16600_v33 = vld [vmem:[#allocation151_spill] sm:$0xff]  ;;  %v3104_v20 = vsel %vm2947_vm13, %v2934_v10, %v2932_v26  ;;  %v2936_v44 = vpop.permute.xlu0 %2935  ;;  %v11851_v25 = vmul.f32 %v8136_v43, %v3728_v16  ;;  %v3703_v42 = vmul.f32 %v3698_v3, %v16601_v46  ;;  %v2938_v36 = vpop.permute.xlu1 %2937  ;;  %v16604_v3 = vld [vmem:[#allocation217_spill] sm:$0xff] }
 0x480   : > { %3358 = vrot.lane.b32.xlu1 %v8964_v35, %s8214_s26  ;;  %v11847_v56 = vmul.f32 %v3712_v37, %v16600_v33  ;;  %7512 = vmatprep.subr.bf16.mxu1 %v7511_v21  ;;  %v3720_v5 = vsel %vm1957_vm12, %v11050_v52, %v11041_v31  ;;  %v3746_v35 = vsel %vm2947_vm13, %v11055_v28, %v11064_v38  ;;  %v3767_v61 = vrot.slane %v3714_v39, 4 }
 0x481   : > { %7514 = vmatpush1.bf16.msra.mxu1 %v7513_v7  ;;  %v3750_v15 = vsel %vm2947_vm13, %v11064_v38, %v11055_v28  ;;  %v3172_v50 = vmul.f32 %v10881_v32, %v2976_v51  ;;  %v2977_v48 = vsel %vm2947_vm13, %v2936_v44, %v2938_v36  ;;  %v3105_v54 = vsel %vm2947_vm13, %v2938_v36, %v2936_v44 }
 0x482   : > { %7446 = vmatpush1.bf16.msra.mxu0 %v7445_v45  ;;  %v3173_v26 = vmul.f32 %v10885_v30, %v3104_v20  ;;  %v3174_v17 = vmul.f32 %v10881_v32, %v2977_v48  ;;  %v3175_v60 = vmul.f32 %v10885_v30, %v3105_v54  ;;  %v7457_v28 = vpack.c.bf16 %v11835_v8, %v11824_v34 }
 0x483   : > { %7448 = vmatprep.subr.bf16.mxu0 %v7447_v62  ;;  %3360 = vrot.lane.b32.xlu0 %v9044_v24, %s8214_s26  ;;  %v3701_v38 = vsel %vm1084_vm10, %v11027_v9, %v11036_v58  ;;  %v3725_v12 = vmul.f32 %v3720_v5, %v10535_v2  ;;  %v3751_v45 = vmul.f32 %v3746_v35, %v10881_v32  ;;  %v2940_v62 = vpop.permute.xlu0 %2939 }
 0x484   : > { %3362 = vrot.lane.b32.xlu1 %v9046_v13, %s8214_s26  ;;  %v3723_v57 = vsel %vm1957_vm12, %v11041_v31, %v11050_v52  ;;  %v3752_v24 = vmul.f32 %v3750_v15, %v10885_v30  ;;  %v7517_v16 = vpack.c.bf16 %v3174_v17, %v3172_v50  ;;  %v2942_v13 = vpop.permute.xlu1 %2941  ;;  %v7515_v23 = vpack.c.bf16 %v3175_v60, %v3173_v26  ;;  %v16608_v15 = vld [vmem:[#allocation144_spill] sm:$0xff]  ;;  %v16609_v50 = vld [vmem:[#allocation145_spill] sm:$0xff] }
 0x485   : > { %v3735_v2 = vsel %vm2510_vm14, %v11069_v1, %v11078_v47  ;;  %v3739_v9 = vsel %vm2510_vm14, %v11078_v47, %v11069_v1  ;;  %v7455_v58 = vpack.c.bf16 %v11844_v55, %v11827_v11  ;;  %v3771_v31 = vcombine.low %v11851_v25, %v11851_v25  ;;  %v16603_v47 = vld [vmem:[#allocation241_spill] sm:$0xff] }
 0x486   : > { %7450 = vmatpush1.bf16.msra.mxu0 %v7449_v29  ;;  %v3766_v52 = vrot.slane %v11847_v56, 4  ;;  %v3702_v4 = vmul.f32 %v3701_v38, %v16602_v0  ;;  %v2978_v29 = vsel %vm2947_vm13, %v2940_v62, %v2942_v13  ;;  %v3780_v1 = vsel %vm461_vm3, %v3703_v42, %v3767_v61  ;;  %7516 = vmatprep.subr.bf16.mxu1 %v7515_v23  ;;  %v7070_v42 = vld [vmem:[%s15172_s2 + $0x40] sm:$0xff] }
 0x487   : > { %7452 = vmatprep.subr.bf16.mxu0 %v7451_v19  ;;  %3364 = vrot.lane.b32.xlu0 %v16155_v18, %s8214_s26  ;;  %v3724_v37 = vmul.f32 %v3723_v57, %v16603_v47  ;;  %v3775_v7 = vrot.slane %v3751_v45, 4  ;;  %v3106_v59 = vsel %vm2947_vm13, %v2942_v13, %v2940_v62  ;;  %v2944_v10 = vpop.permute.xlu0 %2943  ;;  %v3782_v21 = vsel %vm461_vm3, %v3725_v12, %v11851_v25  ;;  %v16605_v19 = vld [vmem:[#allocation209_spill] sm:$0xff]  ;;  %v3791_v62 = vld [vmem:[%s15173_s3 + $0x30] sm:$0xff] }
 0x488   : > { %3366 = vrot.lane.b32.xlu1 %v9070_v41, %s8214_s26  ;;  %v3776_v34 = vrot.slane %v3752_v24, 4  ;;  %v3740_v11 = vmul.f32 %v3735_v2, %v11138_v49  ;;  %v3741_v18 = vmul.f32 %v3739_v9, %v11155_v14  ;;  %v3761_v41 = vsel %vm3384_vm15, %v16605_v19, %v16604_v3  ;;  %7518 = vmatpush1.bf16.msra.mxu1 %v7517_v16  ;;  %v2946_v8 = vpop.permute.xlu1 %2945  ;;  %v7075_v24 = vld [vmem:[%s15172_s2 + $0x68] sm:$0xff]  ;;  %v16613_v9 = vld [vmem:[#allocation175_spill] sm:$0xff] }
 0x489   : > { %v3757_v6 = vsel %vm3384_vm15, %v16604_v3, %v16605_v19  ;;  %v3176_v39 = vmul.f32 %v10881_v32, %v2978_v29  ;;  %v2979_v49 = vsel %vm2947_vm13, %v2944_v10, %v2946_v8  ;;  %v3107_v14 = vsel %vm2947_vm13, %v2946_v8, %v2944_v10  ;;  %v16612_v2 = vld [vmem:[#allocation174_spill] sm:$0xff]  ;;  %v16614_v29 = vld [vmem:[#allocation180_spill] sm:$0xff] }
 0x48a   : > { %7454 = vmatpush1.bf16.msra.mxu0 %v7453_v27  ;;  %v3177_v51 = vmul.f32 %v10885_v30, %v3106_v59  ;;  %v3178_v55 = vmul.f32 %v10881_v32, %v2979_v49  ;;  %v3179_v63 = vmul.f32 %v10885_v30, %v3107_v14  ;;  %v16607_v27 = vld [vmem:[#allocation138_spill] sm:$0xff]  ;;  %v3763_v33 = vmul.f32 %v3761_v41, %v11470_v22  ;;  %v3787_v49 = vld [vmem:[%s15173_s3 + $0x10] sm:$0xff] }
 0x48b   : > { %7456 = vmatprep.subr.bf16.mxu0 %v7455_v58  ;;  %3368 = vrot.lane.b32.xlu0 %v16606_v40, %s8214_s26  ;;  %v3257_v56 = vpop.permute.xlu0 %3256  ;;  %v7587_v20 = vpack.c.bf16 %v3782_v21, %v3780_v1  ;;  %v3779_v44 = vsel %vm461_vm3, %v3702_v4, %v3766_v52  ;;  %v3781_v43 = vsel %vm461_vm3, %v3724_v37, %v3771_v31  ;;  %v16611_v57 = vmov 0.0   ;;  %v3785_v4 = vld [vmem:[%s15173_s3] sm:$0xff]  ;;  %v3786_v10 = vld [vmem:[%s15173_s3 + $0x8] sm:$0xff]  ;;  %v3788_v40 = vld [vmem:[%s15173_s3 + $0x18] sm:$0xff] }
 0x48c   : > { %3370 = vrot.lane.b32.xlu1 %v16607_v27, %s8214_s26  ;;  %v3762_v25 = vmul.f32 %v3757_v6, %v11466_v53  ;;  %v3784_v32 = vsel %vm461_vm3, %v3741_v18, %v3776_v34  ;;  %v7521_v46 = vpack.c.bf16 %v3178_v55, %v3176_v39  ;;  %v3259_v30 = vpop.permute.xlu1 %3258  ;;  %v7519_v5 = vpack.c.bf16 %v3179_v63, %v3177_v51  ;;  %v16615_v1 = vld [vmem:[#allocation181_spill] sm:$0xff] }
 0x48d   : > { %v3783_v35 = vsel %vm461_vm3, %v3740_v11, %v3775_v7  ;;  %v3385_v36 = vsel %vm3384_vm15, %v3257_v56, %v3259_v30  ;;  %v7589_v48 = vpack.c.bf16 %v3781_v43, %v3779_v44  ;;  %v7591_v54 = vpack.c.bf16 %v3763_v33, %v3784_v32 }
 0x48e   : > { %7458 = vmatpush1.bf16.msra.mxu0 %v7457_v28  ;;  %v3513_v61 = vsel %vm3384_vm15, %v3259_v30, %v3257_v56  ;;  %7520 = vmatprep.subr.bf16.mxu1 %v7519_v5  ;;  %v7594_v17 = vpack.c.bf16 %v3762_v25, %v3783_v35  ;;  %v7072_v28 = vld [vmem:[%s15172_s2 + $0x50] sm:$0xff]  ;;  %v3553_v38 = vmul.f32 %v11466_v53, %v3385_v36 }
 0x48f   : > { %7588 = vmatprep.subr.bf16.mxu0 %v7587_v20  ;;  %3372 = vrot.lane.b32.xlu0 %v16608_v15, %s8214_s26  ;;  %v3261_v26 = vpop.permute.xlu0 %3260  ;;  %v3554_v16 = vmul.f32 %v11470_v22, %v3513_v61 }
 0x490   : > { %3374 = vrot.lane.b32.xlu1 %v16609_v50, %s8214_s26  ;;  %7522 = vmatpush1.bf16.msra.mxu1 %v7521_v46  ;;  %v3263_v60 = vpop.permute.xlu1 %3262  ;;  %v3790_v50 = vld [vmem:[%s15173_s3 + $0x28] sm:$0xff] }
 0x491   : > { %2811 = vmatmul.mubr.f32.vlgmr.msra.gmra.mrb[32].mxu0 %v7070_v42  ;;  %v3386_v12 = vsel %vm3384_vm15, %v3261_v26, %v3263_v60  ;;  %v3514_v45 = vsel %vm3384_vm15, %v3263_v60, %v3261_v26  ;;  %v3789_v42 = vld [vmem:[%s15173_s3 + $0x20] sm:$0xff] }
 0x492   : > { %7590 = vmatpush1.bf16.msra.mxu0 %v7589_v48  ;;  %3983 = vmatprep.mubr.f32.mxu0 %v16611_v57  ;;  %v3555_v13 = vmul.f32 %v11466_v53, %v3386_v12  ;;  %v3556_v23 = vmul.f32 %v11470_v22, %v3514_v45 }
 0x493   : > { %7593 = vmatprep.subr.msk.bf16.mxu0 %vm8452_vm8, %v7591_v54  ;;  %3376 = vrot.lane.b32.xlu0 %v16612_v2, %s8214_s26  ;;  %v3265_v58 = vpop.permute.xlu0 %3264  ;;  %v3792_v2 = vld [vmem:[%s15173_s3 + $0x38] sm:$0xff] }
 0x494   : > { %3378 = vrot.lane.b32.xlu1 %v16613_v9, %s8214_s26  ;;  %3248 = vmatmul.mubr.f32.vlgmr.msra.gmra.mrb[32].mxu1 %v7072_v28  ;;  %v7525_v31 = vpack.c.bf16 %v3555_v13, %v3553_v38  ;;  %v3267_v52 = vpop.permute.xlu1 %3266  ;;  %v7523_v0 = vpack.c.bf16 %v3556_v23, %v3554_v16 }
 0x495   : > { %3684 = vmatprep.mubr.f32.mxu1 %v7075_v24  ;;  %v3387_v47 = vsel %vm3384_vm15, %v3265_v58, %v3267_v52  ;;  %v3515_v37 = vsel %vm3384_vm15, %v3267_v52, %v3265_v58 }
 0x496   : > { %7596 = vmatpush1.bf16.msk.msra.mxu0 %vm8452_vm8, %v7594_v17  ;;  %7524 = vmatprep.subr.bf16.mxu1 %v7523_v0  ;;  %v3557_v11 = vmul.f32 %v11466_v53, %v3387_v47  ;;  %v3558_v18 = vmul.f32 %v11470_v22, %v3515_v37 }
 0x497   : > { %3380 = vrot.lane.b32.xlu0 %v16614_v29, %s8214_s26  ;;  %v3269_v7 = vpop.permute.xlu0 %3268  ;;  %7526 = vmatpush1.bf16.msra.mxu1 %v7525_v31 }
 0x498   : > { %3382 = vrot.lane.b32.xlu1 %v16615_v1, %s8214_s26  ;;  %v3271_v59 = vpop.permute.xlu1 %3270  ;;  %s296_s26 = sand.u32 1, %s8191_s28  }
 0x499   : > { %7078 = vmatmul.mubr.msk.f32.vlgmr.msra.gmra.mrb[34].mxu0 %vm500_vm9, %v3785_v4  ;;  %v3388_v21 = vsel %vm3384_vm15, %v3269_v7, %v3271_v59  ;;  %v3516_v34 = vsel %vm3384_vm15, %v3271_v59, %v3269_v7  ;;  %v3793_v7 = vld [vmem:[%s15173_s3 + $0x40] sm:$0xff] }
 0x49a   : > { %3989 = vmatprep.mubr.f32.mxu0 %v16611_v57  ;;  %v3559_v3 = vmul.f32 %v11466_v53, %v3388_v21  ;;  %v3560_v19 = vmul.f32 %v11470_v22, %v3516_v34 }
 0x49b   : > { %v3273_v41 = vpop.permute.xlu0 %3272 }
 0x49c   : > { %v7529_v8 = vpack.c.bf16 %v3559_v3, %v3557_v11  ;;  %v3275_v6 = vpop.permute.xlu1 %3274  ;;  %v7527_v39 = vpack.c.bf16 %v3560_v19, %v3558_v18  ;;  %v3794_v11 = vld [vmem:[%s15173_s3 + $0x48] sm:$0xff] }
 0x49d   : > { %7079 = vmatmul.mubr.msk.f32.gmra.mrb[36].mxu0 %vm500_vm9, %v3786_v10  ;;  %v3389_v14 = vsel %vm3384_vm15, %v3273_v41, %v3275_v6  ;;  %v3517_v51 = vsel %vm3384_vm15, %v3275_v6, %v3273_v41 }
 0x49e   : > { %3995 = vmatprep.mubr.f32.mxu0 %v16611_v57  ;;  %7528 = vmatprep.subr.bf16.mxu1 %v7527_v39  ;;  %v3561_v56 = vmul.f32 %v11466_v53, %v3389_v14  ;;  %v3562_v20 = vmul.f32 %v11470_v22, %v3517_v51 }
 0x49f   : > { %7530 = vmatpush1.bf16.msra.mxu1 %v7529_v8  ;;  %v3277_v55 = vpop.permute.xlu0 %3276 }
 0x4a0   : > { %v3279_v63 = vpop.permute.xlu1 %3278 }
 0x4a1   : > { %7080 = vmatmul.mubr.msk.f32.gmra.mrb[38].mxu0 %vm500_vm9, %v3787_v49  ;;  %v3390_v27 = vsel %vm3384_vm15, %v3277_v55, %v3279_v63  ;;  %v3518_v33 = vsel %vm3384_vm15, %v3279_v63, %v3277_v55  ;;  %v3795_v55 = vld [vmem:[%s15173_s3 + $0x50] sm:$0xff] }
 0x4a2   : > { %4001 = vmatprep.mubr.f32.mxu0 %v16611_v57  ;;  %v3563_v44 = vmul.f32 %v11466_v53, %v3390_v27  ;;  %v3564_v43 = vmul.f32 %v11470_v22, %v3518_v33 }
 0x4a3   : > { %v3281_v32 = vpop.permute.xlu0 %3280 }
 0x4a4   : > { %v7533_v25 = vpack.c.bf16 %v3563_v44, %v3561_v56  ;;  %v3283_v46 = vpop.permute.xlu1 %3282  ;;  %v7531_v30 = vpack.c.bf16 %v3564_v43, %v3562_v20  ;;  %v3796_v56 = vld [vmem:[%s15173_s3 + $0x58] sm:$0xff] }
 0x4a5   : > { %7081 = vmatmul.mubr.msk.f32.gmra.mrb[40].mxu0 %vm500_vm9, %v3788_v40  ;;  %v3391_v5 = vsel %vm3384_vm15, %v3281_v32, %v3283_v46  ;;  %v3519_v35 = vsel %vm3384_vm15, %v3283_v46, %v3281_v32 }
 0x4a6   : > { %4007 = vmatprep.mubr.f32.mxu0 %v16611_v57  ;;  %7532 = vmatprep.subr.bf16.mxu1 %v7531_v30  ;;  %v3565_v61 = vmul.f32 %v11466_v53, %v3391_v5  ;;  %v3566_v26 = vmul.f32 %v11470_v22, %v3519_v35 }
 0x4a7   : > { %7534 = vmatpush1.bf16.msra.mxu1 %v7533_v25  ;;  %v3285_v36 = vpop.permute.xlu0 %3284 }
 0x4a8   : > { %v3287_v15 = vpop.permute.xlu1 %3286 }
 0x4a9   : > { %7082 = vmatmul.mubr.msk.f32.gmra.mrb[42].mxu0 %vm500_vm9, %v3789_v42  ;;  %v3392_v48 = vsel %vm3384_vm15, %v3285_v36, %v3287_v15  ;;  %v3520_v54 = vsel %vm3384_vm15, %v3287_v15, %v3285_v36  ;;  %v3797_v36 = vld [vmem:[%s15173_s3 + $0x60] sm:$0xff] }
 0x4aa   : > { %4013 = vmatprep.mubr.f32.mxu0 %v16611_v57  ;;  %v3567_v17 = vmul.f32 %v11466_v53, %v3392_v48  ;;  %v3568_v60 = vmul.f32 %v11470_v22, %v3520_v54 }
 0x4ab   : > { %v3289_v38 = vpop.permute.xlu0 %3288 }
 0x4ac   : > { %v7537_v28 = vpack.c.bf16 %v3567_v17, %v3565_v61  ;;  %v3291_v12 = vpop.permute.xlu1 %3290  ;;  %v7535_v45 = vpack.c.bf16 %v3568_v60, %v3566_v26  ;;  %v3798_v61 = vld [vmem:[%s15173_s3 + $0x68] sm:$0xff] }
 0x4ad   : > { %7083 = vmatmul.mubr.msk.f32.gmra.mrb[44].mxu0 %vm500_vm9, %v3790_v50  ;;  %v3393_v24 = vsel %vm3384_vm15, %v3289_v38, %v3291_v12  ;;  %v3521_v16 = vsel %vm3384_vm15, %v3291_v12, %v3289_v38 }
 0x4ae   : > { %4019 = vmatprep.mubr.f32.mxu0 %v16611_v57  ;;  %7536 = vmatprep.subr.bf16.mxu1 %v7535_v45  ;;  %v3569_v31 = vmul.f32 %v11466_v53, %v3393_v24  ;;  %v3570_v52 = vmul.f32 %v11470_v22, %v3521_v16 }
 0x4af   : > { %7538 = vmatpush1.bf16.msra.mxu1 %v7537_v28  ;;  %v3293_v13 = vpop.permute.xlu0 %3292 }
 0x4b0   : > { %v3295_v23 = vpop.permute.xlu1 %3294 }
 0x4b1   : > { %7084 = vmatmul.mubr.msk.f32.gmra.mrb[46].mxu0 %vm500_vm9, %v3791_v62  ;;  %v3394_v9 = vsel %vm3384_vm15, %v3293_v13, %v3295_v23  ;;  %v3522_v58 = vsel %vm3384_vm15, %v3295_v23, %v3293_v13  ;;  %v3799_v13 = vld [vmem:[%s15173_s3 + $0x70] sm:$0xff] }
 0x4b2   : > { %4025 = vmatprep.mubr.f32.mxu0 %v16611_v57  ;;  %v3571_v0 = vmul.f32 %v11466_v53, %v3394_v9  ;;  %v3572_v4 = vmul.f32 %v11470_v22, %v3522_v58 }
 0x4b3   : > { %v3297_v1 = vpop.permute.xlu0 %3296 }
 0x4b4   : > { %v7541_v29 = vpack.c.bf16 %v3571_v0, %v3569_v31  ;;  %v3299_v47 = vpop.permute.xlu1 %3298  ;;  %v7539_v37 = vpack.c.bf16 %v3572_v4, %v3570_v52  ;;  %v3800_v31 = vld [vmem:[%s15173_s3 + $0x78] sm:$0xff] }
 0x4b5   : > { %7085 = vmatmul.mubr.msk.f32.gmra.mrb[48].mxu0 %vm500_vm9, %v3792_v2  ;;  %v3395_v59 = vsel %vm3384_vm15, %v3297_v1, %v3299_v47  ;;  %v3523_v10 = vsel %vm3384_vm15, %v3299_v47, %v3297_v1 }
 0x4b6   : > { %4031 = vmatprep.mubr.f32.mxu0 %v16611_v57  ;;  %7540 = vmatprep.subr.bf16.mxu1 %v7539_v37  ;;  %v3573_v19 = vmul.f32 %v11466_v53, %v3395_v59  ;;  %v3574_v41 = vmul.f32 %v11470_v22, %v3523_v10 }
 0x4b7   : > { %7542 = vmatpush1.bf16.msra.mxu1 %v7541_v29  ;;  %v3301_v21 = vpop.permute.xlu0 %3300 }
 0x4b8   : > { %v3303_v34 = vpop.permute.xlu1 %3302 }
 0x4b9   : > { %7086 = vmatmul.mubr.msk.f32.gmra.mrb[50].mxu0 %vm500_vm9, %v3793_v7  ;;  %v3396_v18 = vsel %vm3384_vm15, %v3301_v21, %v3303_v34  ;;  %v3524_v3 = vsel %vm3384_vm15, %v3303_v34, %v3301_v21  ;;  %v3801_v21 = vld [vmem:[%s15173_s3 + $0x80] sm:$0xff] }
 0x4ba   : > { %4037 = vmatprep.mubr.f32.mxu0 %v16611_v57  ;;  %v3575_v8 = vmul.f32 %v11466_v53, %v3396_v18  ;;  %v3576_v6 = vmul.f32 %v11470_v22, %v3524_v3 }
 0x4bb   : > { %v3305_v49 = vpop.permute.xlu0 %3304 }
 0x4bc   : > { %v7545_v39 = vpack.c.bf16 %v3575_v8, %v3573_v19  ;;  %v3307_v14 = vpop.permute.xlu1 %3306  ;;  %v7543_v51 = vpack.c.bf16 %v3576_v6, %v3574_v41  ;;  %v3802_v19 = vld [vmem:[%s15173_s3 + $0x88] sm:$0xff] }
 0x4bd   : > { %7087 = vmatmul.mubr.msk.f32.gmra.mrb[52].mxu0 %vm500_vm9, %v3794_v11  ;;  %v3397_v63 = vsel %vm3384_vm15, %v3305_v49, %v3307_v14  ;;  %v3525_v40 = vsel %vm3384_vm15, %v3307_v14, %v3305_v49 }
 0x4be   : > { %4043 = vmatprep.mubr.f32.mxu0 %v16611_v57  ;;  %7544 = vmatprep.subr.bf16.mxu1 %v7543_v51  ;;  %v3577_v43 = vmul.f32 %v11466_v53, %v3397_v63  ;;  %v3578_v25 = vmul.f32 %v11470_v22, %v3525_v40 }
 0x4bf   : > { %7546 = vmatpush1.bf16.msra.mxu1 %v7545_v39  ;;  %v3309_v27 = vpop.permute.xlu0 %3308 }
 0x4c0   : > { %v3311_v33 = vpop.permute.xlu1 %3310 }
 0x4c1   : > { %7088 = vmatmul.mubr.msk.f32.gmra.mrb[54].mxu0 %vm500_vm9, %v3795_v55  ;;  %v3398_v20 = vsel %vm3384_vm15, %v3309_v27, %v3311_v33  ;;  %v3526_v44 = vsel %vm3384_vm15, %v3311_v33, %v3309_v27 }
 0x4c2   : > { %4049 = vmatprep.mubr.f32.mxu0 %v16611_v57  ;;  %v3579_v32 = vmul.f32 %v11466_v53, %v3398_v20  ;;  %v3580_v46 = vmul.f32 %v11470_v22, %v3526_v44 }
 0x4c3   : > { %v3313_v42 = vpop.permute.xlu0 %3312 }
 0x4c4   : > { %v7549_v30 = vpack.c.bf16 %v3579_v32, %v3577_v43  ;;  %v3315_v5 = vpop.permute.xlu1 %3314  ;;  %v7547_v35 = vpack.c.bf16 %v3580_v46, %v3578_v25 }
 0x4c5   : > { %7089 = vmatmul.mubr.msk.f32.gmra.mrb[56].mxu0 %vm500_vm9, %v3796_v56  ;;  %v3399_v15 = vsel %vm3384_vm15, %v3313_v42, %v3315_v5  ;;  %v3527_v50 = vsel %vm3384_vm15, %v3315_v5, %v3313_v42 }
 0x4c6   : > { %4055 = vmatprep.mubr.f32.mxu0 %v16611_v57  ;;  %7548 = vmatprep.subr.bf16.mxu1 %v7547_v35  ;;  %v3581_v60 = vmul.f32 %v11466_v53, %v3399_v15  ;;  %v3582_v28 = vmul.f32 %v11470_v22, %v3527_v50 }
 0x4c7   : > { %7550 = vmatpush1.bf16.msra.mxu1 %v7549_v30  ;;  %v3317_v48 = vpop.permute.xlu0 %3316 }
 0x4c8   : > { %v3319_v54 = vpop.permute.xlu1 %3318 }
 0x4c9   : > { %7090 = vmatmul.mubr.msk.f32.gmra.mrb[58].mxu0 %vm500_vm9, %v3797_v36  ;;  %v3400_v26 = vsel %vm3384_vm15, %v3317_v48, %v3319_v54  ;;  %v3528_v17 = vsel %vm3384_vm15, %v3319_v54, %v3317_v48 }
 0x4ca   : > { %4061 = vmatprep.mubr.f32.mxu0 %v16611_v57  ;;  %v3583_v38 = vmul.f32 %v11466_v53, %v3400_v26  ;;  %v3584_v12 = vmul.f32 %v11470_v22, %v3528_v17  ;;  %v3803_v17 = vld [vmem:[%s15173_s3 + $0x90] sm:$0xff] }
 0x4cb   : > { %v3321_v62 = vpop.permute.xlu0 %3320 }
 0x4cc   : > { %v7553_v45 = vpack.c.bf16 %v3583_v38, %v3581_v60  ;;  %v3323_v24 = vpop.permute.xlu1 %3322  ;;  %v7551_v16 = vpack.c.bf16 %v3584_v12, %v3582_v28 }
 0x4cd   : > { %7091 = vmatmul.mubr.msk.f32.gmra.mrb[60].mxu0 %vm500_vm9, %v3798_v61  ;;  %v3401_v23 = vsel %vm3384_vm15, %v3321_v62, %v3323_v24  ;;  %v3529_v2 = vsel %vm3384_vm15, %v3323_v24, %v3321_v62 }
 0x4ce   : > { %4067 = vmatprep.mubr.f32.mxu0 %v16611_v57  ;;  %7552 = vmatprep.subr.bf16.mxu1 %v7551_v16  ;;  %v3585_v4 = vmul.f32 %v11466_v53, %v3401_v23  ;;  %v3586_v29 = vmul.f32 %v11470_v22, %v3529_v2 }
 0x4cf   : > { %7554 = vmatpush1.bf16.msra.mxu1 %v7553_v45  ;;  %v3325_v9 = vpop.permute.xlu0 %3324 }
 0x4d1   : > { %7092 = vmatmul.mubr.msk.f32.gmra.mrb[62].mxu0 %vm500_vm9, %v3799_v13  ;;  %v3327_v58 = vpop.permute.xlu1 %3326  ;;  %v3804_v13 = vld [vmem:[%s15173_s3 + $0x98] sm:$0xff] }
 0x4d2   : > { %4073 = vmatprep.mubr.f32.mxu0 %v16611_v57  ;;  %v3402_v52 = vsel %vm3384_vm15, %v3325_v9, %v3327_v58  ;;  %v3530_v0 = vsel %vm3384_vm15, %v3327_v58, %v3325_v9 }
 0x4d3   : > { %v3587_v1 = vmul.f32 %v11466_v53, %v3402_v52  ;;  %v3588_v47 = vmul.f32 %v11470_v22, %v3530_v0 }
 0x4d4   : > { %v3329_v7 = vpop.permute.xlu0 %3328 }
 0x4d5   : > { %7093 = vmatmul.mubr.msk.f32.gmra.mrb[64].mxu0 %vm500_vm9, %v3800_v31  ;;  %v7557_v37 = vpack.c.bf16 %v3587_v1, %v3585_v4  ;;  %v3331_v59 = vpop.permute.xlu1 %3330  ;;  %v7555_v10 = vpack.c.bf16 %v3588_v47, %v3586_v29 }
 0x4d6   : > { %4079 = vmatprep.mubr.f32.mxu0 %v16611_v57  ;;  %v3403_v34 = vsel %vm3384_vm15, %v3329_v7, %v3331_v59  ;;  %v3531_v11 = vsel %vm3384_vm15, %v3331_v59, %v3329_v7 }
 0x4d7   : > { %7556 = vmatprep.subr.bf16.mxu1 %v7555_v10  ;;  %v3589_v6 = vmul.f32 %v11466_v53, %v3403_v34  ;;  %v3590_v39 = vmul.f32 %v11470_v22, %v3531_v11 }
 0x4d8   : > { %7558 = vmatpush1.bf16.msra.mxu1 %v7557_v37  ;;  %v3333_v18 = vpop.permute.xlu0 %3332 }
 0x4d9   : > { %7094 = vmatmul.mubr.msk.f32.gmra.mrb[66].mxu0 %vm500_vm9, %v3801_v21  ;;  %v3335_v3 = vpop.permute.xlu1 %3334 }
 0x4da   : > { %4085 = vmatprep.mubr.f32.mxu0 %v16611_v57  ;;  %v3404_v41 = vsel %vm3384_vm15, %v3333_v18, %v3335_v3  ;;  %v3532_v8 = vsel %vm3384_vm15, %v3335_v3, %v3333_v18 }
 0x4db   : > { %v3591_v49 = vmul.f32 %v11466_v53, %v3404_v41  ;;  %v3592_v14 = vmul.f32 %v11470_v22, %v3532_v8 }
 0x4dc   : > { %v3337_v55 = vpop.permute.xlu0 %3336 }
 0x4dd   : > { %7095 = vmatmul.mubr.msk.f32.gmra.mrb[68].mxu0 %vm500_vm9, %v3802_v19  ;;  %v7561_v51 = vpack.c.bf16 %v3591_v49, %v3589_v6  ;;  %v3339_v63 = vpop.permute.xlu1 %3338  ;;  %v7559_v40 = vpack.c.bf16 %v3592_v14, %v3590_v39 }
 0x4de   : > { %4091 = vmatprep.mubr.f32.mxu0 %v16611_v57  ;;  %v3405_v27 = vsel %vm3384_vm15, %v3337_v55, %v3339_v63  ;;  %v3533_v33 = vsel %vm3384_vm15, %v3339_v63, %v3337_v55 }
 0x4df   : > { %7560 = vmatprep.subr.bf16.mxu1 %v7559_v40  ;;  %v3593_v25 = vmul.f32 %v11466_v53, %v3405_v27  ;;  %v3594_v32 = vmul.f32 %v11470_v22, %v3533_v33  ;;  %v3805_v40 = vld [vmem:[%s15173_s3 + $0xa0] sm:$0xff] }
 0x4e0   : > { %7562 = vmatpush1.bf16.msra.mxu1 %v7561_v51  ;;  %v3341_v56 = vpop.permute.xlu0 %3340 }
 0x4e1   : > { %7096 = vmatmul.mubr.msk.f32.gmra.mrb[70].mxu0 %vm500_vm9, %v3803_v17 }
 0x4e2   : > { %v3343_v20 = vpop.permute.xlu1 %3342  ;;  %4097 = vmatprep.mubr.f32.mxu0 %v16611_v57 }
 0x4e3   : > { %v3406_v44 = vsel %vm3384_vm15, %v3341_v56, %v3343_v20  ;;  %v3534_v43 = vsel %vm3384_vm15, %v3343_v20, %v3341_v56 }
 0x4e4   : > { %v3595_v46 = vmul.f32 %v11466_v53, %v3406_v44  ;;  %v3596_v30 = vmul.f32 %v11470_v22, %v3534_v43 }
 0x4e5   : > { %v3345_v5 = vpop.permute.xlu0 %3344  ;;  %7097 = vmatmul.mubr.msk.f32.gmra.mrb[72].mxu0 %vm500_vm9, %v3804_v13  ;;  %v3812_v13 = vld [vmem:[%s15173_s3 + $0xd8] sm:$0xff] }
 0x4e6   : > { %v7565_v42 = vpack.c.bf16 %v3595_v46, %v3593_v25  ;;  %v3347_v35 = vpop.permute.xlu1 %3346  ;;  %v7563_v36 = vpack.c.bf16 %v3596_v30, %v3594_v32  ;;  %4103 = vmatprep.mubr.f32.mxu0 %v16611_v57  ;;  %v3806_v46 = vld [vmem:[%s15173_s3 + $0xa8] sm:$0xff] }
 0x4e7   : > { %v3407_v15 = vsel %vm3384_vm15, %v3345_v5, %v3347_v35  ;;  %v3535_v50 = vsel %vm3384_vm15, %v3347_v35, %v3345_v5 }
 0x4e8   : > { %7564 = vmatprep.subr.bf16.mxu1 %v7563_v36  ;;  %v3597_v60 = vmul.f32 %v11466_v53, %v3407_v15  ;;  %v3598_v28 = vmul.f32 %v11470_v22, %v3535_v50 }
 0x4e9   : > { %7566 = vmatpush1.bf16.msra.mxu1 %v7565_v42  ;;  %v3349_v48 = vpop.permute.xlu0 %3348  ;;  %7098 = vmatmul.mubr.msk.f32.gmra.mrb[74].mxu0 %vm500_vm9, %v3805_v40 }
 0x4ea   : > { %v3351_v54 = vpop.permute.xlu1 %3350  ;;  %4109 = vmatprep.mubr.f32.mxu0 %v16611_v57 }
 0x4eb   : > { %v3408_v61 = vsel %vm3384_vm15, %v3349_v48, %v3351_v54  ;;  %v3536_v26 = vsel %vm3384_vm15, %v3351_v54, %v3349_v48 }
 0x4ec   : > { %v3599_v38 = vmul.f32 %v11466_v53, %v3408_v61  ;;  %v3600_v12 = vmul.f32 %v11470_v22, %v3536_v26 }
 0x4ed   : > { %v3353_v62 = vpop.permute.xlu0 %3352  ;;  %7099 = vmatmul.mubr.msk.f32.gmra.mrb[76].mxu0 %vm500_vm9, %v3806_v46 }
 0x4ee   : > { %v7569_v45 = vpack.c.bf16 %v3599_v38, %v3597_v60  ;;  %v3355_v24 = vpop.permute.xlu1 %3354  ;;  %v7567_v16 = vpack.c.bf16 %v3600_v12, %v3598_v28  ;;  %4115 = vmatprep.mubr.f32.mxu0 %v16611_v57 }
 0x4ef   : > { %v3409_v23 = vsel %vm3384_vm15, %v3353_v62, %v3355_v24  ;;  %v3537_v2 = vsel %vm3384_vm15, %v3355_v24, %v3353_v62  ;;  %v3807_v62 = vld [vmem:[%s15173_s3 + $0xb0] sm:$0xff]  ;;  %v3810_v24 = vld [vmem:[%s15173_s3 + $0xc8] sm:$0xff] }
 0x4f0   : > { %7568 = vmatprep.subr.bf16.mxu1 %v7567_v16  ;;  %v3601_v0 = vmul.f32 %v11466_v53, %v3409_v23  ;;  %v3602_v4 = vmul.f32 %v11470_v22, %v3537_v2  ;;  %v3811_v16 = vld [vmem:[%s15173_s3 + $0xd0] sm:$0xff]  ;;  %v3813_v23 = vld [vmem:[%s15173_s3 + $0xe0] sm:$0xff]  ;;  %v3814_v2 = vld [vmem:[%s15173_s3 + $0xe8] sm:$0xff] }
 0x4f1   : > { %7570 = vmatpush1.bf16.msra.mxu1 %v7569_v45  ;;  %v3357_v9 = vpop.permute.xlu0 %3356  ;;  %v7074_v45 = vld [vmem:[%s15172_s2 + $0x60] sm:$0xff]  ;;  %7100 = vmatmul.mubr.msk.f32.gmra.mrb[78].mxu0 %vm500_vm9, %v3807_v62 }
 0x4f2   : > { %v3359_v58 = vpop.permute.xlu1 %3358  ;;  %4121 = vmatprep.mubr.f32.mxu0 %v16611_v57 }
 0x4f3   : > { %v3410_v31 = vsel %vm3384_vm15, %v3357_v9, %v3359_v58  ;;  %v3538_v52 = vsel %vm3384_vm15, %v3359_v58, %v3357_v9 }
 0x4f4   : > { %v3603_v29 = vmul.f32 %v11466_v53, %v3410_v31  ;;  %v3604_v1 = vmul.f32 %v11470_v22, %v3538_v52  ;;  %v3815_v31 = vld [vmem:[%s15173_s3 + $0xf0] sm:$0xff]  ;;  %v3816_v52 = vld [vmem:[%s15173_s3 + $0xf8] sm:$0xff] }
 0x4f5   : > { %v3361_v37 = vpop.permute.xlu0 %3360 }
 0x4f6   : > { %v7573_v47 = vpack.c.bf16 %v3603_v29, %v3601_v0  ;;  %v3363_v7 = vpop.permute.xlu1 %3362  ;;  %v7571_v59 = vpack.c.bf16 %v3604_v1, %v3602_v4  ;;  %v16620_v1 = vld [vmem:[#allocation6_spill] sm:$0xff] }
 0x4f7   : > { %v3411_v10 = vsel %vm3384_vm15, %v3361_v37, %v3363_v7  ;;  %v3539_v21 = vsel %vm3384_vm15, %v3363_v7, %v3361_v37  ;;  %v16623_v7 = vld [vmem:[#allocation7_spill] sm:$0xff] }
 0x4f8   : > { %7572 = vmatprep.subr.bf16.mxu1 %v7571_v59  ;;  %v3605_v19 = vmul.f32 %v11466_v53, %v3411_v10  ;;  %v3606_v41 = vmul.f32 %v11470_v22, %v3539_v21 }
 0x4f9   : > { %7574 = vmatpush1.bf16.msra.mxu1 %v7573_v47  ;;  %v3365_v34 = vpop.permute.xlu0 %3364 }
 0x4fa   : > { %v3367_v11 = vpop.permute.xlu1 %3366 }
 0x4fb   : > { %v3412_v18 = vsel %vm3384_vm15, %v3365_v34, %v3367_v11  ;;  %v3540_v3 = vsel %vm3384_vm15, %v3367_v11, %v3365_v34 }
 0x4fc   : > { %v3607_v8 = vmul.f32 %v11466_v53, %v3412_v18  ;;  %v3608_v6 = vmul.f32 %v11470_v22, %v3540_v3 }
 0x4fd   : > { %v3369_v49 = vpop.permute.xlu0 %3368 }
 0x4fe   : > { %v7577_v39 = vpack.c.bf16 %v3607_v8, %v3605_v19  ;;  %v3371_v14 = vpop.permute.xlu1 %3370  ;;  %v7575_v51 = vpack.c.bf16 %v3608_v6, %v3606_v41 }
 0x4ff   : > { %v3413_v55 = vsel %vm3384_vm15, %v3369_v49, %v3371_v14  ;;  %v3541_v63 = vsel %vm3384_vm15, %v3371_v14, %v3369_v49 }
 0x500   : > { %7576 = vmatprep.subr.bf16.mxu1 %v7575_v51  ;;  %v3609_v44 = vmul.f32 %v11466_v53, %v3413_v55  ;;  %v3610_v43 = vmul.f32 %v11470_v22, %v3541_v63 }
 0x501   : > { %7578 = vmatpush1.bf16.msra.mxu1 %v7577_v39  ;;  %v3373_v27 = vpop.permute.xlu0 %3372 }
 0x502   : > { %v3375_v33 = vpop.permute.xlu1 %3374 }
 0x503   : > { %v3414_v56 = vsel %vm3384_vm15, %v3373_v27, %v3375_v33  ;;  %v3542_v20 = vsel %vm3384_vm15, %v3375_v33, %v3373_v27 }
 0x504   : > { %v3611_v25 = vmul.f32 %v11466_v53, %v3414_v56  ;;  %v3612_v32 = vmul.f32 %v11470_v22, %v3542_v20 }
 0x505   : > { %v3377_v42 = vpop.permute.xlu0 %3376 }
 0x506   : > { %v7581_v30 = vpack.c.bf16 %v3611_v25, %v3609_v44  ;;  %v3379_v5 = vpop.permute.xlu1 %3378  ;;  %v7579_v35 = vpack.c.bf16 %v3612_v32, %v3610_v43 }
 0x507   : > { %v3415_v36 = vsel %vm3384_vm15, %v3377_v42, %v3379_v5  ;;  %v3543_v15 = vsel %vm3384_vm15, %v3379_v5, %v3377_v42 }
 0x508   : > { %7580 = vmatprep.subr.bf16.mxu1 %v7579_v35  ;;  %v3613_v26 = vmul.f32 %v11466_v53, %v3415_v36  ;;  %v3614_v17 = vmul.f32 %v11470_v22, %v3543_v15 }
 0x509   : > { %7582 = vmatpush1.bf16.msra.mxu1 %v7581_v30  ;;  %v3381_v50 = vpop.permute.xlu0 %3380 }
 0x50a   : > { %v3383_v48 = vpop.permute.xlu1 %3382 }
 0x50b   : > { %v3416_v54 = vsel %vm3384_vm15, %v3381_v50, %v3383_v48  ;;  %v3544_v61 = vsel %vm3384_vm15, %v3383_v48, %v3381_v50 }
 0x50c   : > { %v3615_v60 = vmul.f32 %v11466_v53, %v3416_v54  ;;  %v3616_v28 = vmul.f32 %v11470_v22, %v3544_v61  ;;  %v3808_v53 = vld [vmem:[%s15173_s3 + $0xb8] sm:$0xff]  ;;  %v3809_v22 = vld [vmem:[%s15173_s3 + $0xc0] sm:$0xff] }
 0x50d   : > { %7101 = vmatmul.mubr.msk.f32.gmra.mrb[80].mxu0 %vm500_vm9, %v3808_v53 }
 0x50e   : > { %v7585_v38 = vpack.c.bf16 %v3615_v60, %v3613_v26  ;;  %v7583_v12 = vpack.c.bf16 %v3616_v28, %v3614_v17  ;;  %4127 = vmatprep.mubr.f32.mxu0 %v16611_v57 }
 0x510   : > { %7584 = vmatprep.subr.bf16.mxu1 %v7583_v12 }
 0x511   : > { %7586 = vmatpush1.bf16.msra.mxu1 %v7585_v38  ;;  %7102 = vmatmul.mubr.msk.f32.gmra.mrb[82].mxu0 %vm500_vm9, %v3809_v22 }
 0x512   : > { %4133 = vmatprep.mubr.f32.mxu0 %v16611_v57 }
 0x514   : > { %3685 = vmatmul.mubr.f32.vlgmr.msra.gmra.mrb[32].mxu1 %v7074_v45 }
 0x515   : > { %7103 = vmatmul.mubr.msk.f32.gmra.mrb[84].mxu0 %vm500_vm9, %v3810_v24 }
 0x516   : > { %4139 = vmatprep.mubr.f32.mxu0 %v16611_v57 }
 0x519   : > { %7104 = vmatmul.mubr.msk.f32.gmra.mrb[86].mxu0 %vm500_vm9, %v3811_v16 }
 0x51a   : > { %4145 = vmatprep.mubr.f32.mxu0 %v16611_v57 }
 0x51d   : > { %7105 = vmatmul.mubr.msk.f32.gmra.mrb[88].mxu0 %vm500_vm9, %v3812_v13 }
 0x51e   : > { %4151 = vmatprep.mubr.f32.mxu0 %v16611_v57 }
 0x521   : > { %7106 = vmatmul.mubr.msk.f32.gmra.mrb[90].mxu0 %vm500_vm9, %v3813_v23 }
 0x522   : > { %4157 = vmatprep.mubr.f32.mxu0 %v16611_v57 }
 0x525   : > { %7107 = vmatmul.mubr.msk.f32.gmra.mrb[92].mxu0 %vm500_vm9, %v3814_v2 }
 0x526   : > { %4163 = vmatprep.mubr.f32.mxu0 %v16611_v57 }
 0x529   : > { %7108 = vmatmul.mubr.msk.f32.gmra.mrb[94].mxu0 %vm500_vm9, %v3815_v31 }
 0x52a   : > { %4169 = vmatprep.mubr.f32.mxu0 %v16611_v57 }
 0x52d   : > { %7109 = vmatmul.mubr.msk.f32.gmra.mrb[96].mxu0 %vm500_vm9, %v3816_v52 }
 0x564   : > { %v12246_v9 = vpop.f32.mrb[32].mxu0 }
 0x565   : > { %v12248_v58 = vpop.f32.mrb[33].mxu0 }
 0x56c   : > { %v12258_v0 = vpop.f32.mrb[34].mxu0 }
 0x56d   : > { %16616 = vst [vmem:[#allocation234_spill] sm:$0xff] %v12258_v0  ;;  %4763 = vrot.lane.b32.xlu1 %v12258_v0, %s8202_s23  ;;  %4336 = vrot.lane.b32.xlu0 %v12258_v0, %s8201_s22  ;;  %v12265_v4 = vpop.f32.mrb[35].mxu0  ;;  %v12277_v47 = vmul.f32 %v12258_v0, %v16620_v1 }
 0x56e   : > { %16617 = vst [vmem:[#allocation226_spill] sm:$0xff] %v12265_v4  ;;  %v12285_v59 = vmul.f32 %v12265_v4, %v16623_v7 }
 0x56f   : > { %16621 = vst [vmem:[#allocation248_spill] sm:$0xff] %v12277_v47 }
 0x570   : > { %v12267_v29 = vpop.f32.mrb[36].mxu0  ;;  %16624 = vst [vmem:[#allocation249_spill] sm:$0xff] %v12285_v59 }
 0x571   : > { %16618 = vst [vmem:[#allocation235_spill] sm:$0xff] %v12267_v29  ;;  %5191 = vrot.lane.b32.xlu1 %v12258_v0, %s8203_s24  ;;  %4208 = vrot.lane.b32.xlu0 %v12265_v4, %s8201_s22  ;;  %v12273_v57 = vpop.f32.mrb[37].mxu0  ;;  %v12281_v37 = vmul.f32 %v12267_v29, %v16620_v1 }
 0x572   : > { %16619 = vst [vmem:[#allocation227_spill] sm:$0xff] %v12273_v57  ;;  %v12289_v10 = vmul.f32 %v12273_v57, %v16623_v7 }
 0x573   : > { %16622 = vst [vmem:[#allocation242_spill] sm:$0xff] %v12281_v37 }
 0x574   : > { %16625 = vst [vmem:[#allocation243_spill] sm:$0xff] %v12289_v10  ;;  %v12293_v34 = vpop.f32.mrb[38].mxu0 }
 0x575   : > { %4667 = vrot.lane.b32.xlu1 %v12265_v4, %s8202_s23  ;;  %4765 = vrot.lane.b32.xlu0 %v12267_v29, %s8202_s23  ;;  %v12301_v18 = vpop.f32.mrb[39].mxu0  ;;  %v12305_v3 = vmul.f32 %v12293_v34, %v16620_v1 }
 0x576   : > { %16626 = vst [vmem:[#allocation83_spill] sm:$0xff] %v12301_v18  ;;  %v12311_v41 = vmul.f32 %v12301_v18, %v16623_v7 }
 0x577   : > { %16627 = vst [vmem:[#allocation263_spill] sm:$0xff] %v12305_v3 }
 0x578   : > { %v12307_v19 = vpop.f32.mrb[40].mxu0  ;;  %16628 = vst [vmem:[#allocation256_spill] sm:$0xff] %v12311_v41  ;;  %v309_v41 = vld [vmem:[%s15177_s7] sm:$0xff] }
 0x579   : > { %5095 = vrot.lane.b32.xlu1 %v12265_v4, %s8203_s24  ;;  %5193 = vrot.lane.b32.xlu0 %v12267_v29, %s8203_s24  ;;  %v12317_v8 = vpop.f32.mrb[41].mxu0  ;;  %v12321_v6 = vmul.f32 %v12307_v19, %v16620_v1 }
 0x57a   : > { %16629 = vst [vmem:[#allocation264_spill] sm:$0xff] %v12317_v8  ;;  %v12325_v39 = vmul.f32 %v12317_v8, %v16623_v7 }
 0x57b   : > { %16630 = vst [vmem:[#allocation257_spill] sm:$0xff] %v12321_v6 }
 0x57c   : > { %16631 = vst [vmem:[#allocation274_spill] sm:$0xff] %v12325_v39  ;;  %v12329_v14 = vpop.f32.mrb[42].mxu0  ;;  %v310_v39 = vld [vmem:[%s15177_s7 + $0x8] sm:$0xff] }
 0x57d   : > { %16632 = vst [vmem:[#allocation11_spill] sm:$0xff] %v12329_v14  ;;  %4338 = vrot.lane.b32.xlu1 %v12267_v29, %s8201_s22  ;;  %4669 = vrot.lane.b32.xlu0 %v12273_v57, %s8202_s23  ;;  %v12337_v55 = vpop.f32.mrb[43].mxu0  ;;  %v12341_v63 = vmul.f32 %v12329_v14, %v16620_v1 }
 0x57e   : > { %16633 = vst [vmem:[#allocation271_spill] sm:$0xff] %v12337_v55  ;;  %v12347_v27 = vmul.f32 %v12337_v55, %v16623_v7 }
 0x57f   : > { %16634 = vst [vmem:[#allocation131_spill] sm:$0xff] %v12341_v63 }
 0x580   : > { %v12343_v40 = vpop.f32.mrb[44].mxu0  ;;  %16636 = vst [vmem:[#allocation133_spill] sm:$0xff] %v12347_v27  ;;  %v8049_v27 = vadd.f32 %v12246_v9, %v309_v41 }
 0x581   : > { %16635 = vst [vmem:[#allocation116_spill] sm:$0xff] %v12343_v40  ;;  %5097 = vrot.lane.b32.xlu0 %v12273_v57, %s8203_s24  ;;  %4210 = vrot.lane.b32.xlu1 %v12273_v57, %s8201_s22  ;;  %v12353_v33 = vpop.f32.mrb[45].mxu0  ;;  %v12357_v56 = vmul.f32 %v12343_v40, %v16620_v1 }
 0x582   : > { %16637 = vst [vmem:[#allocation119_spill] sm:$0xff] %v12353_v33  ;;  %v12361_v20 = vmul.f32 %v12353_v33, %v16623_v7 }
 0x583   : > { %16638 = vst [vmem:[#allocation166_spill] sm:$0xff] %v12357_v56 }
 0x584   : > { %16639 = vst [vmem:[#allocation156_spill] sm:$0xff] %v12361_v20  ;;  %v12365_v43 = vpop.f32.mrb[46].mxu0 }
 0x585   : > { %16640 = vst [vmem:[#allocation167_spill] sm:$0xff] %v12365_v43  ;;  %4767 = vrot.lane.b32.xlu1 %v12293_v34, %s8202_s23  ;;  %4340 = vrot.lane.b32.xlu0 %v12293_v34, %s8201_s22  ;;  %v12373_v32 = vpop.f32.mrb[47].mxu0  ;;  %v12377_v46 = vmul.f32 %v12365_v43, %v16620_v1 }
 0x586   : > { %16641 = vst [vmem:[#allocation157_spill] sm:$0xff] %v12373_v32  ;;  %v12383_v42 = vmul.f32 %v12373_v32, %v16623_v7 }
 0x587   : > { %16642 = vst [vmem:[#allocation200_spill] sm:$0xff] %v12377_v46 }
 0x588   : > { %v12379_v30 = vpop.f32.mrb[48].mxu0  ;;  %16644 = vst [vmem:[#allocation201_spill] sm:$0xff] %v12383_v42 }
 0x589   : > { %16643 = vst [vmem:[#allocation191_spill] sm:$0xff] %v12379_v30  ;;  %5195 = vrot.lane.b32.xlu1 %v12293_v34, %s8203_s24  ;;  %4212 = vrot.lane.b32.xlu0 %v12301_v18, %s8201_s22  ;;  %v12389_v5 = vpop.f32.mrb[49].mxu0  ;;  %v12393_v35 = vmul.f32 %v12379_v30, %v16620_v1 }
 0x58a   : > { %16645 = vst [vmem:[#allocation192_spill] sm:$0xff] %v12389_v5  ;;  %v12397_v36 = vmul.f32 %v12389_v5, %v16623_v7 }
 0x58b   : > { %16646 = vst [vmem:[#allocation218_spill] sm:$0xff] %v12393_v35 }
 0x58c   : > { %16647 = vst [vmem:[#allocation210_spill] sm:$0xff] %v12397_v36  ;;  %v12401_v50 = vpop.f32.mrb[50].mxu0 }
 0x58d   : > { %16648 = vst [vmem:[#allocation219_spill] sm:$0xff] %v12401_v50  ;;  %4671 = vrot.lane.b32.xlu1 %v12301_v18, %s8202_s23  ;;  %4769 = vrot.lane.b32.xlu0 %v12307_v19, %s8202_s23  ;;  %v12409_v54 = vpop.f32.mrb[51].mxu0  ;;  %v12413_v61 = vmul.f32 %v12401_v50, %v16620_v1 }
 0x58e   : > { %16649 = vst [vmem:[#allocation211_spill] sm:$0xff] %v12409_v54  ;;  %v12419_v17 = vmul.f32 %v12409_v54, %v16623_v7 }
 0x58f   : > { %16650 = vst [vmem:[#allocation236_spill] sm:$0xff] %v12413_v61 }
 0x590   : > { %v12415_v26 = vpop.f32.mrb[52].mxu0  ;;  %16652 = vst [vmem:[#allocation237_spill] sm:$0xff] %v12419_v17 }
 0x591   : > { %16651 = vst [vmem:[#allocation228_spill] sm:$0xff] %v12415_v26  ;;  %5099 = vrot.lane.b32.xlu1 %v12301_v18, %s8203_s24  ;;  %5197 = vrot.lane.b32.xlu0 %v12307_v19, %s8203_s24  ;;  %v12425_v60 = vpop.f32.mrb[53].mxu0  ;;  %v12429_v28 = vmul.f32 %v12415_v26, %v16620_v1 }
 0x592   : > { %16653 = vst [vmem:[#allocation229_spill] sm:$0xff] %v12425_v60  ;;  %v12433_v38 = vmul.f32 %v12425_v60, %v16623_v7 }
 0x593   : > { %16654 = vst [vmem:[#allocation250_spill] sm:$0xff] %v12429_v28 }
 0x594   : > { %16655 = vst [vmem:[#allocation244_spill] sm:$0xff] %v12433_v38  ;;  %v12437_v45 = vpop.f32.mrb[54].mxu0 }
 0x595   : > { %16656 = vst [vmem:[#allocation251_spill] sm:$0xff] %v12437_v45  ;;  %4342 = vrot.lane.b32.xlu1 %v12307_v19, %s8201_s22  ;;  %4673 = vrot.lane.b32.xlu0 %v12317_v8, %s8202_s23  ;;  %v12445_v53 = vpop.f32.mrb[55].mxu0  ;;  %v12449_v22 = vmul.f32 %v12437_v45, %v16620_v1 }
 0x596   : > { %16657 = vst [vmem:[#allocation245_spill] sm:$0xff] %v12445_v53  ;;  %v12455_v16 = vmul.f32 %v12445_v53, %v16623_v7 }
 0x597   : > { %16658 = vst [vmem:[#allocation265_spill] sm:$0xff] %v12449_v22 }
 0x598   : > { %v12451_v24 = vpop.f32.mrb[56].mxu0  ;;  %16660 = vst [vmem:[#allocation266_spill] sm:$0xff] %v12455_v16 }
 0x599   : > { %16659 = vst [vmem:[#allocation258_spill] sm:$0xff] %v12451_v24  ;;  %5101 = vrot.lane.b32.xlu0 %v12317_v8, %s8203_s24  ;;  %4214 = vrot.lane.b32.xlu1 %v12317_v8, %s8201_s22  ;;  %v12461_v13 = vpop.f32.mrb[57].mxu0  ;;  %v12465_v23 = vmul.f32 %v12451_v24, %v16620_v1 }
 0x59a   : > { %16661 = vst [vmem:[#allocation259_spill] sm:$0xff] %v12461_v13  ;;  %v12469_v2 = vmul.f32 %v12461_v13, %v16623_v7 }
 0x59b   : > { %16662 = vst [vmem:[#allocation276_spill] sm:$0xff] %v12465_v23 }
 0x59c   : > { %16663 = vst [vmem:[#allocation273_spill] sm:$0xff] %v12469_v2  ;;  %v12473_v52 = vpop.f32.mrb[58].mxu0 }
 0x59d   : > { %16664 = vst [vmem:[#allocation137_spill] sm:$0xff] %v12473_v52  ;;  %4771 = vrot.lane.b32.xlu1 %v12329_v14, %s8202_s23  ;;  %4344 = vrot.lane.b32.xlu0 %v12329_v14, %s8201_s22  ;;  %v12481_v62 = vpop.f32.mrb[59].mxu0  ;;  %v12485_v15 = vmul.f32 %v12473_v52, %v16620_v1 }
 0x59e   : > { %16665 = vst [vmem:[#allocation118_spill] sm:$0xff] %v12481_v62  ;;  %v12491_v31 = vmul.f32 %v12481_v62, %v16623_v7 }
 0x59f   : > { %16666 = vst [vmem:[#allocation143_spill] sm:$0xff] %v12485_v15 }
 0x5a0   : > { %v12487_v48 = vpop.f32.mrb[60].mxu0  ;;  %16668 = vst [vmem:[#allocation169_spill] sm:$0xff] %v12491_v31 }
 0x5a1   : > { %16667 = vst [vmem:[#allocation121_spill] sm:$0xff] %v12487_v48  ;;  %5199 = vrot.lane.b32.xlu1 %v12329_v14, %s8203_s24  ;;  %4216 = vrot.lane.b32.xlu0 %v12337_v55, %s8201_s22  ;;  %v12497_v12 = vpop.f32.mrb[61].mxu0  ;;  %v12501_v44 = vmul.f32 %v12487_v48, %v16620_v1 }
 0x5a2   : > { %16669 = vst [vmem:[#allocation158_spill] sm:$0xff] %v12497_v12  ;;  %v12505_v25 = vmul.f32 %v12497_v12, %v16623_v7 }
 0x5a3   : > { %16670 = vst [vmem:[#allocation171_spill] sm:$0xff] %v12501_v44 }
 0x5a4   : > { %16671 = vst [vmem:[#allocation159_spill] sm:$0xff] %v12505_v25  ;;  %v12509_v51 = vpop.f32.mrb[62].mxu0 }
 0x5a5   : > { %16672 = vst [vmem:[#allocation202_spill] sm:$0xff] %v12509_v51  ;;  %4675 = vrot.lane.b32.xlu1 %v12337_v55, %s8202_s23  ;;  %4773 = vrot.lane.b32.xlu0 %v12343_v40, %s8202_s23  ;;  %v12517_v11 = vpop.f32.mrb[63].mxu0  ;;  %v12521_v22 = vmul.f32 %v12509_v51, %v16620_v1 }
 0x5a6   : > { %16673 = vst [vmem:[#allocation193_spill] sm:$0xff] %v12517_v11  ;;  %v12527_v49 = vmul.f32 %v12517_v11, %v16623_v7 }
 0x5a7   : > { %16674 = vst [vmem:[#allocation203_spill] sm:$0xff] %v12521_v22 }
 0x5a8   : > { %v12523_v23 = vpop.f32.mrb[64].mxu0  ;;  %16676 = vst [vmem:[#allocation212_spill] sm:$0xff] %v12527_v49 }
 0x5a9   : > { %16675 = vst [vmem:[#allocation194_spill] sm:$0xff] %v12523_v23  ;;  %5103 = vrot.lane.b32.xlu1 %v12337_v55, %s8203_s24  ;;  %5201 = vrot.lane.b32.xlu0 %v12343_v40, %s8203_s24  ;;  %v12533_v21 = vpop.f32.mrb[65].mxu0  ;;  %v12537_v15 = vmul.f32 %v12523_v23, %v16620_v1 }
 0x5aa   : > { %16677 = vst [vmem:[#allocation220_spill] sm:$0xff] %v12533_v21  ;;  %v12541_v44 = vmul.f32 %v12533_v21, %v16623_v7 }
 0x5ab   : > { %16678 = vst [vmem:[#allocation213_spill] sm:$0xff] %v12537_v15 }
 0x5ac   : > { %16679 = vst [vmem:[#allocation221_spill] sm:$0xff] %v12541_v44  ;;  %v12545_v25 = vpop.f32.mrb[66].mxu0 }
 0x5ad   : > { %16680 = vst [vmem:[#allocation238_spill] sm:$0xff] %v12545_v25  ;;  %4346 = vrot.lane.b32.xlu1 %v12343_v40, %s8201_s22  ;;  %4677 = vrot.lane.b32.xlu0 %v12353_v33, %s8202_s23  ;;  %v12553_v2 = vpop.f32.mrb[67].mxu0  ;;  %v12563_v31 = vmul.f32 %v12545_v25, %v16620_v1 }
 0x5ae   : > { %16681 = vst [vmem:[#allocation230_spill] sm:$0xff] %v12553_v2  ;;  %v12559_v28 = vmul.f32 %v12553_v2, %v16623_v7 }
 0x5af   : > { %16684 = vst [vmem:[#allocation252_spill] sm:$0xff] %v12563_v31 }
 0x5b0   : > { %v12555_v61 = vpop.f32.mrb[68].mxu0  ;;  %16683 = vst [vmem:[#allocation231_spill] sm:$0xff] %v12559_v28 }
 0x5b1   : > { %16682 = vst [vmem:[#allocation239_spill] sm:$0xff] %v12555_v61  ;;  %5105 = vrot.lane.b32.xlu0 %v12353_v33, %s8203_s24  ;;  %4218 = vrot.lane.b32.xlu1 %v12353_v33, %s8201_s22  ;;  %v12569_v16 = vpop.f32.mrb[69].mxu0  ;;  %v12573_v22 = vmul.f32 %v12555_v61, %v16620_v1 }
 0x5b2   : > { %16685 = vst [vmem:[#allocation246_spill] sm:$0xff] %v12569_v16  ;;  %v12577_v15 = vmul.f32 %v12569_v16, %v16623_v7 }
 0x5b3   : > { %16686 = vst [vmem:[#allocation253_spill] sm:$0xff] %v12573_v22 }
 0x5b4   : > { %16687 = vst [vmem:[#allocation247_spill] sm:$0xff] %v12577_v15  ;;  %v12599_v49 = vpop.f32.mrb[70].mxu0 }
 0x5b5   : > { %4775 = vrot.lane.b32.xlu1 %v12365_v43, %s8202_s23  ;;  %4348 = vrot.lane.b32.xlu0 %v12365_v43, %s8201_s22  ;;  %16688 = vst [vmem:[#allocation16_spill] sm:$0xff] %v12599_v49  ;;  %v12601_v44 = vpop.f32.mrb[71].mxu0  ;;  %v12621_v17 = vmul.f32 %v12599_v49, %v16620_v1 }
 0x5b6   : > { %16689 = vst [vmem:[#allocation267_spill] sm:$0xff] %v12601_v44  ;;  %v12613_v28 = vmul.f32 %v12601_v44, %v16623_v7 }
 0x5b7   : > { %16694 = vst [vmem:[#allocation92_spill] sm:$0xff] %v12621_v17 }
 0x5b8   : > { %v12603_v31 = vpop.f32.mrb[72].mxu0  ;;  %16692 = vst [vmem:[#allocation261_spill] sm:$0xff] %v12613_v28 }
 0x5b9   : > { %5203 = vrot.lane.b32.xlu1 %v12365_v43, %s8203_s24  ;;  %4220 = vrot.lane.b32.xlu0 %v12373_v32, %s8201_s22  ;;  %16690 = vst [vmem:[#allocation260_spill] sm:$0xff] %v12603_v31  ;;  %v12609_v22 = vpop.f32.mrb[73].mxu0  ;;  %v12625_v38 = vmul.f32 %v12603_v31, %v16620_v1 }
 0x5ba   : > { %16691 = vst [vmem:[#allocation268_spill] sm:$0xff] %v12609_v22  ;;  %v12617_v15 = vmul.f32 %v12609_v22, %v16623_v7 }
 0x5bb   : > { %16695 = vst [vmem:[#allocation277_spill] sm:$0xff] %v12625_v38 }
 0x5bc   : > { %16693 = vst [vmem:[#allocation87_spill] sm:$0xff] %v12617_v15  ;;  %v12651_v35 = vpop.f32.mrb[74].mxu0 }
 0x5bd   : > { %4679 = vrot.lane.b32.xlu1 %v12373_v32, %s8202_s23  ;;  %4777 = vrot.lane.b32.xlu0 %v12379_v30, %s8202_s23  ;;  %16696 = vst [vmem:[#allocation275_spill] sm:$0xff] %v12651_v35  ;;  %v12653_v46 = vpop.f32.mrb[75].mxu0  ;;  %v12673_v63 = vmul.f32 %v12651_v35, %v16620_v1 }
 0x5be   : > { %16697 = vst [vmem:[#allocation42_spill] sm:$0xff] %v12653_v46  ;;  %v12665_v42 = vmul.f32 %v12653_v46, %v16623_v7 }
 0x5bf   : > { %16702 = vst [vmem:[#allocation49_spill] sm:$0xff] %v12673_v63 }
 0x5c0   : > { %v12655_v17 = vpop.f32.mrb[76].mxu0  ;;  %16700 = vst [vmem:[#allocation38_spill] sm:$0xff] %v12665_v42 }
 0x5c1   : > { %5107 = vrot.lane.b32.xlu1 %v12373_v32, %s8203_s24  ;;  %5205 = vrot.lane.b32.xlu0 %v12379_v30, %s8203_s24  ;;  %16698 = vst [vmem:[#allocation41_spill] sm:$0xff] %v12655_v17  ;;  %v12661_v38 = vpop.f32.mrb[77].mxu0  ;;  %v12677_v56 = vmul.f32 %v12655_v17, %v16620_v1 }
 0x5c2   : > { %16699 = vst [vmem:[#allocation39_spill] sm:$0xff] %v12661_v38  ;;  %v12669_v36 = vmul.f32 %v12661_v38, %v16623_v7 }
 0x5c3   : > { %16703 = vst [vmem:[#allocation51_spill] sm:$0xff] %v12677_v56  ;;  %v8053_v56 = vadd.f32 %v12248_v58, %v310_v39 }
 0x5c4   : > { %16701 = vst [vmem:[#allocation54_spill] sm:$0xff] %v12669_v36 }
 0x5c5   : > { %4350 = vrot.lane.b32.xlu1 %v12379_v30, %s8201_s22  ;;  %4681 = vrot.lane.b32.xlu0 %v12389_v5, %s8202_s23 }
 0x5c9   : > { %5109 = vrot.lane.b32.xlu0 %v12389_v5, %s8203_s24  ;;  %4222 = vrot.lane.b32.xlu1 %v12389_v5, %s8201_s22 }
 0x5cd   : > { %4779 = vrot.lane.b32.xlu1 %v12401_v50, %s8202_s23  ;;  %4352 = vrot.lane.b32.xlu0 %v12401_v50, %s8201_s22 }
 0x5d1   : > { %5207 = vrot.lane.b32.xlu1 %v12401_v50, %s8203_s24  ;;  %4224 = vrot.lane.b32.xlu0 %v12409_v54, %s8201_s22  ;;  %v16717_v50 = vld [vmem:[#allocation13_spill] sm:$0xff] }
 0x5d5   : > { %4683 = vrot.lane.b32.xlu1 %v12409_v54, %s8202_s23  ;;  %4781 = vrot.lane.b32.xlu0 %v12415_v26, %s8202_s23 }
 0x5d9   : > { %5111 = vrot.lane.b32.xlu1 %v12409_v54, %s8203_s24  ;;  %5209 = vrot.lane.b32.xlu0 %v12415_v26, %s8203_s24 }
 0x5dd   : > { %4354 = vrot.lane.b32.xlu1 %v12415_v26, %s8201_s22  ;;  %4685 = vrot.lane.b32.xlu0 %v12425_v60, %s8202_s23  ;;  %v16716_v26 = vld [vmem:[#allocation12_spill] sm:$0xff] }
 0x5df   : > { %v4764_v28 = vpop.permute.xlu1 %4763  ;;  %v4337_v15 = vpop.permute.xlu0 %4336 }
 0x5e1   : > { %5113 = vrot.lane.b32.xlu0 %v12425_v60, %s8203_s24  ;;  %4226 = vrot.lane.b32.xlu1 %v12425_v60, %s8201_s22 }
 0x5e3   : > { %v12687_v3 = vpop.permute.xlu1 %5191  ;;  %v4209_v6 = vpop.permute.xlu0 %4208 }
 0x5e4   : > { %16704 = vst [vmem:[#allocation46_spill] sm:$0xff] %v12687_v3 }
 0x5e5   : > { %4783 = vrot.lane.b32.xlu1 %v12437_v45, %s8202_s23  ;;  %4356 = vrot.lane.b32.xlu0 %v12437_v45, %s8201_s22 }
 0x5e7   : > { %v4668_v20 = vpop.permute.xlu1 %4667  ;;  %v4766_v63 = vpop.permute.xlu0 %4765 }
 0x5e8   : > { %v3686_v42 = vpop.f32.mrb[32].mxu1  ;;  %v4923_v9 = vsel %vm338_vm0, %v4668_v20, %v4764_v28  ;;  %v4827_v58 = vsel %vm338_vm0, %v4764_v28, %v4668_v20  ;;  %v4400_v28 = vsel %vm318_vm1, %v4337_v15, %v4209_v6 }
 0x5e9   : > { %v12701_v36 = vadd.f32 %v8049_v27, %v3686_v42  ;;  %v3688_v47 = vpop.f32.mrb[33].mxu1  ;;  %5211 = vrot.lane.b32.xlu1 %v12437_v45, %s8203_s24  ;;  %4228 = vrot.lane.b32.xlu0 %v12445_v53, %s8201_s22  ;;  %v16709_v27 = vld [vmem:[#allocation9_spill] sm:$0xff]  ;;  %v4529_v5 = vmul.f32 %v4400_v28, %v16717_v50 }
 0x5ea   : > { %v12707_v37 = vadd.f32 %v8053_v56, %v3688_v47  ;;  %v4955_v42 = vmul.f32 %v4923_v9, %v16709_v27 }
 0x5eb   : > { %16705 = vst [vmem:[#allocation66_spill] sm:$0xff] %v12701_v36  ;;  %v12709_v59 = vpop.permute.xlu1 %5095  ;;  %v12711_v10 = vpop.permute.xlu0 %5193  ;;  %v16711_v36 = vld [vmem:[#allocation10_spill] sm:$0xff] }
 0x5ec   : > { %16706 = vst [vmem:[#allocation60_spill] sm:$0xff] %v12707_v37  ;;  %16707 = vst [vmem:[#allocation64_spill] sm:$0xff] %v12709_v59  ;;  %v12722_v37 = vpop.f32.mrb[78].mxu0  ;;  %v4956_v3 = vmul.f32 %v4827_v58, %v16711_v36 }
 0x5ed   : > { %16708 = vst [vmem:[#allocation58_spill] sm:$0xff] %v12711_v10  ;;  %4687 = vrot.lane.b32.xlu1 %v12445_v53, %s8202_s23  ;;  %4785 = vrot.lane.b32.xlu0 %v12451_v24, %s8202_s23  ;;  %16710 = vst [vmem:[#allocation80_spill] sm:$0xff] %v12722_v37  ;;  %v12731_v20 = vpop.f32.mrb[79].mxu0 }
 0x5ee   : > { %16712 = vst [vmem:[#allocation73_spill] sm:$0xff] %v12731_v20  ;;  %v12735_v9 = vpop.f32.mrb[80].mxu0 }
 0x5ef   : > { %v4339_v41 = vpop.permute.xlu1 %4338  ;;  %v4670_v39 = vpop.permute.xlu0 %4669  ;;  %16713 = vst [vmem:[#allocation78_spill] sm:$0xff] %v12735_v9  ;;  %v12767_v28 = vmul.f32 %v12735_v9, %v16620_v1 }
 0x5f0   : > { %v4828_v47 = vsel %vm338_vm0, %v4766_v63, %v4670_v39  ;;  %v4924_v56 = vsel %vm338_vm0, %v4670_v39, %v4766_v63  ;;  %v4496_v63 = vsel %vm318_vm1, %v4209_v6, %v4337_v15  ;;  %v12741_v60 = vpop.f32.mrb[81].mxu0 }
 0x5f1   : > { %v4957_v59 = vmul.f32 %v4924_v56, %v16709_v27  ;;  %v4958_v10 = vmul.f32 %v4828_v47, %v16711_v36  ;;  %5115 = vrot.lane.b32.xlu1 %v12445_v53, %s8203_s24  ;;  %5213 = vrot.lane.b32.xlu0 %v12451_v24, %s8203_s24  ;;  %16715 = vst [vmem:[#allocation89_spill] sm:$0xff] %v12741_v60  ;;  %16721 = vst [vmem:[#allocation90_spill] sm:$0xff] %v12767_v28 }
 0x5f2   : > { %v4528_v54 = vmul.f32 %v4496_v63, %v16716_v26 }
 0x5f3   : > { %v7663_v39 = vpack.c.bf16 %v4957_v59, %v4955_v42  ;;  %v12737_v58 = vpop.permute.xlu0 %5097  ;;  %v4211_v56 = vpop.permute.xlu1 %4210  ;;  %v7661_v45 = vpack.c.bf16 %v4958_v10, %v4956_v3  ;;  %v12753_v59 = vmul.f32 %v12731_v20, %v16623_v7  ;;  %v12757_v10 = vmul.f32 %v12741_v60, %v16623_v7 }
 0x5f4   : > { %16714 = vst [vmem:[#allocation70_spill] sm:$0xff] %v12737_v58  ;;  %v4401_v47 = vsel %vm318_vm1, %v4339_v41, %v4211_v56  ;;  %v4497_v53 = vsel %vm318_vm1, %v4211_v56, %v4339_v41  ;;  %v12761_v3 = vmul.f32 %v12722_v37, %v16620_v1 }
 0x5f5   : > { %v4530_v30 = vmul.f32 %v4497_v53, %v16716_v26  ;;  %v4531_v6 = vmul.f32 %v4401_v47, %v16717_v50  ;;  %7662 = vmatprep.subr.bf16.mxu1 %v7661_v45  ;;  %4358 = vrot.lane.b32.xlu1 %v12451_v24, %s8201_s22  ;;  %16718 = vst [vmem:[#allocation88_spill] sm:$0xff] %v12753_v59  ;;  %16719 = vst [vmem:[#allocation33_spill] sm:$0xff] %v12757_v10 }
 0x5f6   : > { %4689 = vrot.lane.b32.xlu0 %v12461_v13, %s8202_s23  ;;  %16720 = vst [vmem:[#allocation91_spill] sm:$0xff] %v12761_v3  ;;  %7664 = vmatpush1.bf16.msra.mxu1 %v7663_v39 }
 0x5f7   : > { %v7599_v15 = vpack.c.bf16 %v4530_v30, %v4528_v54  ;;  %v4768_v45 = vpop.permute.xlu1 %4767  ;;  %v4341_v53 = vpop.permute.xlu0 %4340  ;;  %v7597_v41 = vpack.c.bf16 %v4531_v6, %v4529_v5 }
 0x5f9   : > { %7598 = vmatprep.subr.bf16.mxu0 %v7597_v41  ;;  %4230 = vrot.lane.b32.xlu1 %v12461_v13, %s8201_s22  ;;  %v12791_v41 = vpop.f32.mrb[82].mxu0 }
 0x5fa   : > { %5117 = vrot.lane.b32.xlu0 %v12461_v13, %s8203_s24  ;;  %7600 = vmatpush1.bf16.msra.mxu0 %v7599_v15  ;;  %16725 = vst [vmem:[#allocation103_spill] sm:$0xff] %v12791_v41  ;;  %v12793_v30 = vpop.f32.mrb[83].mxu0 }
 0x5fb   : > { %v12775_v54 = vpop.permute.xlu1 %5195  ;;  %v4213_v5 = vpop.permute.xlu0 %4212  ;;  %16726 = vst [vmem:[#allocation140_spill] sm:$0xff] %v12793_v30 }
 0x5fc   : > { %16722 = vst [vmem:[#allocation102_spill] sm:$0xff] %v12775_v54  ;;  %v12799_v42 = vpop.f32.mrb[84].mxu0 }
 0x5fd   : > { %4787 = vrot.lane.b32.xlu1 %v12473_v52, %s8202_s23  ;;  %16727 = vst [vmem:[#allocation139_spill] sm:$0xff] %v12799_v42  ;;  %v12805_v54 = vpop.f32.mrb[85].mxu0 }
 0x5fe   : > { %4360 = vrot.lane.b32.xlu0 %v12473_v52, %s8201_s22  ;;  %16728 = vst [vmem:[#allocation142_spill] sm:$0xff] %v12805_v54  ;;  %v12819_v58 = vmul.f32 %v12805_v54, %v16623_v7 }
 0x5ff   : > { %v4672_v63 = vpop.permute.xlu1 %4671  ;;  %v4770_v39 = vpop.permute.xlu0 %4769 }
 0x600   : > { %v4829_v6 = vsel %vm338_vm0, %v4768_v45, %v4672_v63  ;;  %v4925_v15 = vsel %vm338_vm0, %v4672_v63, %v4768_v45  ;;  %16731 = vst [vmem:[#allocation176_spill] sm:$0xff] %v12819_v58 }
 0x601   : > { %5215 = vrot.lane.b32.xlu1 %v12473_v52, %s8203_s24  ;;  %v4959_v3 = vmul.f32 %v4925_v15, %v16709_v27  ;;  %v4960_v28 = vmul.f32 %v4829_v6, %v16711_v36  ;;  %v4498_v52 = vsel %vm318_vm1, %v4213_v5, %v4341_v53 }
 0x602   : > { %4232 = vrot.lane.b32.xlu0 %v12481_v62, %s8201_s22 }
 0x603   : > { %v12785_v56 = vpop.permute.xlu1 %5099  ;;  %v12787_v47 = vpop.permute.xlu0 %5197 }
 0x604   : > { %16723 = vst [vmem:[#allocation101_spill] sm:$0xff] %v12785_v56  ;;  %16724 = vst [vmem:[#allocation104_spill] sm:$0xff] %v12787_v47  ;;  %v12809_v56 = vmul.f32 %v12793_v30, %v16623_v7  ;;  %v12813_v47 = vmul.f32 %v12791_v41, %v16620_v1 }
 0x605   : > { %4691 = vrot.lane.b32.xlu1 %v12481_v62, %s8202_s23 }
 0x606   : > { %4789 = vrot.lane.b32.xlu0 %v12487_v48, %s8202_s23  ;;  %16729 = vst [vmem:[#allocation141_spill] sm:$0xff] %v12809_v56  ;;  %16730 = vst [vmem:[#allocation177_spill] sm:$0xff] %v12813_v47 }
 0x607   : > { %v4343_v59 = vpop.permute.xlu1 %4342  ;;  %v4674_v10 = vpop.permute.xlu0 %4673 }
 0x608   : > { %v4830_v45 = vsel %vm338_vm0, %v4770_v39, %v4674_v10  ;;  %v4926_v63 = vsel %vm338_vm0, %v4674_v10, %v4770_v39  ;;  %v12823_v10 = vmul.f32 %v12799_v42, %v16620_v1  ;;  %v4402_v39 = vsel %vm318_vm1, %v4341_v53, %v4213_v5 }
 0x609   : > { %v4961_v15 = vmul.f32 %v4926_v63, %v16709_v27  ;;  %v4962_v6 = vmul.f32 %v4830_v45, %v16711_v36  ;;  %5119 = vrot.lane.b32.xlu1 %v12481_v62, %s8203_s24  ;;  %v4532_v5 = vmul.f32 %v4498_v52, %v16716_v26  ;;  %v4533_v62 = vmul.f32 %v4402_v39, %v16717_v50 }
 0x60a   : > { %16732 = vst [vmem:[#allocation179_spill] sm:$0xff] %v12823_v10  ;;  %5217 = vrot.lane.b32.xlu0 %v12487_v48, %s8203_s24 }
 0x60b   : > { %v7667_v63 = vpack.c.bf16 %v4961_v15, %v4959_v3  ;;  %v12831_v45 = vpop.permute.xlu0 %5101  ;;  %v4215_v13 = vpop.permute.xlu1 %4214  ;;  %v7665_v24 = vpack.c.bf16 %v4962_v6, %v4960_v28 }
 0x60c   : > { %16733 = vst [vmem:[#allocation178_spill] sm:$0xff] %v12831_v45  ;;  %v4403_v33 = vsel %vm318_vm1, %v4343_v59, %v4215_v13  ;;  %v4499_v53 = vsel %vm318_vm1, %v4215_v13, %v4343_v59 }
 0x60d   : > { %v4534_v3 = vmul.f32 %v4499_v53, %v16716_v26  ;;  %v4535_v15 = vmul.f32 %v4403_v33, %v16717_v50  ;;  %7666 = vmatprep.subr.bf16.mxu1 %v7665_v24  ;;  %4362 = vrot.lane.b32.xlu1 %v12487_v48, %s8201_s22 }
 0x60e   : > { %4693 = vrot.lane.b32.xlu0 %v12497_v12, %s8202_s23  ;;  %7668 = vmatpush1.bf16.msra.mxu1 %v7667_v63 }
 0x60f   : > { %v7603_v28 = vpack.c.bf16 %v4534_v3, %v4532_v5  ;;  %v4772_v6 = vpop.permute.xlu1 %4771  ;;  %v4345_v43 = vpop.permute.xlu0 %4344  ;;  %v7601_v13 = vpack.c.bf16 %v4535_v15, %v4533_v62 }
 0x610   : > { %v12857_v62 = vpop.f32.mrb[86].mxu0 }
 0x611   : > { %7602 = vmatprep.subr.bf16.mxu0 %v7601_v13  ;;  %4234 = vrot.lane.b32.xlu1 %v12497_v12, %s8201_s22  ;;  %16735 = vst [vmem:[#allocation35_spill] sm:$0xff] %v12857_v62  ;;  %v12859_v39 = vpop.f32.mrb[87].mxu0 }
 0x612   : > { %5121 = vrot.lane.b32.xlu0 %v12497_v12, %s8203_s24  ;;  %7604 = vmatpush1.bf16.msra.mxu0 %v7603_v28  ;;  %16736 = vst [vmem:[#allocation40_spill] sm:$0xff] %v12859_v39  ;;  %v12865_v63 = vpop.f32.mrb[88].mxu0  ;;  %v12875_v15 = vmul.f32 %v12859_v39, %v16623_v7  ;;  %v12879_v28 = vmul.f32 %v12857_v62, %v16620_v1 }
 0x613   : > { %v12851_v33 = vpop.permute.xlu1 %5199  ;;  %v4217_v24 = vpop.permute.xlu0 %4216  ;;  %16737 = vst [vmem:[#allocation32_spill] sm:$0xff] %v12865_v63  ;;  %v12887_v32 = vmul.f32 %v12865_v63, %v16620_v1 }
 0x614   : > { %16734 = vst [vmem:[#allocation43_spill] sm:$0xff] %v12851_v33  ;;  %v12871_v3 = vpop.f32.mrb[89].mxu0  ;;  %16740 = vst [vmem:[#allocation53_spill] sm:$0xff] %v12875_v15  ;;  %v4404_v48 = vsel %vm318_vm1, %v4345_v43, %v4217_v24  ;;  %v4500_v40 = vsel %vm318_vm1, %v4217_v24, %v4345_v43 }
 0x615   : > { %4791 = vrot.lane.b32.xlu1 %v12509_v51, %s8202_s23  ;;  %16741 = vst [vmem:[#allocation47_spill] sm:$0xff] %v12879_v28  ;;  %v12883_v13 = vmul.f32 %v12871_v3, %v16623_v7  ;;  %16743 = vst [vmem:[#allocation124_spill] sm:$0xff] %v12887_v32  ;;  %v4537_v33 = vmul.f32 %v4404_v48, %v16717_v50 }
 0x616   : > { %4364 = vrot.lane.b32.xlu0 %v12509_v51, %s8201_s22 }
 0x617   : > { %v4676_v52 = vpop.permute.xlu1 %4675  ;;  %v4774_v59 = vpop.permute.xlu0 %4773  ;;  %16742 = vst [vmem:[#allocation269_spill] sm:$0xff] %v12883_v13 }
 0x618   : > { %v4831_v47 = vsel %vm338_vm0, %v4772_v6, %v4676_v52  ;;  %v4927_v10 = vsel %vm338_vm0, %v4676_v52, %v4772_v6 }
 0x619   : > { %5219 = vrot.lane.b32.xlu1 %v12509_v51, %s8203_s24  ;;  %v4963_v6 = vmul.f32 %v4927_v10, %v16709_v27  ;;  %v4964_v52 = vmul.f32 %v4831_v47, %v16711_v36 }
 0x61a   : > { %4236 = vrot.lane.b32.xlu0 %v12517_v11, %s8201_s22 }
 0x61b   : > { %v12867_v53 = vpop.permute.xlu1 %5103  ;;  %v12869_v5 = vpop.permute.xlu0 %5201 }
 0x61c   : > { %16738 = vst [vmem:[#allocation55_spill] sm:$0xff] %v12867_v53  ;;  %16739 = vst [vmem:[#allocation52_spill] sm:$0xff] %v12869_v5 }
 0x61d   : > { %4695 = vrot.lane.b32.xlu1 %v12517_v11, %s8202_s23 }
 0x61e   : > { %4793 = vrot.lane.b32.xlu0 %v12523_v23, %s8202_s23 }
 0x61f   : > { %v4347_v56 = vpop.permute.xlu1 %4346  ;;  %v4678_v58 = vpop.permute.xlu0 %4677 }
 0x620   : > { %v4832_v5 = vsel %vm338_vm0, %v4774_v59, %v4678_v58  ;;  %v4928_v45 = vsel %vm338_vm0, %v4678_v58, %v4774_v59 }
 0x621   : > { %v4965_v51 = vmul.f32 %v4928_v45, %v16709_v27  ;;  %v4966_v12 = vmul.f32 %v4832_v5, %v16711_v36  ;;  %5123 = vrot.lane.b32.xlu1 %v12517_v11, %s8203_s24  ;;  %v4536_v5 = vmul.f32 %v4500_v40, %v16716_v26 }
 0x622   : > { %5221 = vrot.lane.b32.xlu0 %v12523_v23, %s8203_s24 }
 0x623   : > { %v7671_v53 = vpack.c.bf16 %v4965_v51, %v4963_v6  ;;  %v12911_v58 = vpop.permute.xlu0 %5105  ;;  %v4219_v10 = vpop.permute.xlu1 %4218  ;;  %v7669_v59 = vpack.c.bf16 %v4966_v12, %v4964_v52 }
 0x624   : > { %16744 = vst [vmem:[#allocation67_spill] sm:$0xff] %v12911_v58  ;;  %v4405_v47 = vsel %vm318_vm1, %v4347_v56, %v4219_v10  ;;  %v4501_v45 = vsel %vm318_vm1, %v4219_v10, %v4347_v56  ;;  %v12929_v52 = vpop.f32.mrb[90].mxu0 }
 0x625   : > { %v4538_v43 = vmul.f32 %v4501_v45, %v16716_v26  ;;  %v4539_v24 = vmul.f32 %v4405_v47, %v16717_v50  ;;  %7670 = vmatprep.subr.bf16.mxu1 %v7669_v59  ;;  %4366 = vrot.lane.b32.xlu1 %v12523_v23, %s8201_s22  ;;  %16746 = vst [vmem:[#allocation17_spill] sm:$0xff] %v12929_v52  ;;  %v12931_v10 = vpop.f32.mrb[91].mxu0 }
 0x626   : > { %4697 = vrot.lane.b32.xlu0 %v12533_v21, %s8202_s23  ;;  %7672 = vmatpush1.bf16.msra.mxu1 %v7671_v53  ;;  %16747 = vst [vmem:[#allocation105_spill] sm:$0xff] %v12931_v10  ;;  %v12943_v45 = vmul.f32 %v12931_v10, %v16623_v7 }
 0x627   : > { %v7607_v51 = vpack.c.bf16 %v4538_v43, %v4536_v5  ;;  %v4776_v12 = vpop.permute.xlu1 %4775  ;;  %v4349_v6 = vpop.permute.xlu0 %4348  ;;  %v7605_v56 = vpack.c.bf16 %v4539_v24, %v4537_v33  ;;  %v12947_v5 = vmul.f32 %v12929_v52, %v16620_v1 }
 0x628   : > { %v12937_v33 = vpop.f32.mrb[92].mxu0  ;;  %16750 = vst [vmem:[#allocation62_spill] sm:$0xff] %v12943_v45 }
 0x629   : > { %7606 = vmatprep.subr.bf16.mxu0 %v7605_v56  ;;  %4238 = vrot.lane.b32.xlu1 %v12533_v21, %s8201_s22  ;;  %16748 = vst [vmem:[#allocation120_spill] sm:$0xff] %v12937_v33  ;;  %v12939_v47 = vpop.f32.mrb[93].mxu0  ;;  %16751 = vst [vmem:[#allocation81_spill] sm:$0xff] %v12947_v5  ;;  %v12955_v24 = vmul.f32 %v12937_v33, %v16620_v1 }
 0x62a   : > { %5125 = vrot.lane.b32.xlu0 %v12533_v21, %s8203_s24  ;;  %7608 = vmatpush1.bf16.msra.mxu0 %v7607_v51  ;;  %16749 = vst [vmem:[#allocation65_spill] sm:$0xff] %v12939_v47  ;;  %v12951_v43 = vmul.f32 %v12939_v47, %v16623_v7 }
 0x62b   : > { %v12927_v40 = vpop.permute.xlu1 %5203  ;;  %v4221_v48 = vpop.permute.xlu0 %4220  ;;  %16753 = vst [vmem:[#allocation125_spill] sm:$0xff] %v12955_v24 }
 0x62c   : > { %16745 = vst [vmem:[#allocation61_spill] sm:$0xff] %v12927_v40  ;;  %16752 = vst [vmem:[#allocation74_spill] sm:$0xff] %v12951_v43  ;;  %v4502_v24 = vsel %vm318_vm1, %v4221_v48, %v4349_v6 }
 0x62d   : > { %4795 = vrot.lane.b32.xlu1 %v12545_v25, %s8202_s23 }
 0x62e   : > { %4368 = vrot.lane.b32.xlu0 %v12545_v25, %s8201_s22 }
 0x62f   : > { %v4680_v53 = vpop.permute.xlu1 %4679  ;;  %v4778_v59 = vpop.permute.xlu0 %4777 }
 0x630   : > { %v4833_v15 = vsel %vm338_vm0, %v4776_v12, %v4680_v53  ;;  %v4929_v13 = vsel %vm338_vm0, %v4680_v53, %v4776_v12  ;;  %v4406_v53 = vsel %vm318_vm1, %v4349_v6, %v4221_v48 }
 0x631   : > { %5223 = vrot.lane.b32.xlu1 %v12545_v25, %s8203_s24  ;;  %v4967_v28 = vmul.f32 %v4929_v13, %v16709_v27  ;;  %v4968_v32 = vmul.f32 %v4833_v15, %v16711_v36  ;;  %v4541_v43 = vmul.f32 %v4406_v53, %v16717_v50 }
 0x632   : > { %4240 = vrot.lane.b32.xlu0 %v12553_v2, %s8201_s22 }
 0x633   : > { %v12961_v51 = vpop.permute.xlu1 %5107  ;;  %v12963_v56 = vpop.permute.xlu0 %5205 }
 0x634   : > { %16754 = vst [vmem:[#allocation107_spill] sm:$0xff] %v12961_v51  ;;  %16755 = vst [vmem:[#allocation150_spill] sm:$0xff] %v12963_v56 }
 0x635   : > { %4699 = vrot.lane.b32.xlu1 %v12553_v2, %s8202_s23 }
 0x636   : > { %4797 = vrot.lane.b32.xlu0 %v12555_v61, %s8202_s23 }
 0x637   : > { %v4351_v40 = vpop.permute.xlu1 %4350  ;;  %v4682_v51 = vpop.permute.xlu0 %4681 }
 0x638   : > { %v4834_v56 = vsel %vm338_vm0, %v4778_v59, %v4682_v51  ;;  %v4930_v58 = vsel %vm338_vm0, %v4682_v51, %v4778_v59 }
 0x639   : > { %v4969_v5 = vmul.f32 %v4930_v58, %v16709_v27  ;;  %v4970_v12 = vmul.f32 %v4834_v56, %v16711_v36  ;;  %5127 = vrot.lane.b32.xlu1 %v12553_v2, %s8203_s24  ;;  %v4540_v56 = vmul.f32 %v4502_v24, %v16716_v26 }
 0x63a   : > { %5225 = vrot.lane.b32.xlu0 %v12555_v61, %s8203_s24 }
 0x63b   : > { %v7675_v45 = vpack.c.bf16 %v4969_v5, %v4967_v28  ;;  %v12987_v59 = vpop.permute.xlu0 %5109  ;;  %v4223_v13 = vpop.permute.xlu1 %4222  ;;  %v7673_v51 = vpack.c.bf16 %v4970_v12, %v4968_v32 }
 0x63c   : > { %16756 = vst [vmem:[#allocation113_spill] sm:$0xff] %v12987_v59  ;;  %v4407_v15 = vsel %vm318_vm1, %v4351_v40, %v4223_v13  ;;  %v4503_v58 = vsel %vm318_vm1, %v4223_v13, %v4351_v40  ;;  %v12999_v12 = vpop.f32.mrb[94].mxu0 }
 0x63d   : > { %v4542_v6 = vmul.f32 %v4503_v58, %v16716_v26  ;;  %v4543_v48 = vmul.f32 %v4407_v15, %v16717_v50  ;;  %7674 = vmatprep.subr.bf16.mxu1 %v7673_v51  ;;  %4370 = vrot.lane.b32.xlu1 %v12555_v61, %s8201_s22  ;;  %v13001_v24 = vpop.f32.mrb[95].mxu0  ;;  %v13019_v15 = vmul.f32 %v12999_v12, %v16620_v1 }
 0x63e   : > { %4701 = vrot.lane.b32.xlu0 %v12569_v16, %s8202_s23  ;;  %7676 = vmatpush1.bf16.msra.mxu1 %v7675_v45  ;;  %16757 = vst [vmem:[#allocation79_spill] sm:$0xff] %v13001_v24  ;;  %v13007_v53 = vpop.f32.mrb[96].mxu0 }
 0x63f   : > { %v7611_v32 = vpack.c.bf16 %v4542_v6, %v4540_v56  ;;  %v4780_v28 = vpop.permute.xlu1 %4779  ;;  %v4353_v5 = vpop.permute.xlu0 %4352  ;;  %v7609_v40 = vpack.c.bf16 %v4543_v48, %v4541_v43  ;;  %16758 = vst [vmem:[#allocation75_spill] sm:$0xff] %v13007_v53  ;;  %v13015_v43 = vmul.f32 %v13001_v24, %v16623_v7  ;;  %16762 = vst [vmem:[#allocation186_spill] sm:$0xff] %v13019_v15 }
 0x640   : > { %v13011_v51 = vpop.f32.mrb[97].mxu0  ;;  %v13027_v56 = vmul.f32 %v13007_v53, %v16620_v1 }
 0x641   : > { %7610 = vmatprep.subr.bf16.mxu0 %v7609_v40  ;;  %4242 = vrot.lane.b32.xlu1 %v12569_v16, %s8201_s22  ;;  %16760 = vst [vmem:[#allocation93_spill] sm:$0xff] %v13011_v51  ;;  %16761 = vst [vmem:[#allocation106_spill] sm:$0xff] %v13015_v43  ;;  %v13023_v58 = vmul.f32 %v13011_v51, %v16623_v7 }
 0x642   : > { %5129 = vrot.lane.b32.xlu0 %v12569_v16, %s8203_s24  ;;  %7612 = vmatpush1.bf16.msra.mxu0 %v7611_v32  ;;  %16764 = vst [vmem:[#allocation85_spill] sm:$0xff] %v13027_v56 }
 0x643   : > { %v13009_v13 = vpop.permute.xlu1 %5207  ;;  %v4225_v45 = vpop.permute.xlu0 %4224  ;;  %16763 = vst [vmem:[#allocation84_spill] sm:$0xff] %v13023_v58 }
 0x644   : > { %16759 = vst [vmem:[#allocation94_spill] sm:$0xff] %v13009_v13 }
 0x645   : > { %4799 = vrot.lane.b32.xlu1 %v12599_v49, %s8202_s23 }
 0x646   : > { %4372 = vrot.lane.b32.xlu0 %v12599_v49, %s8201_s22 }
 0x647   : > { %v4684_v6 = vpop.permute.xlu1 %4683  ;;  %v4782_v48 = vpop.permute.xlu0 %4781 }
 0x648   : > { %v4835_v13 = vsel %vm338_vm0, %v4780_v28, %v4684_v6  ;;  %v4931_v59 = vsel %vm338_vm0, %v4684_v6, %v4780_v28  ;;  %v4408_v6 = vsel %vm318_vm1, %v4353_v5, %v4225_v45 }
 0x649   : > { %5227 = vrot.lane.b32.xlu1 %v12599_v49, %s8203_s24  ;;  %v4971_v43 = vmul.f32 %v4931_v59, %v16709_v27  ;;  %v4972_v58 = vmul.f32 %v4835_v13, %v16711_v36  ;;  %v4545_v16 = vmul.f32 %v4408_v6, %v16717_v50 }
 0x64a   : > { %4244 = vrot.lane.b32.xlu0 %v12601_v44, %s8201_s22 }
 0x64b   : > { %v13041_v1 = vpop.permute.xlu1 %5111  ;;  %v13043_v7 = vpop.permute.xlu0 %5209 }
 0x64c   : > { %16765 = vst [vmem:[#allocation195_spill] sm:$0xff] %v13041_v1  ;;  %16766 = vst [vmem:[#allocation161_spill] sm:$0xff] %v13043_v7  ;;  %v4504_v7 = vsel %vm318_vm1, %v4225_v45, %v4353_v5 }
 0x64d   : > { %4703 = vrot.lane.b32.xlu1 %v12601_v44, %s8202_s23 }
 0x64e   : > { %4801 = vrot.lane.b32.xlu0 %v12603_v31, %s8202_s23 }
 0x64f   : > { %v4355_v40 = vpop.permute.xlu1 %4354  ;;  %v4686_v32 = vpop.permute.xlu0 %4685 }
 0x650   : > { %v4836_v15 = vsel %vm338_vm0, %v4782_v48, %v4686_v32  ;;  %v4932_v56 = vsel %vm338_vm0, %v4686_v32, %v4782_v48 }
 0x651   : > { %v4973_v1 = vmul.f32 %v4932_v56, %v16709_v27  ;;  %v4974_v28 = vmul.f32 %v4836_v15, %v16711_v36  ;;  %5131 = vrot.lane.b32.xlu1 %v12601_v44, %s8203_s24  ;;  %v4544_v15 = vmul.f32 %v4504_v7, %v16716_v26 }
 0x652   : > { %5229 = vrot.lane.b32.xlu0 %v12603_v31, %s8203_s24 }
 0x653   : > { %v7679_v49 = vpack.c.bf16 %v4973_v1, %v4971_v43  ;;  %v13063_v48 = vpop.permute.xlu0 %5113  ;;  %v4227_v59 = vpop.permute.xlu1 %4226  ;;  %v7677_v32 = vpack.c.bf16 %v4974_v28, %v4972_v58 }
 0x654   : > { %16767 = vst [vmem:[#allocation96_spill] sm:$0xff] %v13063_v48  ;;  %v4409_v13 = vsel %vm318_vm1, %v4355_v40, %v4227_v59  ;;  %v4505_v56 = vsel %vm318_vm1, %v4227_v59, %v4355_v40 }
 0x655   : > { %v4546_v5 = vmul.f32 %v4505_v56, %v16716_v26  ;;  %v4547_v45 = vmul.f32 %v4409_v13, %v16717_v50  ;;  %7678 = vmatprep.subr.bf16.mxu1 %v7677_v32  ;;  %4374 = vrot.lane.b32.xlu1 %v12603_v31, %s8201_s22 }
 0x656   : > { %4705 = vrot.lane.b32.xlu0 %v12609_v22, %s8202_s23  ;;  %7680 = vmatpush1.bf16.msra.mxu1 %v7679_v49 }
 0x657   : > { %v7615_v43 = vpack.c.bf16 %v4546_v5, %v4544_v15  ;;  %v4784_v58 = vpop.permute.xlu1 %4783  ;;  %v4357_v1 = vpop.permute.xlu0 %4356  ;;  %v7613_v40 = vpack.c.bf16 %v4547_v45, %v4545_v16 }
 0x659   : > { %7614 = vmatprep.subr.bf16.mxu0 %v7613_v40  ;;  %4246 = vrot.lane.b32.xlu1 %v12609_v22, %s8201_s22 }
 0x65a   : > { %5133 = vrot.lane.b32.xlu0 %v12609_v22, %s8203_s24  ;;  %7616 = vmatpush1.bf16.msra.mxu0 %v7615_v43 }
 0x65b   : > { %v13079_v7 = vpop.permute.xlu1 %5211  ;;  %v4229_v28 = vpop.permute.xlu0 %4228 }
 0x65c   : > { %16768 = vst [vmem:[#allocation95_spill] sm:$0xff] %v13079_v7 }
 0x65d   : > { %4803 = vrot.lane.b32.xlu1 %v12651_v35, %s8202_s23 }
 0x65e   : > { %4376 = vrot.lane.b32.xlu0 %v12651_v35, %s8201_s22 }
 0x65f   : > { %v4688_v49 = vpop.permute.xlu1 %4687  ;;  %v4786_v6 = vpop.permute.xlu0 %4785 }
 0x660   : > { %v4933_v32 = vsel %vm338_vm0, %v4688_v49, %v4784_v58  ;;  %v4837_v13 = vsel %vm338_vm0, %v4784_v58, %v4688_v49  ;;  %v4410_v58 = vsel %vm318_vm1, %v4357_v1, %v4229_v28  ;;  %v4506_v49 = vsel %vm318_vm1, %v4229_v28, %v4357_v1 }
 0x661   : > { %5231 = vrot.lane.b32.xlu1 %v12651_v35, %s8203_s24  ;;  %v4975_v5 = vmul.f32 %v4933_v32, %v16709_v27  ;;  %v4976_v40 = vmul.f32 %v4837_v13, %v16711_v36  ;;  %v4549_v48 = vmul.f32 %v4410_v58, %v16717_v50 }
 0x662   : > { %4248 = vrot.lane.b32.xlu0 %v12653_v46, %s8201_s22 }
 0x663   : > { %v13089_v16 = vpop.permute.xlu1 %5115  ;;  %v13091_v59 = vpop.permute.xlu0 %5213 }
 0x664   : > { %16769 = vst [vmem:[#allocation109_spill] sm:$0xff] %v13089_v16  ;;  %16770 = vst [vmem:[#allocation108_spill] sm:$0xff] %v13091_v59 }
 0x665   : > { %4707 = vrot.lane.b32.xlu1 %v12653_v46, %s8202_s23 }
 0x666   : > { %4805 = vrot.lane.b32.xlu0 %v12655_v17, %s8202_s23 }
 0x667   : > { %v4359_v56 = vpop.permute.xlu1 %4358 }
 0x668   : > { %v4690_v15 = vpop.permute.xlu0 %4689 }
 0x669   : > { %v4838_v45 = vsel %vm338_vm0, %v4786_v6, %v4690_v15  ;;  %v4934_v43 = vsel %vm338_vm0, %v4690_v15, %v4786_v6  ;;  %5135 = vrot.lane.b32.xlu1 %v12653_v46, %s8203_s24 }
 0x66a   : > { %v4977_v7 = vmul.f32 %v4934_v43, %v16709_v27  ;;  %v4978_v16 = vmul.f32 %v4838_v45, %v16711_v36  ;;  %5233 = vrot.lane.b32.xlu0 %v12655_v17, %s8203_s24  ;;  %v4548_v45 = vmul.f32 %v4506_v49, %v16716_v26 }
 0x66b   : > { %v4231_v6 = vpop.permute.xlu1 %4230 }
 0x66c   : > { %v7683_v32 = vpack.c.bf16 %v4977_v7, %v4975_v5  ;;  %v13111_v59 = vpop.permute.xlu0 %5117  ;;  %v7681_v15 = vpack.c.bf16 %v4978_v16, %v4976_v40  ;;  %v4411_v13 = vsel %vm318_vm1, %v4359_v56, %v4231_v6  ;;  %v4507_v43 = vsel %vm318_vm1, %v4231_v6, %v4359_v56 }
 0x66d   : > { %v4550_v46 = vmul.f32 %v4507_v43, %v16716_v26  ;;  %v4551_v17 = vmul.f32 %v4411_v13, %v16717_v50  ;;  %4250 = vrot.lane.b32.xlu1 %v12661_v38, %s8201_s22 }
 0x66e   : > { %7682 = vmatprep.subr.bf16.mxu1 %v7681_v15  ;;  %4709 = vrot.lane.b32.xlu0 %v12661_v38, %s8202_s23 }
 0x66f   : > { %v7619_v1 = vpack.c.bf16 %v4550_v46, %v4548_v45  ;;  %7684 = vmatpush1.bf16.msra.mxu1 %v7683_v32  ;;  %v4788_v7 = vpop.permute.xlu1 %4787  ;;  %v7617_v16 = vpack.c.bf16 %v4551_v17, %v4549_v48 }
 0x670   : > { %v4361_v28 = vpop.permute.xlu0 %4360 }
 0x671   : > { %7618 = vmatprep.subr.bf16.mxu0 %v7617_v16  ;;  %4807 = vrot.lane.b32.xlu1 %v12722_v37, %s8202_s23 }
 0x672   : > { %5137 = vrot.lane.b32.xlu0 %v12661_v38, %s8203_s24  ;;  %7620 = vmatpush1.bf16.msra.mxu0 %v7619_v1 }
 0x673   : > { %v13127_v56 = vpop.permute.xlu1 %5215 }
 0x674   : > { %16771 = vst [vmem:[#allocation97_spill] sm:$0xff] %v13127_v56  ;;  %v4233_v5 = vpop.permute.xlu0 %4232 }
 0x675   : > { %5235 = vrot.lane.b32.xlu1 %v12722_v37, %s8203_s24  ;;  %v4412_v16 = vsel %vm318_vm1, %v4361_v28, %v4233_v5 }
 0x676   : > { %4252 = vrot.lane.b32.xlu0 %v12731_v20, %s8201_s22 }
 0x677   : > { %v4692_v46 = vpop.permute.xlu1 %4691 }
 0x678   : > { %v4790_v40 = vpop.permute.xlu0 %4789  ;;  %v4839_v58 = vsel %vm338_vm0, %v4788_v7, %v4692_v46  ;;  %v4935_v49 = vsel %vm338_vm0, %v4692_v46, %v4788_v7  ;;  %v4508_v46 = vsel %vm318_vm1, %v4233_v5, %v4361_v28 }
 0x679   : > { %4711 = vrot.lane.b32.xlu1 %v12731_v20, %s8202_s23  ;;  %v4979_v43 = vmul.f32 %v4935_v49, %v16709_v27  ;;  %v4980_v45 = vmul.f32 %v4839_v58, %v16711_v36 }
 0x67a   : > { %4809 = vrot.lane.b32.xlu0 %v12735_v9, %s8202_s23 }
 0x67b   : > { %v13137_v17 = vpop.permute.xlu1 %5119 }
 0x67c   : > { %16772 = vst [vmem:[#allocation98_spill] sm:$0xff] %v13137_v17  ;;  %v13139_v48 = vpop.permute.xlu0 %5217  ;;  %v4553_v17 = vmul.f32 %v4412_v16, %v16717_v50 }
 0x67d   : > { %16773 = vst [vmem:[#allocation205_spill] sm:$0xff] %v13139_v48  ;;  %5139 = vrot.lane.b32.xlu1 %v12731_v20, %s8203_s24 }
 0x67e   : > { %5237 = vrot.lane.b32.xlu0 %v12735_v9, %s8203_s24 }
 0x67f   : > { %v4363_v32 = vpop.permute.xlu1 %4362 }
 0x680   : > { %v4694_v6 = vpop.permute.xlu0 %4693 }
 0x681   : > { %v4840_v15 = vsel %vm338_vm0, %v4790_v40, %v4694_v6  ;;  %v4936_v13 = vsel %vm338_vm0, %v4694_v6, %v4790_v40  ;;  %4254 = vrot.lane.b32.xlu1 %v12741_v60, %s8201_s22 }
 0x682   : > { %v4981_v1 = vmul.f32 %v4936_v13, %v16709_v27  ;;  %v4982_v7 = vmul.f32 %v4840_v15, %v16711_v36  ;;  %4713 = vrot.lane.b32.xlu0 %v12741_v60, %s8202_s23  ;;  %v4552_v15 = vmul.f32 %v4508_v46, %v16716_v26 }
 0x683   : > { %v4235_v49 = vpop.permute.xlu1 %4234 }
 0x684   : > { %v7687_v56 = vpack.c.bf16 %v4981_v1, %v4979_v43  ;;  %v13159_v40 = vpop.permute.xlu0 %5121  ;;  %v7685_v6 = vpack.c.bf16 %v4982_v7, %v4980_v45  ;;  %v4413_v58 = vsel %vm318_vm1, %v4363_v32, %v4235_v49  ;;  %v4509_v13 = vsel %vm318_vm1, %v4235_v49, %v4363_v32 }
 0x685   : > { %16774 = vst [vmem:[#allocation204_spill] sm:$0xff] %v13159_v40  ;;  %v4554_v28 = vmul.f32 %v4509_v13, %v16716_v26  ;;  %v4555_v5 = vmul.f32 %v4413_v58, %v16717_v50  ;;  %4811 = vrot.lane.b32.xlu1 %v12791_v41, %s8202_s23 }
 0x686   : > { %7686 = vmatprep.subr.bf16.mxu1 %v7685_v6  ;;  %5141 = vrot.lane.b32.xlu0 %v12741_v60, %s8203_s24 }
 0x687   : > { %v7623_v43 = vpack.c.bf16 %v4554_v28, %v4552_v15  ;;  %7688 = vmatpush1.bf16.msra.mxu1 %v7687_v56  ;;  %v4792_v45 = vpop.permute.xlu1 %4791  ;;  %v7621_v32 = vpack.c.bf16 %v4555_v5, %v4553_v17 }
 0x688   : > { %v4365_v1 = vpop.permute.xlu0 %4364 }
 0x689   : > { %7622 = vmatprep.subr.bf16.mxu0 %v7621_v32  ;;  %5239 = vrot.lane.b32.xlu1 %v12791_v41, %s8203_s24 }
 0x68a   : > { %4256 = vrot.lane.b32.xlu0 %v12793_v30, %s8201_s22  ;;  %7624 = vmatpush1.bf16.msra.mxu0 %v7623_v43 }
 0x68b   : > { %v13175_v7 = vpop.permute.xlu1 %5219 }
 0x68c   : > { %16775 = vst [vmem:[#allocation223_spill] sm:$0xff] %v13175_v7  ;;  %v4237_v16 = vpop.permute.xlu0 %4236 }
 0x68d   : > { %4715 = vrot.lane.b32.xlu1 %v12793_v30, %s8202_s23 }
 0x68e   : > { %4813 = vrot.lane.b32.xlu0 %v12799_v42, %s8202_s23 }
 0x68f   : > { %v4696_v56 = vpop.permute.xlu1 %4695 }
 0x690   : > { %v4794_v46 = vpop.permute.xlu0 %4793  ;;  %v4841_v6 = vsel %vm338_vm0, %v4792_v45, %v4696_v56  ;;  %v4937_v58 = vsel %vm338_vm0, %v4696_v56, %v4792_v45  ;;  %v4414_v56 = vsel %vm318_vm1, %v4365_v1, %v4237_v16 }
 0x691   : > { %5143 = vrot.lane.b32.xlu1 %v12793_v30, %s8203_s24  ;;  %v4983_v43 = vmul.f32 %v4937_v58, %v16709_v27  ;;  %v4984_v32 = vmul.f32 %v4841_v6, %v16711_v36  ;;  %v4557_v48 = vmul.f32 %v4414_v56, %v16717_v50 }
 0x692   : > { %5241 = vrot.lane.b32.xlu0 %v12799_v42, %s8203_s24 }
 0x693   : > { %v13185_v17 = vpop.permute.xlu1 %5123 }
 0x694   : > { %16776 = vst [vmem:[#allocation222_spill] sm:$0xff] %v13185_v17  ;;  %v13187_v49 = vpop.permute.xlu0 %5221  ;;  %v4510_v17 = vsel %vm318_vm1, %v4237_v16, %v4365_v1 }
 0x695   : > { %16777 = vst [vmem:[#allocation111_spill] sm:$0xff] %v13187_v49  ;;  %4258 = vrot.lane.b32.xlu1 %v12805_v54, %s8201_s22 }
 0x696   : > { %4717 = vrot.lane.b32.xlu0 %v12805_v54, %s8202_s23 }
 0x697   : > { %v4367_v13 = vpop.permute.xlu1 %4366 }
 0x698   : > { %v4698_v15 = vpop.permute.xlu0 %4697 }
 0x699   : > { %v4842_v28 = vsel %vm338_vm0, %v4794_v46, %v4698_v15  ;;  %v4938_v5 = vsel %vm338_vm0, %v4698_v15, %v4794_v46  ;;  %4815 = vrot.lane.b32.xlu1 %v12857_v62, %s8202_s23 }
 0x69a   : > { %v4985_v7 = vmul.f32 %v4938_v5, %v16709_v27  ;;  %v4986_v45 = vmul.f32 %v4842_v28, %v16711_v36  ;;  %5145 = vrot.lane.b32.xlu0 %v12805_v54, %s8203_s24  ;;  %v4556_v28 = vmul.f32 %v4510_v17, %v16716_v26 }
 0x69b   : > { %v4239_v58 = vpop.permute.xlu1 %4238 }
 0x69c   : > { %v7691_v49 = vpack.c.bf16 %v4985_v7, %v4983_v43  ;;  %v13207_v46 = vpop.permute.xlu0 %5125  ;;  %v7689_v15 = vpack.c.bf16 %v4986_v45, %v4984_v32  ;;  %v4415_v6 = vsel %vm318_vm1, %v4367_v13, %v4239_v58  ;;  %v4511_v5 = vsel %vm318_vm1, %v4239_v58, %v4367_v13 }
 0x69d   : > { %16778 = vst [vmem:[#allocation110_spill] sm:$0xff] %v13207_v46  ;;  %v4558_v1 = vmul.f32 %v4511_v5, %v16716_v26  ;;  %v4559_v16 = vmul.f32 %v4415_v6, %v16717_v50  ;;  %5243 = vrot.lane.b32.xlu1 %v12857_v62, %s8203_s24 }
 0x69e   : > { %7690 = vmatprep.subr.bf16.mxu1 %v7689_v15  ;;  %4260 = vrot.lane.b32.xlu0 %v12859_v39, %s8201_s22 }
 0x69f   : > { %v7627_v7 = vpack.c.bf16 %v4558_v1, %v4556_v28  ;;  %7692 = vmatpush1.bf16.msra.mxu1 %v7691_v49  ;;  %v4796_v43 = vpop.permute.xlu1 %4795  ;;  %v7625_v13 = vpack.c.bf16 %v4559_v16, %v4557_v48 }
 0x6a0   : > { %v4369_v32 = vpop.permute.xlu0 %4368 }
 0x6a1   : > { %7626 = vmatprep.subr.bf16.mxu0 %v7625_v13  ;;  %4719 = vrot.lane.b32.xlu1 %v12859_v39, %s8202_s23 }
 0x6a2   : > { %4817 = vrot.lane.b32.xlu0 %v12865_v63, %s8202_s23  ;;  %7628 = vmatpush1.bf16.msra.mxu0 %v7627_v7 }
 0x6a3   : > { %v13223_v17 = vpop.permute.xlu1 %5223 }
 0x6a4   : > { %16779 = vst [vmem:[#allocation147_spill] sm:$0xff] %v13223_v17  ;;  %v4241_v45 = vpop.permute.xlu0 %4240 }
 0x6a5   : > { %5147 = vrot.lane.b32.xlu1 %v12859_v39, %s8203_s24 }
 0x6a6   : > { %5245 = vrot.lane.b32.xlu0 %v12865_v63, %s8203_s24 }
 0x6a7   : > { %v4700_v49 = vpop.permute.xlu1 %4699 }
 0x6a8   : > { %v4798_v56 = vpop.permute.xlu0 %4797  ;;  %v4843_v15 = vsel %vm338_vm0, %v4796_v43, %v4700_v49  ;;  %v4939_v6 = vsel %vm338_vm0, %v4700_v49, %v4796_v43  ;;  %v4416_v49 = vsel %vm318_vm1, %v4369_v32, %v4241_v45 }
 0x6a9   : > { %4262 = vrot.lane.b32.xlu1 %v12871_v3, %s8201_s22  ;;  %v4987_v7 = vmul.f32 %v4939_v6, %v16709_v27  ;;  %v4988_v13 = vmul.f32 %v4843_v15, %v16711_v36  ;;  %v4561_v46 = vmul.f32 %v4416_v49, %v16717_v50 }
 0x6aa   : > { %4721 = vrot.lane.b32.xlu0 %v12871_v3, %s8202_s23 }
 0x6ab   : > { %v13233_v48 = vpop.permute.xlu1 %5127 }
 0x6ac   : > { %16780 = vst [vmem:[#allocation146_spill] sm:$0xff] %v13233_v48  ;;  %v13235_v58 = vpop.permute.xlu0 %5225  ;;  %v4512_v48 = vsel %vm318_vm1, %v4241_v45, %v4369_v32 }
 0x6ad   : > { %16781 = vst [vmem:[#allocation99_spill] sm:$0xff] %v13235_v58  ;;  %4819 = vrot.lane.b32.xlu1 %v12929_v52, %s8202_s23 }
 0x6ae   : > { %5149 = vrot.lane.b32.xlu0 %v12871_v3, %s8203_s24 }
 0x6af   : > { %v4371_v5 = vpop.permute.xlu1 %4370 }
 0x6b0   : > { %v4702_v28 = vpop.permute.xlu0 %4701 }
 0x6b1   : > { %v4844_v1 = vsel %vm338_vm0, %v4798_v56, %v4702_v28  ;;  %v4940_v16 = vsel %vm338_vm0, %v4702_v28, %v4798_v56  ;;  %5247 = vrot.lane.b32.xlu1 %v12929_v52, %s8203_s24 }
 0x6b2   : > { %v4989_v17 = vmul.f32 %v4940_v16, %v16709_v27  ;;  %v4990_v43 = vmul.f32 %v4844_v1, %v16711_v36  ;;  %4264 = vrot.lane.b32.xlu0 %v12931_v10, %s8201_s22  ;;  %v4560_v1 = vmul.f32 %v4512_v48, %v16716_v26 }
 0x6b3   : > { %v4243_v6 = vpop.permute.xlu1 %4242 }
 0x6b4   : > { %v7695_v58 = vpack.c.bf16 %v4989_v17, %v4987_v7  ;;  %v13255_v56 = vpop.permute.xlu0 %5129  ;;  %v7693_v28 = vpack.c.bf16 %v4990_v43, %v4988_v13  ;;  %v4417_v15 = vsel %vm318_vm1, %v4371_v5, %v4243_v6  ;;  %v4513_v16 = vsel %vm318_vm1, %v4243_v6, %v4371_v5 }
 0x6b5   : > { %16782 = vst [vmem:[#allocation100_spill] sm:$0xff] %v13255_v56  ;;  %v4562_v32 = vmul.f32 %v4513_v16, %v16716_v26  ;;  %v4563_v45 = vmul.f32 %v4417_v15, %v16717_v50  ;;  %4723 = vrot.lane.b32.xlu1 %v12931_v10, %s8202_s23 }
 0x6b6   : > { %7694 = vmatprep.subr.bf16.mxu1 %v7693_v28  ;;  %4821 = vrot.lane.b32.xlu0 %v12937_v33, %s8202_s23 }
 0x6b7   : > { %v7631_v17 = vpack.c.bf16 %v4562_v32, %v4560_v1  ;;  %7696 = vmatpush1.bf16.msra.mxu1 %v7695_v58  ;;  %v4800_v7 = vpop.permute.xlu1 %4799  ;;  %v7629_v5 = vpack.c.bf16 %v4563_v45, %v4561_v46 }
 0x6b8   : > { %v4373_v13 = vpop.permute.xlu0 %4372 }
 0x6b9   : > { %7630 = vmatprep.subr.bf16.mxu0 %v7629_v5  ;;  %5151 = vrot.lane.b32.xlu1 %v12931_v10, %s8203_s24 }
 0x6ba   : > { %5249 = vrot.lane.b32.xlu0 %v12937_v33, %s8203_s24  ;;  %7632 = vmatpush1.bf16.msra.mxu0 %v7631_v17 }
 0x6bb   : > { %v13271_v48 = vpop.permute.xlu1 %5227 }
 0x6bc   : > { %16783 = vst [vmem:[#allocation26_spill] sm:$0xff] %v13271_v48  ;;  %v4245_v43 = vpop.permute.xlu0 %4244 }
 0x6bd   : > { %4266 = vrot.lane.b32.xlu1 %v12939_v47, %s8201_s22 }
 0x6be   : > { %4725 = vrot.lane.b32.xlu0 %v12939_v47, %s8202_s23 }
 0x6bf   : > { %v4704_v58 = vpop.permute.xlu1 %4703 }
 0x6c0   : > { %v4802_v49 = vpop.permute.xlu0 %4801  ;;  %v4845_v28 = vsel %vm338_vm0, %v4800_v7, %v4704_v58  ;;  %v4941_v15 = vsel %vm338_vm0, %v4704_v58, %v4800_v7  ;;  %v4418_v58 = vsel %vm318_vm1, %v4373_v13, %v4245_v43 }
 0x6c1   : > { %4823 = vrot.lane.b32.xlu1 %v12999_v12, %s8202_s23  ;;  %v4991_v17 = vmul.f32 %v4941_v15, %v16709_v27  ;;  %v4992_v5 = vmul.f32 %v4845_v28, %v16711_v36 }
 0x6c2   : > { %5153 = vrot.lane.b32.xlu0 %v12939_v47, %s8203_s24 }
 0x6c3   : > { %v13281_v46 = vpop.permute.xlu1 %5131 }
 0x6c4   : > { %16784 = vst [vmem:[#allocation8_spill] sm:$0xff] %v13281_v46  ;;  %v13283_v6 = vpop.permute.xlu0 %5229  ;;  %v4514_v46 = vsel %vm318_vm1, %v4245_v43, %v4373_v13 }
 0x6c5   : > { %16785 = vst [vmem:[#allocation149_spill] sm:$0xff] %v13283_v6  ;;  %4727 = vrot.lane.b32.xlu1 %v13001_v24, %s8202_s23  ;;  %v4564_v43 = vmul.f32 %v4514_v46, %v16716_v26  ;;  %v4565_v6 = vmul.f32 %v4418_v58, %v16717_v50 }
 0x6c6   : > { %4268 = vrot.lane.b32.xlu0 %v13001_v24, %s8201_s22 }
 0x6c7   : > { %v4375_v16 = vpop.permute.xlu1 %4374 }
 0x6c8   : > { %v4706_v1 = vpop.permute.xlu0 %4705 }
 0x6c9   : > { %v4846_v32 = vsel %vm338_vm0, %v4802_v49, %v4706_v1  ;;  %v4942_v45 = vsel %vm338_vm0, %v4706_v1, %v4802_v49  ;;  %5155 = vrot.lane.b32.xlu1 %v13001_v24, %s8203_s24  ;;  %v7111_v49 = vld [vmem:[%s15174_s4 + $0x18] sm:$0xff] }
 0x6ca   : > { %v4993_v48 = vmul.f32 %v4942_v45, %v16709_v27  ;;  %v4994_v7 = vmul.f32 %v4846_v32, %v16711_v36  ;;  %4825 = vrot.lane.b32.xlu0 %v13007_v53, %s8202_s23  ;;  %5086 = vmatprep.mubr.f32.mxu1 %v7111_v49 }
 0x6cb   : > { %v4247_v1 = vpop.permute.xlu1 %4246 }
 0x6cc   : > { %v7699_v15 = vpack.c.bf16 %v4993_v48, %v4991_v17  ;;  %v13306_v28 = vpop.permute.xlu0 %5133  ;;  %v7697_v45 = vpack.c.bf16 %v4994_v7, %v4992_v5  ;;  %v4419_v32 = vsel %vm318_vm1, %v4375_v16, %v4247_v1  ;;  %v4515_v13 = vsel %vm318_vm1, %v4247_v1, %v4375_v16 }
 0x6cd   : > { %v4566_v56 = vmul.f32 %v4515_v13, %v16716_v26  ;;  %v4567_v40 = vmul.f32 %v4419_v32, %v16717_v50  ;;  %4270 = vrot.lane.b32.xlu1 %v13011_v51, %s8201_s22 }
 0x6ce   : > { %7698 = vmatprep.subr.bf16.mxu1 %v7697_v45  ;;  %4729 = vrot.lane.b32.xlu0 %v13011_v51, %s8202_s23  ;;  %s16788_s23 = smov 112  }
 0x6cf   : > { %v7635_v48 = vpack.c.bf16 %v4566_v56, %v4564_v43  ;;  %7700 = vmatpush1.bf16.msra.mxu1 %v7699_v15  ;;  %v4804_v17 = vpop.permute.xlu1 %4803  ;;  %v7633_v16 = vpack.c.bf16 %v4567_v40, %v4565_v6 }
 0x6d0   : > { %v13318_v5 = vpop.permute.xlu0 %4376 }
 0x6d1   : > { %16786 = vst [vmem:[#allocation148_spill] sm:$0xff] %v13318_v5  ;;  %7634 = vmatprep.subr.bf16.mxu0 %v7633_v16  ;;  %5251 = vrot.lane.b32.xlu1 %v12999_v12, %s8203_s24 }
 0x6d2   : > { %5157 = vrot.lane.b32.xlu0 %v13011_v51, %s8203_s24  ;;  %7636 = vmatpush1.bf16.msra.mxu0 %v7635_v48 }
 0x6d3   : > { %v13324_v46 = vpop.permute.xlu1 %5231 }
 0x6d4   : > { %v13326_v7 = vpop.permute.xlu0 %4248 }
 0x6d5   : > { %16787 = vst [vmem:[#allocation112_spill] sm:$0xff] %v13326_v7  ;;  %5663 = vrot.lane.b32.xlu1 %v12258_v0, %s16788_s23 }
 0x6d6   : > { %5253 = vrot.lane.b32.xlu0 %v13007_v53, %s8203_s24 }
 0x6d7   : > { %v4708_v56 = vpop.permute.xlu1 %4707 }
 0x6d8   : > { %v4806_v40 = vpop.permute.xlu0 %4805  ;;  %v4943_v49 = vsel %vm338_vm0, %v4708_v56, %v4804_v17  ;;  %v4847_v15 = vsel %vm338_vm0, %v4804_v17, %v4708_v56 }
 0x6d9   : > { %5667 = vrot.lane.b32.xlu1 %v12267_v29, %s16788_s23  ;;  %v4995_v32 = vmul.f32 %v4943_v49, %v16709_v27  ;;  %v4996_v48 = vmul.f32 %v4847_v15, %v16711_v36 }
 0x6da   : > { %5665 = vrot.lane.b32.xlu0 %v12265_v4, %s16788_s23 }
 0x6db   : > { %v13336_v6 = vpop.permute.xlu1 %5135 }
 0x6dc   : > { %v13338_v58 = vpop.permute.xlu0 %5233 }
 0x6dd   : > { %5671 = vrot.lane.b32.xlu1 %v12293_v34, %s16788_s23 }
 0x6de   : > { %5669 = vrot.lane.b32.xlu0 %v12273_v57, %s16788_s23 }
 0x6df   : > { %v13346_v45 = vpop.permute.xlu1 %4250 }
 0x6e0   : > { %v4710_v1 = vpop.permute.xlu0 %4709  ;;  %16789 = vst [vmem:[#allocation126_spill] sm:$0xff] %v13346_v45  ;;  %v16798_v45 = vld [vmem:[#allocation191_spill] sm:$0xff] }
 0x6e1   : > { %v4848_v13 = vsel %vm338_vm0, %v4806_v40, %v4710_v1  ;;  %v4944_v43 = vsel %vm338_vm0, %v4710_v1, %v4806_v40  ;;  %5675 = vrot.lane.b32.xlu1 %v12307_v19, %s16788_s23  ;;  %v16792_v1 = vld [vmem:[#allocation116_spill] sm:$0xff] }
 0x6e2   : > { %v4997_v16 = vmul.f32 %v4944_v43, %v16709_v27  ;;  %v4998_v50 = vmul.f32 %v4848_v13, %v16711_v36  ;;  %5673 = vrot.lane.b32.xlu0 %v12301_v18, %s16788_s23  ;;  %v16794_v13 = vld [vmem:[#allocation167_spill] sm:$0xff] }
 0x6e3   : > { %v4808_v49 = vpop.permute.xlu1 %4807 }
 0x6e4   : > { %v7703_v17 = vpack.c.bf16 %v4997_v16, %v4995_v32  ;;  %v13358_v56 = vpop.permute.xlu0 %5137  ;;  %v7701_v26 = vpack.c.bf16 %v4998_v50, %v4996_v48  ;;  %v16797_v16 = vld [vmem:[#allocation157_spill] sm:$0xff] }
 0x6e5   : > { %5679 = vrot.lane.b32.xlu1 %v12329_v14, %s16788_s23 }
 0x6e6   : > { %7702 = vmatprep.subr.bf16.mxu1 %v7701_v26  ;;  %5677 = vrot.lane.b32.xlu0 %v12317_v8, %s16788_s23  ;;  %v16793_v26 = vld [vmem:[#allocation119_spill] sm:$0xff] }
 0x6e7   : > { %7704 = vmatpush1.bf16.msra.mxu1 %v7703_v17  ;;  %v13364_v40 = vpop.permute.xlu1 %5235 }
 0x6e8   : > { %16790 = vst [vmem:[#allocation183_spill] sm:$0xff] %v13364_v40  ;;  %v13366_v15 = vpop.permute.xlu0 %4252 }
 0x6e9   : > { %16791 = vst [vmem:[#allocation182_spill] sm:$0xff] %v13366_v15  ;;  %5683 = vrot.lane.b32.xlu1 %v16792_v1, %s16788_s23 }
 0x6ea   : > { %5681 = vrot.lane.b32.xlu0 %v12337_v55, %s16788_s23 }
 0x6eb   : > { %v4712_v32 = vpop.permute.xlu1 %4711 }
 0x6ec   : > { %v4810_v50 = vpop.permute.xlu0 %4809  ;;  %v4849_v17 = vsel %vm338_vm0, %v4808_v49, %v4712_v32  ;;  %v4945_v15 = vsel %vm338_vm0, %v4712_v32, %v4808_v49  ;;  %v16800_v49 = vld [vmem:[#allocation192_spill] sm:$0xff]  ;;  %v16801_v32 = vld [vmem:[#allocation219_spill] sm:$0xff] }
 0x6ed   : > { %5687 = vrot.lane.b32.xlu1 %v16794_v13, %s16788_s23  ;;  %v4999_v40 = vmul.f32 %v4945_v15, %v16709_v27  ;;  %v16804_v15 = vld [vmem:[#allocation228_spill] sm:$0xff] }
 0x6ee   : > { %5685 = vrot.lane.b32.xlu0 %v16793_v26, %s16788_s23 }
 0x6ef   : > { %v13376_v43 = vpop.permute.xlu1 %5139 }
 0x6f0   : > { %16795 = vst [vmem:[#allocation130_spill] sm:$0xff] %v13376_v43  ;;  %v13378_v48 = vpop.permute.xlu0 %5237  ;;  %v5000_v43 = vmul.f32 %v4849_v17, %v16711_v36 }
 0x6f1   : > { %16796 = vst [vmem:[#allocation132_spill] sm:$0xff] %v13378_v48  ;;  %5691 = vrot.lane.b32.xlu1 %v16798_v45, %s16788_s23 }
 0x6f2   : > { %5689 = vrot.lane.b32.xlu0 %v16797_v16, %s16788_s23 }
 0x6f3   : > { %v13386_v7 = vpop.permute.xlu1 %4254 }
 0x6f4   : > { %v4714_v5 = vpop.permute.xlu0 %4713  ;;  %16799 = vst [vmem:[#allocation127_spill] sm:$0xff] %v13386_v7 }
 0x6f5   : > { %v4850_v26 = vsel %vm338_vm0, %v4810_v50, %v4714_v5  ;;  %v4946_v13 = vsel %vm338_vm0, %v4714_v5, %v4810_v50  ;;  %5695 = vrot.lane.b32.xlu1 %v16801_v32, %s16788_s23  ;;  %v16803_v5 = vld [vmem:[#allocation211_spill] sm:$0xff] }
 0x6f6   : > { %v5001_v16 = vmul.f32 %v4946_v13, %v16709_v27  ;;  %v5002_v1 = vmul.f32 %v4850_v26, %v16711_v36  ;;  %5693 = vrot.lane.b32.xlu0 %v16800_v49, %s16788_s23  ;;  %v16807_v13 = vld [vmem:[#allocation229_spill] sm:$0xff] }
 0x6f7   : > { %v4812_v48 = vpop.permute.xlu1 %4811 }
 0x6f8   : > { %v7707_v45 = vpack.c.bf16 %v5001_v16, %v4999_v40  ;;  %v13398_v7 = vpop.permute.xlu0 %5141  ;;  %v7705_v55 = vpack.c.bf16 %v5002_v1, %v5000_v43  ;;  %v16808_v40 = vld [vmem:[#allocation251_spill] sm:$0xff]  ;;  %v16810_v43 = vld [vmem:[#allocation258_spill] sm:$0xff] }
 0x6f9   : > { %16802 = vst [vmem:[#allocation28_spill] sm:$0xff] %v13398_v7  ;;  %5699 = vrot.lane.b32.xlu1 %v16804_v15, %s16788_s23 }
 0x6fa   : > { %7706 = vmatprep.subr.bf16.mxu1 %v7705_v55  ;;  %5697 = vrot.lane.b32.xlu0 %v16803_v5, %s16788_s23  ;;  %v16809_v55 = vld [vmem:[#allocation245_spill] sm:$0xff] }
 0x6fb   : > { %7708 = vmatpush1.bf16.msra.mxu1 %v7707_v45  ;;  %v13404_v50 = vpop.permute.xlu1 %5239 }
 0x6fc   : > { %16805 = vst [vmem:[#allocation162_spill] sm:$0xff] %v13404_v50  ;;  %v13406_v26 = vpop.permute.xlu0 %4256 }
 0x6fd   : > { %16806 = vst [vmem:[#allocation115_spill] sm:$0xff] %v13406_v26  ;;  %5703 = vrot.lane.b32.xlu1 %v16808_v40, %s16788_s23  ;;  %v16813_v26 = vld [vmem:[#allocation259_spill] sm:$0xff]  ;;  %v16814_v40 = vld [vmem:[#allocation137_spill] sm:$0xff] }
 0x6fe   : > { %5701 = vrot.lane.b32.xlu0 %v16807_v13, %s16788_s23 }
 0x6ff   : > { %v4716_v16 = vpop.permute.xlu1 %4715 }
 0x700   : > { %v4814_v1 = vpop.permute.xlu0 %4813  ;;  %v4851_v13 = vsel %vm338_vm0, %v4812_v48, %v4716_v16  ;;  %v4947_v15 = vsel %vm338_vm0, %v4716_v16, %v4812_v48  ;;  %v16816_v48 = vld [vmem:[#allocation118_spill] sm:$0xff]  ;;  %v16817_v16 = vld [vmem:[#allocation121_spill] sm:$0xff] }
 0x701   : > { %5707 = vrot.lane.b32.xlu1 %v16810_v43, %s16788_s23  ;;  %v5003_v49 = vmul.f32 %v4947_v15, %v16709_v27  ;;  %v5004_v50 = vmul.f32 %v4851_v13, %v16711_v36  ;;  %v16819_v15 = vld [vmem:[#allocation202_spill] sm:$0xff] }
 0x702   : > { %5705 = vrot.lane.b32.xlu0 %v16809_v55, %s16788_s23 }
 0x703   : > { %v13416_v17 = vpop.permute.xlu1 %5143 }
 0x704   : > { %16811 = vst [vmem:[#allocation185_spill] sm:$0xff] %v13416_v17  ;;  %v13418_v45 = vpop.permute.xlu0 %5241 }
 0x705   : > { %16812 = vst [vmem:[#allocation184_spill] sm:$0xff] %v13418_v45  ;;  %5711 = vrot.lane.b32.xlu1 %v16814_v40, %s16788_s23 }
 0x706   : > { %5709 = vrot.lane.b32.xlu0 %v16813_v26, %s16788_s23 }
 0x707   : > { %v13426_v32 = vpop.permute.xlu1 %4258 }
 0x708   : > { %v4718_v5 = vpop.permute.xlu0 %4717  ;;  %16815 = vst [vmem:[#allocation134_spill] sm:$0xff] %v13426_v32 }
 0x709   : > { %v4852_v55 = vsel %vm338_vm0, %v4814_v1, %v4718_v5  ;;  %v4948_v43 = vsel %vm338_vm0, %v4718_v5, %v4814_v1  ;;  %5715 = vrot.lane.b32.xlu1 %v16817_v16, %s16788_s23  ;;  %v16818_v5 = vld [vmem:[#allocation158_spill] sm:$0xff] }
 0x70a   : > { %v5005_v26 = vmul.f32 %v4948_v43, %v16709_v27  ;;  %v5006_v17 = vmul.f32 %v4852_v55, %v16711_v36  ;;  %5713 = vrot.lane.b32.xlu0 %v16816_v48, %s16788_s23 }
 0x70b   : > { %v4816_v45 = vpop.permute.xlu1 %4815 }
 0x70c   : > { %v7711_v40 = vpack.c.bf16 %v5005_v26, %v5003_v49  ;;  %v13438_v32 = vpop.permute.xlu0 %5145  ;;  %v7709_v7 = vpack.c.bf16 %v5006_v17, %v5004_v50 }
 0x70d   : > { %5719 = vrot.lane.b32.xlu1 %v16819_v15, %s16788_s23 }
 0x70e   : > { %7710 = vmatprep.subr.bf16.mxu1 %v7709_v7  ;;  %5717 = vrot.lane.b32.xlu0 %v16818_v5, %s16788_s23 }
 0x70f   : > { %7712 = vmatpush1.bf16.msra.mxu1 %v7711_v40  ;;  %v13444_v13 = vpop.permute.xlu1 %5243 }
 0x710   : > { %v13446_v1 = vpop.permute.xlu0 %4260 }
 0x711   : > { %16820 = vst [vmem:[#allocation135_spill] sm:$0xff] %v13446_v1  ;;  %5723 = vrot.lane.b32.xlu1 %v12523_v23, %s16788_s23 }
 0x712   : > { %5721 = vrot.lane.b32.xlu0 %v12517_v11, %s16788_s23 }
 0x713   : > { %v4720_v49 = vpop.permute.xlu1 %4719 }
 0x714   : > { %v4818_v50 = vpop.permute.xlu0 %4817  ;;  %v4853_v40 = vsel %vm338_vm0, %v4816_v45, %v4720_v49  ;;  %v4949_v55 = vsel %vm338_vm0, %v4720_v49, %v4816_v45  ;;  %v16822_v45 = vld [vmem:[#allocation246_spill] sm:$0xff]  ;;  %v16823_v49 = vld [vmem:[#allocation16_spill] sm:$0xff] }
 0x715   : > { %5727 = vrot.lane.b32.xlu1 %v12545_v25, %s16788_s23  ;;  %v5008_v23 = vmul.f32 %v4853_v40, %v16711_v36 }
 0x716   : > { %5725 = vrot.lane.b32.xlu0 %v12533_v21, %s16788_s23  ;;  %v5007_v21 = vmul.f32 %v4949_v55, %v16709_v27 }
 0x717   : > { %v13456_v7 = vpop.permute.xlu1 %5147 }
 0x718   : > { %v13458_v26 = vpop.permute.xlu0 %5245 }
 0x719   : > { %5731 = vrot.lane.b32.xlu1 %v12555_v61, %s16788_s23 }
 0x71a   : > { %5729 = vrot.lane.b32.xlu0 %v12553_v2, %s16788_s23 }
 0x71b   : > { %v13466_v17 = vpop.permute.xlu1 %4262 }
 0x71c   : > { %v4722_v43 = vpop.permute.xlu0 %4721  ;;  %16821 = vst [vmem:[#allocation163_spill] sm:$0xff] %v13466_v17 }
 0x71d   : > { %v4854_v1 = vsel %vm338_vm0, %v4818_v50, %v4722_v43  ;;  %v4950_v25 = vsel %vm338_vm0, %v4722_v43, %v4818_v50  ;;  %5735 = vrot.lane.b32.xlu1 %v16823_v49, %s16788_s23 }
 0x71e   : > { %v5009_v2 = vmul.f32 %v4950_v25, %v16709_v27  ;;  %v5010_v11 = vmul.f32 %v4854_v1, %v16711_v36  ;;  %5733 = vrot.lane.b32.xlu0 %v16822_v45, %s16788_s23 }
 0x71f   : > { %v4820_v15 = vpop.permute.xlu1 %4819 }
 0x720   : > { %v7715_v61 = vpack.c.bf16 %v5009_v2, %v5007_v21  ;;  %v13478_v17 = vpop.permute.xlu0 %5149  ;;  %v7713_v5 = vpack.c.bf16 %v5010_v11, %v5008_v23  ;;  %v16825_v23 = vld [vmem:[#allocation42_spill] sm:$0xff]  ;;  %v16826_v2 = vld [vmem:[#allocation41_spill] sm:$0xff] }
 0x721   : > { %5739 = vrot.lane.b32.xlu1 %v12603_v31, %s16788_s23  ;;  %v16836_v31 = vld [vmem:[#allocation104_spill] sm:$0xff] }
 0x722   : > { %7714 = vmatprep.subr.bf16.mxu1 %v7713_v5  ;;  %5737 = vrot.lane.b32.xlu0 %v12601_v44, %s16788_s23 }
 0x723   : > { %7716 = vmatpush1.bf16.msra.mxu1 %v7715_v61  ;;  %v13484_v25 = vpop.permute.xlu1 %5247 }
 0x724   : > { %v13486_v1 = vpop.permute.xlu0 %4264 }
 0x725   : > { %16824 = vst [vmem:[#allocation152_spill] sm:$0xff] %v13486_v1  ;;  %5743 = vrot.lane.b32.xlu1 %v12651_v35, %s16788_s23 }
 0x726   : > { %5741 = vrot.lane.b32.xlu0 %v12609_v22, %s16788_s23 }
 0x727   : > { %v4724_v21 = vpop.permute.xlu1 %4723 }
 0x728   : > { %v4822_v11 = vpop.permute.xlu0 %4821  ;;  %v4855_v50 = vsel %vm338_vm0, %v4820_v15, %v4724_v21  ;;  %v4951_v40 = vsel %vm338_vm0, %v4724_v21, %v4820_v15 }
 0x729   : > { %5747 = vrot.lane.b32.xlu1 %v16826_v2, %s16788_s23  ;;  %v5012_v35 = vmul.f32 %v4855_v50, %v16711_v36 }
 0x72a   : > { %5745 = vrot.lane.b32.xlu0 %v16825_v23, %s16788_s23  ;;  %v5011_v23 = vmul.f32 %v4951_v40, %v16709_v27  ;;  %v16831_v40 = vld [vmem:[#allocation64_spill] sm:$0xff] }
 0x72b   : > { %v13496_v5 = vpop.permute.xlu1 %5151 }
 0x72c   : > { %v13498_v61 = vpop.permute.xlu0 %5249 }
 0x72d   : > { %5751 = vrot.lane.b32.xlu1 %v12722_v37, %s16788_s23 }
 0x72e   : > { %5749 = vrot.lane.b32.xlu0 %v12661_v38, %s16788_s23 }
 0x72f   : > { %v13506_v43 = vpop.permute.xlu1 %4266 }
 0x730   : > { %v4726_v55 = vpop.permute.xlu0 %4725  ;;  %16827 = vst [vmem:[#allocation168_spill] sm:$0xff] %v13506_v43 }
 0x731   : > { %v4856_v1 = vsel %vm338_vm0, %v4822_v11, %v4726_v55  ;;  %v4952_v2 = vsel %vm338_vm0, %v4726_v55, %v4822_v11  ;;  %5755 = vrot.lane.b32.xlu1 %v12735_v9, %s16788_s23  ;;  %v16832_v55 = vld [vmem:[#allocation46_spill] sm:$0xff] }
 0x732   : > { %v5013_v38 = vmul.f32 %v4952_v2, %v16709_v27  ;;  %v5014_v22 = vmul.f32 %v4856_v1, %v16711_v36  ;;  %5753 = vrot.lane.b32.xlu0 %v12731_v20, %s16788_s23 }
 0x733   : > { %v4824_v43 = vpop.permute.xlu1 %4823 }
 0x734   : > { %v7719_v15 = vpack.c.bf16 %v5013_v38, %v5011_v23  ;;  %v13518_v21 = vpop.permute.xlu0 %5153  ;;  %v7717_v37 = vpack.c.bf16 %v5014_v22, %v5012_v35  ;;  %v16830_v22 = vld [vmem:[#allocation58_spill] sm:$0xff] }
 0x735   : > { %5759 = vrot.lane.b32.xlu1 %v12791_v41, %s16788_s23  ;;  %v16834_v41 = vld [vmem:[#allocation15_spill] sm:$0xff] }
 0x736   : > { %7718 = vmatprep.subr.bf16.mxu1 %v7717_v37  ;;  %5757 = vrot.lane.b32.xlu0 %v12741_v60, %s16788_s23  ;;  %v16829_v37 = vld [vmem:[#allocation70_spill] sm:$0xff] }
 0x737   : > { %7720 = vmatpush1.bf16.msra.mxu1 %v7719_v15  ;;  %v4728_v1 = vpop.permute.xlu1 %4727  ;;  %v5256_v23 = vsel %vm358_vm2, %v16830_v22, %v16829_v37  ;;  %v5255_v15 = vsel %vm358_vm2, %v16832_v55, %v16831_v40 }
 0x738   : > { %v13524_v11 = vpop.permute.xlu0 %4268  ;;  %v4857_v2 = vsel %vm338_vm0, %v4824_v43, %v4728_v1  ;;  %v4953_v50 = vsel %vm338_vm0, %v4728_v1, %v4824_v43 }
 0x739   : > { %16828 = vst [vmem:[#allocation170_spill] sm:$0xff] %v13524_v11  ;;  %5763 = vrot.lane.b32.xlu1 %v12799_v42, %s16788_s23  ;;  %v5015_v1 = vmul.f32 %v4953_v50, %v16709_v27  ;;  %v16838_v50 = vld [vmem:[#allocation101_spill] sm:$0xff] }
 0x73a   : > { %5761 = vrot.lane.b32.xlu0 %v12793_v30, %s16788_s23  ;;  %v5352_v30 = vsel %vm358_vm2, %v16829_v37, %v16830_v22 }
 0x73b   : > { %v13530_v38 = vpop.permute.xlu1 %5155 }
 0x73c   : > { %v4826_v35 = vpop.permute.xlu0 %4825 }
 0x73d   : > { %5767 = vrot.lane.b32.xlu1 %v12857_v62, %s16788_s23  ;;  %v5016_v62 = vmul.f32 %v4857_v2, %v16711_v36 }
 0x73e   : > { %5765 = vrot.lane.b32.xlu0 %v12805_v54, %s16788_s23  ;;  %v5386_v54 = vmul.f32 %v5256_v23, %v16834_v41  ;;  %v16837_v23 = vld [vmem:[#allocation14_spill] sm:$0xff] }
 0x73f   : > { %v13544_v42 = vpop.permute.xlu1 %4270  ;;  %v5385_v2 = vmul.f32 %v5352_v30, %v16837_v23 }
 0x740   : > { %v4730_v11 = vpop.permute.xlu0 %4729  ;;  %16833 = vst [vmem:[#allocation37_spill] sm:$0xff] %v13544_v42  ;;  %v16835_v42 = vld [vmem:[#allocation178_spill] sm:$0xff] }
 0x741   : > { %v4858_v60 = vsel %vm338_vm0, %v4826_v35, %v4730_v11  ;;  %v4954_v43 = vsel %vm338_vm0, %v4730_v11, %v4826_v35  ;;  %v5258_v37 = vsel %vm358_vm2, %v16836_v31, %v16835_v42  ;;  %5771 = vrot.lane.b32.xlu1 %v12865_v63, %s16788_s23  ;;  %v5351_v11 = vsel %vm358_vm2, %v16831_v40, %v16832_v55 }
 0x742   : > { %v5017_v9 = vmul.f32 %v4954_v43, %v16709_v27  ;;  %v5018_v20 = vmul.f32 %v4858_v60, %v16711_v36  ;;  %5769 = vrot.lane.b32.xlu0 %v12859_v39, %s16788_s23  ;;  %v5384_v35 = vmul.f32 %v5255_v15, %v16834_v41  ;;  %v16839_v43 = vld [vmem:[#allocation102_spill] sm:$0xff]  ;;  %v5354_v63 = vsel %vm358_vm2, %v16835_v42, %v16836_v31  ;;  %v7110_v31 = vld [vmem:[%s15174_s4 + $0x10] sm:$0xff] }
 0x743   : > { %v13569_v36 = vpop.permute.xlu1 %5251  ;;  %v5257_v39 = vsel %vm358_vm2, %v16839_v43, %v16838_v50  ;;  %v5390_v40 = vmul.f32 %v5258_v37, %v16834_v41  ;;  %v5383_v55 = vmul.f32 %v5351_v11, %v16837_v23  ;;  %v5353_v42 = vsel %vm358_vm2, %v16838_v50, %v16839_v43  ;;  %v16844_v43 = vld [vmem:[#allocation113_spill] sm:$0xff] }
 0x744   : > { %v7723_v22 = vpack.c.bf16 %v5017_v9, %v5015_v1  ;;  %v13567_v27 = vpop.permute.xlu0 %5157  ;;  %v7721_v60 = vpack.c.bf16 %v5018_v20, %v5016_v62  ;;  %v7725_v9 = vpack.c.bf16 %v5386_v54, %v5384_v35  ;;  %v16840_v20 = vld [vmem:[#allocation67_spill] sm:$0xff]  ;;  %v16841_v62 = vld [vmem:[#allocation52_spill] sm:$0xff]  ;;  %v5388_v54 = vmul.f32 %v5257_v39, %v16834_v41 }
 0x745   : > { %v5260_v30 = vsel %vm358_vm2, %v16841_v62, %v16840_v20  ;;  %5775 = vrot.lane.b32.xlu1 %v12929_v52, %s16788_s23  ;;  %v7727_v37 = vpack.c.bf16 %v5385_v2, %v5383_v55  ;;  %v5389_v11 = vmul.f32 %v5354_v63, %v16837_v23  ;;  %v16842_v35 = vld [vmem:[#allocation55_spill] sm:$0xff]  ;;  %v7113_v52 = vld [vmem:[%s15174_s4 + $0x28] sm:$0xff]  ;;  %v5356_v39 = vsel %vm358_vm2, %v16840_v20, %v16841_v62 }
 0x746   : > { %5773 = vrot.lane.b32.xlu0 %v12871_v3, %s16788_s23  ;;  %7722 = vmatprep.subr.bf16.mxu1 %v7721_v60  ;;  %v5394_v50 = vmul.f32 %v5260_v30, %v16834_v41  ;;  %v7729_v2 = vpack.c.bf16 %v5390_v40, %v5388_v54  ;;  %v5387_v63 = vmul.f32 %v5353_v42, %v16837_v23  ;;  %v16846_v54 = vld [vmem:[#allocation107_spill] sm:$0xff] }
 0x747   : > { %7724 = vmatpush1.bf16.msra.mxu1 %v7723_v22  ;;  %v13596_v1 = vpop.permute.xlu1 %5663  ;;  %v16843_v22 = vld [vmem:[#allocation43_spill] sm:$0xff]  ;;  %v5393_v42 = vmul.f32 %v5356_v39, %v16837_v23 }
 0x748   : > { %7726 = vmatprep.subr.bf16.mxu1 %v7725_v9  ;;  %v13594_v15 = vpop.permute.xlu0 %5253  ;;  %v5259_v60 = vsel %vm358_vm2, %v16843_v22, %v16842_v35  ;;  %v16845_v9 = vld [vmem:[#allocation150_spill] sm:$0xff]  ;;  %v5355_v20 = vsel %vm358_vm2, %v16842_v35, %v16843_v22 }
 0x749   : > { %v5262_v55 = vsel %vm358_vm2, %v16845_v9, %v16844_v43  ;;  %5779 = vrot.lane.b32.xlu1 %v12937_v33, %s16788_s23  ;;  %v5392_v62 = vmul.f32 %v5259_v60, %v16834_v41  ;;  %v5391_v60 = vmul.f32 %v5355_v20, %v16837_v23  ;;  %v16850_v20 = vld [vmem:[#allocation195_spill] sm:$0xff] }
 0x74a   : > { %5777 = vrot.lane.b32.xlu0 %v12931_v10, %s16788_s23  ;;  %5087 = vmatmul.mubr.f32.vlgmr.msra.gmra.mrb[34].mxu1 %v7110_v31  ;;  %v7731_v31 = vpack.c.bf16 %v5389_v11, %v5387_v63  ;;  %v16847_v10 = vld [vmem:[#allocation61_spill] sm:$0xff]  ;;  %v5398_v35 = vmul.f32 %v5262_v55, %v16834_v41 }
 0x74b   : > { %7728 = vmatpush1.bf16.msra.mxu1 %v7727_v37  ;;  %v13623_v40 = vpop.permute.xlu1 %5667  ;;  %5514 = vmatprep.mubr.f32.mxu1 %v7113_v52  ;;  %v5261_v33 = vsel %vm358_vm2, %v16847_v10, %v16846_v54  ;;  %v5358_v37 = vsel %vm358_vm2, %v16844_v43, %v16845_v9  ;;  %v7733_v22 = vpack.c.bf16 %v5394_v50, %v5392_v62  ;;  %v16848_v52 = vld [vmem:[#allocation96_spill] sm:$0xff]  ;;  %v16849_v11 = vld [vmem:[#allocation161_spill] sm:$0xff]  ;;  %v16851_v62 = vld [vmem:[#allocation94_spill] sm:$0xff] }
 0x74c   : > { %7730 = vmatprep.subr.bf16.mxu1 %v7729_v2  ;;  %v13621_v30 = vpop.permute.xlu0 %5665  ;;  %v5264_v39 = vsel %vm358_vm2, %v16849_v11, %v16848_v52  ;;  %v5357_v2 = vsel %vm358_vm2, %v16846_v54, %v16847_v10  ;;  %v5396_v63 = vmul.f32 %v5261_v33, %v16834_v41  ;;  %v7735_v9 = vpack.c.bf16 %v5393_v42, %v5391_v60  ;;  %v16852_v42 = vld [vmem:[#allocation108_spill] sm:$0xff] }
 0x74d   : > { %5783 = vrot.lane.b32.xlu1 %v12999_v12, %s16788_s23  ;;  %v5397_v55 = vmul.f32 %v5358_v37, %v16837_v23  ;;  %v5402_v10 = vmul.f32 %v5264_v39, %v16834_v41  ;;  %v5395_v54 = vmul.f32 %v5357_v2, %v16837_v23  ;;  %v5266_v37 = vsel %vm358_vm2, %v16852_v42, %v13111_v59  ;;  %v16853_v2 = vld [vmem:[#allocation109_spill] sm:$0xff] }
 0x74e   : > { %5781 = vrot.lane.b32.xlu0 %v12939_v47, %s16788_s23  ;;  %v5263_v47 = vsel %vm358_vm2, %v16851_v62, %v16850_v20  ;;  %v7737_v33 = vpack.c.bf16 %v5398_v35, %v5396_v63  ;;  %v16854_v63 = vld [vmem:[#allocation95_spill] sm:$0xff] }
 0x74f   : > { %7732 = vmatpush1.bf16.msra.mxu1 %v7731_v31  ;;  %v13647_v50 = vpop.permute.xlu1 %5671  ;;  %v5360_v31 = vsel %vm358_vm2, %v16848_v52, %v16849_v11  ;;  %v5400_v60 = vmul.f32 %v5263_v47, %v16834_v41  ;;  %v7739_v11 = vpack.c.bf16 %v5397_v55, %v5395_v54  ;;  %v16856_v55 = vld [vmem:[#allocation205_spill] sm:$0xff] }
 0x750   : > { %7734 = vmatprep.subr.bf16.mxu1 %v7733_v22  ;;  %v13645_v43 = vpop.permute.xlu0 %5669  ;;  %v5359_v22 = vsel %vm358_vm2, %v16850_v20, %v16851_v62  ;;  %v5401_v39 = vmul.f32 %v5360_v31, %v16837_v23  ;;  %v5406_v20 = vmul.f32 %v5266_v37, %v16834_v41 }
 0x751   : > { %5787 = vrot.lane.b32.xlu1 %v13007_v53, %s16788_s23  ;;  %v7741_v47 = vpack.c.bf16 %v5402_v10, %v5400_v60  ;;  %v5399_v62 = vmul.f32 %v5359_v22, %v16837_v23  ;;  %v16858_v22 = vld [vmem:[#allocation98_spill] sm:$0xff]  ;;  %v16859_v60 = vld [vmem:[#allocation97_spill] sm:$0xff] }
 0x752   : > { %5785 = vrot.lane.b32.xlu0 %v13001_v24, %s16788_s23  ;;  %v5265_v24 = vsel %vm358_vm2, %v16854_v63, %v16853_v2 }
 0x753   : > { %7736 = vmatpush1.bf16.msra.mxu1 %v7735_v9  ;;  %v13671_v35 = vpop.permute.xlu1 %5675  ;;  %v5362_v9 = vsel %vm358_vm2, %v13111_v59, %v16852_v42  ;;  %v5361_v59 = vsel %vm358_vm2, %v16853_v2, %v16854_v63  ;;  %v5404_v54 = vmul.f32 %v5265_v24, %v16834_v41  ;;  %v7743_v10 = vpack.c.bf16 %v5401_v39, %v5399_v62  ;;  %v16860_v63 = vld [vmem:[#allocation110_spill] sm:$0xff] }
 0x754   : > { %7738 = vmatprep.subr.bf16.mxu1 %v7737_v33  ;;  %v13669_v52 = vpop.permute.xlu0 %5673  ;;  %v16855_v33 = vld [vmem:[#allocation204_spill] sm:$0xff]  ;;  %v5405_v37 = vmul.f32 %v5362_v9, %v16837_v23  ;;  %v5403_v39 = vmul.f32 %v5361_v59, %v16837_v23  ;;  %v16861_v9 = vld [vmem:[#allocation111_spill] sm:$0xff]  ;;  %v5363_v62 = vsel %vm358_vm2, %v16858_v22, %v16859_v60  ;;  %v16862_v59 = vld [vmem:[#allocation222_spill] sm:$0xff] }
 0x755   : > { %v5268_v31 = vsel %vm358_vm2, %v16856_v55, %v16855_v33  ;;  %6091 = vrot.lane.b32.xlu1 %v12258_v0, %s16857_s25  ;;  %v7745_v24 = vpack.c.bf16 %v5406_v20, %v5404_v54  ;;  %v16863_v54 = vld [vmem:[#allocation223_spill] sm:$0xff] }
 0x756   : > { %5789 = vrot.lane.b32.xlu0 %v13011_v51, %s16788_s23  ;;  %v5267_v51 = vsel %vm358_vm2, %v16859_v60, %v16858_v22  ;;  %v5410_v2 = vmul.f32 %v5268_v31, %v16834_v41  ;;  %v7747_v20 = vpack.c.bf16 %v5405_v37, %v5403_v39  ;;  %v5407_v37 = vmul.f32 %v5363_v62, %v16837_v23  ;;  %v16864_v60 = vld [vmem:[#allocation100_spill] sm:$0xff]  ;;  %v16866_v62 = vld [vmem:[#allocation146_spill] sm:$0xff]  ;;  %s6950_s23 = scalar_lea.sflag [#allocation3], %s296_s26 }
 0x757   : > { %7740 = vmatpush1.bf16.msra.mxu1 %v7739_v11  ;;  %v13699_v53 = vpop.permute.xlu1 %5679  ;;  %v5364_v11 = vsel %vm358_vm2, %v16855_v33, %v16856_v55  ;;  %v5408_v33 = vmul.f32 %v5267_v51, %v16834_v41  ;;  %v5365_v39 = vsel %vm358_vm2, %v16862_v59, %v16863_v54 }
 0x758   : > { %7742 = vmatprep.subr.bf16.mxu1 %v7741_v47  ;;  %v13693_v42 = vpop.permute.xlu0 %5677  ;;  %v5270_v47 = vsel %vm358_vm2, %v16861_v9, %v16860_v63  ;;  %v5409_v31 = vmul.f32 %v5364_v11, %v16837_v23  ;;  %v16865_v11 = vld [vmem:[#allocation99_spill] sm:$0xff] }
 0x759   : > { %6095 = vrot.lane.b32.xlu1 %v12267_v29, %s16857_s25  ;;  %v5414_v22 = vmul.f32 %v5270_v47, %v16834_v41  ;;  %v7749_v51 = vpack.c.bf16 %v5410_v2, %v5408_v33  ;;  %v16867_v33 = vld [vmem:[#allocation147_spill] sm:$0xff] }
 0x75a   : > { %6093 = vrot.lane.b32.xlu0 %v12265_v4, %s16857_s25  ;;  %v5269_v4 = vsel %vm358_vm2, %v16863_v54, %v16862_v59  ;;  %v7751_v2 = vpack.c.bf16 %v5409_v31, %v5407_v37  ;;  %v5411_v31 = vmul.f32 %v5365_v39, %v16837_v23  ;;  %v16868_v54 = vld [vmem:[#allocation149_spill] sm:$0xff]  ;;  %v16870_v39 = vld [vmem:[#allocation26_spill] sm:$0xff] }
 0x75b   : > { %7744 = vmatpush1.bf16.msra.mxu1 %v7743_v10  ;;  %v13723_v0 = vpop.permute.xlu1 %5683  ;;  %v5366_v10 = vsel %vm358_vm2, %v16860_v63, %v16861_v9  ;;  %v5412_v63 = vmul.f32 %v5269_v4, %v16834_v41 }
 0x75c   : > { %7746 = vmatprep.subr.bf16.mxu1 %v7745_v24  ;;  %v13717_v55 = vpop.permute.xlu0 %5681  ;;  %v5272_v24 = vsel %vm358_vm2, %v16865_v11, %v16864_v60  ;;  %v5413_v47 = vmul.f32 %v5366_v10, %v16837_v23  ;;  %v5274_v10 = vsel %vm358_vm2, %v16868_v54, %v13306_v28 }
 0x75d   : > { %6099 = vrot.lane.b32.xlu1 %v12293_v34, %s16857_s25  ;;  %v5418_v59 = vmul.f32 %v5272_v24, %v16834_v41  ;;  %v7753_v4 = vpack.c.bf16 %v5414_v22, %v5412_v63  ;;  %v16869_v24 = vld [vmem:[#allocation8_spill] sm:$0xff] }
 0x75e   : > { %6097 = vrot.lane.b32.xlu0 %v12273_v57, %s16857_s25  ;;  %v5271_v57 = vsel %vm358_vm2, %v16867_v33, %v16866_v62  ;;  %v7755_v22 = vpack.c.bf16 %v5413_v47, %v5411_v31  ;;  %v5273_v63 = vsel %vm358_vm2, %v16870_v39, %v16869_v24 }
 0x75f   : > { %7748 = vmatpush1.bf16.msra.mxu1 %v7747_v20  ;;  %v13747_v29 = vpop.permute.xlu1 %5687  ;;  %v5368_v20 = vsel %vm358_vm2, %v16864_v60, %v16865_v11  ;;  %v5416_v37 = vmul.f32 %v5271_v57, %v16834_v41 }
 0x760   : > { %7750 = vmatprep.subr.bf16.mxu1 %v7749_v51  ;;  %v13741_v9 = vpop.permute.xlu0 %5685  ;;  %v5367_v51 = vsel %vm358_vm2, %v16866_v62, %v16867_v33  ;;  %v5417_v11 = vmul.f32 %v5368_v20, %v16837_v23  ;;  %v5422_v62 = vmul.f32 %v5274_v10, %v16834_v41  ;;  %v5276_v33 = vsel %vm358_vm2, %v13338_v58, %v13358_v56 }
 0x761   : > { %6103 = vrot.lane.b32.xlu1 %v12307_v19, %s16857_s25  ;;  %v7757_v57 = vpack.c.bf16 %v5418_v59, %v5416_v37  ;;  %v5415_v47 = vmul.f32 %v5367_v51, %v16837_v23  ;;  %v5420_v20 = vmul.f32 %v5273_v63, %v16834_v41  ;;  %v5372_v51 = vsel %vm358_vm2, %v13358_v56, %v13338_v58  ;;  %v16873_v63 = vld [vmem:[#allocation132_spill] sm:$0xff] }
 0x762   : > { %6101 = vrot.lane.b32.xlu0 %v12301_v18, %s16857_s25  ;;  %v5426_v37 = vmul.f32 %v5276_v33, %v16834_v41  ;;  %v5371_v58 = vsel %vm358_vm2, %v13336_v6, %v13324_v46  ;;  %v5425_v33 = vmul.f32 %v5372_v51, %v16837_v23  ;;  %v16878_v51 = vld [vmem:[#allocation184_spill] sm:$0xff] }
 0x763   : > { %7752 = vmatpush1.bf16.msra.mxu1 %v7751_v2  ;;  %v13771_v18 = vpop.permute.xlu1 %5691  ;;  %v5370_v2 = vsel %vm358_vm2, %v13306_v28, %v16868_v54  ;;  %v5369_v28 = vsel %vm358_vm2, %v16869_v24, %v16870_v39  ;;  %v7759_v59 = vpack.c.bf16 %v5417_v11, %v5415_v47  ;;  %v5275_v54 = vsel %vm358_vm2, %v13324_v46, %v13336_v6  ;;  %v16872_v39 = vld [vmem:[#allocation28_spill] sm:$0xff]  ;;  %v16877_v6 = vld [vmem:[#allocation119_spill] sm:$0xff] }
 0x764   : > { %7754 = vmatprep.subr.bf16.mxu1 %v7753_v4  ;;  %v13765_v60 = vpop.permute.xlu0 %5689  ;;  %v5421_v31 = vmul.f32 %v5370_v2, %v16837_v23  ;;  %v7761_v24 = vpack.c.bf16 %v5422_v62, %v5420_v20  ;;  %v5419_v11 = vmul.f32 %v5369_v28, %v16837_v23  ;;  %v5278_v2 = vsel %vm358_vm2, %v16873_v63, %v16872_v39  ;;  %v16875_v28 = vld [vmem:[#allocation130_spill] sm:$0xff]  ;;  %v16876_v20 = vld [vmem:[#allocation183_spill] sm:$0xff] }
 0x765   : > { %6107 = vrot.lane.b32.xlu1 %v12329_v14, %s16857_s25  ;;  %v5424_v56 = vmul.f32 %v5275_v54, %v16834_v41  ;;  %v5430_v46 = vmul.f32 %v5278_v2, %v16834_v41 }
 0x766   : > { %6105 = vrot.lane.b32.xlu0 %v12317_v8, %s16857_s25  ;;  %v7763_v62 = vpack.c.bf16 %v5421_v31, %v5419_v11  ;;  %v5423_v31 = vmul.f32 %v5371_v58, %v16837_v23  ;;  %v16879_v11 = vld [vmem:[#allocation167_spill] sm:$0xff] }
 0x767   : > { %7756 = vmatpush1.bf16.msra.mxu1 %v7755_v22  ;;  %v13795_v10 = vpop.permute.xlu1 %5695  ;;  %v16871_v22 = vld [vmem:[#allocation271_spill] sm:$0xff]  ;;  %v7765_v54 = vpack.c.bf16 %v5426_v37, %v5424_v56  ;;  %v16880_v56 = vld [vmem:[#allocation185_spill] sm:$0xff] }
 0x768   : > { %7758 = vmatprep.subr.bf16.mxu1 %v7757_v57  ;;  %v13789_v4 = vpop.permute.xlu0 %5693  ;;  %v16874_v57 = vld [vmem:[#allocation116_spill] sm:$0xff]  ;;  %v7767_v37 = vpack.c.bf16 %v5425_v33, %v5423_v31 }
 0x769   : > { %6111 = vrot.lane.b32.xlu1 %v16874_v57, %s16857_s25 }
 0x76a   : > { %6109 = vrot.lane.b32.xlu0 %v16871_v22, %s16857_s25  ;;  %v5277_v22 = vsel %vm358_vm2, %v16876_v20, %v16875_v28 }
 0x76b   : > { %7760 = vmatpush1.bf16.msra.mxu1 %v7759_v59  ;;  %v13819_v14 = vpop.permute.xlu1 %5699  ;;  %v5374_v59 = vsel %vm358_vm2, %v16872_v39, %v16873_v63  ;;  %v5373_v39 = vsel %vm358_vm2, %v16875_v28, %v16876_v20  ;;  %v5428_v63 = vmul.f32 %v5277_v22, %v16834_v41  ;;  %v16882_v22 = vld [vmem:[#allocation157_spill] sm:$0xff] }
 0x76c   : > { %7762 = vmatprep.subr.bf16.mxu1 %v7761_v24  ;;  %v13813_v47 = vpop.permute.xlu0 %5697  ;;  %v5280_v24 = vsel %vm358_vm2, %v16878_v51, %v13438_v32  ;;  %v5429_v58 = vmul.f32 %v5374_v59, %v16837_v23  ;;  %v5427_v33 = vmul.f32 %v5373_v39, %v16837_v23  ;;  %v5282_v59 = vsel %vm358_vm2, %v13458_v26, %v13478_v17 }
 0x76d   : > { %6115 = vrot.lane.b32.xlu1 %v16879_v11, %s16857_s25  ;;  %v5434_v28 = vmul.f32 %v5280_v24, %v16834_v41  ;;  %v7769_v20 = vpack.c.bf16 %v5430_v46, %v5428_v63  ;;  %v5281_v39 = vsel %vm358_vm2, %v13444_v13, %v13456_v7 }
 0x76e   : > { %6113 = vrot.lane.b32.xlu0 %v16877_v6, %s16857_s25  ;;  %v16881_v6 = vld [vmem:[#allocation162_spill] sm:$0xff]  ;;  %v7771_v46 = vpack.c.bf16 %v5429_v58, %v5427_v33 }
 0x76f   : > { %7764 = vmatpush1.bf16.msra.mxu1 %v7763_v62  ;;  %v5279_v57 = vsel %vm358_vm2, %v16881_v6, %v16880_v56  ;;  %v13843_v8 = vpop.permute.xlu1 %5703  ;;  %v5376_v62 = vsel %vm358_vm2, %v13438_v32, %v16878_v51  ;;  %v5375_v32 = vsel %vm358_vm2, %v16880_v56, %v16881_v6  ;;  %v5438_v6 = vmul.f32 %v5282_v59, %v16834_v41 }
 0x770   : > { %7766 = vmatprep.subr.bf16.mxu1 %v7765_v54  ;;  %v13837_v2 = vpop.permute.xlu0 %5701  ;;  %v16883_v54 = vld [vmem:[#allocation191_spill] sm:$0xff]  ;;  %v5432_v31 = vmul.f32 %v5279_v57, %v16834_v41  ;;  %v5433_v24 = vmul.f32 %v5376_v62, %v16837_v23  ;;  %v16884_v57 = vld [vmem:[#allocation192_spill] sm:$0xff]  ;;  %v5431_v58 = vmul.f32 %v5375_v32, %v16837_v23  ;;  %v5284_v62 = vsel %vm358_vm2, %v13498_v61, %v13518_v21 }
 0x771   : > { %6119 = vrot.lane.b32.xlu1 %v16883_v54, %s16857_s25  ;;  %v5283_v32 = vsel %vm358_vm2, %v13484_v25, %v13496_v5 }
 0x772   : > { %6117 = vrot.lane.b32.xlu0 %v16882_v22, %s16857_s25  ;;  %v7773_v56 = vpack.c.bf16 %v5434_v28, %v5432_v31  ;;  %v7775_v28 = vpack.c.bf16 %v5433_v24, %v5431_v58 }
 0x773   : > { %7768 = vmatpush1.bf16.msra.mxu1 %v7767_v37  ;;  %v13867_v63 = vpop.permute.xlu1 %5707  ;;  %v5378_v37 = vsel %vm358_vm2, %v13478_v17, %v13458_v26  ;;  %v5377_v26 = vsel %vm358_vm2, %v13456_v7, %v13444_v13  ;;  %v5436_v17 = vmul.f32 %v5281_v39, %v16834_v41  ;;  %v5442_v13 = vmul.f32 %v5284_v62, %v16834_v41  ;;  %v16886_v7 = vld [vmem:[#allocation211_spill] sm:$0xff] }
 0x774   : > { %7770 = vmatprep.subr.bf16.mxu1 %v7769_v20  ;;  %v13861_v51 = vpop.permute.xlu0 %5705  ;;  %v16885_v20 = vld [vmem:[#allocation219_spill] sm:$0xff]  ;;  %v5437_v59 = vmul.f32 %v5378_v37, %v16837_v23  ;;  %v5435_v24 = vmul.f32 %v5377_v26, %v16837_v23  ;;  %v5286_v37 = vsel %vm358_vm2, %v13594_v15, %v13567_v27  ;;  %v5285_v26 = vsel %vm358_vm2, %v13569_v36, %v13530_v38 }
 0x775   : > { %6123 = vrot.lane.b32.xlu1 %v16885_v20, %s16857_s25  ;;  %v7777_v39 = vpack.c.bf16 %v5438_v6, %v5436_v17 }
 0x776   : > { %6121 = vrot.lane.b32.xlu0 %v16884_v57, %s16857_s25  ;;  %v7779_v6 = vpack.c.bf16 %v5437_v59, %v5435_v24  ;;  %v5444_v24 = vmul.f32 %v5285_v26, %v16834_v41  ;;  %v16893_v26 = vld [vmem:[#allocation137_spill] sm:$0xff] }
 0x777   : > { %7772 = vmatpush1.bf16.msra.mxu1 %v7771_v46  ;;  %v13891_v31 = vpop.permute.xlu1 %5711  ;;  %v5380_v46 = vsel %vm358_vm2, %v13518_v21, %v13498_v61  ;;  %v5379_v61 = vsel %vm358_vm2, %v13496_v5, %v13484_v25  ;;  %v5440_v21 = vmul.f32 %v5283_v32, %v16834_v41  ;;  %v5446_v25 = vmul.f32 %v5286_v37, %v16834_v41  ;;  %v16888_v5 = vld [vmem:[#allocation229_spill] sm:$0xff] }
 0x778   : > { %7774 = vmatprep.subr.bf16.mxu1 %v7773_v56  ;;  %v13885_v33 = vpop.permute.xlu0 %5709  ;;  %v16887_v56 = vld [vmem:[#allocation228_spill] sm:$0xff]  ;;  %v5441_v62 = vmul.f32 %v5380_v46, %v16837_v23  ;;  %v5439_v59 = vmul.f32 %v5379_v61, %v16837_v23  ;;  %v16889_v46 = vld [vmem:[#allocation251_spill] sm:$0xff] }
 0x779   : > { %6127 = vrot.lane.b32.xlu1 %v16887_v56, %s16857_s25  ;;  %v7781_v32 = vpack.c.bf16 %v5442_v13, %v5440_v21  ;;  %v16890_v13 = vld [vmem:[#allocation245_spill] sm:$0xff]  ;;  %v7785_v61 = vpack.c.bf16 %v5446_v25, %v5444_v24  ;;  %v16894_v25 = vld [vmem:[#allocation243_spill] sm:$0xff]  ;;  %v7115_v24 = vld [vmem:[%s15174_s4 + $0x38] sm:$0xff] }
 0x77a   : > { %6125 = vrot.lane.b32.xlu0 %v16886_v7, %s16857_s25 }
 0x77b   : > { %7776 = vmatpush1.bf16.msra.mxu1 %v7775_v28  ;;  %v13915_v17 = vpop.permute.xlu1 %5715  ;;  %v5382_v28 = vsel %vm358_vm2, %v13567_v27, %v13594_v15  ;;  %v7783_v15 = vpack.c.bf16 %v5441_v62, %v5439_v59  ;;  %v16892_v62 = vld [vmem:[#allocation259_spill] sm:$0xff] }
 0x77c   : > { %7778 = vmatprep.subr.bf16.mxu1 %v7777_v39  ;;  %v13909_v58 = vpop.permute.xlu0 %5713  ;;  %v5381_v39 = vsel %vm358_vm2, %v13530_v38, %v13569_v36  ;;  %v5445_v37 = vmul.f32 %v5382_v28, %v16837_v23 }
 0x77d   : > { %6131 = vrot.lane.b32.xlu1 %v16889_v46, %s16857_s25  ;;  %v5443_v21 = vmul.f32 %v5381_v39, %v16837_v23  ;;  %v7112_v23 = vld [vmem:[%s15174_s4 + $0x20] sm:$0xff] }
 0x77e   : > { %6129 = vrot.lane.b32.xlu0 %v16888_v5, %s16857_s25 }
 0x77f   : > { %7780 = vmatpush1.bf16.msra.mxu1 %v7779_v6  ;;  %v13933_v5 = vpop.permute.xlu1 %5719  ;;  %v16891_v6 = vld [vmem:[#allocation258_spill] sm:$0xff]  ;;  %v7787_v41 = vpack.c.bf16 %v5445_v37, %v5443_v21  ;;  %v16898_v37 = vld [vmem:[#allocation248_spill] sm:$0xff] }
 0x780   : > { %7782 = vmatprep.subr.bf16.mxu1 %v7781_v32  ;;  %v13930_v27 = vpop.permute.xlu0 %5717  ;;  %v16895_v32 = vld [vmem:[#allocation249_spill] sm:$0xff] }
 0x781   : > { %6135 = vrot.lane.b32.xlu1 %v16891_v6, %s16857_s25  ;;  %v16896_v59 = vpack.c.bf16 %v16894_v25, %v16895_v32  ;;  %v16901_v25 = vld [vmem:[#allocation256_spill] sm:$0xff] }
 0x782   : > { %6133 = vrot.lane.b32.xlu0 %v16890_v13, %s16857_s25 }
 0x783   : > { %7784 = vmatpush1.bf16.msra.mxu1 %v7783_v15  ;;  %v13942_v36 = vpop.permute.xlu1 %5723  ;;  %v16897_v15 = vld [vmem:[#allocation242_spill] sm:$0xff] }
 0x784   : > { %v13940_v38 = vpop.permute.xlu0 %5721  ;;  %7786 = vmatprep.subr.bf16.mxu1 %v7785_v61  ;;  %v16899_v61 = vpack.c.bf16 %v16897_v15, %v16898_v37  ;;  %v16908_v37 = vld [vmem:[#allocation156_spill] sm:$0xff] }
 0x785   : > { %6139 = vrot.lane.b32.xlu1 %v16893_v26, %s16857_s25  ;;  %v16903_v26 = vld [vmem:[#allocation158_spill] sm:$0xff] }
 0x786   : > { %6137 = vrot.lane.b32.xlu0 %v16892_v62, %s16857_s25 }
 0x787   : > { %7788 = vmatpush1.bf16.msra.mxu1 %v7787_v41  ;;  %v13956_v39 = vpop.permute.xlu1 %5727  ;;  %v16900_v41 = vld [vmem:[#allocation274_spill] sm:$0xff] }
 0x788   : > { %v13951_v28 = vpop.permute.xlu0 %5725  ;;  %7790 = vmatprep.subr.bf16.mxu1 %v16896_v59  ;;  %v16902_v32 = vpack.c.bf16 %v16900_v41, %v16901_v25  ;;  %v16912_v25 = vld [vmem:[#allocation194_spill] sm:$0xff] }
 0x789   : > { %6143 = vrot.lane.b32.xlu1 %v16817_v16, %s16857_s25  ;;  %v16905_v16 = vld [vmem:[#allocation257_spill] sm:$0xff] }
 0x78a   : > { %6141 = vrot.lane.b32.xlu0 %v16816_v48, %s16857_s25  ;;  %5515 = vmatmul.mubr.f32.vlgmr.msra.gmra.mrb[34].mxu1 %v7112_v23  ;;  %v16904_v23 = vld [vmem:[#allocation202_spill] sm:$0xff]  ;;  %v16906_v48 = vld [vmem:[#allocation263_spill] sm:$0xff] }
 0x78b   : > { %7792 = vmatpush1.bf16.msra.mxu1 %v16899_v61  ;;  %5654 = vmatprep.mubr.f32.mxu1 %v7115_v24  ;;  %v13973_v59 = vpop.permute.xlu1 %5731  ;;  %v16907_v62 = vpack.c.bf16 %v16905_v16, %v16906_v48  ;;  %v16909_v61 = vld [vmem:[#allocation133_spill] sm:$0xff]  ;;  %v16916_v16 = vld [vmem:[#allocation210_spill] sm:$0xff] }
 0x78c   : > { %v13968_v21 = vpop.permute.xlu0 %5729  ;;  %7794 = vmatprep.subr.bf16.mxu1 %v16902_v32  ;;  %v16910_v6 = vpack.c.bf16 %v16908_v37, %v16909_v61  ;;  %v16911_v24 = vld [vmem:[#allocation193_spill] sm:$0xff]  ;;  %v16913_v32 = vld [vmem:[#allocation166_spill] sm:$0xff] }
 0x78d   : > { %6147 = vrot.lane.b32.xlu1 %v16904_v23, %s16857_s25  ;;  %v16914_v23 = vld [vmem:[#allocation131_spill] sm:$0xff]  ;;  %v16920_v61 = vld [vmem:[#allocation238_spill] sm:$0xff] }
 0x78e   : > { %6145 = vrot.lane.b32.xlu0 %v16903_v26, %s16857_s25  ;;  %v16915_v26 = vpack.c.bf16 %v16913_v32, %v16914_v23  ;;  %v16925_v32 = vld [vmem:[#allocation237_spill] sm:$0xff] }
 0x78f   : > { %7796 = vmatpush1.bf16.msra.mxu1 %v16907_v62  ;;  %v13987_v41 = vpop.permute.xlu1 %5735  ;;  %v16917_v62 = vld [vmem:[#allocation201_spill] sm:$0xff] }
 0x790   : > { %v13982_v15 = vpop.permute.xlu0 %5733  ;;  %7798 = vmatprep.subr.bf16.mxu1 %v16910_v6  ;;  %v16918_v13 = vpack.c.bf16 %v16916_v16, %v16917_v62  ;;  %v16919_v6 = vld [vmem:[#allocation220_spill] sm:$0xff]  ;;  %v16928_v62 = vld [vmem:[#allocation239_spill] sm:$0xff] }
 0x791   : > { %6151 = vrot.lane.b32.xlu1 %v16912_v25, %s16857_s25  ;;  %v16922_v25 = vld [vmem:[#allocation200_spill] sm:$0xff] }
 0x792   : > { %6149 = vrot.lane.b32.xlu0 %v16911_v24, %s16857_s25  ;;  %v16921_v24 = vld [vmem:[#allocation218_spill] sm:$0xff] }
 0x793   : > { %7800 = vmatpush1.bf16.msra.mxu1 %v16915_v26  ;;  %v14001_v37 = vpop.permute.xlu1 %5739  ;;  %v16923_v46 = vpack.c.bf16 %v16921_v24, %v16922_v25  ;;  %v16924_v26 = vld [vmem:[#allocation244_spill] sm:$0xff]  ;;  %v16933_v25 = vld [vmem:[#allocation266_spill] sm:$0xff] }
 0x794   : > { %v13996_v48 = vpop.permute.xlu0 %5737  ;;  %7802 = vmatprep.subr.bf16.mxu1 %v16918_v13  ;;  %v16926_v56 = vpack.c.bf16 %v16924_v26, %v16925_v32  ;;  %v16927_v13 = vld [vmem:[#allocation230_spill] sm:$0xff]  ;;  %v16936_v32 = vld [vmem:[#allocation265_spill] sm:$0xff] }
 0x795   : > { %6155 = vrot.lane.b32.xlu1 %v16920_v61, %s16857_s25  ;;  %v16930_v61 = vld [vmem:[#allocation236_spill] sm:$0xff] }
 0x796   : > { %6153 = vrot.lane.b32.xlu0 %v16919_v6, %s16857_s25  ;;  %v16929_v6 = vld [vmem:[#allocation250_spill] sm:$0xff] }
 0x797   : > { %7804 = vmatpush1.bf16.msra.mxu1 %v16923_v46  ;;  %v14015_v16 = vpop.permute.xlu1 %5743  ;;  %v16931_v7 = vpack.c.bf16 %v16929_v6, %v16930_v61  ;;  %v16932_v46 = vld [vmem:[#allocation273_spill] sm:$0xff] }
 0x798   : > { %v14010_v23 = vpop.permute.xlu0 %5741  ;;  %7806 = vmatprep.subr.bf16.mxu1 %v16926_v56  ;;  %v16934_v20 = vpack.c.bf16 %v16932_v46, %v16933_v25  ;;  %v16935_v56 = vld [vmem:[#allocation276_spill] sm:$0xff]  ;;  %v16939_v61 = vld [vmem:[#allocation169_spill] sm:$0xff]  ;;  %v16943_v25 = vld [vmem:[#allocation171_spill] sm:$0xff] }
 0x799   : > { %6159 = vrot.lane.b32.xlu1 %v16928_v62, %s16857_s25  ;;  %v16937_v62 = vpack.c.bf16 %v16935_v56, %v16936_v32  ;;  %v16948_v32 = vld [vmem:[#allocation212_spill] sm:$0xff] }
 0x79a   : > { %6157 = vrot.lane.b32.xlu0 %v16927_v13, %s16857_s25 }
 0x79b   : > { %7808 = vmatpush1.bf16.msra.mxu1 %v16931_v7  ;;  %v14029_v26 = vpop.permute.xlu1 %5747  ;;  %v16938_v7 = vld [vmem:[#allocation159_spill] sm:$0xff] }
 0x79c   : > { %v14024_v24 = vpop.permute.xlu0 %5745  ;;  %7810 = vmatprep.subr.bf16.mxu1 %v16934_v20  ;;  %v16940_v13 = vpack.c.bf16 %v16938_v7, %v16939_v61  ;;  %v16942_v20 = vld [vmem:[#allocation260_spill] sm:$0xff]  ;;  %v16951_v61 = vld [vmem:[#allocation275_spill] sm:$0xff] }
 0x79d   : > { %6163 = vrot.lane.b32.xlu1 %v16823_v49, %s16857_s25  ;;  %v16944_v49 = vld [vmem:[#allocation143_spill] sm:$0xff] }
 0x79e   : > { %6161 = vrot.lane.b32.xlu0 %v16822_v45, %s16857_s25  ;;  %v16945_v45 = vpack.c.bf16 %v16943_v25, %v16944_v49  ;;  %v16957_v25 = vld [vmem:[#allocation231_spill] sm:$0xff] }
 0x79f   : > { %7812 = vmatpush1.bf16.msra.mxu1 %v16937_v62  ;;  %v14043_v46 = vpop.permute.xlu1 %5751  ;;  %v16947_v62 = vld [vmem:[#allocation221_spill] sm:$0xff] }
 0x7a0   : > { %v14038_v6 = vpop.permute.xlu0 %5749  ;;  %7814 = vmatprep.subr.bf16.mxu1 %v16940_v13  ;;  %16941 = vst [vmem:[#allocation153_spill] sm:$0xff] %v14043_v46  ;;  %v16949_v57 = vpack.c.bf16 %v16947_v62, %v16948_v32  ;;  %v16950_v13 = vld [vmem:[#allocation268_spill] sm:$0xff]  ;;  %v16961_v32 = vld [vmem:[#allocation41_spill] sm:$0xff] }
 0x7a1   : > { %6167 = vrot.lane.b32.xlu1 %v16942_v20, %s16857_s25  ;;  %v16953_v20 = vld [vmem:[#allocation203_spill] sm:$0xff]  ;;  %v17029_v46 = vld [vmem:[#allocation21_spill] sm:$0xff] }
 0x7a2   : > { %6165 = vrot.lane.b32.xlu0 %v12601_v44, %s16857_s25  ;;  %v16952_v44 = vld [vmem:[#allocation213_spill] sm:$0xff] }
 0x7a3   : > { %7816 = vmatpush1.bf16.msra.mxu1 %v16945_v45  ;;  %v14057_v7 = vpop.permute.xlu1 %5755  ;;  %v16954_v54 = vpack.c.bf16 %v16952_v44, %v16953_v20  ;;  %v16956_v45 = vld [vmem:[#allocation247_spill] sm:$0xff]  ;;  %v16967_v20 = vld [vmem:[#allocation261_spill] sm:$0xff] }
 0x7a4   : > { %v14052_v56 = vpop.permute.xlu0 %5753  ;;  %7818 = vmatprep.subr.bf16.mxu1 %v16949_v57  ;;  %v16958_v22 = vpack.c.bf16 %v16956_v45, %v16957_v25  ;;  %v16960_v57 = vld [vmem:[#allocation42_spill] sm:$0xff]  ;;  %v16971_v25 = vld [vmem:[#allocation80_spill] sm:$0xff] }
 0x7a5   : > { %16946 = vst [vmem:[#allocation188_spill] sm:$0xff] %v14052_v56  ;;  %6171 = vrot.lane.b32.xlu1 %v16951_v61, %s16857_s25  ;;  %v16963_v61 = vld [vmem:[#allocation252_spill] sm:$0xff] }
 0x7a6   : > { %6169 = vrot.lane.b32.xlu0 %v16950_v13, %s16857_s25  ;;  %v16962_v13 = vld [vmem:[#allocation253_spill] sm:$0xff] }
 0x7a7   : > { %7820 = vmatpush1.bf16.msra.mxu1 %v16954_v54  ;;  %v14071_v62 = vpop.permute.xlu1 %5759  ;;  %v16964_v11 = vpack.c.bf16 %v16962_v13, %v16963_v61  ;;  %v16966_v54 = vld [vmem:[#allocation87_spill] sm:$0xff]  ;;  %v16977_v61 = vld [vmem:[#allocation38_spill] sm:$0xff] }
 0x7a8   : > { %v14066_v49 = vpop.permute.xlu0 %5757  ;;  %7822 = vmatprep.subr.bf16.mxu1 %v16958_v22  ;;  %16959 = vst [vmem:[#allocation172_spill] sm:$0xff] %v14071_v62  ;;  %v16968_v56 = vpack.c.bf16 %v16966_v54, %v16967_v20  ;;  %v16970_v22 = vld [vmem:[#allocation39_spill] sm:$0xff]  ;;  %v16981_v20 = vld [vmem:[#allocation78_spill] sm:$0xff] }
 0x7a9   : > { %16955 = vst [vmem:[#allocation197_spill] sm:$0xff] %v14066_v49  ;;  %6175 = vrot.lane.b32.xlu1 %v16961_v32, %s16857_s25  ;;  %v16973_v32 = vld [vmem:[#allocation92_spill] sm:$0xff] }
 0x7aa   : > { %6173 = vrot.lane.b32.xlu0 %v16960_v57, %s16857_s25  ;;  %v16972_v57 = vld [vmem:[#allocation277_spill] sm:$0xff] }
 0x7ab   : > { %7824 = vmatpush1.bf16.msra.mxu1 %v16964_v11  ;;  %v14085_v45 = vpop.permute.xlu1 %5763  ;;  %v16974_v62 = vpack.c.bf16 %v16972_v57, %v16973_v32  ;;  %v16976_v11 = vld [vmem:[#allocation54_spill] sm:$0xff]  ;;  %v16987_v32 = vld [vmem:[#allocation88_spill] sm:$0xff] }
 0x7ac   : > { %v14080_v44 = vpop.permute.xlu0 %5761  ;;  %7826 = vmatprep.subr.bf16.mxu1 %v16968_v56  ;;  %16969 = vst [vmem:[#allocation20_spill] sm:$0xff] %v14085_v45  ;;  %v16980_v56 = vld [vmem:[#allocation73_spill] sm:$0xff] }
 0x7ad   : > { %16965 = vst [vmem:[#allocation173_spill] sm:$0xff] %v14080_v44  ;;  %6179 = vrot.lane.b32.xlu1 %v16971_v25, %s16857_s25  ;;  %v16978_v44 = vpack.c.bf16 %v16976_v11, %v16977_v61  ;;  %v16983_v25 = vld [vmem:[#allocation49_spill] sm:$0xff]  ;;  %v16991_v61 = vld [vmem:[#allocation103_spill] sm:$0xff] }
 0x7ae   : > { %6177 = vrot.lane.b32.xlu0 %v16970_v22, %s16857_s25  ;;  %v16982_v22 = vld [vmem:[#allocation51_spill] sm:$0xff] }
 0x7af   : > { %7828 = vmatpush1.bf16.msra.mxu1 %v16974_v62  ;;  %v14099_v54 = vpop.permute.xlu1 %5767  ;;  %v16984_v45 = vpack.c.bf16 %v16982_v22, %v16983_v25  ;;  %v16986_v62 = vld [vmem:[#allocation33_spill] sm:$0xff] }
 0x7b0   : > { %v14094_v13 = vpop.permute.xlu0 %5765  ;;  %7830 = vmatprep.subr.bf16.mxu1 %v16978_v44  ;;  %16979 = vst [vmem:[#allocation196_spill] sm:$0xff] %v14099_v54  ;;  %v16990_v44 = vld [vmem:[#allocation89_spill] sm:$0xff] }
 0x7b1   : > { %16975 = vst [vmem:[#allocation187_spill] sm:$0xff] %v14094_v13  ;;  %6183 = vrot.lane.b32.xlu1 %v16981_v20, %s16857_s25  ;;  %v16988_v13 = vpack.c.bf16 %v16986_v62, %v16987_v32  ;;  %v16993_v20 = vld [vmem:[#allocation91_spill] sm:$0xff]  ;;  %v16997_v25 = vld [vmem:[#allocation141_spill] sm:$0xff] }
 0x7b2   : > { %6181 = vrot.lane.b32.xlu0 %v16980_v56, %s16857_s25  ;;  %v16992_v56 = vld [vmem:[#allocation90_spill] sm:$0xff]  ;;  %v17001_v32 = vld [vmem:[#allocation139_spill] sm:$0xff] }
 0x7b3   : > { %7832 = vmatpush1.bf16.msra.mxu1 %v16984_v45  ;;  %v14113_v11 = vpop.permute.xlu1 %5771  ;;  %v16994_v54 = vpack.c.bf16 %v16992_v56, %v16993_v20  ;;  %v16996_v45 = vld [vmem:[#allocation176_spill] sm:$0xff]  ;;  %v17007_v20 = vld [vmem:[#allocation53_spill] sm:$0xff] }
 0x7b4   : > { %v14108_v57 = vpop.permute.xlu0 %5769  ;;  %7834 = vmatprep.subr.bf16.mxu1 %v16988_v13  ;;  %16989 = vst [vmem:[#allocation29_spill] sm:$0xff] %v14113_v11  ;;  %v17000_v13 = vld [vmem:[#allocation140_spill] sm:$0xff] }
 0x7b5   : > { %16985 = vst [vmem:[#allocation27_spill] sm:$0xff] %v14108_v57  ;;  %6187 = vrot.lane.b32.xlu1 %v16991_v61, %s16857_s25  ;;  %v16998_v57 = vpack.c.bf16 %v16996_v45, %v16997_v25  ;;  %v17003_v61 = vld [vmem:[#allocation177_spill] sm:$0xff]  ;;  %v5920_v25 = vsel %vm390_vm5, %v13645_v43, %v13623_v40 }
 0x7b6   : > { %6185 = vrot.lane.b32.xlu0 %v16990_v44, %s16857_s25  ;;  %v17002_v44 = vld [vmem:[#allocation179_spill] sm:$0xff] }
 0x7b7   : > { %7836 = vmatpush1.bf16.msra.mxu1 %v16994_v54  ;;  %v14127_v62 = vpop.permute.xlu1 %5775  ;;  %v17004_v11 = vpack.c.bf16 %v17002_v44, %v17003_v61  ;;  %v17006_v54 = vld [vmem:[#allocation269_spill] sm:$0xff]  ;;  %v17012_v44 = vld [vmem:[#allocation124_spill] sm:$0xff] }
 0x7b8   : > { %v14122_v22 = vpop.permute.xlu0 %5773  ;;  %7838 = vmatprep.subr.bf16.mxu1 %v16998_v57  ;;  %16999 = vst [vmem:[#allocation214_spill] sm:$0xff] %v14127_v62  ;;  %v17010_v57 = vld [vmem:[#allocation142_spill] sm:$0xff] }
 0x7b9   : > { %16995 = vst [vmem:[#allocation206_spill] sm:$0xff] %v14122_v22  ;;  %6191 = vrot.lane.b32.xlu1 %v17001_v32, %s16857_s25  ;;  %v17008_v22 = vpack.c.bf16 %v17006_v54, %v17007_v20  ;;  %v17016_v54 = vld [vmem:[#allocation74_spill] sm:$0xff] }
 0x7ba   : > { %6189 = vrot.lane.b32.xlu0 %v17000_v13, %s16857_s25  ;;  %v17011_v13 = vld [vmem:[#allocation35_spill] sm:$0xff]  ;;  %v17020_v62 = vld [vmem:[#allocation22_spill] sm:$0xff] }
 0x7bb   : > { %7840 = vmatpush1.bf16.msra.mxu1 %v17004_v11  ;;  %v14141_v45 = vpop.permute.xlu1 %5779  ;;  %v17013_v11 = vld [vmem:[#allocation47_spill] sm:$0xff] }
 0x7bc   : > { %v14136_v56 = vpop.permute.xlu0 %5777  ;;  %7842 = vmatprep.subr.bf16.mxu1 %v17008_v22  ;;  %17009 = vst [vmem:[#allocation215_spill] sm:$0xff] %v14141_v45  ;;  %v17014_v61 = vpack.c.bf16 %v17012_v44, %v17013_v11  ;;  %v17017_v22 = vld [vmem:[#allocation62_spill] sm:$0xff]  ;;  %v5954_v45 = vmul.f32 %v5920_v25, %v17020_v62  ;;  %v17021_v44 = vld [vmem:[#allocation40_spill] sm:$0xff]  ;;  %v5922_v11 = vsel %vm390_vm5, %v13693_v42, %v13671_v35 }
 0x7bd   : > { %17005 = vst [vmem:[#allocation207_spill] sm:$0xff] %v14136_v56  ;;  %6195 = vrot.lane.b32.xlu1 %v17011_v13, %s16857_s25  ;;  %v17018_v20 = vpack.c.bf16 %v17016_v54, %v17017_v22  ;;  %v5792_v13 = vsel %vm390_vm5, %v13623_v40, %v13645_v43  ;;  %v17023_v54 = vld [vmem:[#allocation125_spill] sm:$0xff]  ;;  %v5791_v40 = vsel %vm390_vm5, %v13596_v1, %v13621_v30 }
 0x7be   : > { %6193 = vrot.lane.b32.xlu0 %v17010_v57, %s16857_s25  ;;  %v5919_v57 = vsel %vm390_vm5, %v13621_v30, %v13596_v1  ;;  %v17024_v22 = vld [vmem:[#allocation81_spill] sm:$0xff]  ;;  %v5953_v49 = vmul.f32 %v5792_v13, %v17029_v46  ;;  %v5794_v1 = vsel %vm390_vm5, %v13671_v35, %v13693_v42  ;;  %v5958_v30 = vmul.f32 %v5922_v11, %v17020_v62  ;;  %v7114_v35 = vld [vmem:[%s15174_s4 + $0x30] sm:$0xff] }
 0x7bf   : > { %7844 = vmatpush1.bf16.msra.mxu1 %v17014_v61  ;;  %v14161_v56 = vpop.permute.xlu1 %5783  ;;  %v17022_v61 = vld [vmem:[#allocation32_spill] sm:$0xff]  ;;  %v5952_v43 = vmul.f32 %v5919_v57, %v17020_v62  ;;  %v5924_v13 = vsel %vm390_vm5, %v13741_v9, %v13723_v0  ;;  %v5793_v42 = vsel %vm390_vm5, %v13647_v50, %v13669_v52 }
 0x7c0   : > { %v14153_v32 = vpop.permute.xlu0 %5781  ;;  %7846 = vmatprep.subr.bf16.mxu1 %v17018_v20  ;;  %17019 = vst [vmem:[#allocation233_spill] sm:$0xff] %v14161_v56  ;;  %v17025_v20 = vpack.c.bf16 %v17023_v54, %v17024_v22  ;;  %v17027_v56 = vld [vmem:[#allocation106_spill] sm:$0xff] }
 0x7c1   : > { %17015 = vst [vmem:[#allocation225_spill] sm:$0xff] %v14153_v32  ;;  %6199 = vrot.lane.b32.xlu1 %v17022_v61, %s16857_s25  ;;  %v5921_v61 = vsel %vm390_vm5, %v13669_v52, %v13647_v50  ;;  %v7853_v57 = vpack.c.bf16 %v5954_v45, %v5952_v43  ;;  %v17032_v22 = vld [vmem:[#allocation186_spill] sm:$0xff]  ;;  %v5957_v43 = vmul.f32 %v5794_v1, %v17029_v46 }
 0x7c2   : > { %6197 = vrot.lane.b32.xlu0 %v17021_v44, %s16857_s25  ;;  %v17026_v44 = vld [vmem:[#allocation84_spill] sm:$0xff]  ;;  %v5956_v45 = vmul.f32 %v5921_v61, %v17020_v62  ;;  %v5796_v50 = vsel %vm390_vm5, %v13723_v0, %v13741_v9  ;;  %v5962_v52 = vmul.f32 %v5924_v13, %v17020_v62  ;;  %v5955_v1 = vmul.f32 %v5793_v42, %v17029_v46 }
 0x7c3   : > { %7848 = vmatpush1.bf16.msra.mxu1 %v17025_v20  ;;  %v17028_v32 = vpack.c.bf16 %v17026_v44, %v17027_v56  ;;  %v14190_v54 = vpop.permute.xlu1 %5787  ;;  %v17030_v56 = vld [vmem:[#allocation17_spill] sm:$0xff]  ;;  %v5795_v0 = vsel %vm390_vm5, %v13699_v53, %v13717_v55  ;;  %v5925_v42 = vsel %vm390_vm5, %v13765_v60, %v13747_v29 }
 0x7c4   : > { %v14181_v25 = vpop.permute.xlu0 %5785  ;;  %v17031_v44 = vld [vmem:[#allocation85_spill] sm:$0xff]  ;;  %v7857_v61 = vpack.c.bf16 %v5958_v30, %v5956_v45  ;;  %v7859_v30 = vpack.c.bf16 %v5957_v43, %v5955_v1  ;;  %v5959_v43 = vmul.f32 %v5795_v0, %v17029_v46  ;;  %v5927_v1 = vsel %vm390_vm5, %v13813_v47, %v13795_v10 }
 0x7c5   : > { %7850 = vmatprep.subr.bf16.mxu1 %v17028_v32  ;;  %v5951_v32 = vmul.f32 %v5791_v40, %v17029_v46  ;;  %6203 = vrot.lane.b32.xlu1 %v17030_v56, %s16857_s25  ;;  %v17033_v20 = vpack.c.bf16 %v17031_v44, %v17032_v22  ;;  %v5923_v44 = vsel %vm390_vm5, %v13717_v55, %v13699_v53  ;;  %v17036_v55 = vld [vmem:[#allocation65_spill] sm:$0xff] }
 0x7c6   : > { %6201 = vrot.lane.b32.xlu0 %v12871_v3, %s16857_s25  ;;  %v5960_v9 = vmul.f32 %v5923_v44, %v17020_v62  ;;  %v5800_v0 = vsel %vm390_vm5, %v13819_v14, %v13837_v2 }
 0x7c7   : > { %7852 = vmatpush1.bf16.msra.mxu1 %v17033_v20  ;;  %v7855_v40 = vpack.c.bf16 %v5953_v49, %v5951_v32  ;;  %v14220_v22 = vpop.permute.xlu1 %6091  ;;  %v7117_v20 = vld [vmem:[%s15174_s4 + $0x48] sm:$0xff]  ;;  %v17034_v49 = vld [vmem:[#allocation105_spill] sm:$0xff]  ;;  %v17035_v32 = vld [vmem:[#allocation120_spill] sm:$0xff] }
 0x7c8   : > { %v14214_v11 = vpop.permute.xlu0 %5789  ;;  %7854 = vmatprep.subr.bf16.mxu1 %v7853_v57  ;;  %v5926_v57 = vsel %vm390_vm5, %v13789_v4, %v13771_v18  ;;  %v7861_v44 = vpack.c.bf16 %v5962_v52, %v5960_v9 }
 0x7c9   : > { %6207 = vrot.lane.b32.xlu1 %v17035_v32, %s16857_s25  ;;  %v5966_v53 = vmul.f32 %v5926_v57, %v17020_v62 }
 0x7ca   : > { %6205 = vrot.lane.b32.xlu0 %v17034_v49, %s16857_s25  ;;  %5655 = vmatmul.mubr.f32.vlgmr.msra.gmra.mrb[34].mxu1 %v7114_v35  ;;  %v5961_v35 = vmul.f32 %v5796_v50, %v17029_v46 }
 0x7cb   : > { %7856 = vmatpush1.bf16.msra.mxu1 %v7855_v40  ;;  %6082 = vmatprep.mubr.f32.mxu1 %v7117_v20  ;;  %v14247_v45 = vpop.permute.xlu1 %6095  ;;  %v5798_v40 = vsel %vm390_vm5, %v13771_v18, %v13789_v4  ;;  %v5928_v20 = vsel %vm390_vm5, %v13837_v2, %v13819_v14  ;;  %v5797_v18 = vsel %vm390_vm5, %v13747_v29, %v13765_v60  ;;  %v17037_v60 = vld [vmem:[#allocation79_spill] sm:$0xff] }
 0x7cc   : > { %v14241_v13 = vpop.permute.xlu0 %6093  ;;  %7858 = vmatprep.subr.bf16.mxu1 %v7857_v61  ;;  %v5964_v4 = vmul.f32 %v5925_v42, %v17020_v62  ;;  %v7863_v52 = vpack.c.bf16 %v5961_v35, %v5959_v43  ;;  %v5965_v61 = vmul.f32 %v5798_v40, %v17029_v46  ;;  %v5970_v29 = vmul.f32 %v5928_v20, %v17020_v62  ;;  %v17038_v42 = vld [vmem:[#allocation75_spill] sm:$0xff] }
 0x7cd   : > { %6211 = vrot.lane.b32.xlu1 %v12999_v12, %s16857_s25  ;;  %v5930_v35 = vsel %vm390_vm5, %v13885_v33, %v13867_v63  ;;  %v5799_v14 = vsel %vm390_vm5, %v13795_v10, %v13813_v47  ;;  %v5968_v2 = vmul.f32 %v5927_v1, %v17020_v62  ;;  %v5929_v43 = vsel %vm390_vm5, %v13861_v51, %v13843_v8  ;;  %v17039_v47 = vld [vmem:[#allocation93_spill] sm:$0xff]  ;;  %v17041_v1 = vld [vmem:[#allocation234_spill] sm:$0xff] }
 0x7ce   : > { %6209 = vrot.lane.b32.xlu0 %v17036_v55, %s16857_s25  ;;  %v7865_v9 = vpack.c.bf16 %v5966_v53, %v5964_v4  ;;  %v5974_v10 = vmul.f32 %v5930_v35, %v17020_v62 }
 0x7cf   : > { %7860 = vmatpush1.bf16.msra.mxu1 %v7859_v30  ;;  %v14271_v57 = vpop.permute.xlu1 %6099  ;;  %v5963_v30 = vmul.f32 %v5797_v18, %v17029_v46  ;;  %v5802_v18 = vsel %vm390_vm5, %v13867_v63, %v13885_v33  ;;  %v7869_v4 = vpack.c.bf16 %v5970_v29, %v5968_v2  ;;  %v5801_v63 = vsel %vm390_vm5, %v13843_v8, %v13861_v51  ;;  %v17042_v51 = vld [vmem:[#allocation226_spill] sm:$0xff] }
 0x7d0   : > { %v14265_v50 = vpop.permute.xlu0 %6097  ;;  %7862 = vmatprep.subr.bf16.mxu1 %v7861_v44  ;;  %v5969_v44 = vmul.f32 %v5800_v0, %v17029_v46  ;;  %v5972_v33 = vmul.f32 %v5929_v43, %v17020_v62  ;;  %v17043_v43 = vld [vmem:[#allocation235_spill] sm:$0xff] }
 0x7d1   : > { %6215 = vrot.lane.b32.xlu1 %v17038_v42, %s16857_s25  ;;  %v7867_v53 = vpack.c.bf16 %v5965_v61, %v5963_v30  ;;  %v5932_v61 = vsel %vm390_vm5, %v13930_v27, %v13915_v17  ;;  %v5931_v30 = vsel %vm390_vm5, %v13909_v58, %v13891_v31 }
 0x7d2   : > { %6213 = vrot.lane.b32.xlu0 %v17037_v60, %s16857_s25  ;;  %v5978_v8 = vmul.f32 %v5932_v61, %v17020_v62  ;;  %v7873_v2 = vpack.c.bf16 %v5974_v10, %v5972_v33 }
 0x7d3   : > { %7864 = vmatpush1.bf16.msra.mxu1 %v7863_v52  ;;  %v14295_v20 = vpop.permute.xlu1 %6103  ;;  %v5967_v52 = vmul.f32 %v5799_v14, %v17029_v46  ;;  %v5804_v14 = vsel %vm390_vm5, %v13915_v17, %v13930_v27  ;;  %v5803_v17 = vsel %vm390_vm5, %v13891_v31, %v13909_v58  ;;  %v5976_v27 = vmul.f32 %v5931_v30, %v17020_v62  ;;  %v17044_v58 = vld [vmem:[#allocation227_spill] sm:$0xff] }
 0x7d4   : > { %v14289_v40 = vpop.permute.xlu0 %6101  ;;  %7866 = vmatprep.subr.bf16.mxu1 %v7865_v9  ;;  %v5973_v9 = vmul.f32 %v5802_v18, %v17029_v46  ;;  %v5975_v33 = vmul.f32 %v5803_v17, %v17029_v46 }
 0x7d5   : > { %6519 = vrot.lane.b32.xlu1 %v17041_v1, %s17040_s18  ;;  %v7871_v29 = vpack.c.bf16 %v5969_v44, %v5967_v52  ;;  %v5934_v44 = vsel %vm390_vm5, %v13951_v28, %v13942_v36  ;;  %v5933_v52 = vsel %vm390_vm5, %v13940_v38, %v13933_v5  ;;  %v5806_v1 = vsel %vm390_vm5, %v13942_v36, %v13951_v28 }
 0x7d6   : > { %6217 = vrot.lane.b32.xlu0 %v17039_v47, %s16857_s25  ;;  %v5982_v31 = vmul.f32 %v5934_v44, %v17020_v62  ;;  %v5805_v36 = vsel %vm390_vm5, %v13933_v5, %v13940_v38  ;;  %v5980_v28 = vmul.f32 %v5933_v52, %v17020_v62  ;;  %v17045_v38 = vld [vmem:[#allocation83_spill] sm:$0xff]  ;;  %v5938_v44 = vsel %vm390_vm5, %v14010_v23, %v14001_v37  ;;  %s7027_s25 = sshll.u32 %s296_s26, 4 }
 0x7d7   : > { %7868 = vmatpush1.bf16.msra.mxu1 %v7867_v53  ;;  %v14319_v35 = vpop.permute.xlu1 %6107  ;;  %v5971_v53 = vmul.f32 %v5801_v63, %v17029_v46  ;;  %v7877_v63 = vpack.c.bf16 %v5978_v8, %v5976_v27  ;;  %v5935_v8 = vsel %vm390_vm5, %v13968_v21, %v13956_v39  ;;  %s298_s17 = scalar_lea.vmem [#allocation2], %s7027_s25 }
 0x7d8   : > { %v14313_v0 = vpop.permute.xlu0 %6105  ;;  %7870 = vmatprep.subr.bf16.mxu1 %v7869_v4  ;;  %v5977_v4 = vmul.f32 %v5804_v14, %v17029_v46  ;;  %v5981_v14 = vmul.f32 %v5806_v1, %v17029_v46  ;;  %s6964_s20 = sshll.u32 %s298_s17, 4  ;;  %s15130_s20 = int_to_ptr.vmem [resolvable:$true] %s6964_s20 }
 0x7d9   : > { %6523 = vrot.lane.b32.xlu1 %v17043_v43, %s17040_s18  ;;  %v7875_v10 = vpack.c.bf16 %v5973_v9, %v5971_v53  ;;  %v5979_v53 = vmul.f32 %v5805_v36, %v17029_v46  ;;  %v5939_v36 = vsel %vm390_vm5, %v14024_v24, %v14015_v16  ;;  %s8137_s9 = scalar_lea.vmem %s15130_s20, 256 }
 0x7da   : > { %6521 = vrot.lane.b32.xlu0 %v17042_v51, %s17040_s18  ;;  %v7879_v30 = vpack.c.bf16 %v5977_v4, %v5975_v33  ;;  %p8138_p11 = scmp.ne.s32.totalorder %s15130_s20, %s8137_s9 }
 0x7db   : > { %7872 = vmatpush1.bf16.msra.mxu1 %v7871_v29  ;;  %v14343_v61 = vpop.permute.xlu1 %6111  ;;  %v5936_v29 = vsel %vm390_vm5, %v13982_v15, %v13973_v59  ;;  %v7883_v17 = vpack.c.bf16 %v5981_v14, %v5979_v53 }
 0x7dc   : > { %v14337_v18 = vpop.permute.xlu0 %6109  ;;  %7874 = vmatprep.subr.bf16.mxu1 %v7873_v2  ;;  %v5986_v5 = vmul.f32 %v5936_v29, %v17020_v62  ;;  %v7881_v2 = vpack.c.bf16 %v5982_v31, %v5980_v28  ;;  %v5940_v31 = vsel %vm390_vm5, %v14038_v6, %v14029_v26  ;;  %p8139_p12 = pnand %p8138_p11, %p8299_p5 }
 0x7dd   : > { %6527 = vrot.lane.b32.xlu1 %v12293_v34, %s17040_s18  ;;  %v5808_v34 = vsel %vm390_vm5, %v13973_v59, %v13982_v15  ;;  %v5807_v59 = vsel %vm390_vm5, %v13956_v39, %v13968_v21  ;;  %v5984_v15 = vmul.f32 %v5935_v8, %v17020_v62  ;;  %v5990_v39 = vmul.f32 %v5938_v44, %v17020_v62  ;;  %v17046_v21 = vld [vmem:[#allocation264_spill] sm:$0xff] }
 0x7de   : > { %6525 = vrot.lane.b32.xlu0 %v17044_v58, %s17040_s18  ;;  %v5985_v27 = vmul.f32 %v5808_v34, %v17029_v46  ;;  %v5983_v1 = vmul.f32 %v5807_v59, %v17029_v46  ;;  %v17047_v58 = vld [vmem:[#allocation11_spill] sm:$0xff]  ;;  %v17049_v34 = vld [vmem:[#allocation197_spill] sm:$0xff]  ;;  %p8140_p13 = pneg %p8139_p12 }
 0x7df   : > { %7876 = vmatpush1.bf16.msra.mxu1 %v7875_v10  ;;  %v14367_v51 = vpop.permute.xlu1 %6115  ;;  %v5937_v10 = vsel %vm390_vm5, %v13996_v48, %v13987_v41  ;;  %v7885_v52 = vpack.c.bf16 %v5986_v5, %v5984_v15  ;;  %v5942_v5 = vsel %vm390_vm5, %v17049_v34, %v14057_v7  ;;  %v17051_v59 = vld [vmem:[#allocation153_spill] sm:$0xff]  ;;  %v17052_v15 = vld [vmem:[#allocation188_spill] sm:$0xff] }
 0x7e0   : > { %v14361_v9 = vpop.permute.xlu0 %6113  ;;  %7878 = vmatprep.subr.bf16.mxu1 %v7877_v63  ;;  %v7887_v33 = vpack.c.bf16 %v5985_v27, %v5983_v1 }
 0x7e1   : > { %6531 = vrot.lane.b32.xlu1 %v12307_v19, %s17040_s18  ;;  %v5810_v19 = vsel %vm390_vm5, %v14001_v37, %v14010_v23  ;;  %v5809_v37 = vsel %vm390_vm5, %v13987_v41, %v13996_v48  ;;  %v5988_v23 = vmul.f32 %v5937_v10, %v17020_v62  ;;  %v5994_v41 = vmul.f32 %v5940_v31, %v17020_v62  ;;  %v17048_v48 = vld [vmem:[#allocation271_spill] sm:$0xff] }
 0x7e2   : > { %6529 = vrot.lane.b32.xlu0 %v17045_v38, %s17040_s18  ;;  %v5989_v29 = vmul.f32 %v5810_v19, %v17029_v46  ;;  %v5987_v8 = vmul.f32 %v5809_v37, %v17029_v46  ;;  %v17050_v38 = vld [vmem:[#allocation116_spill] sm:$0xff]  ;;  %v5814_v10 = vsel %vm390_vm5, %v14057_v7, %v17049_v34  ;;  %v17056_v31 = vld [vmem:[#allocation167_spill] sm:$0xff]  ;;  %v5813_v7 = vsel %vm390_vm5, %v17051_v59, %v17052_v15 }
 0x7e3   : > { %7880 = vmatpush1.bf16.msra.mxu1 %v7879_v30  ;;  %v14391_v4 = vpop.permute.xlu1 %6119  ;;  %v5812_v30 = vsel %vm390_vm5, %v14029_v26, %v14038_v6  ;;  %v7889_v14 = vpack.c.bf16 %v5990_v39, %v5988_v23  ;;  %v5811_v26 = vsel %vm390_vm5, %v14015_v16, %v14024_v24  ;;  %v5992_v6 = vmul.f32 %v5939_v36, %v17020_v62  ;;  %v17053_v24 = vld [vmem:[#allocation119_spill] sm:$0xff]  ;;  %v17058_v36 = vld [vmem:[#allocation173_spill] sm:$0xff] }
 0x7e4   : > { %v14385_v43 = vpop.permute.xlu0 %6117  ;;  %7882 = vmatprep.subr.bf16.mxu1 %v7881_v2  ;;  %v7891_v53 = vpack.c.bf16 %v5989_v29, %v5987_v8  ;;  %v5993_v44 = vmul.f32 %v5812_v30, %v17029_v46  ;;  %v5998_v16 = vmul.f32 %v5942_v5, %v17020_v62  ;;  %v5991_v39 = vmul.f32 %v5811_v26, %v17029_v46  ;;  %v17057_v29 = vld [vmem:[#allocation172_spill] sm:$0xff]  ;;  %v17059_v8 = vld [vmem:[#allocation157_spill] sm:$0xff]  ;;  %v17061_v26 = vld [vmem:[#allocation206_spill] sm:$0xff] }
 0x7e5   : > { %6535 = vrot.lane.b32.xlu1 %v17047_v58, %s17040_s18  ;;  %v7893_v19 = vpack.c.bf16 %v5994_v41, %v5992_v6  ;;  %v5943_v30 = vsel %vm390_vm5, %v17058_v36, %v17057_v29  ;;  %v5995_v5 = vmul.f32 %v5813_v7, %v17029_v46 }
 0x7e6   : > { %6533 = vrot.lane.b32.xlu0 %v17046_v21, %s17040_s18  ;;  %v17054_v21 = vld [vmem:[#allocation20_spill] sm:$0xff]  ;;  %v7895_v23 = vpack.c.bf16 %v5993_v44, %v5991_v39  ;;  %v5815_v44 = vsel %vm390_vm5, %v17057_v29, %v17058_v36  ;;  %v17068_v29 = vld [vmem:[#allocation219_spill] sm:$0xff] }
 0x7e7   : > { %7884 = vmatpush1.bf16.msra.mxu1 %v7883_v17  ;;  %v14415_v28 = vpop.permute.xlu1 %6123  ;;  %v5941_v17 = vsel %vm390_vm5, %v17052_v15, %v17051_v59  ;;  %v6000_v59 = vmul.f32 %v5943_v30, %v17020_v62  ;;  %v5999_v7 = vmul.f32 %v5815_v44, %v17029_v46  ;;  %v17071_v44 = vld [vmem:[#allocation211_spill] sm:$0xff] }
 0x7e8   : > { %v14409_v63 = vpop.permute.xlu0 %6121  ;;  %7886 = vmatprep.subr.bf16.mxu1 %v7885_v52  ;;  %v17055_v52 = vld [vmem:[#allocation187_spill] sm:$0xff]  ;;  %v5996_v58 = vmul.f32 %v5941_v17, %v17020_v62 }
 0x7e9   : > { %6539 = vrot.lane.b32.xlu1 %v17050_v38, %s17040_s18  ;;  %v5944_v1 = vsel %vm390_vm5, %v17055_v52, %v17054_v21  ;;  %v17060_v38 = vld [vmem:[#allocation29_spill] sm:$0xff] }
 0x7ea   : > { %6537 = vrot.lane.b32.xlu0 %v17048_v48, %s17040_s18  ;;  %v5816_v48 = vsel %vm390_vm5, %v17054_v21, %v17055_v52  ;;  %v7897_v34 = vpack.c.bf16 %v5998_v16, %v5996_v58  ;;  %v5946_v6 = vsel %vm390_vm5, %v17061_v26, %v17060_v38  ;;  %v17063_v16 = vld [vmem:[#allocation196_spill] sm:$0xff]  ;;  %v5818_v21 = vsel %vm390_vm5, %v17060_v38, %v17061_v26  ;;  %v17066_v58 = vld [vmem:[#allocation215_spill] sm:$0xff] }
 0x7eb   : > { %7888 = vmatpush1.bf16.msra.mxu1 %v7887_v33  ;;  %v14439_v27 = vpop.permute.xlu1 %6127  ;;  %v5997_v33 = vmul.f32 %v5814_v10, %v17029_v46  ;;  %v6001_v10 = vmul.f32 %v5816_v48, %v17029_v46  ;;  %v6006_v52 = vmul.f32 %v5946_v6, %v17020_v62 }
 0x7ec   : > { %v14433_v2 = vpop.permute.xlu0 %6125  ;;  %7890 = vmatprep.subr.bf16.mxu1 %v7889_v14  ;;  %v6002_v14 = vmul.f32 %v5944_v1, %v17020_v62  ;;  %v17065_v1 = vld [vmem:[#allocation192_spill] sm:$0xff] }
 0x7ed   : > { %6543 = vrot.lane.b32.xlu1 %v17056_v31, %s17040_s18  ;;  %v7899_v17 = vpack.c.bf16 %v5997_v33, %v5995_v5  ;;  %v17070_v5 = vld [vmem:[#allocation207_spill] sm:$0xff] }
 0x7ee   : > { %6541 = vrot.lane.b32.xlu0 %v17053_v24, %s17040_s18  ;;  %v17064_v24 = vld [vmem:[#allocation27_spill] sm:$0xff]  ;;  %v7901_v31 = vpack.c.bf16 %v6002_v14, %v6000_v59  ;;  %v7903_v14 = vpack.c.bf16 %v6001_v10, %v5999_v7  ;;  %v5950_v10 = vsel %vm390_vm5, %v14214_v11, %v14190_v54 }
 0x7ef   : > { %7892 = vmatpush1.bf16.msra.mxu1 %v7891_v53  ;;  %v14463_v41 = vpop.permute.xlu1 %6131  ;;  %v17062_v53 = vld [vmem:[#allocation191_spill] sm:$0xff]  ;;  %v5817_v36 = vsel %vm390_vm5, %v17063_v16, %v17064_v24 }
 0x7f0   : > { %v14457_v37 = vpop.permute.xlu0 %6129  ;;  %7894 = vmatprep.subr.bf16.mxu1 %v7893_v19  ;;  %v5945_v19 = vsel %vm390_vm5, %v17064_v24, %v17063_v16  ;;  %v17072_v16 = vld [vmem:[#allocation228_spill] sm:$0xff] }
 0x7f1   : > { %6547 = vrot.lane.b32.xlu1 %v17062_v53, %s17040_s18  ;;  %v6004_v30 = vmul.f32 %v5945_v19, %v17020_v62 }
 0x7f2   : > { %6545 = vrot.lane.b32.xlu0 %v17059_v8, %s17040_s18  ;;  %v6005_v8 = vmul.f32 %v5818_v21, %v17029_v46 }
 0x7f3   : > { %7896 = vmatpush1.bf16.msra.mxu1 %v7895_v23  ;;  %v14487_v39 = vpop.permute.xlu1 %6135  ;;  %v17067_v23 = vld [vmem:[#allocation225_spill] sm:$0xff]  ;;  %v7905_v59 = vpack.c.bf16 %v6006_v52, %v6004_v30 }
 0x7f4   : > { %v14481_v15 = vpop.permute.xlu0 %6133  ;;  %7898 = vmatprep.subr.bf16.mxu1 %v7897_v34  ;;  %v5948_v33 = vsel %vm390_vm5, %v17067_v23, %v17066_v58  ;;  %v17069_v34 = vld [vmem:[#allocation214_spill] sm:$0xff]  ;;  %v5820_v6 = vsel %vm390_vm5, %v17066_v58, %v17067_v23  ;;  %v5822_v23 = vsel %vm390_vm5, %v14190_v54, %v14214_v11 }
 0x7f5   : > { %6551 = vrot.lane.b32.xlu1 %v17068_v29, %s17040_s18  ;;  %v5947_v38 = vsel %vm390_vm5, %v17070_v5, %v17069_v34  ;;  %v6010_v53 = vmul.f32 %v5948_v33, %v17020_v62  ;;  %v5819_v24 = vsel %vm390_vm5, %v17069_v34, %v17070_v5  ;;  %v6014_v33 = vmul.f32 %v5950_v10, %v17020_v62  ;;  %v17074_v29 = vld [vmem:[#allocation229_spill] sm:$0xff] }
 0x7f6   : > { %6549 = vrot.lane.b32.xlu0 %v17065_v1, %s17040_s18  ;;  %v6008_v19 = vmul.f32 %v5947_v38, %v17020_v62  ;;  %v6009_v1 = vmul.f32 %v5820_v6, %v17029_v46  ;;  %v6007_v30 = vmul.f32 %v5819_v24, %v17029_v46  ;;  %v6013_v38 = vmul.f32 %v5822_v23, %v17029_v46  ;;  %v17078_v24 = vld [vmem:[#allocation258_spill] sm:$0xff] }
 0x7f7   : > { %7900 = vmatpush1.bf16.msra.mxu1 %v7899_v17  ;;  %v14511_v26 = vpop.permute.xlu1 %6139  ;;  %v6003_v17 = vmul.f32 %v5817_v36, %v17029_v46  ;;  %v6347_v6 = vsel %vm410_vm4, %v14241_v13, %v14220_v22  ;;  %v6222_v23 = vsel %vm410_vm4, %v14295_v20, %v14313_v0 }
 0x7f8   : > { %v14505_v48 = vpop.permute.xlu0 %6137  ;;  %7902 = vmatprep.subr.bf16.mxu1 %v7901_v31  ;;  %v17073_v31 = vld [vmem:[#allocation233_spill] sm:$0xff]  ;;  %v7909_v36 = vpack.c.bf16 %v6010_v53, %v6008_v19  ;;  %v7911_v5 = vpack.c.bf16 %v6009_v1, %v6007_v30  ;;  %v17079_v1 = vld [vmem:[#allocation18_spill] sm:$0xff] }
 0x7f9   : > { %6555 = vrot.lane.b32.xlu1 %v17072_v16, %s17040_s18  ;;  %v7907_v52 = vpack.c.bf16 %v6005_v8, %v6003_v17  ;;  %v5949_v7 = vsel %vm390_vm5, %v14181_v25, %v17073_v31  ;;  %v17075_v8 = vld [vmem:[#allocation251_spill] sm:$0xff]  ;;  %v5821_v54 = vsel %vm390_vm5, %v17073_v31, %v14181_v25  ;;  %v6350_v16 = vsel %vm410_vm4, %v14313_v0, %v14295_v20  ;;  %v17081_v30 = vld [vmem:[#allocation137_spill] sm:$0xff] }
 0x7fa   : > { %6553 = vrot.lane.b32.xlu0 %v17071_v44, %s17040_s18  ;;  %v6012_v11 = vmul.f32 %v5949_v7, %v17020_v62  ;;  %v6220_v44 = vsel %vm410_vm4, %v14247_v45, %v14265_v50  ;;  %v17077_v62 = vld [vmem:[#allocation245_spill] sm:$0xff]  ;;  %v6011_v10 = vmul.f32 %v5821_v54, %v17029_v46  ;;  %v6349_v31 = vsel %vm410_vm4, %v14289_v40, %v14271_v57 }
 0x7fb   : > { %7904 = vmatpush1.bf16.msra.mxu1 %v7903_v14  ;;  %v14535_v58 = vpop.permute.xlu1 %6143  ;;  %v6348_v14 = vsel %vm410_vm4, %v14265_v50, %v14247_v45  ;;  %v6219_v45 = vsel %vm410_vm4, %v14220_v22, %v14241_v13  ;;  %v6381_v46 = vmul.f32 %v6220_v44, %v17079_v1  ;;  %v17080_v13 = vld [vmem:[#allocation259_spill] sm:$0xff]  ;;  %v7116_v20 = vld [vmem:[%s15174_s4 + $0x40] sm:$0xff]  ;;  %v6221_v0 = vsel %vm410_vm4, %v14271_v57, %v14289_v40  ;;  %v17082_v44 = vld [vmem:[#allocation118_spill] sm:$0xff] }
 0x7fc   : > { %v14529_v21 = vpop.permute.xlu0 %6141  ;;  %7906 = vmatprep.subr.bf16.mxu1 %v7905_v59  ;;  %v17076_v59 = vld [vmem:[#allocation19_spill] sm:$0xff]  ;;  %v7913_v17 = vpack.c.bf16 %v6014_v33, %v6012_v11  ;;  %v6385_v11 = vmul.f32 %v6222_v23, %v17079_v1  ;;  %v6224_v57 = vsel %vm410_vm4, %v14343_v61, %v14361_v9 }
 0x7fd   : > { %6559 = vrot.lane.b32.xlu1 %v17075_v8, %s17040_s18  ;;  %v6382_v25 = vmul.f32 %v6348_v14, %v17076_v59  ;;  %v6380_v50 = vmul.f32 %v6347_v6, %v17076_v59  ;;  %v6386_v22 = vmul.f32 %v6350_v16, %v17076_v59  ;;  %v6384_v14 = vmul.f32 %v6349_v31, %v17076_v59  ;;  %v7119_v6 = vld [vmem:[%s15174_s4 + $0x58] sm:$0xff] }
 0x7fe   : > { %6557 = vrot.lane.b32.xlu0 %v17074_v29, %s17040_s18  ;;  %v6379_v29 = vmul.f32 %v6219_v45, %v17079_v1  ;;  %v6389_v45 = vmul.f32 %v6224_v57, %v17079_v1 }
 0x7ff   : > { %7908 = vmatpush1.bf16.msra.mxu1 %v7907_v52  ;;  %v14559_v53 = vpop.permute.xlu1 %6147  ;;  %v7915_v52 = vpack.c.bf16 %v6013_v38, %v6011_v10  ;;  %v7917_v33 = vpack.c.bf16 %v6382_v25, %v6380_v50  ;;  %v7921_v25 = vpack.c.bf16 %v6386_v22, %v6384_v14  ;;  %v17083_v10 = vld [vmem:[#allocation121_spill] sm:$0xff]  ;;  %v6353_v50 = vsel %vm410_vm4, %v14385_v43, %v14367_v51 }
 0x800   : > { %v14553_v34 = vpop.permute.xlu0 %6145  ;;  %7910 = vmatprep.subr.bf16.mxu1 %v7909_v36  ;;  %v6352_v36 = vsel %vm410_vm4, %v14361_v9, %v14343_v61  ;;  %v7919_v54 = vpack.c.bf16 %v6381_v46, %v6379_v29  ;;  %v6223_v61 = vsel %vm410_vm4, %v14319_v35, %v14337_v18  ;;  %v6226_v46 = vsel %vm410_vm4, %v14391_v4, %v14409_v63 }
 0x801   : > { %6563 = vrot.lane.b32.xlu1 %v17078_v24, %s17040_s18  ;;  %v6390_v40 = vmul.f32 %v6352_v36, %v17076_v59  ;;  %v6387_v23 = vmul.f32 %v6223_v61, %v17079_v1  ;;  %v6356_v22 = vsel %vm410_vm4, %v14457_v37, %v14439_v27  ;;  %v6393_v36 = vmul.f32 %v6226_v46, %v17079_v1 }
 0x802   : > { %6561 = vrot.lane.b32.xlu0 %v17077_v62, %s17040_s18  ;;  %v6383_v62 = vmul.f32 %v6221_v0, %v17079_v1  ;;  %v6228_v0 = vsel %vm410_vm4, %v14439_v27, %v14457_v37  ;;  %v6227_v27 = vsel %vm410_vm4, %v14415_v28, %v14433_v2  ;;  %v6360_v61 = vsel %vm410_vm4, %v14553_v34, %v14535_v58 }
 0x803   : > { %7912 = vmatpush1.bf16.msra.mxu1 %v7911_v5  ;;  %v14583_v7 = vpop.permute.xlu1 %6151  ;;  %v6351_v5 = vsel %vm410_vm4, %v14337_v18, %v14319_v35  ;;  %v17084_v18 = vld [vmem:[#allocation158_spill] sm:$0xff]  ;;  %v7927_v29 = vpack.c.bf16 %v6389_v45, %v6387_v23  ;;  %v6359_v46 = vsel %vm410_vm4, %v14529_v21, %v14511_v26 }
 0x804   : > { %v14577_v19 = vpop.permute.xlu0 %6149  ;;  %7914 = vmatprep.subr.bf16.mxu1 %v7913_v17  ;;  %v6354_v17 = vsel %vm410_vm4, %v14409_v63, %v14391_v4  ;;  %v6388_v9 = vmul.f32 %v6351_v5, %v17076_v59  ;;  %v7923_v24 = vpack.c.bf16 %v6385_v11, %v6383_v62  ;;  %v6225_v4 = vsel %vm410_vm4, %v14367_v51, %v14385_v43  ;;  %v17086_v43 = vld [vmem:[#allocation193_spill] sm:$0xff]  ;;  %v17087_v5 = vld [vmem:[#allocation194_spill] sm:$0xff] }
 0x805   : > { %6567 = vrot.lane.b32.xlu1 %v17081_v30, %s17040_s18  ;;  %v6394_v35 = vmul.f32 %v6354_v17, %v17076_v59  ;;  %v6392_v63 = vmul.f32 %v6353_v50, %v17076_v59  ;;  %v6355_v30 = vsel %vm410_vm4, %v14433_v2, %v14415_v28  ;;  %v6398_v51 = vmul.f32 %v6356_v22, %v17076_v59  ;;  %v17088_v2 = vld [vmem:[#allocation220_spill] sm:$0xff] }
 0x806   : > { %6565 = vrot.lane.b32.xlu0 %v17080_v13, %s17040_s18  ;;  %v7925_v31 = vpack.c.bf16 %v6390_v40, %v6388_v9  ;;  %v17085_v13 = vld [vmem:[#allocation202_spill] sm:$0xff]  ;;  %v6358_v11 = vsel %vm410_vm4, %v14505_v48, %v14487_v39  ;;  %v6396_v37 = vmul.f32 %v6355_v30, %v17076_v59  ;;  %v6397_v40 = vmul.f32 %v6228_v0, %v17079_v1 }
 0x807   : > { %7916 = vmatpush1.bf16.msra.mxu1 %v7915_v52  ;;  %v14610_v38 = vpop.permute.xlu1 %6155  ;;  %v7929_v14 = vpack.c.bf16 %v6394_v35, %v6392_v63  ;;  %v6230_v62 = vsel %vm410_vm4, %v14487_v39, %v14505_v48  ;;  %v6402_v28 = vmul.f32 %v6358_v11, %v17076_v59  ;;  %v17089_v9 = vld [vmem:[#allocation238_spill] sm:$0xff]  ;;  %v6229_v39 = vsel %vm410_vm4, %v14463_v41, %v14481_v15 }
 0x808   : > { %v14604_v8 = vpop.permute.xlu0 %6153  ;;  %7918 = vmatprep.subr.bf16.mxu1 %v7917_v33  ;;  %v7933_v17 = vpack.c.bf16 %v6398_v51, %v6396_v37  ;;  %v6401_v50 = vmul.f32 %v6230_v62, %v17079_v1  ;;  %v6399_v23 = vmul.f32 %v6229_v39, %v17079_v1 }
 0x809   : > { %6571 = vrot.lane.b32.xlu1 %v17083_v10, %s17040_s18  ;;  %v6395_v10 = vmul.f32 %v6227_v27, %v17079_v1  ;;  %v6362_v22 = vsel %vm410_vm4, %v14604_v8, %v14583_v7  ;;  %v6234_v0 = vsel %vm410_vm4, %v14583_v7, %v14604_v8  ;;  %v6233_v7 = vsel %vm410_vm4, %v14559_v53, %v14577_v19 }
 0x80a   : > { %6569 = vrot.lane.b32.xlu0 %v17082_v44, %s17040_s18  ;;  %6083 = vmatmul.mubr.f32.vlgmr.msra.gmra.mrb[34].mxu1 %v7116_v20  ;;  %v6357_v44 = vsel %vm410_vm4, %v14481_v15, %v14463_v41  ;;  %v17090_v41 = vld [vmem:[#allocation230_spill] sm:$0xff]  ;;  %v7939_v63 = vpack.c.bf16 %v6401_v50, %v6399_v23  ;;  %v6410_v51 = vmul.f32 %v6362_v22, %v17076_v59  ;;  %v17096_v50 = vld [vmem:[#allocation268_spill] sm:$0xff] }
 0x80b   : > { %7920 = vmatpush1.bf16.msra.mxu1 %v7919_v54  ;;  %6510 = vmatprep.mubr.f32.mxu1 %v7119_v6  ;;  %v14637_v52 = vpop.permute.xlu1 %6159  ;;  %v6391_v54 = vmul.f32 %v6225_v4, %v17079_v1  ;;  %v6400_v48 = vmul.f32 %v6357_v44, %v17076_v59  ;;  %v7935_v45 = vpack.c.bf16 %v6397_v40, %v6395_v10 }
 0x80c   : > { %v14631_v16 = vpop.permute.xlu0 %6157  ;;  %7922 = vmatprep.subr.bf16.mxu1 %v7921_v25  ;;  %v6409_v27 = vmul.f32 %v6234_v0, %v17079_v1  ;;  %v6407_v62 = vmul.f32 %v6233_v7, %v17079_v1 }
 0x80d   : > { %6575 = vrot.lane.b32.xlu1 %v17085_v13, %s17040_s18  ;;  %v7931_v57 = vpack.c.bf16 %v6393_v36, %v6391_v54  ;;  %v7937_v15 = vpack.c.bf16 %v6402_v28, %v6400_v48  ;;  %v17091_v13 = vld [vmem:[#allocation239_spill] sm:$0xff]  ;;  %v6361_v36 = vsel %vm410_vm4, %v14577_v19, %v14559_v53  ;;  %v17093_v54 = vld [vmem:[#allocation16_spill] sm:$0xff]  ;;  %v6363_v37 = vsel %vm410_vm4, %v14631_v16, %v14610_v38 }
 0x80e   : > { %6573 = vrot.lane.b32.xlu0 %v17084_v18, %s17040_s18  ;;  %v6232_v18 = vsel %vm410_vm4, %v14535_v58, %v14553_v34  ;;  %v6231_v58 = vsel %vm410_vm4, %v14511_v26, %v14529_v21  ;;  %v6404_v34 = vmul.f32 %v6359_v46, %v17076_v59  ;;  %v17092_v26 = vld [vmem:[#allocation246_spill] sm:$0xff]  ;;  %v6408_v8 = vmul.f32 %v6361_v36, %v17076_v59  ;;  %v17094_v53 = vld [vmem:[#allocation267_spill] sm:$0xff] }
 0x80f   : > { %7924 = vmatpush1.bf16.msra.mxu1 %v7923_v24  ;;  %v14661_v20 = vpop.permute.xlu1 %6163  ;;  %v7947_v10 = vpack.c.bf16 %v6409_v27, %v6407_v62 }
 0x810   : > { %v14655_v33 = vpop.permute.xlu0 %6161  ;;  %7926 = vmatprep.subr.bf16.mxu1 %v7925_v31  ;;  %v6406_v31 = vmul.f32 %v6360_v61, %v17076_v59  ;;  %v7945_v19 = vpack.c.bf16 %v6410_v51, %v6408_v8 }
 0x811   : > { %6579 = vrot.lane.b32.xlu1 %v17087_v5, %s17040_s18  ;;  %v6236_v40 = vsel %vm410_vm4, %v14637_v52, %v14655_v33 }
 0x812   : > { %6577 = vrot.lane.b32.xlu0 %v17086_v43, %s17040_s18  ;;  %v7941_v21 = vpack.c.bf16 %v6406_v31, %v6404_v34  ;;  %v6403_v43 = vmul.f32 %v6231_v58, %v17079_v1  ;;  %v6413_v61 = vmul.f32 %v6236_v40, %v17079_v1  ;;  %v17098_v34 = vld [vmem:[#allocation275_spill] sm:$0xff] }
 0x813   : > { %7928 = vmatpush1.bf16.msra.mxu1 %v7927_v29  ;;  %v14685_v25 = vpop.permute.xlu1 %6167  ;;  %v6405_v29 = vmul.f32 %v6232_v18, %v17079_v1  ;;  %v17097_v18 = vld [vmem:[#allocation41_spill] sm:$0xff] }
 0x814   : > { %v14679_v6 = vpop.permute.xlu0 %6165  ;;  %7930 = vmatprep.subr.bf16.mxu1 %v7929_v14  ;;  %v6364_v14 = vsel %vm410_vm4, %v14655_v33, %v14637_v52  ;;  %v6412_v52 = vmul.f32 %v6363_v37, %v17076_v59 }
 0x815   : > { %6583 = vrot.lane.b32.xlu1 %v17089_v9, %s17040_s18  ;;  %v7943_v5 = vpack.c.bf16 %v6405_v29, %v6403_v43  ;;  %v6414_v44 = vmul.f32 %v6364_v14, %v17076_v59  ;;  %v6365_v9 = vsel %vm410_vm4, %v14679_v6, %v14661_v20  ;;  %v6237_v31 = vsel %vm410_vm4, %v14661_v20, %v14679_v6  ;;  %v17099_v29 = vld [vmem:[#allocation42_spill] sm:$0xff] }
 0x816   : > { %6581 = vrot.lane.b32.xlu0 %v17088_v2, %s17040_s18  ;;  %v17095_v2 = vld [vmem:[#allocation260_spill] sm:$0xff]  ;;  %v6415_v6 = vmul.f32 %v6237_v31, %v17079_v1 }
 0x817   : > { %7932 = vmatpush1.bf16.msra.mxu1 %v7931_v57  ;;  %v14707_v35 = vpop.permute.xlu1 %6171 }
 0x818   : > { %v6170_v24 = vpop.permute.xlu0 %6169  ;;  %7934 = vmatprep.subr.bf16.mxu1 %v7933_v17  ;;  %v6235_v17 = vsel %vm410_vm4, %v14610_v38, %v14631_v16  ;;  %v7949_v38 = vpack.c.bf16 %v6414_v44, %v6412_v52 }
 0x819   : > { %6587 = vrot.lane.b32.xlu1 %v17091_v13, %s17040_s18  ;;  %v6366_v28 = vsel %vm410_vm4, %v6170_v24, %v14685_v25  ;;  %v6238_v48 = vsel %vm410_vm4, %v14685_v25, %v6170_v24  ;;  %v6411_v16 = vmul.f32 %v6235_v17, %v17079_v1  ;;  %v6416_v25 = vmul.f32 %v6365_v9, %v17076_v59  ;;  %v17102_v17 = vld [vmem:[#allocation78_spill] sm:$0xff] }
 0x81a   : > { %6585 = vrot.lane.b32.xlu0 %v17090_v41, %s17040_s18 }
 0x81b   : > { %7936 = vmatpush1.bf16.msra.mxu1 %v7935_v45  ;;  %v6176_v30 = vpop.permute.xlu1 %6175  ;;  %v6418_v45 = vmul.f32 %v6366_v28, %v17076_v59  ;;  %v7951_v41 = vpack.c.bf16 %v6413_v61, %v6411_v16  ;;  %v17101_v28 = vld [vmem:[#allocation80_spill] sm:$0xff]  ;;  %v17103_v16 = vld [vmem:[#allocation73_spill] sm:$0xff] }
 0x81c   : > { %v14725_v4 = vpop.permute.xlu0 %6173  ;;  %7938 = vmatprep.subr.bf16.mxu1 %v7937_v15  ;;  %v6417_v15 = vmul.f32 %v6238_v48, %v17079_v1 }
 0x81d   : > { %6591 = vrot.lane.b32.xlu1 %v17093_v54, %s17040_s18  ;;  %v6367_v23 = vsel %vm410_vm4, %v14725_v4, %v14707_v35  ;;  %v7953_v20 = vpack.c.bf16 %v6418_v45, %v6416_v25  ;;  %v6239_v36 = vsel %vm410_vm4, %v14707_v35, %v14725_v4  ;;  %v17100_v4 = vld [vmem:[#allocation39_spill] sm:$0xff] }
 0x81e   : > { %6589 = vrot.lane.b32.xlu0 %v17092_v26, %s17040_s18  ;;  %v7955_v51 = vpack.c.bf16 %v6417_v15, %v6415_v6  ;;  %v6419_v35 = vmul.f32 %v6239_v36, %v17079_v1 }
 0x81f   : > { %7940 = vmatpush1.bf16.msra.mxu1 %v7939_v63  ;;  %v6180_v57 = vpop.permute.xlu1 %6179 }
 0x820   : > { %v6178_v11 = vpop.permute.xlu0 %6177  ;;  %7942 = vmatprep.subr.bf16.mxu1 %v7941_v21 }
 0x821   : > { %6595 = vrot.lane.b32.xlu1 %v17095_v2, %s17040_s18  ;;  %v6368_v46 = vsel %vm410_vm4, %v6178_v11, %v6176_v30  ;;  %v6240_v13 = vsel %vm410_vm4, %v6176_v30, %v6178_v11  ;;  %v6420_v30 = vmul.f32 %v6367_v23, %v17076_v59 }
 0x822   : > { %6593 = vrot.lane.b32.xlu0 %v17094_v53, %s17040_s18  ;;  %v6422_v58 = vmul.f32 %v6368_v46, %v17076_v59  ;;  %v6421_v26 = vmul.f32 %v6240_v13, %v17079_v1  ;;  %v17104_v13 = vld [vmem:[#allocation89_spill] sm:$0xff] }
 0x823   : > { %7944 = vmatpush1.bf16.msra.mxu1 %v7943_v5  ;;  %v6184_v39 = vpop.permute.xlu1 %6183 }
 0x824   : > { %v6182_v33 = vpop.permute.xlu0 %6181  ;;  %7946 = vmatprep.subr.bf16.mxu1 %v7945_v19  ;;  %v7957_v7 = vpack.c.bf16 %v6422_v58, %v6420_v30  ;;  %v7959_v27 = vpack.c.bf16 %v6421_v26, %v6419_v35  ;;  %v17106_v30 = vld [vmem:[#allocation139_spill] sm:$0xff]  ;;  %v17107_v35 = vld [vmem:[#allocation140_spill] sm:$0xff] }
 0x825   : > { %4378 = vrot.lane.b32.xlu1 %v17097_v18, %s8201_s22  ;;  %v6369_v21 = vsel %vm410_vm4, %v6182_v33, %v6180_v57  ;;  %v6241_v8 = vsel %vm410_vm4, %v6180_v57, %v6182_v33 }
 0x826   : > { %6597 = vrot.lane.b32.xlu0 %v17096_v50, %s17040_s18  ;;  %v6424_v11 = vmul.f32 %v6369_v21, %v17076_v59  ;;  %v6423_v2 = vmul.f32 %v6241_v8, %v17079_v1 }
 0x827   : > { %7948 = vmatpush1.bf16.msra.mxu1 %v7947_v10  ;;  %v6188_v22 = vpop.permute.xlu1 %6187 }
 0x828   : > { %v6186_v24 = vpop.permute.xlu0 %6185  ;;  %7950 = vmatprep.subr.bf16.mxu1 %v7949_v38 }
 0x829   : > { %v6370_v63 = vsel %vm410_vm4, %v6186_v24, %v6184_v39  ;;  %6601 = vrot.lane.b32.xlu1 %v17099_v29, %s17040_s18  ;;  %v6242_v14 = vsel %vm410_vm4, %v6184_v39, %v6186_v24 }
 0x82a   : > { %6599 = vrot.lane.b32.xlu0 %v17098_v34, %s17040_s18  ;;  %v6426_v54 = vmul.f32 %v6370_v63, %v17076_v59  ;;  %v6425_v37 = vmul.f32 %v6242_v14, %v17079_v1  ;;  %v17105_v63 = vld [vmem:[#allocation103_spill] sm:$0xff] }
 0x82b   : > { %7952 = vmatpush1.bf16.msra.mxu1 %v7951_v41  ;;  %v6192_v43 = vpop.permute.xlu1 %6191 }
 0x82c   : > { %v6190_v0 = vpop.permute.xlu0 %6189  ;;  %7954 = vmatprep.subr.bf16.mxu1 %v7953_v20  ;;  %v7961_v57 = vpack.c.bf16 %v6426_v54, %v6424_v11  ;;  %v7963_v61 = vpack.c.bf16 %v6425_v37, %v6423_v2 }
 0x82d   : > { %6605 = vrot.lane.b32.xlu1 %v17100_v4, %s17040_s18  ;;  %v6371_v40 = vsel %vm410_vm4, %v6190_v0, %v6188_v22  ;;  %v6243_v52 = vsel %vm410_vm4, %v6188_v22, %v6190_v0 }
 0x82e   : > { %6603 = vrot.lane.b32.xlu0 %v17097_v18, %s17040_s18  ;;  %v6428_v33 = vmul.f32 %v6371_v40, %v17076_v59  ;;  %v6427_v45 = vmul.f32 %v6243_v52, %v17079_v1  ;;  %v17108_v40 = vld [vmem:[#allocation142_spill] sm:$0xff]  ;;  %v17109_v52 = vld [vmem:[#allocation35_spill] sm:$0xff] }
 0x82f   : > { %7956 = vmatpush1.bf16.msra.mxu1 %v7955_v51  ;;  %v6196_v53 = vpop.permute.xlu1 %6195 }
 0x830   : > { %v6194_v5 = vpop.permute.xlu0 %6193  ;;  %7958 = vmatprep.subr.bf16.mxu1 %v7957_v7 }
 0x831   : > { %v6372_v44 = vsel %vm410_vm4, %v6194_v5, %v6192_v43  ;;  %v6244_v19 = vsel %vm410_vm4, %v6192_v43, %v6194_v5  ;;  %4382 = vrot.lane.b32.xlu1 %v17102_v17, %s8201_s22 }
 0x832   : > { %v6430_v62 = vmul.f32 %v6372_v44, %v17076_v59  ;;  %4380 = vrot.lane.b32.xlu0 %v17101_v28, %s8201_s22  ;;  %v6429_v9 = vmul.f32 %v6244_v19, %v17079_v1 }
 0x833   : > { %7960 = vmatpush1.bf16.msra.mxu1 %v7959_v27  ;;  %v6200_v39 = vpop.permute.xlu1 %6199 }
 0x834   : > { %v6198_v10 = vpop.permute.xlu0 %6197  ;;  %7962 = vmatprep.subr.bf16.mxu1 %v7961_v57  ;;  %v7965_v48 = vpack.c.bf16 %v6430_v62, %v6428_v33  ;;  %v7967_v18 = vpack.c.bf16 %v6429_v9, %v6427_v45  ;;  %v17110_v33 = vld [vmem:[#allocation32_spill] sm:$0xff]  ;;  %v7118_v45 = vld [vmem:[%s15174_s4 + $0x50] sm:$0xff] }
 0x835   : > { %v6245_v50 = vsel %vm410_vm4, %v6196_v53, %v6198_v10  ;;  %v6373_v38 = vsel %vm410_vm4, %v6198_v10, %v6196_v53  ;;  %6609 = vrot.lane.b32.xlu1 %v17103_v16, %s17040_s18 }
 0x836   : > { %6607 = vrot.lane.b32.xlu0 %v17101_v28, %s17040_s18  ;;  %v6431_v41 = vmul.f32 %v6245_v50, %v17079_v1  ;;  %v6432_v15 = vmul.f32 %v6373_v38, %v17076_v59  ;;  %v17112_v38 = vld [vmem:[#allocation23_spill] sm:$0xff] }
 0x837   : > { %7964 = vmatpush1.bf16.msra.mxu1 %v7963_v61  ;;  %v6204_v24 = vpop.permute.xlu1 %6203 }
 0x838   : > { %v6202_v46 = vpop.permute.xlu0 %6201  ;;  %7966 = vmatprep.subr.bf16.mxu1 %v7965_v48 }
 0x839   : > { %v6246_v31 = vsel %vm410_vm4, %v6200_v39, %v6202_v46  ;;  %v6374_v25 = vsel %vm410_vm4, %v6202_v46, %v6200_v39  ;;  %6613 = vrot.lane.b32.xlu1 %v17104_v13, %s17040_s18 }
 0x83a   : > { %v6433_v23 = vmul.f32 %v6246_v31, %v17079_v1  ;;  %v6434_v22 = vmul.f32 %v6374_v25, %v17076_v59  ;;  %6611 = vrot.lane.b32.xlu0 %v17102_v17, %s17040_s18  ;;  %v17113_v25 = vld [vmem:[#allocation24_spill] sm:$0xff] }
 0x83b   : > { %7968 = vmatpush1.bf16.msra.mxu1 %v7967_v18  ;;  %v6208_v6 = vpop.permute.xlu1 %6207 }
 0x83c   : > { %v7971_v58 = vpack.c.bf16 %v6433_v23, %v6431_v41  ;;  %v6206_v34 = vpop.permute.xlu0 %6205  ;;  %v7969_v20 = vpack.c.bf16 %v6434_v22, %v6432_v15 }
 0x83d   : > { %v6247_v29 = vsel %vm410_vm4, %v6204_v24, %v6206_v34  ;;  %v6375_v36 = vsel %vm410_vm4, %v6206_v34, %v6204_v24  ;;  %4386 = vrot.lane.b32.xlu1 %v17106_v30, %s8201_s22 }
 0x83e   : > { %4384 = vrot.lane.b32.xlu0 %v17105_v63, %s8201_s22  ;;  %7970 = vmatprep.subr.bf16.mxu1 %v7969_v20  ;;  %v6435_v43 = vmul.f32 %v6247_v29, %v17079_v1  ;;  %v6436_v14 = vmul.f32 %v6375_v36, %v17076_v59 }
 0x83f   : > { %7972 = vmatpush1.bf16.msra.mxu1 %v7971_v58  ;;  %v6212_v21 = vpop.permute.xlu1 %6211 }
 0x840   : > { %v6210_v0 = vpop.permute.xlu0 %6209 }
 0x841   : > { %v6248_v51 = vsel %vm410_vm4, %v6208_v6, %v6210_v0  ;;  %v6376_v26 = vsel %vm410_vm4, %v6210_v0, %v6208_v6  ;;  %6617 = vrot.lane.b32.xlu1 %v17107_v35, %s17040_s18 }
 0x842   : > { %v6437_v54 = vmul.f32 %v6248_v51, %v17079_v1  ;;  %v6438_v7 = vmul.f32 %v6376_v26, %v17076_v59  ;;  %6615 = vrot.lane.b32.xlu0 %v17105_v63, %s17040_s18 }
 0x843   : > { %v6216_v5 = vpop.permute.xlu1 %6215 }
 0x844   : > { %v7975_v4 = vpack.c.bf16 %v6437_v54, %v6435_v43  ;;  %v6214_v8 = vpop.permute.xlu0 %6213  ;;  %v7973_v11 = vpack.c.bf16 %v6438_v7, %v6436_v14  ;;  %v4593_v54 = vld [vmem:[%s15174_s4 + $0x8] sm:$0xff] }
 0x845   : > { %v6249_v27 = vsel %vm410_vm4, %v6212_v21, %v6214_v8  ;;  %v6377_v37 = vsel %vm410_vm4, %v6214_v8, %v6212_v21  ;;  %6621 = vrot.lane.b32.xlu1 %v17108_v40, %s17040_s18  ;;  %4658 = vmatprep.mubr.f32.mxu0 %v4593_v54 }
 0x846   : > { %6619 = vrot.lane.b32.xlu0 %v17106_v30, %s17040_s18  ;;  %7974 = vmatprep.subr.bf16.mxu1 %v7973_v11  ;;  %v6439_v28 = vmul.f32 %v6249_v27, %v17079_v1  ;;  %v6440_v57 = vmul.f32 %v6377_v37, %v17076_v59 }
 0x847   : > { %7976 = vmatpush1.bf16.msra.mxu1 %v7975_v4  ;;  %v6520_v62 = vpop.permute.xlu1 %6519 }
 0x848   : > { %v6218_v44 = vpop.permute.xlu0 %6217 }
 0x849   : > { %v6250_v53 = vsel %vm410_vm4, %v6216_v5, %v6218_v44  ;;  %v6378_v19 = vsel %vm410_vm4, %v6218_v44, %v6216_v5  ;;  %4390 = vrot.lane.b32.xlu1 %v17110_v33, %s8201_s22  ;;  %v7121_v44 = vld [vmem:[%s15174_s4 + $0x68] sm:$0xff] }
 0x84a   : > { %v6441_v2 = vmul.f32 %v6250_v53, %v17079_v1  ;;  %v6442_v17 = vmul.f32 %v6378_v19, %v17076_v59  ;;  %4388 = vrot.lane.b32.xlu0 %v17109_v52, %s8201_s22  ;;  %v17111_v59 = vld [vmem:[#allocation40_spill] sm:$0xff] }
 0x84b   : > { %v6524_v39 = vpop.permute.xlu1 %6523 }
 0x84c   : > { %v7979_v10 = vpack.c.bf16 %v6441_v2, %v6439_v28  ;;  %v6522_v61 = vpop.permute.xlu0 %6521  ;;  %v7977_v9 = vpack.c.bf16 %v6442_v17, %v6440_v57 }
 0x84d   : > { %v6647_v48 = vsel %vm430_vm6, %v6520_v62, %v6522_v61  ;;  %v6775_v1 = vsel %vm430_vm6, %v6522_v61, %v6520_v62  ;;  %6625 = vrot.lane.b32.xlu1 %v17111_v59, %s17040_s18 }
 0x84e   : > { %6623 = vrot.lane.b32.xlu0 %v17109_v52, %s17040_s18  ;;  %7978 = vmatprep.subr.bf16.mxu1 %v7977_v9  ;;  %v6807_v16 = vmul.f32 %v6647_v48, %v17112_v38  ;;  %v6808_v24 = vmul.f32 %v6775_v1, %v17113_v25 }
 0x84f   : > { %7980 = vmatpush1.bf16.msra.mxu1 %v7979_v10  ;;  %v6528_v31 = vpop.permute.xlu1 %6527 }
 0x850   : > { %v6526_v50 = vpop.permute.xlu0 %6525 }
 0x851   : > { %v6648_v46 = vsel %vm430_vm6, %v6524_v39, %v6526_v50  ;;  %v6776_v18 = vsel %vm430_vm6, %v6526_v50, %v6524_v39  ;;  %6629 = vrot.lane.b32.xlu1 %v12871_v3, %s17040_s18 }
 0x852   : > { %v6809_v41 = vmul.f32 %v6648_v46, %v17112_v38  ;;  %v6810_v15 = vmul.f32 %v6776_v18, %v17113_v25  ;;  %6627 = vrot.lane.b32.xlu0 %v17110_v33, %s17040_s18  ;;  %6511 = vmatmul.mubr.f32.vlgmr.msra.gmra.mrb[34].mxu1 %v7118_v45 }
 0x853   : > { %v6532_v58 = vpop.permute.xlu1 %6531  ;;  %6938 = vmatprep.mubr.f32.mxu1 %v7121_v44 }
 0x854   : > { %v7983_v23 = vpack.c.bf16 %v6809_v41, %v6807_v16  ;;  %v6530_v22 = vpop.permute.xlu0 %6529  ;;  %v7981_v13 = vpack.c.bf16 %v6810_v15, %v6808_v24 }
 0x855   : > { %v6649_v34 = vsel %vm430_vm6, %v6528_v31, %v6530_v22  ;;  %v6777_v20 = vsel %vm430_vm6, %v6530_v22, %v6528_v31  ;;  %4394 = vrot.lane.b32.xlu1 %v17035_v32, %s8201_s22 }
 0x856   : > { %4392 = vrot.lane.b32.xlu0 %v17030_v56, %s8201_s22  ;;  %7982 = vmatprep.subr.bf16.mxu1 %v7981_v13  ;;  %v6811_v36 = vmul.f32 %v6649_v34, %v17112_v38  ;;  %v6812_v30 = vmul.f32 %v6777_v20, %v17113_v25 }
 0x857   : > { %7984 = vmatpush1.bf16.msra.mxu1 %v7983_v23  ;;  %v6536_v29 = vpop.permute.xlu1 %6535 }
 0x858   : > { %v6534_v6 = vpop.permute.xlu0 %6533 }
 0x859   : > { %v6650_v63 = vsel %vm430_vm6, %v6532_v58, %v6534_v6  ;;  %v6778_v3 = vsel %vm430_vm6, %v6534_v6, %v6532_v58  ;;  %6633 = vrot.lane.b32.xlu1 %v17034_v49, %s17040_s18 }
 0x85a   : > { %v6813_v0 = vmul.f32 %v6650_v63, %v17112_v38  ;;  %v6814_v51 = vmul.f32 %v6778_v3, %v17113_v25  ;;  %6631 = vrot.lane.b32.xlu0 %v17030_v56, %s17040_s18 }
 0x85b   : > { %v6540_v14 = vpop.permute.xlu1 %6539 }
 0x85c   : > { %v7987_v26 = vpack.c.bf16 %v6813_v0, %v6811_v36  ;;  %v6538_v21 = vpop.permute.xlu0 %6537  ;;  %v7985_v43 = vpack.c.bf16 %v6814_v51, %v6812_v30 }
 0x85d   : > { %v6651_v7 = vsel %vm430_vm6, %v6536_v29, %v6538_v21  ;;  %v6779_v35 = vsel %vm430_vm6, %v6538_v21, %v6536_v29  ;;  %6637 = vrot.lane.b32.xlu1 %v17036_v55, %s17040_s18 }
 0x85e   : > { %6635 = vrot.lane.b32.xlu0 %v17035_v32, %s17040_s18  ;;  %7986 = vmatprep.subr.bf16.mxu1 %v7985_v43  ;;  %v6815_v11 = vmul.f32 %v6651_v7, %v17112_v38  ;;  %v6816_v32 = vmul.f32 %v6779_v35, %v17113_v25 }
 0x85f   : > { %7988 = vmatpush1.bf16.msra.mxu1 %v7987_v26  ;;  %v6544_v8 = vpop.permute.xlu1 %6543 }
 0x860   : > { %v6542_v56 = vpop.permute.xlu0 %6541 }
 0x861   : > { %v6652_v49 = vsel %vm430_vm6, %v6540_v14, %v6542_v56  ;;  %v6780_v4 = vsel %vm430_vm6, %v6542_v56, %v6540_v14  ;;  %4398 = vrot.lane.b32.xlu1 %v17038_v42, %s8201_s22 }
 0x862   : > { %v6817_v5 = vmul.f32 %v6652_v49, %v17112_v38  ;;  %v6818_v27 = vmul.f32 %v6780_v4, %v17113_v25  ;;  %4396 = vrot.lane.b32.xlu0 %v12999_v12, %s8201_s22  ;;  %s8215_s22 = smov [#allocation2]  }
 0x863   : > { %v6548_v53 = vpop.permute.xlu1 %6547  ;;  %s8141_s24 = sshll.u32 %s8215_s22, 4  ;;  %s8142_s24 = int_to_ptr.vmem [resolvable:$false] %s8141_s24 }
 0x864   : > { %v7991_v55 = vpack.c.bf16 %v6817_v5, %v6815_v11  ;;  %v6546_v37 = vpop.permute.xlu0 %6545  ;;  %v7989_v40 = vpack.c.bf16 %v6818_v27, %v6816_v32  ;;  %p8144_p0 = scmp.lt.s32.totalorder %s15130_s20, %s8142_s24 }
 0x865   : > { %v6653_v19 = vsel %vm430_vm6, %v6544_v8, %v6546_v37  ;;  %v6781_v62 = vsel %vm430_vm6, %v6546_v37, %v6544_v8  ;;  %6641 = vrot.lane.b32.xlu1 %v17037_v60, %s17040_s18 }
 0x866   : > { %6639 = vrot.lane.b32.xlu0 %v12999_v12, %s17040_s18  ;;  %7990 = vmatprep.subr.bf16.mxu1 %v7989_v40  ;;  %v6819_v52 = vmul.f32 %v6653_v19, %v17112_v38  ;;  %v6820_v33 = vmul.f32 %v6781_v62, %v17113_v25 }
 0x867   : > { %7992 = vmatpush1.bf16.msra.mxu1 %v7991_v55  ;;  %v6552_v17 = vpop.permute.xlu1 %6551 }
 0x868   : > { %v6550_v28 = vpop.permute.xlu0 %6549 }
 0x869   : > { %v6654_v57 = vsel %vm430_vm6, %v6548_v53, %v6550_v28  ;;  %v6782_v2 = vsel %vm430_vm6, %v6550_v28, %v6548_v53  ;;  %6645 = vrot.lane.b32.xlu1 %v17039_v47, %s17040_s18 }
 0x86a   : > { %v6821_v12 = vmul.f32 %v6654_v57, %v17112_v38  ;;  %v6822_v10 = vmul.f32 %v6782_v2, %v17113_v25  ;;  %6643 = vrot.lane.b32.xlu0 %v17038_v42, %s17040_s18  ;;  %s8143_s18 = scalar_lea.vmem %s8142_s24, 512 }
 0x86b   : > { %v6556_v39 = vpop.permute.xlu1 %6555  ;;  %p8145_p1 = scmp.lt.s32.totalorder %s8143_s18, %s8137_s9 }
 0x86c   : > { %v7995_v60 = vpack.c.bf16 %v6821_v12, %v6819_v52  ;;  %v6554_v61 = vpop.permute.xlu0 %6553  ;;  %v7993_v9 = vpack.c.bf16 %v6822_v10, %v6820_v33 }
 0x86d   : > { %v6655_v48 = vsel %vm430_vm6, %v6552_v17, %v6554_v61  ;;  %v6783_v1 = vsel %vm430_vm6, %v6554_v61, %v6552_v17  ;;  %p8146_p2 = por %p8145_p1, %p8144_p0 }
 0x86e   : > { %7994 = vmatprep.subr.bf16.mxu1 %v7993_v9  ;;  %v6823_v42 = vmul.f32 %v6655_v48, %v17112_v38  ;;  %v6824_v47 = vmul.f32 %v6783_v1, %v17113_v25 }
 0x86f   : > { %7996 = vmatpush1.bf16.msra.mxu1 %v7995_v60  ;;  %v6560_v16 = vpop.permute.xlu1 %6559  ;;  %p8147_p3 = pnand %p8146_p2, %p8140_p13 }
 0x870   : > { %v6558_v59 = vpop.permute.xlu0 %6557 }
 0x871   : > { %v6656_v45 = vsel %vm430_vm6, %v6556_v39, %v6558_v59  ;;  %v6784_v50 = vsel %vm430_vm6, %v6558_v59, %v6556_v39 }
 0x872   : > { %v6825_v46 = vmul.f32 %v6656_v45, %v17112_v38  ;;  %v6826_v18 = vmul.f32 %v6784_v50, %v17113_v25 }
 0x873   : > { %v6564_v15 = vpop.permute.xlu1 %6563 }
 0x874   : > { %v7999_v31 = vpack.c.bf16 %v6825_v46, %v6823_v42  ;;  %v6562_v24 = vpop.permute.xlu0 %6561  ;;  %v7997_v41 = vpack.c.bf16 %v6826_v18, %v6824_v47 }
 0x875   : > { %v6657_v23 = vsel %vm430_vm6, %v6560_v16, %v6562_v24  ;;  %v6785_v22 = vsel %vm430_vm6, %v6562_v24, %v6560_v16  ;;  %v17115_v24 = vld [vmem:[#allocation148_spill] sm:$0xff] }
 0x876   : > { %7998 = vmatprep.subr.bf16.mxu1 %v7997_v41  ;;  %v6827_v6 = vmul.f32 %v6657_v23, %v17112_v38  ;;  %v6828_v63 = vmul.f32 %v6785_v22, %v17113_v25 }
 0x877   : > { %8000 = vmatpush1.bf16.msra.mxu1 %v7999_v31  ;;  %v6568_v20 = vpop.permute.xlu1 %6567  ;;  %v17114_v31 = vld [vmem:[#allocation112_spill] sm:$0xff] }
 0x878   : > { %v6566_v13 = vpop.permute.xlu0 %6565  ;;  %v4420_v41 = vsel %vm318_vm1, %v17115_v24, %v17114_v31 }
 0x879   : > { %v6658_v58 = vsel %vm430_vm6, %v6564_v15, %v6566_v13  ;;  %v6786_v34 = vsel %vm430_vm6, %v6566_v13, %v6564_v15  ;;  %v4516_v15 = vsel %vm318_vm1, %v17114_v31, %v17115_v24 }
 0x87a   : > { %v6829_v3 = vmul.f32 %v6658_v58, %v17112_v38  ;;  %v6830_v29 = vmul.f32 %v6786_v34, %v17113_v25 }
 0x87b   : > { %v6572_v51 = vpop.permute.xlu1 %6571 }
 0x87c   : > { %v8003_v36 = vpack.c.bf16 %v6829_v3, %v6827_v6  ;;  %v6570_v30 = vpop.permute.xlu0 %6569  ;;  %v8001_v0 = vpack.c.bf16 %v6830_v29, %v6828_v63  ;;  %v17116_v3 = vld [vmem:[#allocation126_spill] sm:$0xff] }
 0x87d   : > { %v6659_v26 = vsel %vm430_vm6, %v6568_v20, %v6570_v30  ;;  %v6787_v21 = vsel %vm430_vm6, %v6570_v30, %v6568_v20  ;;  %v17117_v30 = vld [vmem:[#allocation12_spill] sm:$0xff] }
 0x87e   : > { %8002 = vmatprep.subr.bf16.mxu1 %v8001_v0  ;;  %v6831_v35 = vmul.f32 %v6659_v26, %v17112_v38  ;;  %v6832_v56 = vmul.f32 %v6787_v21, %v17113_v25  ;;  %v4568_v0 = vmul.f32 %v4516_v15, %v17117_v30 }
 0x87f   : > { %8004 = vmatpush1.bf16.msra.mxu1 %v8003_v36  ;;  %v6576_v7 = vpop.permute.xlu1 %6575 }
 0x880   : > { %v6574_v43 = vpop.permute.xlu0 %6573 }
 0x881   : > { %v6660_v14 = vsel %vm430_vm6, %v6572_v51, %v6574_v43  ;;  %v6788_v54 = vsel %vm430_vm6, %v6574_v43, %v6572_v51  ;;  %v17118_v51 = vld [vmem:[#allocation13_spill] sm:$0xff] }
 0x882   : > { %v6833_v49 = vmul.f32 %v6660_v14, %v17112_v38  ;;  %v6834_v4 = vmul.f32 %v6788_v54, %v17113_v25  ;;  %v4569_v26 = vmul.f32 %v4420_v41, %v17118_v51 }
 0x883   : > { %v6580_v5 = vpop.permute.xlu1 %6579 }
 0x884   : > { %v8007_v8 = vpack.c.bf16 %v6833_v49, %v6831_v35  ;;  %v6578_v11 = vpop.permute.xlu0 %6577  ;;  %v8005_v32 = vpack.c.bf16 %v6834_v4, %v6832_v56 }
 0x885   : > { %v6661_v27 = vsel %vm430_vm6, %v6576_v7, %v6578_v11  ;;  %v6789_v55 = vsel %vm430_vm6, %v6578_v11, %v6576_v7 }
 0x886   : > { %8006 = vmatprep.subr.bf16.mxu1 %v8005_v32  ;;  %v6835_v19 = vmul.f32 %v6661_v27, %v17112_v38  ;;  %v6836_v62 = vmul.f32 %v6789_v55, %v17113_v25 }
 0x887   : > { %8008 = vmatpush1.bf16.msra.mxu1 %v8007_v8  ;;  %v6584_v53 = vpop.permute.xlu1 %6583 }
 0x888   : > { %v6582_v37 = vpop.permute.xlu0 %6581 }
 0x889   : > { %v6662_v40 = vsel %vm430_vm6, %v6580_v5, %v6582_v37  ;;  %v6790_v44 = vsel %vm430_vm6, %v6582_v37, %v6580_v5 }
 0x88a   : > { %v6837_v28 = vmul.f32 %v6662_v40, %v17112_v38  ;;  %v6838_v57 = vmul.f32 %v6790_v44, %v17113_v25 }
 0x88b   : > { %v6588_v33 = vpop.permute.xlu1 %6587 }
 0x88c   : > { %v8011_v2 = vpack.c.bf16 %v6837_v28, %v6835_v19  ;;  %v6586_v17 = vpop.permute.xlu0 %6585  ;;  %v8009_v52 = vpack.c.bf16 %v6838_v57, %v6836_v62  ;;  %v17119_v62 = vld [vmem:[#allocation182_spill] sm:$0xff] }
 0x88d   : > { %v6663_v12 = vsel %vm430_vm6, %v6584_v53, %v6586_v17  ;;  %v6791_v10 = vsel %vm430_vm6, %v6586_v17, %v6584_v53 }
 0x88e   : > { %8010 = vmatprep.subr.bf16.mxu1 %v8009_v52  ;;  %v6839_v48 = vmul.f32 %v6663_v12, %v17112_v38  ;;  %v6840_v1 = vmul.f32 %v6791_v10, %v17113_v25  ;;  %v17120_v12 = vld [vmem:[#allocation127_spill] sm:$0xff] }
 0x88f   : > { %8012 = vmatpush1.bf16.msra.mxu1 %v8011_v2  ;;  %v6592_v39 = vpop.permute.xlu1 %6591 }
 0x890   : > { %v6590_v60 = vpop.permute.xlu0 %6589 }
 0x891   : > { %v6664_v61 = vsel %vm430_vm6, %v6588_v33, %v6590_v60  ;;  %v6792_v9 = vsel %vm430_vm6, %v6590_v60, %v6588_v33 }
 0x892   : > { %v6841_v59 = vmul.f32 %v6664_v61, %v17112_v38  ;;  %v6842_v45 = vmul.f32 %v6792_v9, %v17113_v25 }
 0x893   : > { %v6596_v47 = vpop.permute.xlu1 %6595 }
 0x894   : > { %v8015_v50 = vpack.c.bf16 %v6841_v59, %v6839_v48  ;;  %v6594_v16 = vpop.permute.xlu0 %6593  ;;  %v8013_v42 = vpack.c.bf16 %v6842_v45, %v6840_v1 }
 0x895   : > { %v6665_v46 = vsel %vm430_vm6, %v6592_v39, %v6594_v16  ;;  %v6793_v18 = vsel %vm430_vm6, %v6594_v16, %v6592_v39 }
 0x896   : > { %8014 = vmatprep.subr.bf16.mxu1 %v8013_v42  ;;  %v6843_v22 = vmul.f32 %v6665_v46, %v17112_v38  ;;  %v6844_v13 = vmul.f32 %v6793_v18, %v17113_v25 }
 0x897   : > { %8016 = vmatpush1.bf16.msra.mxu1 %v8015_v50  ;;  %v4379_v20 = vpop.permute.xlu1 %4378 }
 0x898   : > { %v6598_v23 = vpop.permute.xlu0 %6597  ;;  %v4421_v29 = vsel %vm318_vm1, %v4379_v20, %v17116_v3  ;;  %v4517_v36 = vsel %vm318_vm1, %v17116_v3, %v4379_v20  ;;  %v17122_v3 = vld [vmem:[#allocation134_spill] sm:$0xff] }
 0x899   : > { %v6666_v58 = vsel %vm430_vm6, %v6596_v47, %v6598_v23  ;;  %v6794_v34 = vsel %vm430_vm6, %v6598_v23, %v6596_v47  ;;  %v4570_v21 = vmul.f32 %v4517_v36, %v17117_v30  ;;  %v4571_v43 = vmul.f32 %v4421_v29, %v17118_v51 }
 0x89a   : > { %v6845_v6 = vmul.f32 %v6666_v58, %v17112_v38  ;;  %v6846_v63 = vmul.f32 %v6794_v34, %v17113_v25 }
 0x89b   : > { %v7639_v35 = vpack.c.bf16 %v4570_v21, %v4568_v0  ;;  %v6602_v56 = vpop.permute.xlu1 %6601  ;;  %v7637_v49 = vpack.c.bf16 %v4571_v43, %v4569_v26 }
 0x89c   : > { %v8019_v14 = vpack.c.bf16 %v6845_v6, %v6843_v22  ;;  %v6600_v54 = vpop.permute.xlu0 %6599  ;;  %v8017_v7 = vpack.c.bf16 %v6846_v63, %v6844_v13  ;;  %v17121_v22 = vld [vmem:[#allocation115_spill] sm:$0xff] }
 0x89d   : > { %7638 = vmatprep.subr.bf16.mxu0 %v7637_v49  ;;  %v6667_v4 = vsel %vm430_vm6, %v6600_v54, %v6602_v56  ;;  %v6795_v8 = vsel %vm430_vm6, %v6602_v56, %v6600_v54 }
 0x89e   : > { %8018 = vmatprep.subr.bf16.mxu1 %v8017_v7  ;;  %7640 = vmatpush1.bf16.msra.mxu0 %v7639_v35  ;;  %v6847_v55 = vmul.f32 %v6667_v4, %v17112_v38  ;;  %v6848_v37 = vmul.f32 %v6795_v8, %v17113_v25 }
 0x89f   : > { %8020 = vmatpush1.bf16.msra.mxu1 %v8019_v14  ;;  %v6606_v32 = vpop.permute.xlu1 %6605 }
 0x8a0   : > { %v6604_v11 = vpop.permute.xlu0 %6603 }
 0x8a1   : > { %v6668_v5 = vsel %vm430_vm6, %v6604_v11, %v6606_v32  ;;  %v6796_v27 = vsel %vm430_vm6, %v6606_v32, %v6604_v11 }
 0x8a2   : > { %v6849_v40 = vmul.f32 %v6668_v5, %v17112_v38  ;;  %v6850_v44 = vmul.f32 %v6796_v27, %v17113_v25 }
 0x8a3   : > { %v4383_v2 = vpop.permute.xlu1 %4382 }
 0x8a4   : > { %v4381_v53 = vpop.permute.xlu0 %4380  ;;  %v8023_v19 = vpack.c.bf16 %v6849_v40, %v6847_v55  ;;  %v8021_v17 = vpack.c.bf16 %v6850_v44, %v6848_v37  ;;  %v4423_v10 = vsel %vm318_vm1, %v4383_v2, %v17120_v12  ;;  %v4519_v60 = vsel %vm318_vm1, %v17120_v12, %v4383_v2  ;;  %v17123_v40 = vld [vmem:[#allocation135_spill] sm:$0xff] }
 0x8a5   : > { %v4422_v28 = vsel %vm318_vm1, %v4381_v53, %v17119_v62  ;;  %v4518_v57 = vsel %vm318_vm1, %v17119_v62, %v4381_v53  ;;  %v4574_v61 = vmul.f32 %v4519_v60, %v17117_v30  ;;  %v4575_v9 = vmul.f32 %v4423_v10, %v17118_v51  ;;  %v17124_v2 = vld [vmem:[#allocation163_spill] sm:$0xff] }
 0x8a6   : > { %v4572_v52 = vmul.f32 %v4518_v57, %v17117_v30  ;;  %v4573_v33 = vmul.f32 %v4422_v28, %v17118_v51  ;;  %8022 = vmatprep.subr.bf16.mxu1 %v8021_v17 }
 0x8a7   : > { %8024 = vmatpush1.bf16.msra.mxu1 %v8023_v19  ;;  %v6610_v1 = vpop.permute.xlu1 %6609 }
 0x8a8   : > { %v6608_v39 = vpop.permute.xlu0 %6607  ;;  %v7643_v48 = vpack.c.bf16 %v4574_v61, %v4572_v52  ;;  %v7641_v59 = vpack.c.bf16 %v4575_v9, %v4573_v33 }
 0x8a9   : > { %v6669_v45 = vsel %vm430_vm6, %v6608_v39, %v6610_v1  ;;  %v6797_v50 = vsel %vm430_vm6, %v6610_v1, %v6608_v39 }
 0x8aa   : > { %7642 = vmatprep.subr.bf16.mxu0 %v7641_v59  ;;  %v6851_v18 = vmul.f32 %v6669_v45, %v17112_v38  ;;  %v6852_v31 = vmul.f32 %v6797_v50, %v17113_v25 }
 0x8ab   : > { %7644 = vmatpush1.bf16.msra.mxu0 %v7643_v48  ;;  %v6614_v42 = vpop.permute.xlu1 %6613 }
 0x8ac   : > { %v6612_v16 = vpop.permute.xlu0 %6611 }
 0x8ad   : > { %v6670_v47 = vsel %vm430_vm6, %v6612_v16, %v6614_v42  ;;  %v6798_v46 = vsel %vm430_vm6, %v6614_v42, %v6612_v16 }
 0x8ae   : > { %v6853_v24 = vmul.f32 %v6670_v47, %v17112_v38  ;;  %v6854_v41 = vmul.f32 %v6798_v46, %v17113_v25 }
 0x8af   : > { %v4387_v34 = vpop.permute.xlu1 %4386 }
 0x8b0   : > { %v4385_v15 = vpop.permute.xlu0 %4384  ;;  %v8027_v23 = vpack.c.bf16 %v6853_v24, %v6851_v18  ;;  %v8025_v20 = vpack.c.bf16 %v6854_v41, %v6852_v31  ;;  %v4425_v29 = vsel %vm318_vm1, %v4387_v34, %v17122_v3  ;;  %v4521_v36 = vsel %vm318_vm1, %v17122_v3, %v4387_v34  ;;  %v17125_v24 = vld [vmem:[#allocation152_spill] sm:$0xff] }
 0x8b1   : > { %v4424_v13 = vsel %vm318_vm1, %v4385_v15, %v17121_v22  ;;  %v4520_v58 = vsel %vm318_vm1, %v17121_v22, %v4385_v15  ;;  %v4578_v0 = vmul.f32 %v4521_v36, %v17117_v30  ;;  %v4579_v26 = vmul.f32 %v4425_v29, %v17118_v51  ;;  %v17126_v34 = vld [vmem:[#allocation168_spill] sm:$0xff] }
 0x8b2   : > { %v4576_v6 = vmul.f32 %v4520_v58, %v17117_v30  ;;  %v4577_v63 = vmul.f32 %v4424_v13, %v17118_v51  ;;  %8026 = vmatprep.subr.bf16.mxu1 %v8025_v20 }
 0x8b3   : > { %8028 = vmatpush1.bf16.msra.mxu1 %v8027_v23  ;;  %v6618_v14 = vpop.permute.xlu1 %6617 }
 0x8b4   : > { %v6616_v21 = vpop.permute.xlu0 %6615  ;;  %v7647_v43 = vpack.c.bf16 %v4578_v0, %v4576_v6  ;;  %v7645_v54 = vpack.c.bf16 %v4579_v26, %v4577_v63 }
 0x8b5   : > { %v6671_v7 = vsel %vm430_vm6, %v6616_v21, %v6618_v14  ;;  %v6799_v35 = vsel %vm430_vm6, %v6618_v14, %v6616_v21 }
 0x8b6   : > { %7646 = vmatprep.subr.bf16.mxu0 %v7645_v54  ;;  %v6855_v11 = vmul.f32 %v6671_v7, %v17112_v38  ;;  %v6856_v32 = vmul.f32 %v6799_v35, %v17113_v25 }
 0x8b7   : > { %7648 = vmatpush1.bf16.msra.mxu0 %v7647_v43  ;;  %v6622_v49 = vpop.permute.xlu1 %6621 }
 0x8b8   : > { %v6620_v56 = vpop.permute.xlu0 %6619 }
 0x8b9   : > { %v6672_v4 = vsel %vm430_vm6, %v6620_v56, %v6622_v49  ;;  %v6800_v8 = vsel %vm430_vm6, %v6622_v49, %v6620_v56 }
 0x8ba   : > { %v6857_v5 = vmul.f32 %v6672_v4, %v17112_v38  ;;  %v6858_v27 = vmul.f32 %v6800_v8, %v17113_v25 }
 0x8bb   : > { %v4391_v19 = vpop.permute.xlu1 %4390 }
 0x8bc   : > { %v4389_v55 = vpop.permute.xlu0 %4388  ;;  %v8031_v37 = vpack.c.bf16 %v6857_v5, %v6855_v11  ;;  %v8029_v62 = vpack.c.bf16 %v6858_v27, %v6856_v32  ;;  %v4427_v17 = vsel %vm318_vm1, %v4391_v19, %v17124_v2  ;;  %v4523_v52 = vsel %vm318_vm1, %v17124_v2, %v4391_v19  ;;  %v17127_v5 = vld [vmem:[#allocation170_spill] sm:$0xff]  ;;  %v17128_v19 = vld [vmem:[#allocation37_spill] sm:$0xff] }
 0x8bd   : > { %v4426_v44 = vsel %vm318_vm1, %v4389_v55, %v17123_v40  ;;  %v4522_v53 = vsel %vm318_vm1, %v17123_v40, %v4389_v55  ;;  %v4582_v33 = vmul.f32 %v4523_v52, %v17117_v30  ;;  %v4583_v12 = vmul.f32 %v4427_v17, %v17118_v51 }
 0x8be   : > { %v4580_v28 = vmul.f32 %v4522_v53, %v17117_v30  ;;  %v4581_v57 = vmul.f32 %v4426_v44, %v17118_v51  ;;  %8030 = vmatprep.subr.bf16.mxu1 %v8029_v62 }
 0x8bf   : > { %8032 = vmatpush1.bf16.msra.mxu1 %v8031_v37  ;;  %v6626_v61 = vpop.permute.xlu1 %6625 }
 0x8c0   : > { %v6624_v10 = vpop.permute.xlu0 %6623  ;;  %v7651_v60 = vpack.c.bf16 %v4582_v33, %v4580_v28  ;;  %v7649_v9 = vpack.c.bf16 %v4583_v12, %v4581_v57 }
 0x8c1   : > { %v6673_v39 = vsel %vm430_vm6, %v6624_v10, %v6626_v61  ;;  %v6801_v48 = vsel %vm430_vm6, %v6626_v61, %v6624_v10 }
 0x8c2   : > { %7650 = vmatprep.subr.bf16.mxu0 %v7649_v9  ;;  %v6859_v16 = vmul.f32 %v6673_v39, %v17112_v38  ;;  %v6860_v42 = vmul.f32 %v6801_v48, %v17113_v25 }
 0x8c3   : > { %7652 = vmatpush1.bf16.msra.mxu0 %v7651_v60  ;;  %v6630_v59 = vpop.permute.xlu1 %6629 }
 0x8c4   : > { %v6628_v1 = vpop.permute.xlu0 %6627 }
 0x8c5   : > { %v6674_v45 = vsel %vm430_vm6, %v6628_v1, %v6630_v59  ;;  %v6802_v50 = vsel %vm430_vm6, %v6630_v59, %v6628_v1 }
 0x8c6   : > { %v6861_v47 = vmul.f32 %v6674_v45, %v17112_v38  ;;  %v6862_v46 = vmul.f32 %v6802_v50, %v17113_v25 }
 0x8c7   : > { %v4395_v23 = vpop.permute.xlu1 %4394 }
 0x8c8   : > { %v4393_v18 = vpop.permute.xlu0 %4392  ;;  %v8035_v31 = vpack.c.bf16 %v6861_v47, %v6859_v16  ;;  %v8033_v22 = vpack.c.bf16 %v6862_v46, %v6860_v42  ;;  %v4429_v20 = vsel %vm318_vm1, %v4395_v23, %v17126_v34  ;;  %v4525_v6 = vsel %vm318_vm1, %v17126_v34, %v4395_v23  ;;  %v7120_v42 = vld [vmem:[%s15174_s4 + $0x60] sm:$0xff]  ;;  %v17129_v46 = vld [vmem:[#allocation66_spill] sm:$0xff] }
 0x8c9   : > { %v4428_v41 = vsel %vm318_vm1, %v4393_v18, %v17125_v24  ;;  %v4524_v15 = vsel %vm318_vm1, %v17125_v24, %v4393_v18  ;;  %v4586_v63 = vmul.f32 %v4525_v6, %v17117_v30  ;;  %v4587_v3 = vmul.f32 %v4429_v20, %v17118_v51  ;;  %v17130_v24 = vld [vmem:[#allocation60_spill] sm:$0xff] }
 0x8ca   : > { %v4584_v13 = vmul.f32 %v4524_v15, %v17117_v30  ;;  %v4585_v58 = vmul.f32 %v4428_v41, %v17118_v51  ;;  %8034 = vmatprep.subr.bf16.mxu1 %v8033_v22 }
 0x8cb   : > { %8036 = vmatpush1.bf16.msra.mxu1 %v8035_v31  ;;  %v6634_v0 = vpop.permute.xlu1 %6633 }
 0x8cc   : > { %v6632_v29 = vpop.permute.xlu0 %6631  ;;  %v7655_v36 = vpack.c.bf16 %v4586_v63, %v4584_v13  ;;  %v7653_v26 = vpack.c.bf16 %v4587_v3, %v4585_v58 }
 0x8cd   : > { %v6675_v21 = vsel %vm430_vm6, %v6632_v29, %v6634_v0  ;;  %v6803_v43 = vsel %vm430_vm6, %v6634_v0, %v6632_v29 }
 0x8ce   : > { %7654 = vmatprep.subr.bf16.mxu0 %v7653_v26  ;;  %v6863_v56 = vmul.f32 %v6675_v21, %v17112_v38  ;;  %v6864_v49 = vmul.f32 %v6803_v43, %v17113_v25 }
 0x8cf   : > { %7656 = vmatpush1.bf16.msra.mxu0 %v7655_v36  ;;  %v6638_v54 = vpop.permute.xlu1 %6637 }
 0x8d0   : > { %v6636_v14 = vpop.permute.xlu0 %6635 }
 0x8d1   : > { %v6676_v7 = vsel %vm430_vm6, %v6636_v14, %v6638_v54  ;;  %v6804_v35 = vsel %vm430_vm6, %v6638_v54, %v6636_v14 }
 0x8d2   : > { %v6865_v4 = vmul.f32 %v6676_v7, %v17112_v38  ;;  %v6866_v8 = vmul.f32 %v6804_v35, %v17113_v25 }
 0x8d3   : > { %v4399_v37 = vpop.permute.xlu1 %4398 }
 0x8d4   : > { %v4397_v11 = vpop.permute.xlu0 %4396  ;;  %v8039_v32 = vpack.c.bf16 %v6865_v4, %v6863_v56  ;;  %v8037_v40 = vpack.c.bf16 %v6866_v8, %v6864_v49  ;;  %v4431_v62 = vsel %vm318_vm1, %v4399_v37, %v17128_v19  ;;  %v4527_v28 = vsel %vm318_vm1, %v17128_v19, %v4399_v37 }
 0x8d5   : > { %v4430_v27 = vsel %vm318_vm1, %v4397_v11, %v17127_v5  ;;  %v4526_v55 = vsel %vm318_vm1, %v17127_v5, %v4397_v11  ;;  %v4590_v57 = vmul.f32 %v4527_v28, %v17117_v30  ;;  %v4591_v2 = vmul.f32 %v4431_v62, %v17118_v51 }
 0x8d6   : > { %v4588_v44 = vmul.f32 %v4526_v55, %v17117_v30  ;;  %v4589_v53 = vmul.f32 %v4430_v27, %v17118_v51  ;;  %8038 = vmatprep.subr.bf16.mxu1 %v8037_v40  ;;  %v4592_v30 = vld [vmem:[%s15174_s4] sm:$0xff] }
 0x8d7   : > { %8040 = vmatpush1.bf16.msra.mxu1 %v8039_v32  ;;  %v6642_v33 = vpop.permute.xlu1 %6641 }
 0x8d8   : > { %v6640_v17 = vpop.permute.xlu0 %6639  ;;  %v7659_v52 = vpack.c.bf16 %v4590_v57, %v4588_v44  ;;  %v7657_v12 = vpack.c.bf16 %v4591_v2, %v4589_v53 }
 0x8d9   : > { %v6677_v10 = vsel %vm430_vm6, %v6640_v17, %v6642_v33  ;;  %v6805_v60 = vsel %vm430_vm6, %v6642_v33, %v6640_v17 }
 0x8da   : > { %7658 = vmatprep.subr.bf16.mxu0 %v7657_v12  ;;  %v6867_v48 = vmul.f32 %v6677_v10, %v17112_v38  ;;  %v6868_v1 = vmul.f32 %v6805_v60, %v17113_v25 }
 0x8db   : > { %7660 = vmatpush1.bf16.msra.mxu0 %v7659_v52  ;;  %v6646_v9 = vpop.permute.xlu1 %6645 }
 0x8dc   : > { %v6644_v61 = vpop.permute.xlu0 %6643 }
 0x8dd   : > { %v6678_v51 = vsel %vm430_vm6, %v6644_v61, %v6646_v9  ;;  %v6806_v39 = vsel %vm430_vm6, %v6646_v9, %v6644_v61 }
 0x8de   : > { %v6869_v59 = vmul.f32 %v6678_v51, %v17112_v38  ;;  %v6870_v45 = vmul.f32 %v6806_v39, %v17113_v25  ;;  %4659 = vmatmul.mubr.f32.vlgmr.msra.gmra.mrb[98].mxu0 %v4592_v30 }
 0x8e0   : > { %v8043_v50 = vpack.c.bf16 %v6869_v59, %v6867_v48  ;;  %v8041_v16 = vpack.c.bf16 %v6870_v45, %v6868_v1 }
 0x8e2   : > { %8042 = vmatprep.subr.bf16.mxu1 %v8041_v16 }
 0x8e3   : > { %8044 = vmatpush1.bf16.msra.mxu1 %v8043_v50 }
 0x8e6   : > { %6939 = vmatmul.mubr.f32.vlgmr.msra.gmra.mrb[34].mxu1 %v7120_v42 }
 0x9b1   : > { %v4660_v47 = vpop.f32.mrb[98].mxu0 }
 0x9b2   : > { %v8051_v18 = vadd.f32 %v17129_v46, %v4660_v47  ;;  %v4662_v31 = vpop.f32.mrb[99].mxu0 }
 0x9b3   : > { %v8055_v38 = vadd.f32 %v17130_v24, %v4662_v31 }
 0x9b9   : > { %v6940_v25 = vpop.f32.mrb[34].mxu1 }
 0x9ba   : > { %v8052_v41 = vadd.f32 %v8051_v18, %v6940_v25  ;;  %v6942_v15 = vpop.f32.mrb[35].mxu1 }
 0x9bb   : > { %v8056_v23 = vadd.f32 %v8055_v38, %v6942_v15 }
 0x9bc   : > { %6947 = vst [vmem:[%s298_s17] sm:$0xff] %v8052_v41 }
 0x9bd   : > { %6948 = vst [vmem:[%s298_s17 + $0x8] sm:$0xff] %v8056_v23 }
 0x9be   : > { %8150 = shalt.err (!%p8147_p3)
}
 0x9bf   : > { %s8151_s21 = scalar_lea.hbm %s15128_s13, 256  ;;  %s8155_s19 = scalar_lea.hbm %s15178_s8, 512 }
 0x9c0   : > { %p8152_p4 = scmp.ne.s32.totalorder %s15128_s13, %s8151_s21  ;;  %p8156_p9 = scmp.lt.u32.totalorder %s15128_s13, %s15178_s8 }
 0x9c1   : > { %p8157_p10 = scmp.lt.u32.totalorder %s8155_s19, %s8151_s21  ;;  %p8159_p12 = scmp.lt.u32.totalorder %s8151_s21, %s15128_s13 }
 0x9c2   : > { %p8153_p7 = pnand %p8152_p4, %p8299_p5 }
 0x9c3   : > { %p8158_p11 = por %p8157_p10, %p8156_p9 }
 0x9c4   : > { %p8154_p8 = pneg %p8153_p7 }
 0x9c5   : > { %p8160_p13 = por %p8159_p12, %p8158_p11 }
 0x9c7   : > { %p8161_p0 = pnand %p8160_p13, %p8154_p8 }
 0x9c9   : > { %8164 = shalt.err (!%p8161_p0)
}
 0x9ca   : > { %8077 = dma.vmem_to_hbm [thread:$0]  (%p8299_p5), %s15130_s20, 256, %s15128_s13, %s6950_s23  }
 0x9cb PF: > { %p8083_p1 = scmp.ge.s32.totalorder %s8199_s30, 2  ;;  %s6976_s12 = sand.u32 1, %s8187_s27  }
 0x9cc   : > { %s6977_s9 = scalar_lea.sflag [#allocation3], %s6976_s12 }
 0x9cd   : > { %p8080_p2 = pnand %p8083_p1, %p8303_p6 }
 0x9cf   : > { %8182 = dma.done.wait (!%p8080_p2), %s6977_s9, 256  }
 0x9d0   : > { %8184 = vsyncadd (!%p8080_p2), %s6977_s9, 4294967040  ;;  %p18_p3 = scmp.ge.s32.totalorder %s8286_s11, 4   ;;  %s17131_s27 = smov %s8191_s28 }
 0x9d1   : > { %s17132_s28 = smov %s8195_s29  ;;  %s17133_s29 = smov %s8297_s14 }
 0x9d2   : > { %s17134_s30 = smov %s8286_s11  ;;  %20 = sbr.rel (!%p18_p3) target bundleno = 3 (0x3), region = 99 }
 0x9d9   :  { %6982 = vsyncpa [#allocation3], 1 }
 0x9da   :  { %6984 = vsyncpa [#allocation3 + $0x1], 1 }

</bundles_post_ra>
